<compile_context>
chip_gen: v6e
topology: v6e:2x2x1
jax: 0.10.0
libtpu: 0.0.40
codegen_flags: <defaults>
</compile_context>

<pallas_src>
from functools import partial

import jax
import jax.numpy as jnp
from jax.experimental import pallas as pl
from jax.experimental.pallas import tpu as pltpu

LANE = 128
SUBLANE = 8


def _round_up(n, m):
    return (n + m - 1) // m * m


def _pick_batch_block(n, m_tile, target_m=512, max_m=2048):
    """Pick B_blk (a divisor of n). Prefer M>=target with >=2 grid steps,
    then M>=target, then >=2 steps, then the largest feasible block."""
    divs = [d for d in range(1, n + 1) if n % d == 0 and d * m_tile <= max_m] or [1]
    both = [d for d in divs if d * m_tile >= target_m and n // d >= 2]
    if both:
        return min(both)
    big = [d for d in divs if d * m_tile >= target_m]
    if big:
        return min(big)
    multi = [d for d in divs if n // d >= 2]
    return max(multi) if multi else max(divs)


# ----------------------------- Pallas kernel -------------------------------

def _basic_block_kernel(*refs, stride, ho, wo, b_blk, has_downsample):
    nph = stride                                  # number of y-phases
    xk_refs = refs[:nph]                          # kw-unrolled input, per y-phase
    xds_ref = refs[nph]                           # residual input (center taps)
    w1_ref, b1_ref, w2_ref, b2_ref = refs[nph + 1:nph + 5]
    idx = nph + 5
    if has_downsample:
        wd_ref, bd_ref = refs[idx], refs[idx + 1]
        idx += 2
    o_ref = refs[idx]
    midk_ref = refs[idx + 1]                      # (B, ho+2, wop, 3*cmid_p) bf16

    m = b_blk * ho * wo
    cmid_p = w1_ref.shape[-1]
    cout_p = w2_ref.shape[-1]
    hp, wop = midk_ref.shape[1], midk_ref.shape[2]

    # ---- conv1 (+bn1 scale folded, +relu): 3 MXU dots, K = kw*cin (padded) ----
    acc1 = None
    for dy in range(3):
        r0 = dy // stride
        win = xk_refs[dy % stride][:, r0:r0 + ho, :, :]     # (B, ho, wo, kc1_p)
        part = jnp.dot(win.reshape(m, win.shape[-1]), w1_ref[dy],
                       preferred_element_type=jnp.float32)
        acc1 = part if acc1 is None else acc1 + part
    out1 = jnp.maximum(acc1 + b1_ref[...], 0.0)
    out1 = out1.reshape(b_blk, ho, wo, cmid_p).astype(midk_ref.dtype)

    # ---- zero only the halo strips (interior is fully overwritten below;
    #      done every step so it is correct under megacore grid sharding) ----
    zrow = jnp.zeros((b_blk, 1, wop, 3 * cmid_p), midk_ref.dtype)
    midk_ref[:, 0:1, :, :] = zrow
    midk_ref[:, ho + 1:ho + 2, :, :] = zrow
    zcol = jnp.zeros((b_blk, hp, 1, cmid_p), midk_ref.dtype)
    midk_ref[:, :, 0:1, 0:cmid_p] = zcol
    midk_ref[:, :, wo - 1:wo, 2 * cmid_p:3 * cmid_p] = zcol

    # ---- kw-unrolled conv1 output kept in VMEM (no HBM round trip):
    #      midk[b, y, x, dx*Cp + c] = zero_pad(out1)[b, y, x+dx, c] ----
    midk_ref[:, 1:ho + 1, 1:wo, 0:cmid_p] = out1[:, :, 0:wo - 1, :]
    midk_ref[:, 1:ho + 1, 0:wo, cmid_p:2 * cmid_p] = out1
    midk_ref[:, 1:ho + 1, 0:wo - 1, 2 * cmid_p:3 * cmid_p] = out1[:, :, 1:wo, :]

    # ---- conv2 (+bn2 scale folded): 3 MXU dots, K = 3*cmid_p ----
    acc2 = None
    for dy in range(3):
        win = midk_ref[:, dy:dy + ho, 0:wo, :]              # (B, ho, wo, 3*cmid_p)
        part = jnp.dot(win.reshape(m, 3 * cmid_p), w2_ref[dy],
                       preferred_element_type=jnp.float32)
        acc2 = part if acc2 is None else acc2 + part

    # ---- residual (identity or 1x1 projection + bn), bias, relu, bf16 store --
    if has_downsample:
        resid = jnp.dot(xds_ref[...].reshape(m, xds_ref.shape[-1]), wd_ref[...],
                        preferred_element_type=jnp.float32) + bd_ref[...]
    else:
        resid = xds_ref[...].reshape(m, xds_ref.shape[-1]).astype(jnp.float32)
    out = jnp.maximum(acc2 + b2_ref[...] + resid, 0.0)
    o_ref[...] = out.reshape(b_blk, ho, wo, cout_p).astype(o_ref.dtype)


# ------------------------------- JAX glue ----------------------------------

def _fold_bn(gamma, beta, mean, var, eps=1e-5):
    scale = gamma / jnp.sqrt(var + eps)
    return scale, beta - mean * scale


def _conv1_row_slabs(w_oihw, scale, kc_p, cout_p):
    # (O,I,3,3) -> [3, kw*cin (pad->kc_p), cout (pad->cout_p)], BN scale folded.
    cout, cin, kh, kw = w_oihw.shape
    w = jnp.transpose(w_oihw, (2, 3, 1, 0)) * scale          # (3,3,cin,cout)
    w = w.reshape(kh, kw * cin, cout)
    w = jnp.pad(w, ((0, 0), (0, kc_p - kw * cin), (0, cout_p - cout)))
    return w.astype(jnp.bfloat16)


def _conv2_row_slabs(w_oihw, scale, cin_p, cout_p):
    # (O,I,3,3) -> [3, kw*cin_p, cout_p]: one lane-block per kw tap (matches midk).
    cout, cin, kh, kw = w_oihw.shape
    w = jnp.transpose(w_oihw, (2, 3, 1, 0)) * scale          # (3,3,cin,cout)
    w = jnp.pad(w, ((0, 0), (0, 0), (0, cin_p - cin), (0, cout_p - cout)))
    return w.reshape(kh, kw * cin_p, cout_p).astype(jnp.bfloat16)


def _conv1x1_mat(w_oihw, scale, cin_p, cout_p):
    cout, cin, _, _ = w_oihw.shape
    w = jnp.transpose(w_oihw, (2, 3, 1, 0)).reshape(cin, cout) * scale[None, :]
    return jnp.pad(w, ((0, cin_p - cin), (0, cout_p - cout))).astype(jnp.bfloat16)


def _pad_bias(b, c_p):
    return jnp.pad(b, (0, c_p - b.shape[0])).reshape(1, c_p).astype(jnp.float32)


def basic_block_forward_nhwc(x_nhwc, params, stride=1):
    """Fused BasicBlock forward. NHWC in -> NHWC bf16 out (lane padding sliced)."""
    assert stride in (1, 2)
    has_ds = "ds_conv_w" in params
    n, h, w, cin = x_nhwc.shape
    cmid = params["conv1_w"].shape[0]
    cout = params["conv2_w"].shape[0]
    ho = (h + 2 - 3) // stride + 1
    wo = (w + 2 - 3) // stride + 1
    if not has_ds:
        assert stride == 1 and cin == cout, "identity residual needs same shape"

    cin_p = _round_up(cin, LANE)
    cmid_p = _round_up(cmid, LANE)
    cout_p = _round_up(cout, LANE)
    kc1_p = _round_up(3 * cin, LANE)          # conv1 contraction depth (kw folded)
    wop = _round_up(wo, SUBLANE)              # sublane-aligned scratch width

    # ---- fold BN (inference running stats) into weight slabs / biases ----
    s1, b1 = _fold_bn(params["bn1_gamma"], params["bn1_beta"],
                      params["bn1_mean"], params["bn1_var"])
    s2, b2 = _fold_bn(params["bn2_gamma"], params["bn2_beta"],
                      params["bn2_mean"], params["bn2_var"])
    w1k = _conv1_row_slabs(params["conv1_w"], s1, kc1_p, cmid_p)
    w2k = _conv2_row_slabs(params["conv2_w"], s2, cmid_p, cout_p)
    b1p = _pad_bias(b1, cmid_p)
    b2p = _pad_bias(b2, cout_p)

    # ---- kw-unrolled input slab: xk[n, y, j, dx*cin + c] = xpad[n, y, s*j+dx, c]
    #      (3x input bytes, but every conv1 row tap becomes one unit-stride slice
    #       and one deep MXU dot; no per-tap window copies in the kernel).
    xpad = jnp.pad(x_nhwc, ((0, 0), (1, 1), (1, 1), (0, 0)))
    xk = jnp.concatenate(
        [xpad[:, :, dx::stride, :][:, :, :wo, :] for dx in range(3)], axis=-1)
    xk = jnp.pad(xk, ((0, 0), (0, 0), (0, 0), (0, kc1_p - 3 * cin)))
    xk = xk.astype(jnp.bfloat16)

    # y-phase decomposition (pure permutation): kernel row dy lives in phase
    # dy % stride at row offset dy // stride.
    phases, hqs = [], []
    for py in range(stride):
        dys = [dy for dy in range(3) if dy % stride == py]
        need = max(d // stride for d in dys) + ho
        ph = xk[:, py::stride, :, :][:, :need, :, :]
        if ph.shape[1] < need:
            ph = jnp.pad(ph, ((0, 0), (0, need - ph.shape[1]), (0, 0), (0, 0)))
        phases.append(ph)
        hqs.append(need)

    # ---- residual input: identity, or strided center taps for the 1x1 proj ----
    if has_ds:
        xds = x_nhwc[:, ::stride, ::stride, :][:, :ho, :wo, :]
        cres_p = cin_p
    else:
        xds = x_nhwc
        cres_p = cout_p        # == cin_p for the identity path
    xds = jnp.pad(xds, ((0, 0), (0, 0), (0, 0), (0, cres_p - cin))).astype(jnp.bfloat16)

    # ---- batch folded into M ----
    b_blk = _pick_batch_block(n, ho * wo)
    grid = (n // b_blk,)

    args = [*phases, xds, w1k, b1p, w2k, b2p]
    in_specs = [pl.BlockSpec((b_blk, hq, wo, kc1_p), lambda i: (i, 0, 0, 0))
                for hq in hqs]
    in_specs += [
        pl.BlockSpec((b_blk, ho, wo, cres_p), lambda i: (i, 0, 0, 0)),
        pl.BlockSpec((3, kc1_p, cmid_p), lambda i: (0, 0, 0)),
        pl.BlockSpec((1, cmid_p), lambda i: (0, 0)),
        pl.BlockSpec((3, 3 * cmid_p, cout_p), lambda i: (0, 0, 0)),
        pl.BlockSpec((1, cout_p), lambda i: (0, 0)),
    ]
    if has_ds:
        sd, bd = _fold_bn(params["ds_bn_gamma"], params["ds_bn_beta"],
                          params["ds_bn_mean"], params["ds_bn_var"])
        args += [_conv1x1_mat(params["ds_conv_w"], sd, cin_p, cout_p),
                 _pad_bias(bd, cout_p)]
        in_specs += [pl.BlockSpec((cin_p, cout_p), lambda i: (0, 0)),
                     pl.BlockSpec((1, cout_p), lambda i: (0, 0))]

    kernel = partial(_basic_block_kernel, stride=stride, ho=ho, wo=wo,
                     b_blk=b_blk, has_downsample=has_ds)

    # ---- adaptive scoped-VMEM limit: double-buffered I/O + scratch + f32 accs.
    #      Capped at 64 MiB so the sizing also holds on v7x's 64 MiB VMEM.
    bpe = 2
    est = 2 * sum(b_blk * hq * wo * kc1_p * bpe for hq in hqs)
    est += 2 * b_blk * ho * wo * cres_p * bpe
    est += 2 * (3 * kc1_p * cmid_p + 9 * cmid_p * cout_p + cin_p * cout_p) * bpe
    est += 2 * b_blk * ho * wo * cout_p * bpe
    est += b_blk * (ho + 2) * wop * 3 * cmid_p * bpe
    est += b_blk * ho * wo * (cmid_p + cout_p) * 4 * 2
    vmem_limit = int(min(64 * 2 ** 20, max(32 * 2 ** 20, 2 * est)))

    out = pl.pallas_call(
        kernel,
        out_shape=jax.ShapeDtypeStruct((n, ho, wo, cout_p), jnp.bfloat16),
        grid_spec=pltpu.PrefetchScalarGridSpec(
            num_scalar_prefetch=0,
            grid=grid,
            in_specs=in_specs,
            out_specs=pl.BlockSpec((b_blk, ho, wo, cout_p), lambda i: (i, 0, 0, 0)),
            scratch_shapes=[pltpu.VMEM((b_blk, ho + 2, wop, 3 * cmid_p),
                                       jnp.bfloat16)],
        ),
        compiler_params=pltpu.CompilerParams(
            dimension_semantics=("parallel",),
            vmem_limit_bytes=vmem_limit,
        ),
    )(*args)
    return out[:, :, :, :cout]                # drop lane padding; NHWC bf16


def basic_block_forward(x_nchw, params, stride=1):
    """NCHW/f32 compatibility wrapper matching the PyTorch module.  In an
    NHWC-native model call basic_block_forward_nhwc directly and these boundary
    transposes / f32 upcast disappear."""
    x = jnp.transpose(x_nchw, (0, 2, 3, 1))
    out = basic_block_forward_nhwc(x, params, stride)
    return jnp.transpose(out, (0, 3, 1, 2)).astype(jnp.float32)


# -------------------------- parameter construction -------------------------

def init_params(key, inplanes, planes, with_downsample):
    ks = jax.random.split(key, 6)

    def he(k, shape, fan_in):
        return jax.random.normal(k, shape, jnp.float32) * jnp.sqrt(2.0 / fan_in)

    def bn(k, c):
        k1, k2, k3, k4 = jax.random.split(k, 4)
        return dict(
            gamma=1.0 + 0.1 * jax.random.normal(k1, (c,), jnp.float32),
            beta=0.1 * jax.random.normal(k2, (c,), jnp.float32),
            mean=0.05 * jax.random.normal(k3, (c,), jnp.float32),
            var=0.5 + jnp.abs(jax.random.normal(k4, (c,), jnp.float32)),
        )

    bn1, bn2 = bn(ks[3], planes), bn(ks[4], planes)
    params = {
        "conv1_w": he(ks[0], (planes, inplanes, 3, 3), inplanes * 9),
        "conv2_w": he(ks[1], (planes, planes, 3, 3), planes * 9),
        "bn1_gamma": bn1["gamma"], "bn1_beta": bn1["beta"],
        "bn1_mean": bn1["mean"], "bn1_var": bn1["var"],
        "bn2_gamma": bn2["gamma"], "bn2_beta": bn2["beta"],
        "bn2_mean": bn2["mean"], "bn2_var": bn2["var"],
    }
    if with_downsample:
        bnd = bn(ks[5], planes)
        params.update({
            "ds_conv_w": he(ks[2], (planes, inplanes, 1, 1), inplanes),
            "ds_bn_gamma": bnd["gamma"], "ds_bn_beta": bnd["beta"],
            "ds_bn_mean": bnd["mean"], "ds_bn_var": bnd["var"],
        })
    return params


# ------------------------------ pure-JAX ref --------------------------------

def ref_forward(x_nchw, params, stride, eps=1e-5):
    def conv(x, w, s, pad):
        return jax.lax.conv_general_dilated(
            x, w, (s, s), [(pad, pad), (pad, pad)],
            dimension_numbers=("NCHW", "OIHW", "NCHW"))

    def bn(x, g, b, m, v):
        g, b, m, v = (t[None, :, None, None] for t in (g, b, m, v))
        return (x - m) / jnp.sqrt(v + eps) * g + b

    out = jax.nn.relu(bn(conv(x_nchw, params["conv1_w"], stride, 1),
                         params["bn1_gamma"], params["bn1_beta"],
                         params["bn1_mean"], params["bn1_var"]))
    out = bn(conv(out, params["conv2_w"], 1, 1),
             params["bn2_gamma"], params["bn2_beta"],
             params["bn2_mean"], params["bn2_var"])
    if "ds_conv_w" in params:
        resid = bn(conv(x_nchw, params["ds_conv_w"], stride, 0),
                   params["ds_bn_gamma"], params["ds_bn_beta"],
                   params["ds_bn_mean"], params["ds_bn_var"])
    else:
        resid = x_nchw
    return jax.nn.relu(out + resid)


# ---------------------------------- main ------------------------------------

if __name__ == "__main__":
    key = jax.random.PRNGKey(0)
    kx, kp1, kp2 = jax.random.split(key, 3)

    x = jax.random.normal(kx, (4, 4, 16, 16), jnp.float32)

    # Path 1: downsample=None -> identity residual (stride 1, inplanes == planes).
    params_id = init_params(kp1, 4, 4, with_downsample=False)
    out_id = jax.block_until_ready(basic_block_forward(x, params_id, stride=1))
    ref_id = ref_forward(x, params_id, 1)
    assert out_id.shape == (4, 4, 16, 16), out_id.shape
    # bf16 matmuls + bf16 output -> looser tolerance than f32.
    assert jnp.allclose(out_id, ref_id, atol=5e-2, rtol=5e-2), \
        float(jnp.max(jnp.abs(out_id - ref_id)))

    # Path 2: projection downsample (1x1 conv + BN), stride 2.
    params_ds = init_params(kp2, 4, 8, with_downsample=True)
    out_ds = jax.block_until_ready(basic_block_forward(x, params_ds, stride=2))
    ref_ds = ref_forward(x, params_ds, 2)
    assert out_ds.shape == (4, 8, 8, 8), out_ds.shape
    assert jnp.allclose(out_ds, ref_ds, atol=5e-2, rtol=5e-2), \
        float(jnp.max(jnp.abs(out_ds - ref_ds)))

    print("KERNEL_OK")
</pallas_src>

<mosaic_0001>
module attributes {stable_mosaic.version = 11 : i64} {
  func.func @_basic_block_kernel(%arg0: i32, %arg1: memref<2x18x16x128xbf16, #tpu.memory_space<vmem>>, %arg2: memref<2x16x16x128xbf16, #tpu.memory_space<vmem>>, %arg3: memref<3x128x128xbf16, #tpu.memory_space<vmem>>, %arg4: memref<1x128xf32, #tpu.memory_space<vmem>>, %arg5: memref<3x384x128xbf16, #tpu.memory_space<vmem>>, %arg6: memref<1x128xf32, #tpu.memory_space<vmem>>, %arg7: memref<2x16x16x128xbf16, #tpu.memory_space<vmem>>, %arg8: memref<2x18x16x384xbf16, #tpu.memory_space<vmem>>) attributes {dimension_semantics = [#tpu.dimension_semantics<parallel>], iteration_bounds = array<i64: 2>, scalar_prefetch = 0 : i64, scratch_operands = 1 : i64, tpu.core_type = #tpu.core_type<tc>, window_params = [{transform_indices = @transform_0, window_bounds = array<i64: 2, 18, 16, 128>}, {transform_indices = @transform_1, window_bounds = array<i64: 2, 16, 16, 128>}, {pipeline_mode = #tpu.pipeline_mode<synchronous>, transform_indices = @transform_2, window_bounds = array<i64: 3, 128, 128>}, {pipeline_mode = #tpu.pipeline_mode<synchronous>, transform_indices = @transform_3, window_bounds = array<i64: 1, 128>}, {pipeline_mode = #tpu.pipeline_mode<synchronous>, transform_indices = @transform_4, window_bounds = array<i64: 3, 384, 128>}, {pipeline_mode = #tpu.pipeline_mode<synchronous>, transform_indices = @transform_5, window_bounds = array<i64: 1, 128>}, {transform_indices = @transform_6, window_bounds = array<i64: 2, 16, 16, 128>}]} {
    %c0 = arith.constant 0 : index
    %c0_0 = arith.constant 0 : index
    %c0_1 = arith.constant 0 : index
    %c0_2 = arith.constant 0 : index
    %0 = vector.load %arg1[%c0, %c0_0, %c0_1, %c0_2] : memref<2x18x16x128xbf16, #tpu.memory_space<vmem>>, vector<2x16x16x128xbf16>
    %1 = vector.shape_cast %0 : vector<2x16x16x128xbf16> to vector<512x128xbf16>
    %c0_3 = arith.constant 0 : index
    %c0_4 = arith.constant 0 : index
    %c0_5 = arith.constant 0 : index
    %2 = vector.load %arg3[%c0_3, %c0_4, %c0_5] : memref<3x128x128xbf16, #tpu.memory_space<vmem>>, vector<1x128x128xbf16>
    %3 = vector.shape_cast %2 : vector<1x128x128xbf16> to vector<128x128xbf16>
    %cst = arith.constant dense<0.000000e+00> : vector<512x128xf32>
    %4 = tpu.matmul %1, %3, %cst {dimension_numbers = #tpu.dot_dimension_numbers<[1], [0], [0], [1], [0, 0, 1, 1], [], []>} : vector<512x128xbf16>, vector<128x128xbf16>, vector<512x128xf32> -> vector<512x128xf32>
    %c0_6 = arith.constant 0 : index
    %c1 = arith.constant 1 : index
    %c0_7 = arith.constant 0 : index
    %c0_8 = arith.constant 0 : index
    %5 = vector.load %arg1[%c0_6, %c1, %c0_7, %c0_8] : memref<2x18x16x128xbf16, #tpu.memory_space<vmem>>, vector<2x16x16x128xbf16>
    %6 = vector.shape_cast %5 : vector<2x16x16x128xbf16> to vector<512x128xbf16>
    %c1_9 = arith.constant 1 : index
    %c0_10 = arith.constant 0 : index
    %c0_11 = arith.constant 0 : index
    %7 = vector.load %arg3[%c1_9, %c0_10, %c0_11] : memref<3x128x128xbf16, #tpu.memory_space<vmem>>, vector<1x128x128xbf16>
    %8 = vector.shape_cast %7 : vector<1x128x128xbf16> to vector<128x128xbf16>
    %cst_12 = arith.constant dense<0.000000e+00> : vector<512x128xf32>
    %9 = tpu.matmul %6, %8, %cst_12 {dimension_numbers = #tpu.dot_dimension_numbers<[1], [0], [0], [1], [0, 0, 1, 1], [], []>} : vector<512x128xbf16>, vector<128x128xbf16>, vector<512x128xf32> -> vector<512x128xf32>
    %10 = arith.addf %4, %9 : vector<512x128xf32>
    %c0_13 = arith.constant 0 : index
    %c2 = arith.constant 2 : index
    %c0_14 = arith.constant 0 : index
    %c0_15 = arith.constant 0 : index
    %11 = vector.load %arg1[%c0_13, %c2, %c0_14, %c0_15] : memref<2x18x16x128xbf16, #tpu.memory_space<vmem>>, vector<2x16x16x128xbf16>
    %12 = vector.shape_cast %11 : vector<2x16x16x128xbf16> to vector<512x128xbf16>
    %c2_16 = arith.constant 2 : index
    %c0_17 = arith.constant 0 : index
    %c0_18 = arith.constant 0 : index
    %13 = vector.load %arg3[%c2_16, %c0_17, %c0_18] : memref<3x128x128xbf16, #tpu.memory_space<vmem>>, vector<1x128x128xbf16>
    %14 = vector.shape_cast %13 : vector<1x128x128xbf16> to vector<128x128xbf16>
    %cst_19 = arith.constant dense<0.000000e+00> : vector<512x128xf32>
    %15 = tpu.matmul %12, %14, %cst_19 {dimension_numbers = #tpu.dot_dimension_numbers<[1], [0], [0], [1], [0, 0, 1, 1], [], []>} : vector<512x128xbf16>, vector<128x128xbf16>, vector<512x128xf32> -> vector<512x128xf32>
    %16 = arith.addf %10, %15 : vector<512x128xf32>
    %c0_20 = arith.constant 0 : index
    %c0_21 = arith.constant 0 : index
    %17 = vector.load %arg4[%c0_20, %c0_21] : memref<1x128xf32, #tpu.memory_space<vmem>>, vector<1x128xf32>
    %18 = vector.broadcast %17 : vector<1x128xf32> to vector<512x128xf32>
    %19 = arith.addf %16, %18 : vector<512x128xf32>
    %cst_22 = arith.constant 0.000000e+00 : f32
    %20 = vector.broadcast %cst_22 : f32 to vector<512x128xf32>
    %21 = arith.maximumf %19, %20 : vector<512x128xf32>
    %22 = vector.shape_cast %21 : vector<512x128xf32> to vector<2x16x16x128xf32>
    %23 = arith.truncf %22 : vector<2x16x16x128xf32> to vector<2x16x16x128xbf16>
    %cst_23 = arith.constant 0.000000e+00 : bf16
    %24 = vector.broadcast %cst_23 : bf16 to vector<2x1x16x384xbf16>
    %c0_24 = arith.constant 0 : index
    %c0_25 = arith.constant 0 : index
    %c0_26 = arith.constant 0 : index
    %c0_27 = arith.constant 0 : index
    %25 = vector.load %arg8[%c0_24, %c0_25, %c0_26, %c0_27] : memref<2x18x16x384xbf16, #tpu.memory_space<vmem>>, vector<2x1x16x384xbf16>
    tpu.vector_store %arg8[%c0_24, %c0_25, %c0_26, %c0_27], %24 {strides = array<i32>} : memref<2x18x16x384xbf16, #tpu.memory_space<vmem>>, vector<2x1x16x384xbf16>,
    %c0_28 = arith.constant 0 : index
    %c17 = arith.constant 17 : index
    %c0_29 = arith.constant 0 : index
    %c0_30 = arith.constant 0 : index
    %26 = vector.load %arg8[%c0_28, %c17, %c0_29, %c0_30] : memref<2x18x16x384xbf16, #tpu.memory_space<vmem>>, vector<2x1x16x384xbf16>
    tpu.vector_store %arg8[%c0_28, %c17, %c0_29, %c0_30], %24 {strides = array<i32>} : memref<2x18x16x384xbf16, #tpu.memory_space<vmem>>, vector<2x1x16x384xbf16>,
    %cst_31 = arith.constant 0.000000e+00 : bf16
    %27 = vector.broadcast %cst_31 : bf16 to vector<2x18x1x128xbf16>
    %c0_32 = arith.constant 0 : index
    %c0_33 = arith.constant 0 : index
    %c0_34 = arith.constant 0 : index
    %c0_35 = arith.constant 0 : index
    %28 = vector.load %arg8[%c0_32, %c0_33, %c0_34, %c0_35] : memref<2x18x16x384xbf16, #tpu.memory_space<vmem>>, vector<2x18x1x128xbf16>
    tpu.vector_store %arg8[%c0_32, %c0_33, %c0_34, %c0_35], %27 {strides = array<i32>} : memref<2x18x16x384xbf16, #tpu.memory_space<vmem>>, vector<2x18x1x128xbf16>,
    %c0_36 = arith.constant 0 : index
    %c0_37 = arith.constant 0 : index
    %c15 = arith.constant 15 : index
    %c256 = arith.constant 256 : index
    %29 = vector.load %arg8[%c0_36, %c0_37, %c15, %c256] : memref<2x18x16x384xbf16, #tpu.memory_space<vmem>>, vector<2x18x1x128xbf16>
    tpu.vector_store %arg8[%c0_36, %c0_37, %c15, %c256], %27 {strides = array<i32>} : memref<2x18x16x384xbf16, #tpu.memory_space<vmem>>, vector<2x18x1x128xbf16>,
    %30 = vector.extract_strided_slice %23 {offsets = [0, 0, 0, 0], sizes = [2, 16, 15, 128], strides = [1, 1, 1, 1]} : vector<2x16x16x128xbf16> to vector<2x16x15x128xbf16>
    %c0_38 = arith.constant 0 : index
    %c1_39 = arith.constant 1 : index
    %c1_40 = arith.constant 1 : index
    %c0_41 = arith.constant 0 : index
    %31 = vector.load %arg8[%c0_38, %c1_39, %c1_40, %c0_41] : memref<2x18x16x384xbf16, #tpu.memory_space<vmem>>, vector<2x16x15x128xbf16>
    tpu.vector_store %arg8[%c0_38, %c1_39, %c1_40, %c0_41], %30 {strides = array<i32>} : memref<2x18x16x384xbf16, #tpu.memory_space<vmem>>, vector<2x16x15x128xbf16>,
    %c0_42 = arith.constant 0 : index
    %c1_43 = arith.constant 1 : index
    %c0_44 = arith.constant 0 : index
    %c128 = arith.constant 128 : index
    %32 = vector.load %arg8[%c0_42, %c1_43, %c0_44, %c128] : memref<2x18x16x384xbf16, #tpu.memory_space<vmem>>, vector<2x16x16x128xbf16>
    tpu.vector_store %arg8[%c0_42, %c1_43, %c0_44, %c128], %23 {strides = array<i32>} : memref<2x18x16x384xbf16, #tpu.memory_space<vmem>>, vector<2x16x16x128xbf16>,
    %33 = vector.extract_strided_slice %23 {offsets = [0, 0, 1, 0], sizes = [2, 16, 15, 128], strides = [1, 1, 1, 1]} : vector<2x16x16x128xbf16> to vector<2x16x15x128xbf16>
    %c0_45 = arith.constant 0 : index
    %c1_46 = arith.constant 1 : index
    %c0_47 = arith.constant 0 : index
    %c256_48 = arith.constant 256 : index
    %34 = vector.load %arg8[%c0_45, %c1_46, %c0_47, %c256_48] : memref<2x18x16x384xbf16, #tpu.memory_space<vmem>>, vector<2x16x15x128xbf16>
    tpu.vector_store %arg8[%c0_45, %c1_46, %c0_47, %c256_48], %33 {strides = array<i32>} : memref<2x18x16x384xbf16, #tpu.memory_space<vmem>>, vector<2x16x15x128xbf16>,
    %c0_49 = arith.constant 0 : index
    %c0_50 = arith.constant 0 : index
    %c0_51 = arith.constant 0 : index
    %c0_52 = arith.constant 0 : index
    %35 = vector.load %arg8[%c0_49, %c0_50, %c0_51, %c0_52] : memref<2x18x16x384xbf16, #tpu.memory_space<vmem>>, vector<2x16x16x384xbf16>
    %36 = vector.shape_cast %35 : vector<2x16x16x384xbf16> to vector<512x384xbf16>
    %c0_53 = arith.constant 0 : index
    %c0_54 = arith.constant 0 : index
    %c0_55 = arith.constant 0 : index
    %37 = vector.load %arg5[%c0_53, %c0_54, %c0_55] : memref<3x384x128xbf16, #tpu.memory_space<vmem>>, vector<1x384x128xbf16>
    %38 = vector.shape_cast %37 : vector<1x384x128xbf16> to vector<384x128xbf16>
    %cst_56 = arith.constant dense<0.000000e+00> : vector<512x128xf32>
    %39 = tpu.matmul %36, %38, %cst_56 {dimension_numbers = #tpu.dot_dimension_numbers<[1], [0], [0], [1], [0, 0, 1, 1], [], []>} : vector<512x384xbf16>, vector<384x128xbf16>, vector<512x128xf32> -> vector<512x128xf32>
    %c0_57 = arith.constant 0 : index
    %c1_58 = arith.constant 1 : index
    %c0_59 = arith.constant 0 : index
    %c0_60 = arith.constant 0 : index
    %40 = vector.load %arg8[%c0_57, %c1_58, %c0_59, %c0_60] : memref<2x18x16x384xbf16, #tpu.memory_space<vmem>>, vector<2x16x16x384xbf16>
    %41 = vector.shape_cast %40 : vector<2x16x16x384xbf16> to vector<512x384xbf16>
    %c1_61 = arith.constant 1 : index
    %c0_62 = arith.constant 0 : index
    %c0_63 = arith.constant 0 : index
    %42 = vector.load %arg5[%c1_61, %c0_62, %c0_63] : memref<3x384x128xbf16, #tpu.memory_space<vmem>>, vector<1x384x128xbf16>
    %43 = vector.shape_cast %42 : vector<1x384x128xbf16> to vector<384x128xbf16>
    %cst_64 = arith.constant dense<0.000000e+00> : vector<512x128xf32>
    %44 = tpu.matmul %41, %43, %cst_64 {dimension_numbers = #tpu.dot_dimension_numbers<[1], [0], [0], [1], [0, 0, 1, 1], [], []>} : vector<512x384xbf16>, vector<384x128xbf16>, vector<512x128xf32> -> vector<512x128xf32>
    %45 = arith.addf %39, %44 : vector<512x128xf32>
    %c0_65 = arith.constant 0 : index
    %c2_66 = arith.constant 2 : index
    %c0_67 = arith.constant 0 : index
    %c0_68 = arith.constant 0 : index
    %46 = vector.load %arg8[%c0_65, %c2_66, %c0_67, %c0_68] : memref<2x18x16x384xbf16, #tpu.memory_space<vmem>>, vector<2x16x16x384xbf16>
    %47 = vector.shape_cast %46 : vector<2x16x16x384xbf16> to vector<512x384xbf16>
    %c2_69 = arith.constant 2 : index
    %c0_70 = arith.constant 0 : index
    %c0_71 = arith.constant 0 : index
    %48 = vector.load %arg5[%c2_69, %c0_70, %c0_71] : memref<3x384x128xbf16, #tpu.memory_space<vmem>>, vector<1x384x128xbf16>
    %49 = vector.shape_cast %48 : vector<1x384x128xbf16> to vector<384x128xbf16>
    %cst_72 = arith.constant dense<0.000000e+00> : vector<512x128xf32>
    %50 = tpu.matmul %47, %49, %cst_72 {dimension_numbers = #tpu.dot_dimension_numbers<[1], [0], [0], [1], [0, 0, 1, 1], [], []>} : vector<512x384xbf16>, vector<384x128xbf16>, vector<512x128xf32> -> vector<512x128xf32>
    %51 = arith.addf %45, %50 : vector<512x128xf32>
    %c0_73 = arith.constant 0 : index
    %c0_74 = arith.constant 0 : index
    %c0_75 = arith.constant 0 : index
    %c0_76 = arith.constant 0 : index
    %52 = vector.load %arg2[%c0_73, %c0_74, %c0_75, %c0_76] : memref<2x16x16x128xbf16, #tpu.memory_space<vmem>>, vector<2x16x16x128xbf16>
    %53 = vector.shape_cast %52 : vector<2x16x16x128xbf16> to vector<512x128xbf16>
    %54 = arith.extf %53 : vector<512x128xbf16> to vector<512x128xf32>
    %c0_77 = arith.constant 0 : index
    %c0_78 = arith.constant 0 : index
    %55 = vector.load %arg6[%c0_77, %c0_78] : memref<1x128xf32, #tpu.memory_space<vmem>>, vector<1x128xf32>
    %56 = vector.broadcast %55 : vector<1x128xf32> to vector<512x128xf32>
    %57 = arith.addf %51, %56 : vector<512x128xf32>
    %58 = arith.addf %57, %54 : vector<512x128xf32>
    %cst_79 = arith.constant 0.000000e+00 : f32
    %59 = vector.broadcast %cst_79 : f32 to vector<512x128xf32>
    %60 = arith.maximumf %58, %59 : vector<512x128xf32>
    %61 = vector.shape_cast %60 : vector<512x128xf32> to vector<2x16x16x128xf32>
    %62 = arith.truncf %61 : vector<2x16x16x128xf32> to vector<2x16x16x128xbf16>
    %c0_80 = arith.constant 0 : index
    %c0_81 = arith.constant 0 : index
    %c0_82 = arith.constant 0 : index
    %c0_83 = arith.constant 0 : index
    %63 = vector.load %arg7[%c0_80, %c0_81, %c0_82, %c0_83] : memref<2x16x16x128xbf16, #tpu.memory_space<vmem>>, vector<2x16x16x128xbf16>
    tpu.vector_store %arg7[%c0_80, %c0_81, %c0_82, %c0_83], %62 {strides = array<i32>} : memref<2x16x16x128xbf16, #tpu.memory_space<vmem>>, vector<2x16x16x128xbf16>,
    return
  }
  func.func @transform_0(%arg0: i32) -> (i32, i32, i32, i32) {
    %c0_i32 = arith.constant 0 : i32
    %c0_i32_0 = arith.constant 0 : i32
    %c0_i32_1 = arith.constant 0 : i32
    %c0_i32_2 = arith.constant 0 : i32
    return %arg0, %c0_i32, %c0_i32_0, %c0_i32_1 : i32, i32, i32, i32
  }
  func.func @transform_1(%arg0: i32) -> (i32, i32, i32, i32) {
    %c0_i32 = arith.constant 0 : i32
    %c0_i32_0 = arith.constant 0 : i32
    %c0_i32_1 = arith.constant 0 : i32
    %c0_i32_2 = arith.constant 0 : i32
    return %arg0, %c0_i32, %c0_i32_0, %c0_i32_1 : i32, i32, i32, i32
  }
  func.func @transform_2(%arg0: i32) -> (i32, i32, i32) {
    %c0_i32 = arith.constant 0 : i32
    %c0_i32_0 = arith.constant 0 : i32
    %c0_i32_1 = arith.constant 0 : i32
    %c0_i32_2 = arith.constant 0 : i32
    return %c0_i32, %c0_i32_0, %c0_i32_1 : i32, i32, i32
  }
  func.func @transform_3(%arg0: i32) -> (i32, i32) {
    %c0_i32 = arith.constant 0 : i32
    %c0_i32_0 = arith.constant 0 : i32
    %c0_i32_1 = arith.constant 0 : i32
    return %c0_i32, %c0_i32_0 : i32, i32
  }
  func.func @transform_4(%arg0: i32) -> (i32, i32, i32) {
    %c0_i32 = arith.constant 0 : i32
    %c0_i32_0 = arith.constant 0 : i32
    %c0_i32_1 = arith.constant 0 : i32
    %c0_i32_2 = arith.constant 0 : i32
    return %c0_i32, %c0_i32_0, %c0_i32_1 : i32, i32, i32
  }
  func.func @transform_5(%arg0: i32) -> (i32, i32) {
    %c0_i32 = arith.constant 0 : i32
    %c0_i32_0 = arith.constant 0 : i32
    %c0_i32_1 = arith.constant 0 : i32
    return %c0_i32, %c0_i32_0 : i32, i32
  }
  func.func @transform_6(%arg0: i32) -> (i32, i32, i32, i32) {
    %c0_i32 = arith.constant 0 : i32
    %c0_i32_0 = arith.constant 0 : i32
    %c0_i32_1 = arith.constant 0 : i32
    %c0_i32_2 = arith.constant 0 : i32
    return %arg0, %c0_i32, %c0_i32_0, %c0_i32_1 : i32, i32, i32, i32
  }
}

</mosaic_0001>

<bundles_post_ra>
// kernel: tpu_custom_call.1
= control target key start
LH: loop header
LB: loop body
LE: loop exit
PB: predicated region body
PF: predicated region fallthrough
CT: control target
= control target key end

     0   :  { %s14724_s0 = inlined_call_operand.hbm [shape: bf16[4,18,16,128], index: 0, kind: input, shape index: {}]   ;;  %s14725_s1 = inlined_call_operand.hbm [shape: bf16[4,16,16,128], index: 1, kind: input, shape index: {}]   ;;  %s14726_s2 = inlined_call_operand.hbm [shape: bf16[3,128,128], index: 2, kind: input, shape index: {}]   ;;  %s14727_s3 = inlined_call_operand.vmem [shape: f32[1,128], index: 3, kind: input, shape index: {}]   ;;  %s14728_s4 = inlined_call_operand.hbm [shape: bf16[3,384,128], index: 4, kind: input, shape index: {}]   ;;  %s14729_s5 = inlined_call_operand.vmem [shape: f32[1,128], index: 5, kind: input, shape index: {}]   ;;  %s14730_s6 = inlined_call_operand.hbm [shape: bf16[4,16,16,128], index: 6, kind: output, shape index: {}]  }
   0x1   :  { %14740 = sst [smem:[#allocation87_spill]] %s14724_s0 }
   0x2   :  { %14741 = sst [smem:[#allocation88_spill]] %s14726_s2 }
   0x3   :  { %14742 = sst [smem:[#allocation89_spill]] %s14728_s4 }
   0x4   :  { %11 = vsyncpa [#allocation4], 0 }
   0x5   :  { %13 = vsyncpa [#allocation4 + $0x1], 0 }
   0x6   :  { %14 = vsyncpa [#allocation7], 0 }
   0x7   :  { %16 = vsyncpa [#allocation7 + $0x1], 0 }
   0x8   :  { %17 = vsyncpa [#allocation10], 0 }
   0x9   :  { %18 = vsyncpa [#allocation5], 0 }
   0xa   :  { %20 = vsyncpa [#allocation5 + $0x1], 0  ;;  %s12032_s21 = smov 0   ;;  %s12034_s22 = smov 0  }
   0xb   :  { %s12036_s23 = smov 0   ;;  %s12038_s24 = smov 0  }
   0xc LB: > { %s12053_s25 = sadd.s32 4294967295, %s11985_s24   ;;  %s9202_s26 = sadd.s32 4294967294, %s11985_s24   ;;  %s11985_s24 = sphi %s12038_s24, %s15157_s24   ;;  %s11981_s23 = sphi %s12036_s23, %s15156_s23   ;;  %s11977_s22 = sphi %s12034_s22, %s15155_s22   ;;  %s11973_s21 = sphi %s12032_s21, %s15154_s21  }
   0xd   : > { %p46_p0 = scmp.ne.s32.totalorder %s11977_s22, %s11973_s21  ;;  %p14735_p1 = scmp.eq.s32.totalorder %s12053_s25, 0 }
   0xe   : > { %p180_p2 = scmp.eq.s32.totalorder %s12053_s25, 1  ;;  %p186_p3 = scmp.eq.s32.totalorder %s9202_s26, 1 }
   0xf   : > { %p12062_p4 = por %p14735_p1, %p46_p0  ;;  %p9203_p5 = scmp.ge.s32.totalorder %s11985_s24, 1 }
  0x10   : > { %p12067_p6 = por %p186_p3, %p46_p0  ;;  %p193_p7 = scmp.lt.s32.totalorder %s11985_s24, 3 }
  0x11   : > { %s14743_s27 = scalar_select %p12062_p4, 1, 0 }
  0x12   : > { %s14744_s28 = scalar_select %p12067_p6, 1, 0 }
  0x13   : > { %p12072_p8 = pnand %p9203_p5, %p193_p7  ;;  %s11987_s30 = smov [#allocation8]  }
  0x14   : > { %s205_s7 = sshll.u32 %s11987_s30, 4  ;;  %s11988_s9 = smov [#allocation9]   ;;  %s206_s7 = int_to_ptr.vmem [resolvable:$true] %s205_s7 }
  0x15   : > { %p11182_p9 = pneg %p12072_p8  ;;  %s221_s10 = sshll.u32 %s11988_s9, 4  ;;  %s222_s10 = int_to_ptr.vmem [resolvable:$true] %s221_s10 }
  0x16   : > { %s11812_s11 = scalar_lea.vmem %s206_s7, 3072  ;;  %p11820_p5 = scmp.lt.s32.totalorder %s206_s7, %s206_s7 }
  0x17   : > { %p12081_p11 = pnand %p11182_p9, %p14735_p1  ;;  %p11813_p13 = scmp.ne.s32.totalorder %s206_s7, %s11812_s11 }
  0x18   : > { %p11821_p7 = scmp.lt.s32.totalorder %s11812_s11, %s11812_s11 }
  0x19   : > { %p11803_p12 = pneg %p12081_p11 }
  0x1a   : > { %p11822_p10 = por %p11821_p7, %p11820_p5 }
  0x1b   : > { %p11815_p0 = pnand %p11813_p13, %p11803_p12 }
  0x1d   : > { %p11816_p3 = pneg %p11815_p0 }
  0x1f   : > { %p11823_p9 = pnand %p11822_p10, %p11816_p3 }
  0x21   : > { %11826 = shalt.err (!%p11823_p9)
}
  0x22   : > { %s14731_s12 = smov 64   ;;  %s14733_s13 = smov 4  }
  0x23   : > { %s14747_s2 = sld [smem:[#allocation88_spill]]  ;;  %s11838_s16 = scalar_lea.vmem %s222_s10, 9216 }
  0x24   : > { %p11839_p13 = scmp.ne.s32.totalorder %s222_s10, %s11838_s16  ;;  %p11846_p10 = scmp.lt.s32.totalorder %s222_s10, %s222_s10 }
  0x25   : > { %p11847_p3 = scmp.lt.s32.totalorder %s11838_s16, %s11838_s16 }
  0x26   : > { %p11841_p0 = pnand %p11839_p13, %p11803_p12 }
  0x27   : > { %p11848_p7 = por %p11847_p3, %p11846_p10 }
  0x28   : > { %p11842_p5 = pneg %p11841_p0 }
  0x29   : > { %11185 = dma.hbm_to_vmem [thread:$0]  (!%p12081_p11), %s14747_s2, 3072, %s206_s7, [#allocation7], %s14731_s12, %s14731_s12, %s14733_s13  }
  0x2a   : > { %p11849_p9 = pnand %p11848_p7, %p11842_p5 }
  0x2c   : > { %11852 = shalt.err (!%p11849_p9)
}
  0x2d   : > { %s14748_s4 = sld [smem:[#allocation89_spill]]  ;;  %s12110_s19 = sadd.s32 1, %s11985_s24  }
  0x2e   : > { %s33_s20 = sadd.s32 1, %s11981_s23  ;;  %s30_s26 = ssub.s32 %s11985_s24, %s12110_s19 }
  0x2f   : > { %p40_p12 = scmp.ne.s32.totalorder %s11981_s23, %s11977_s22  ;;  %p31_p13 = scmp.eq.s32.totalorder %s30_s26, 0 }
  0x30   : > { %p41_p0 = scmp.eq.s32.totalorder %s11985_s24, 0  ;;  %p11202_p10 = scmp.lt.s32.totalorder %s11985_s24, 2 }
  0x31   : > { %p12120_p5 = por %p180_p2, %p40_p12  ;;  %s12129_s8 = sand.u32 1, %s11981_s23  }
  0x32   : > { %s12126_s7 = scalar_select %p31_p13, %s11981_s23, %s33_s20  }
  0x33   : > { %11188 = dma.hbm_to_vmem [thread:$0]  (!%p12081_p11), %s14748_s4, 9216, %s222_s10, [#allocation10], %s14731_s12, %s14731_s12, %s14733_s13  }
  0x34   : > { %s14749_s30 = scalar_select %p12120_p5, 1, 0 }
  0x35   : > { %14750 = sst [smem:[#allocation17_spill]] %s12126_s7  ;;  %p42_p3 = por %p41_p0, %p40_p12 }
  0x36   : > { %s11165_s9 = smul.u32 288, %s12129_s8  ;;  %s14752_s0 = sld [smem:[#allocation87_spill]] }
  0x37   : > { %s11166_s10 = smul.u32 4608, %s11985_s24  ;;  %p12133_p11 = pnand %p11202_p10, %p42_p3 }
  0x38   : > { %s242_s18 = scalar_lea.vmem [#allocation3], %s11165_s9  ;;  %s239_s26 = scalar_lea.sflag [#allocation4], %s12129_s8 }
  0x39   : > { %s250_s20 = sshll.u32 %s242_s18, 4  ;;  %p11855_p7 = pneg %p12133_p11  ;;  %s12143_s20 = int_to_ptr.vmem [resolvable:$true] %s250_s20 }
  0x3c   : > { %s12141_s17 = scalar_lea.hbm %s14752_s0, %s11166_s10  ;;  %s11858_s10 = scalar_lea.hbm %s14752_s0, 9216 }
  0x3d   : > { %s11853_s12 = scalar_lea.hbm %s12141_s17, 4608  ;;  %p11859_p13 = scmp.lt.s32.totalorder %s12141_s17, %s14752_s0 }
  0x3e   : > { %p11854_p2 = scmp.ne.s32.totalorder %s12141_s17, %s11853_s12  ;;  %p11860_p0 = scmp.lt.s32.totalorder %s11858_s10, %s11853_s12 }
  0x40   : > { %p11856_p9 = pnand %p11855_p7, %p11854_p2  ;;  %p11861_p10 = por %p11860_p0, %p11859_p13 }
  0x42   : > { %p11857_p12 = pneg %p11856_p9 }
  0x44   : > { %p11862_p3 = pnand %p11861_p10, %p11857_p12 }
  0x46   : > { %11865 = shalt.err (!%p11862_p3)
}
  0x47   : > { %s11866_s9 = scalar_lea.vmem %s12143_s20, 4608  ;;  %s11991_s14 = smov [#allocation3]  }
  0x48   : > { %p11867_p1 = scmp.ne.s32.totalorder %s12143_s20, %s11866_s9  ;;  %s11871_s18 = sshll.u32 %s11991_s14, 4  ;;  %s11872_s18 = int_to_ptr.vmem [resolvable:$false] %s11871_s18 }
  0x49   : > { %s11873_s15 = scalar_lea.vmem %s11872_s18, 9216  ;;  %p11874_p6 = scmp.lt.s32.totalorder %s12143_s20, %s11872_s18 }
  0x4a   : > { %p11869_p2 = pnand %p11867_p1, %p11855_p7  ;;  %p11875_p5 = scmp.lt.s32.totalorder %s11873_s15, %s11866_s9 }
  0x4c   : > { %p11870_p9 = pneg %p11869_p2  ;;  %p11876_p4 = por %p11875_p5, %p11874_p6 }
  0x4e   : > { %p11877_p13 = pnand %p11876_p4, %p11870_p9 }
  0x50   : > { %11880 = shalt.err (!%p11877_p13)
}
  0x51   : > { %s14753_s12 = smov 4   ;;  %s14754_s13 = smov 64  }
  0x52   : > { %11192 = dma.hbm_to_vmem [thread:$0]  (!%p12133_p11), %s12141_s17, 4608, %s12143_s20, %s239_s26, %s14754_s13, %s14754_s13, %s14753_s12  }
  0x53   : > { %s9210_s10 = sshll.u32 %s12129_s8, 8  ;;  %s9964_s16 = sshll.u32 %s11985_s24, 12 }
  0x54   : > { %s12180_s18 = scalar_lea.hbm %s14725_s1, %s9964_s16  ;;  %s264_s15 = scalar_lea.vmem [#allocation6], %s9210_s10 }
  0x55   : > { %s272_s0 = sshll.u32 %s264_s15, 4  ;;  %s14755_s2 = sand.u32 1, %s11985_s24   ;;  %s12182_s0 = int_to_ptr.vmem [resolvable:$true] %s272_s0 }
  0x56   : > { %s261_s4 = scalar_lea.sflag [#allocation7], %s14755_s2  ;;  %s11881_s7 = scalar_lea.hbm %s12180_s18, 4096 }
  0x57   : > { %p11882_p1 = scmp.ne.s32.totalorder %s12180_s18, %s11881_s7  ;;  %s11886_s20 = scalar_lea.hbm %s14725_s1, 8192 }
  0x58   : > { %p11887_p5 = scmp.lt.s32.totalorder %s12180_s18, %s14725_s1  ;;  %p11888_p12 = scmp.lt.s32.totalorder %s11886_s20, %s11881_s7 }
  0x59   : > { %p11884_p4 = pnand %p11882_p1, %p11855_p7 }
  0x5a   : > { %p11889_p0 = por %p11888_p12, %p11887_p5 }
  0x5b   : > { %p11885_p6 = pneg %p11884_p4 }
  0x5d   : > { %p11890_p10 = pnand %p11889_p0, %p11885_p6 }
  0x5f   : > { %11893 = shalt.err (!%p11890_p10)
}
  0x60   : > { %s11894_s2 = scalar_lea.vmem %s12182_s0, 4096  ;;  %s11992_s10 = smov [#allocation6]  }
  0x61   : > { %p11895_p3 = scmp.ne.s32.totalorder %s12182_s0, %s11894_s2  ;;  %s11899_s9 = sshll.u32 %s11992_s10, 4  ;;  %s11900_s9 = int_to_ptr.vmem [resolvable:$false] %s11899_s9 }
  0x62   : > { %s11901_s14 = scalar_lea.vmem %s11900_s9, 8192  ;;  %p11902_p13 = scmp.lt.s32.totalorder %s12182_s0, %s11900_s9 }
  0x63   : > { %p11897_p2 = pnand %p11895_p3, %p11855_p7  ;;  %p11903_p1 = scmp.lt.s32.totalorder %s11901_s14, %s11894_s2 }
  0x65   : > { %p11898_p9 = pneg %p11897_p2  ;;  %p11904_p4 = por %p11903_p1, %p11902_p13 }
  0x67   : > { %p11905_p5 = pnand %p11904_p4, %p11898_p9 }
  0x69   : > { %11908 = shalt.err (!%p11905_p5)
}
  0x6a   : > { %11195 = dma.hbm_to_vmem [thread:$0]  (!%p12133_p11), %s12180_s18, 4096, %s12182_s0, %s261_s4, %s14754_s13, %s14754_s13, %s14753_s12  }
  0x6b   : > { %284 = sbr.rel (%p12072_p8) target bundleno = 1381 (0x565), region = 44 }
  0x70   : > { %s12214_s7 = sand.u32 1, %s11977_s22   ;;  %p14756_p7 = scmp.ne.s32.totalorder %s14743_s27, 0 }
  0x71   : > { %s11167_s15 = smul.u32 288, %s12214_s7  ;;  %s287_s8 = scalar_lea.sflag [#allocation4], %s12214_s7 }
  0x73   : > { %s12218_s17 = scalar_lea.vmem [#allocation3], %s11167_s15 }
  0x74   : > { %11952 = dma.done.wait (%p14756_p7), %s287_s8, 4608  }
  0x75   : > { %11954 = vsyncadd (%p14756_p7), %s287_s8, 4294962688  ;;  %s295_s0 = sand.u32 1, %s12053_s25   ;;  %s9215_s4 = sshll.u32 %s12214_s7, 8 }
  0x76   : > { %s296_s29 = scalar_lea.sflag [#allocation7], %s295_s0  ;;  %s12228_s11 = scalar_lea.vmem [#allocation6], %s9215_s4 }
  0x77   : > { %11956 = dma.done.wait (%p14756_p7), %s296_s29, 4096  }
  0x78   : > { %11958 = vsyncadd (%p14756_p7), %s296_s29, 4294963200  ;;  %p14757_p8 = scmp.eq.s32.totalorder %s12053_s25, 0 }
  0x7a   : > { %11960 = dma.done.wait (%p14757_p8), [#allocation7], 3072   ;;  %p14758_p11 = pmov %p14757_p8 }
  0x7b   : > { %p14759_p6 = pmov %p14757_p8 }
  0x7c   : > { %11962 = vsyncadd (%p14758_p11), [#allocation7], 4294964224 }
  0x7d   : > { %11964 = dma.done.wait (%p14759_p6), [#allocation10], 9216   ;;  %p14760_p12 = pmov %p14759_p6 }
  0x7e   : > { %v11245_v0 = vld [vmem:[#allocation8 + $0x78] sm:$0xff]   ;;  %v11247_v2 = vld [vmem:[#allocation8 + $0x70] sm:$0xff]   ;;  %v11249_v4 = vld [vmem:[#allocation8 + $0x68] sm:$0xff]   ;;  %vm2424_vm0 = vcmask 1040384   ;;  %vm2425_vm1 = vsmask.f32 256 }
  0x7f   : > { %11966 = vsyncadd (%p14760_p12), [#allocation10], 4294958080  ;;  %v11246_v1 = vld [vmem:[#allocation8 + $0x38] sm:$0xff]   ;;  %10685 = vmatprep.subr.bf16.mxu0 %v11245_v0  ;;  %v11248_v3 = vld [vmem:[#allocation8 + $0x30] sm:$0xff]   ;;  %vm2535_vm3 = vcmask 1043459   ;;  %vm3385_vm6 = vcmask 1043456  }
  0x80   : > { %10765 = vmatprep.subr.bf16.mxu1 %v11246_v1  ;;  %10686 = vmatpush3.bf16.msra.mxu0 %v11245_v0  ;;  %v11250_v5 = vld [vmem:[#allocation8 + $0x28] sm:$0xff]   ;;  %v11251_v6 = vld [vmem:[#allocation8 + $0x60] sm:$0xff]   ;;  %v11253_v8 = vld [vmem:[#allocation8 + $0x58] sm:$0xff]   ;;  %vm2536_vm4 = vsmask.f32 7950  ;;  %s14392_s14 = scalar_lea.vmem [#allocation11], %s9215_s4 }
  0x81   : > { %10766 = vmatpush3.bf16.msra.mxu1 %v11246_v1  ;;  %10687 = vmatprep.subr.bf16.mxu0 %v11247_v2  ;;  %v11252_v7 = vld [vmem:[#allocation8 + $0x20] sm:$0xff]   ;;  %v11254_v9 = vld [vmem:[#allocation8 + $0x18] sm:$0xff]   ;;  %v11255_v10 = vld [vmem:[#allocation8 + $0x50] sm:$0xff]   ;;  %vm3386_vm7 = vsmask.f32 7938  ;;  %s9087_s0 = sshll.u32 %s14392_s14, 4  ;;  %s14680_s0 = int_to_ptr.vmem [resolvable:$true] %s9087_s0 }
  0x82   : > { %10767 = vmatprep.subr.bf16.mxu1 %v11248_v3  ;;  %v11256_v11 = vld [vmem:[#allocation8 + $0x10] sm:$0xff]   ;;  %v11261_v12 = vld [vmem:[%s12218_s17 + $0x8] sm:$0xff]   ;;  %v11262_v13 = vld [vmem:[%s12218_s17] sm:$0xff]   ;;  %vm3644_vm8 = vsmask.f32 3328  ;;  %s9073_s27 = scalar_lea.sflag [#allocation5], %s12214_s7 }
  0x83   : > { %10701 = vmatprep.mubr.bf16.mxu0 %v11261_v12  ;;  %10781 = vmatprep.mubr.bf16.mxu1 %v11262_v13  ;;  %v11257_v14 = vld [vmem:[#allocation8 + $0x48] sm:$0xff]   ;;  %v11259_v16 = vld [vmem:[#allocation8 + $0x40] sm:$0xff]   ;;  %v11265_v18 = vld [vmem:[#allocation8 + $0xb8] sm:$0xff]   ;;  %vm3645_vm9 = vsmask.f32 7440  ;;  %s11909_s12 = scalar_lea.vmem %s14680_s0, 4096 }
  0x84   : > { %10688 = vmatpush3.bf16.msra.mxu0 %v11247_v2  ;;  %v11258_v15 = vld [vmem:[#allocation8 + $0x8] sm:$0xff]   ;;  %v11260_v17 = vld [vmem:[#allocation8] sm:$0xff]   ;;  %v11263_v19 = vld [vmem:[%s12218_s17 + $0x10] sm:$0xff]   ;;  %vm2806_vm10 = vsmask.f32 4368  ;;  %p11910_p0 = scmp.ne.s32.totalorder %s14680_s0, %s11909_s12  ;;  %p15150_p10 = scmp.ne.s32.totalorder %s14749_s30, 0 }
  0x85   : > { %10768 = vmatpush3.bf16.msra.mxu1 %v11248_v3  ;;  %10689 = vmatprep.subr.bf16.mxu0 %v11249_v4  ;;  %v11264_v20 = vld [vmem:[%s12218_s17 + $0x8] sm:$0xff]   ;;  %v11266_v21 = vld [vmem:[%s12218_s17 + $0x18] sm:$0xff]   ;;  %v11267_v22 = vld [vmem:[%s12218_s17 + $0x10] sm:$0xff]  }
  0x86   : > { %10769 = vmatprep.subr.bf16.mxu1 %v11250_v5  ;;  %v11274_v23 = vld [vmem:[#allocation8 + $0xb0] sm:$0xff]   ;;  %v11268_v24 = vld [vmem:[%s12218_s17 + $0x20] sm:$0xff]   ;;  %v11269_v25 = vld [vmem:[%s12218_s17 + $0x18] sm:$0xff]   ;;  %p11911_p3 = pnand %p11910_p0, %p15150_p10 }
  0x87   : > { %v11283_v26 = vld [vmem:[#allocation8 + $0xa8] sm:$0xff]   ;;  %v11271_v28 = vld [vmem:[%s12218_s17 + $0x20] sm:$0xff]   ;;  %v11272_v29 = vld [vmem:[%s12218_s17 + $0x30] sm:$0xff]  }
  0x88   : > { %10690 = vmatpush3.bf16.msra.mxu0 %v11249_v4  ;;  %v11270_v27 = vld [vmem:[%s12218_s17 + $0x28] sm:$0xff]   ;;  %v11275_v31 = vld [vmem:[%s12218_s17 + $0x38] sm:$0xff]   ;;  %v11292_v32 = vld [vmem:[#allocation8 + $0xa0] sm:$0xff]   ;;  %p11912_p2 = pneg %p11911_p3 }
  0x89   : > { %10770 = vmatpush3.bf16.msra.mxu1 %v11250_v5  ;;  %10691 = vmatprep.subr.bf16.mxu0 %v11251_v6  ;;  %v11273_v30 = vld [vmem:[%s12218_s17 + $0x28] sm:$0xff]   ;;  %v11276_v33 = vld [vmem:[%s12218_s17 + $0x30] sm:$0xff]   ;;  %v11277_v34 = vld [vmem:[%s12218_s17 + $0x40] sm:$0xff]  }
  0x8a   : > { %10771 = vmatprep.subr.bf16.mxu1 %v11252_v7  ;;  %v11278_v35 = vld [vmem:[%s12218_s17 + $0x38] sm:$0xff]   ;;  %v11279_v36 = vld [vmem:[%s12218_s17 + $0x48] sm:$0xff]   ;;  %v11280_v37 = vld [vmem:[%s12218_s17 + $0x40] sm:$0xff]  }
  0x8b   : > { %v11301_v38 = vld [vmem:[#allocation8 + $0x98] sm:$0xff]   ;;  %v11281_v39 = vld [vmem:[%s12218_s17 + $0x50] sm:$0xff]   ;;  %v11282_v40 = vld [vmem:[%s12218_s17 + $0x48] sm:$0xff]  }
  0x8c   : > { %10692 = vmatpush3.bf16.msra.mxu0 %v11251_v6  ;;  %v11284_v41 = vld [vmem:[%s12218_s17 + $0x58] sm:$0xff]   ;;  %v11285_v42 = vld [vmem:[%s12218_s17 + $0x50] sm:$0xff]   ;;  %v11286_v44 = vld [vmem:[%s12218_s17 + $0x60] sm:$0xff]  }
  0x8d   : > { %10772 = vmatpush3.bf16.msra.mxu1 %v11252_v7  ;;  %10693 = vmatprep.subr.bf16.mxu0 %v11253_v8  ;;  %v11310_v43 = vld [vmem:[#allocation8 + $0x90] sm:$0xff]   ;;  %v11287_v45 = vld [vmem:[%s12218_s17 + $0x58] sm:$0xff]   ;;  %v11288_v46 = vld [vmem:[%s12218_s17 + $0x68] sm:$0xff]  }
  0x8e   : > { %10773 = vmatprep.subr.bf16.mxu1 %v11254_v9  ;;  %v11289_v47 = vld [vmem:[%s12218_s17 + $0x60] sm:$0xff]   ;;  %v11319_v48 = vld [vmem:[#allocation8 + $0x88] sm:$0xff]   ;;  %v11290_v49 = vld [vmem:[%s12218_s17 + $0x70] sm:$0xff]  }
  0x8f   : > { %v11291_v50 = vld [vmem:[%s12218_s17 + $0x68] sm:$0xff]   ;;  %v11293_v51 = vld [vmem:[%s12218_s17 + $0x78] sm:$0xff]   ;;  %v11294_v52 = vld [vmem:[%s12218_s17 + $0x70] sm:$0xff]  }
  0x90   : > { %10694 = vmatpush3.bf16.msra.mxu0 %v11253_v8  ;;  %v11328_v53 = vld [vmem:[#allocation8 + $0x80] sm:$0xff]   ;;  %v11296_v55 = vld [vmem:[%s12218_s17 + $0x78] sm:$0xff]   ;;  %v11298_v57 = vld [vmem:[%s12218_s17 + $0x90] sm:$0xff]  }
  0x91   : > { %10774 = vmatpush3.bf16.msra.mxu1 %v11254_v9  ;;  %10695 = vmatprep.subr.bf16.mxu0 %v11255_v10  ;;  %v11295_v54 = vld [vmem:[%s12218_s17 + $0x80] sm:$0xff]   ;;  %v11297_v56 = vld [vmem:[%s12218_s17 + $0x98] sm:$0xff]   ;;  %v11302_v60 = vld [vmem:[%s12218_s17 + $0xa8] sm:$0xff]  }
  0x92   : > { %10775 = vmatprep.subr.bf16.mxu1 %v11256_v11  ;;  %v11299_v58 = vld [vmem:[%s12218_s17 + $0xa0] sm:$0xff]   ;;  %v11300_v59 = vld [vmem:[%s12218_s17 + $0x98] sm:$0xff]   ;;  %v11304_v62 = vld [vmem:[%s12218_s17 + $0xb0] sm:$0xff]  }
  0x93   : > { %v11303_v61 = vld [vmem:[%s12218_s17 + $0xa0] sm:$0xff]   ;;  %v11305_v63 = vld [vmem:[%s12218_s17 + $0xa8] sm:$0xff]   ;;  %v11306_v0 = vld [vmem:[%s12218_s17 + $0xb8] sm:$0xff]  }
  0x94   : > { %10696 = vmatpush3.bf16.msra.mxu0 %v11255_v10  ;;  %v11307_v1 = vld [vmem:[%s12218_s17 + $0xb0] sm:$0xff]   ;;  %v11308_v2 = vld [vmem:[%s12218_s17 + $0xc0] sm:$0xff]   ;;  %v11309_v3 = vld [vmem:[%s12218_s17 + $0xb8] sm:$0xff]  }
  0x95   : > { %10776 = vmatpush3.bf16.msra.mxu1 %v11256_v11  ;;  %10697 = vmatprep.subr.bf16.mxu0 %v11257_v14  ;;  %v11311_v4 = vld [vmem:[%s12218_s17 + $0xc8] sm:$0xff]   ;;  %v11312_v5 = vld [vmem:[%s12218_s17 + $0xc0] sm:$0xff]   ;;  %v11313_v6 = vld [vmem:[%s12218_s17 + $0xd0] sm:$0xff]  }
  0x96   : > { %10777 = vmatprep.subr.bf16.mxu1 %v11258_v15  ;;  %v11314_v7 = vld [vmem:[%s12218_s17 + $0xc8] sm:$0xff]   ;;  %v11315_v8 = vld [vmem:[%s12218_s17 + $0xd8] sm:$0xff]   ;;  %v11316_v9 = vld [vmem:[%s12218_s17 + $0xd0] sm:$0xff]  }
  0x97   : > { %v11317_v10 = vld [vmem:[%s12218_s17 + $0xe0] sm:$0xff]   ;;  %v11318_v11 = vld [vmem:[%s12218_s17 + $0xd8] sm:$0xff]   ;;  %v11320_v12 = vld [vmem:[%s12218_s17 + $0xe8] sm:$0xff]  }
  0x98   : > { %10698 = vmatpush3.bf16.msra.mxu0 %v11257_v14  ;;  %v11321_v13 = vld [vmem:[%s12218_s17 + $0xe0] sm:$0xff]   ;;  %v11322_v14 = vld [vmem:[%s12218_s17 + $0xf0] sm:$0xff]   ;;  %vm12368_vm2 = vmand %vm2424_vm0, %vm2425_vm1 }
  0x99   : > { %10778 = vmatpush3.bf16.msra.mxu1 %v11258_v15  ;;  %10699 = vmatprep.subr.bf16.mxu0 %v11259_v16  ;;  %v11323_v15 = vld [vmem:[%s12218_s17 + $0xe8] sm:$0xff]   ;;  %vm12389_vm5 = vmand %vm2535_vm3, %vm2536_vm4 }
  0x9a   : > { %10779 = vmatprep.subr.bf16.mxu1 %v11260_v17  ;;  %vm12967_vm11 = vmand %vm3385_vm6, %vm3386_vm7 }
  0x9b   : > { %vm12980_vm12 = vmor %vm3644_vm8, %vm3645_vm9 }
  0x9c   : > { %10700 = vmatpush3.bf16.msra.mxu0 %v11259_v16  ;;  %v11324_v16 = vld [vmem:[%s12218_s17 + $0xf8] sm:$0xff]   ;;  %vm12990_vm13 = vmor %vm2425_vm1, %vm2806_vm10 }
  0x9d   : > { %10780 = vmatpush3.bf16.msra.mxu1 %v11260_v17  ;;  %10845 = vmatprep.subr.bf16.mxu0 %v11265_v18  ;;  %v14738_v17 = vmov 0   ;;  %vm13001_vm14 = vmand %vm3385_vm6, %vm3644_vm8 }
  0x9e   : > { %5137 = vmatprep.subr.bf16.mxu1 %v14738_v17  ;;  %2407 = vst [vmem:[#allocation2] sm:$0xff] %v14738_v17  ;;  %2408 = vst [vmem:[#allocation2 + $0x8] sm:$0xf] %v14738_v17 }
  0x9f   : > { %10702 = vmatmul.mubr.bf16.vlgmr.msra.gmra.mxu0 %v11263_v19  ;;  %2409 = vst [vmem:[#allocation2 + $0xc] sm:$0xff] %v14738_v17  ;;  %2410 = vst [vmem:[#allocation2 + $0x14] sm:$0xf] %v14738_v17  ;;  %v11325_v19 = vld [vmem:[%s12218_s17 + $0xf0] sm:$0xff]  }
  0xa0   : > { %10782 = vmatmul.mubr.bf16.vlgmr.msra.gmra.mxu1 %v11264_v20  ;;  %10846 = vmatpush3.bf16.msra.mxu0 %v11265_v18  ;;  %2411 = vst [vmem:[#allocation2 + $0x1b0] sm:$0xff] %v14738_v17  ;;  %2412 = vst [vmem:[#allocation2 + $0x1b8] sm:$0xf] %v14738_v17  ;;  %v11359_v18 = vld [vmem:[#allocation9 + $0xf8] sm:$0xff]   ;;  %v11326_v20 = vld [vmem:[%s12218_s17 + $0x100] sm:$0xff]  }
  0xa1   : > { %10705 = vmatprep.mubr.bf16.mxu0 %v11266_v21  ;;  %10785 = vmatprep.mubr.bf16.mxu1 %v11267_v22  ;;  %2414 = vst [vmem:[#allocation2 + $0x1c4] sm:$0xf] %v14738_v17  ;;  %2416 = vst [vmem:[#allocation2 + $0x198] sm:$0xff] %v14738_v17  ;;  %v11327_v21 = vld [vmem:[%s12218_s17 + $0xf8] sm:$0xff]   ;;  %v11329_v22 = vld [vmem:[%s12218_s17 + $0x108] sm:$0xff]  }
  0xa2   : > { %10847 = vmatprep.subr.bf16.mxu0 %v11274_v23  ;;  %2417 = vst [vmem:[#allocation2 + $0x1a0] sm:$0xf] %v14738_v17  ;;  %2419 = vst [vmem:[#allocation2 + $0x1ac] sm:$0xf] %v14738_v17  ;;  %5138 = vmatpush1.bf16.msra.mxu1 %v11359_v18 }
  0xa3   : > { %2420 = vst [vmem:[#allocation2 + $0x348] sm:$0xff] %v14738_v17  ;;  %2421 = vst [vmem:[#allocation2 + $0x350] sm:$0xf] %v14738_v17  ;;  %5139 = vmatprep.subr.bf16.mxu1 %v14738_v17 }
  0xa4   : > { %10848 = vmatpush3.bf16.msra.mxu0 %v11274_v23  ;;  %2423 = vst [vmem:[#allocation2 + $0x35c] sm:$0xf] %v14738_v17  ;;  %v11362_v23 = vld [vmem:[#allocation9 + $0xf0] sm:$0xff]  }
  0xa5   : > { %10849 = vmatprep.subr.bf16.mxu0 %v11283_v26 }
  0xa6   : > { %5140 = vmatpush1.bf16.msra.mxu1 %v11362_v23 }
  0xa7   : > { %10706 = vmatmul.mubr.bf16.gmra.mxu0 %v11268_v24  ;;  %v11330_v24 = vld [vmem:[%s12218_s17 + $0x100] sm:$0xff]   ;;  %5141 = vmatprep.subr.bf16.mxu1 %v14738_v17 }
  0xa8   : > { %10786 = vmatmul.mubr.bf16.gmra.mxu1 %v11269_v25  ;;  %10709 = vmatprep.mubr.bf16.mxu0 %v11270_v27  ;;  %v11331_v25 = vld [vmem:[%s12218_s17 + $0x110] sm:$0xff]  }
  0xa9   : > { %10789 = vmatprep.mubr.bf16.mxu1 %v11271_v28  ;;  %10850 = vmatpush3.bf16.msra.mxu0 %v11283_v26  ;;  %v11332_v26 = vld [vmem:[%s12218_s17 + $0x108] sm:$0xff]   ;;  %v11333_v27 = vld [vmem:[%s12218_s17 + $0x10] sm:$0xff]  }
  0xaa   : > { %10851 = vmatprep.subr.bf16.mxu0 %v11292_v32  ;;  %v11365_v28 = vld [vmem:[#allocation9 + $0xe8] sm:$0xff]  }
  0xab   : > { %5142 = vmatpush1.bf16.msra.mxu1 %v11365_v28 }
  0xac   : > { %5143 = vmatprep.subr.bf16.mxu1 %v14738_v17 }
  0xad   : > { %10852 = vmatpush3.bf16.msra.mxu0 %v11292_v32  ;;  %v11336_v32 = vld [vmem:[%s12218_s17 + $0x28] sm:$0xff]  }
  0xae   : > { %10853 = vmatprep.subr.bf16.mxu0 %v11301_v38 }
  0xaf   : > { %10710 = vmatmul.mubr.bf16.gmra.mxu0 %v11272_v29  ;;  %v11334_v29 = vld [vmem:[%s12218_s17 + $0x18] sm:$0xff]  }
  0xb0   : > { %10790 = vmatmul.mubr.bf16.gmra.mxu1 %v11273_v30  ;;  %10713 = vmatprep.mubr.bf16.mxu0 %v11275_v31  ;;  %v11335_v30 = vld [vmem:[%s12218_s17 + $0x20] sm:$0xff]  }
  0xb1   : > { %10793 = vmatprep.mubr.bf16.mxu1 %v11276_v33  ;;  %10854 = vmatpush3.bf16.msra.mxu0 %v11301_v38  ;;  %v11368_v31 = vld [vmem:[#allocation9 + $0xe0] sm:$0xff]   ;;  %v11337_v33 = vld [vmem:[%s12218_s17 + $0x30] sm:$0xff]   ;;  %v11340_v38 = vld [vmem:[%s12218_s17 + $0x48] sm:$0xff]  }
  0xb2   : > { %10855 = vmatprep.subr.bf16.mxu0 %v11310_v43  ;;  %5144 = vmatpush1.bf16.msra.mxu1 %v11368_v31 }
  0xb3   : > { %5145 = vmatprep.subr.bf16.mxu1 %v14738_v17 }
  0xb5   : > { %10856 = vmatpush3.bf16.msra.mxu0 %v11310_v43  ;;  %v11343_v43 = vld [vmem:[%s12218_s17 + $0x60] sm:$0xff]  }
  0xb6   : > { %10857 = vmatprep.subr.bf16.mxu0 %v11319_v48 }
  0xb7   : > { %10714 = vmatmul.mubr.bf16.gmra.mxu0 %v11277_v34  ;;  %v11369_v34 = vld [vmem:[#allocation9 + $0xd8] sm:$0xff]  }
  0xb8   : > { %10794 = vmatmul.mubr.bf16.gmra.mxu1 %v11278_v35  ;;  %10717 = vmatprep.mubr.bf16.mxu0 %v11279_v36  ;;  %v11338_v35 = vld [vmem:[%s12218_s17 + $0x38] sm:$0xff]   ;;  %v11370_v36 = vld [vmem:[#allocation9 + $0xd0] sm:$0xff]  }
  0xb9   : > { %10797 = vmatprep.mubr.bf16.mxu1 %v11280_v37  ;;  %10858 = vmatpush3.bf16.msra.mxu0 %v11319_v48  ;;  %v11339_v37 = vld [vmem:[%s12218_s17 + $0x40] sm:$0xff]   ;;  %v11374_v48 = vld [vmem:[#allocation9 + $0x130] sm:$0xff]  }
  0xba   : > { %10859 = vmatprep.subr.bf16.mxu0 %v11328_v53  ;;  %5146 = vmatpush1.bf16.msra.mxu1 %v11369_v34  ;;  %v11356_v34 = vld [vmem:[%s12218_s17 + $0xd8] sm:$0xff]  }
  0xbb   : > { %5147 = vmatprep.subr.bf16.mxu1 %v14738_v17 }
  0xbd   : > { %10860 = vmatpush3.bf16.msra.mxu0 %v11328_v53  ;;  %v11350_v53 = vld [vmem:[%s12218_s17 + $0xa8] sm:$0xff]  }
  0xbe   : > { %5148 = vmatpush1.bf16.msra.mxu1 %v11370_v36  ;;  %v11357_v36 = vld [vmem:[%s12218_s17 + $0xe0] sm:$0xff]  }
  0xbf   : > { %10718 = vmatmul.mubr.bf16.gmra.mxu0 %v11281_v39  ;;  %5149 = vmatprep.subr.bf16.mxu1 %v14738_v17  ;;  %v11371_v39 = vld [vmem:[#allocation9 + $0xc8] sm:$0xff]  }
  0xc0   : > { %10798 = vmatmul.mubr.bf16.gmra.mxu1 %v11282_v40  ;;  %10721 = vmatprep.mubr.bf16.mxu0 %v11284_v41  ;;  %v11341_v40 = vld [vmem:[%s12218_s17 + $0x50] sm:$0xff]   ;;  %v11342_v41 = vld [vmem:[%s12218_s17 + $0x58] sm:$0xff]  }
  0xc1   : > { %10801 = vmatprep.mubr.bf16.mxu1 %v11285_v42  ;;  %v11372_v42 = vld [vmem:[#allocation9 + $0xc0] sm:$0xff]  }
  0xc2   : > { %5150 = vmatpush1.bf16.msra.mxu1 %v11371_v39 }
  0xc3   : > { %5151 = vmatprep.subr.bf16.mxu1 %v14738_v17 }
  0xc6   : > { %5152 = vmatpush1.bf16.msra.mxu1 %v11372_v42 }
  0xc7   : > { %10722 = vmatmul.mubr.bf16.gmra.mxu0 %v11286_v44  ;;  %5153 = vmatprep.subr.bf16.mxu1 %v14738_v17  ;;  %v11344_v44 = vld [vmem:[%s12218_s17 + $0x68] sm:$0xff]  }
  0xc8   : > { %10802 = vmatmul.mubr.bf16.gmra.mxu1 %v11287_v45  ;;  %10725 = vmatprep.mubr.bf16.mxu0 %v11288_v46  ;;  %v11373_v45 = vld [vmem:[#allocation9 + $0x138] sm:$0xff]   ;;  %v11345_v46 = vld [vmem:[%s12218_s17 + $0x70] sm:$0xff]  }
  0xc9   : > { %10805 = vmatprep.mubr.bf16.mxu1 %v11289_v47  ;;  %v11346_v47 = vld [vmem:[%s12218_s17 + $0x78] sm:$0xff]  }
  0xca   : > { %5154 = vmatpush2.bf16.msra.mxu1 %v11373_v45  ;;  %v11380_v45 = vld [vmem:[#allocation9 + $0x110] sm:$0xff]  }
  0xcb   : > { %5155 = vmatprep.subr.bf16.mxu1 %v14738_v17 }
  0xce   : > { %5156 = vmatpush2.bf16.msra.mxu1 %v11374_v48 }
  0xcf   : > { %10726 = vmatmul.mubr.bf16.gmra.mxu0 %v11290_v49  ;;  %v11347_v49 = vld [vmem:[%s12218_s17 + $0x80] sm:$0xff]   ;;  %5157 = vmatprep.subr.bf16.mxu1 %v14738_v17 }
  0xd0   : > { %10806 = vmatmul.mubr.bf16.gmra.mxu1 %v11291_v50  ;;  %10729 = vmatprep.mubr.bf16.mxu0 %v11293_v51  ;;  %v11348_v50 = vld [vmem:[%s12218_s17 + $0x88] sm:$0xff]  }
  0xd1   : > { %10809 = vmatprep.mubr.bf16.mxu1 %v11294_v52  ;;  %v11375_v51 = vld [vmem:[#allocation9 + $0x128] sm:$0xff]   ;;  %v11349_v52 = vld [vmem:[%s12218_s17 + $0xa0] sm:$0xff]  }
  0xd2   : > { %5158 = vmatpush2.bf16.msra.mxu1 %v11375_v51  ;;  %v11384_v51 = vld [vmem:[#allocation9 + $0x158] sm:$0xff]  }
  0xd3   : > { %5159 = vmatprep.subr.bf16.mxu1 %v14738_v17 }
  0xd7   : > { %10730 = vmatmul.mubr.bf16.gmra.mxu0 %v11295_v54  ;;  %v11376_v54 = vld [vmem:[#allocation9 + $0x120] sm:$0xff]  }
  0xd8   : > { %10810 = vmatmul.mubr.bf16.gmra.mxu1 %v11296_v55  ;;  %10733 = vmatprep.mubr.bf16.mxu0 %v11297_v56  ;;  %v11351_v55 = vld [vmem:[%s12218_s17 + $0xb0] sm:$0xff]  }
  0xd9   : > { %10813 = vmatprep.mubr.bf16.mxu1 %v11298_v57  ;;  %5160 = vmatpush2.bf16.msra.mxu1 %v11376_v54 }
  0xda   : > { %5161 = vmatprep.subr.bf16.mxu1 %v14738_v17 }
  0xdf   : > { %10734 = vmatmul.mubr.bf16.gmra.mxu0 %v11299_v58  ;;  %v11378_v58 = vld [vmem:[#allocation9 + $0x178] sm:$0xff]  }
  0xe0   : > { %10814 = vmatmul.mubr.bf16.gmra.mxu1 %v11300_v59  ;;  %10737 = vmatprep.mubr.bf16.mxu0 %v11302_v60 }
  0xe1   : > { %10817 = vmatprep.mubr.bf16.mxu1 %v11303_v61  ;;  %10925 = vmatprep.subr.bf16.mxu0 %v11378_v58 }
  0xe7   : > { %10738 = vmatmul.mubr.bf16.gmra.mxu0 %v11304_v62  ;;  %v11352_v62 = vld [vmem:[%s12218_s17 + $0xb8] sm:$0xff]  }
  0xe8   : > { %10818 = vmatmul.mubr.bf16.gmra.mxu1 %v11305_v63  ;;  %10741 = vmatprep.mubr.bf16.mxu0 %v11306_v0  ;;  %v11353_v0 = vld [vmem:[%s12218_s17 + $0xc0] sm:$0xff]  }
  0xe9   : > { %10821 = vmatprep.mubr.bf16.mxu1 %v11307_v1  ;;  %v2433_v1 = vld [vmem:[#allocation2 + $0x30] sm:$0x1] }
  0xef   : > { %10742 = vmatmul.mubr.bf16.gmra.mxu0 %v11308_v2 }
  0xf0   : > { %10822 = vmatmul.mubr.bf16.gmra.mxu1 %v11309_v3  ;;  %10745 = vmatprep.mubr.bf16.mxu0 %v11311_v4 }
  0xf1   : > { %10825 = vmatprep.mubr.bf16.mxu1 %v11312_v5  ;;  %v2434_v5 = vsel %vm12368_vm2, 0, %v2433_v1  ;;  %v2445_v1 = vld [vmem:[#allocation2 + $0x90] sm:$0x1] }
  0xf2   : > { %2435 = vst [vmem:[#allocation2 + $0x30] sm:$0x1] %v2434_v5 }
  0xf7   : > { %10746 = vmatmul.mubr.bf16.gmra.mxu0 %v11313_v6 }
  0xf8   : > { %10826 = vmatmul.mubr.bf16.gmra.mxu1 %v11314_v7  ;;  %10749 = vmatprep.mubr.bf16.mxu0 %v11315_v8  ;;  %v2430_v7 = vld [vmem:[#allocation2 + $0x18] sm:$0x1]  ;;  %v11379_v8 = vld [vmem:[#allocation9 + $0x170] sm:$0xff]  }
  0xf9   : > { %10829 = vmatprep.mubr.bf16.mxu1 %v11316_v9 }
  0xff   : > { %10750 = vmatmul.mubr.bf16.gmra.mxu0 %v11317_v10  ;;  %v2431_v10 = vsel %vm12368_vm2, 0, %v2430_v7  ;;  %v2446_v7 = vsel %vm12368_vm2, 0, %v2445_v1 }
 0x100   : > { %10830 = vmatmul.mubr.bf16.gmra.mxu1 %v11318_v11  ;;  %10753 = vmatprep.mubr.bf16.mxu0 %v11320_v12  ;;  %2432 = vst [vmem:[#allocation2 + $0x18] sm:$0x1] %v2431_v10  ;;  %2447 = vst [vmem:[#allocation2 + $0x90] sm:$0x1] %v2446_v7 }
 0x101   : > { %10833 = vmatprep.mubr.bf16.mxu1 %v11321_v13 }
 0x107   : > { %10754 = vmatmul.mubr.bf16.gmra.mxu0 %v11322_v14  ;;  %v11354_v14 = vld [vmem:[%s12218_s17 + $0xc8] sm:$0xff]  }
 0x108   : > { %10834 = vmatmul.mubr.bf16.gmra.mxu1 %v11323_v15  ;;  %10757 = vmatprep.mubr.bf16.mxu0 %v11324_v16  ;;  %v2544_v16 = vld [vmem:[#allocation2 + $0x44] sm:$0x8] }
 0x109   : > { %10837 = vmatprep.mubr.bf16.mxu1 %v11325_v19  ;;  %v11355_v19 = vld [vmem:[%s12218_s17 + $0xd0] sm:$0xff]  }
 0x10f   : > { %10758 = vmatmul.mubr.bf16.gmra.mxu0 %v11326_v20  ;;  %v2545_v20 = vsel %vm12389_vm5, 0, %v2544_v16  ;;  %v11383_v16 = vld [vmem:[#allocation9 + $0x108] sm:$0xff]  }
 0x110   : > { %10838 = vmatmul.mubr.bf16.gmra.mxu1 %v11327_v21  ;;  %10761 = vmatprep.mubr.bf16.mxu0 %v11329_v22  ;;  %2546 = vst [vmem:[#allocation2 + $0x44] sm:$0x8] %v2545_v20  ;;  %v2541_v22 = vld [vmem:[#allocation2 + $0x2c] sm:$0x8]  ;;  %v11361_v20 = vld [vmem:[%s12218_s17 + $0xf8] sm:$0xff]  }
 0x111   : > { %10841 = vmatprep.mubr.bf16.mxu1 %v11330_v24  ;;  %v2542_v24 = vsel %vm12389_vm5, 0, %v2541_v22 }
 0x112   : > { %2543 = vst [vmem:[#allocation2 + $0x2c] sm:$0x8] %v2542_v24 }
 0x117   : > { %10762 = vmatmul.mubr.bf16.gmra.mxu0 %v11331_v25  ;;  %v11381_v25 = vld [vmem:[#allocation9 + $0x168] sm:$0xff]  }
 0x118   : > { %10842 = vmatmul.mubr.bf16.gmra.mxu1 %v11332_v26  ;;  %10861 = vmatprep.mubr.bf16.mxu0 %v11333_v27  ;;  %v11377_v27 = vld [vmem:[#allocation9 + $0x118] sm:$0xff]  }
 0x119   : > { %5162 = vmatpush2.bf16.msra.mxu1 %v11377_v27 }
 0x11a   : > { %5163 = vmatprep.subr.bf16.mxu1 %v14738_v17 }
 0x11d   : > { %5164 = vmatpush2.bf16.msra.mxu1 %v11380_v45 }
 0x11e   : > { %5165 = vmatprep.subr.bf16.mxu1 %v14738_v17 }
 0x11f   : > { %10862 = vmatmul.mubr.bf16.vlgmr.msra.gmra.mxu0 %v11334_v29  ;;  %v2439_v29 = vld [vmem:[#allocation2 + $0x60] sm:$0x1] }
 0x120   : > { %10865 = vmatprep.mubr.bf16.mxu0 %v11335_v30  ;;  %10926 = vmatpush3.bf16.msra.mxu0 %v11378_v58  ;;  %v2440_v31 = vsel %vm12368_vm2, 0, %v2439_v29  ;;  %v2547_v58 = vld [vmem:[#allocation2 + $0x5c] sm:$0x8]  ;;  %v11385_v29 = vld [vmem:[#allocation9 + $0x150] sm:$0xff]  }
 0x121   : > { %10927 = vmatprep.subr.bf16.mxu0 %v11379_v8  ;;  %2441 = vst [vmem:[#allocation2 + $0x60] sm:$0x1] %v2440_v31  ;;  %5166 = vmatpush2.bf16.msra.mxu1 %v11383_v16 }
 0x122   : > { %5167 = vmatprep.subr.bf16.mxu1 %v14738_v17 }
 0x124   : > { %10928 = vmatpush3.bf16.msra.mxu0 %v11379_v8 }
 0x125   : > { %10929 = vmatprep.subr.bf16.mxu0 %v11381_v25 }
 0x127   : > { %10866 = vmatmul.mubr.bf16.gmra.mxu0 %v11336_v32 }
 0x128   : > { %10869 = vmatprep.mubr.bf16.mxu0 %v11337_v33  ;;  %10930 = vmatpush3.bf16.msra.mxu0 %v11381_v25  ;;  %v11363_v25 = vld [vmem:[%s12218_s17 + $0x100] sm:$0xff]  }
 0x12f   : > { %10870 = vmatmul.mubr.bf16.gmra.mxu0 %v11338_v35 }
 0x130   : > { %10873 = vmatprep.mubr.bf16.mxu0 %v11339_v37 }
 0x137   : > { %10874 = vmatmul.mubr.bf16.gmra.mxu0 %v11340_v38  ;;  %v2436_v38 = vld [vmem:[#allocation2 + $0x48] sm:$0x1] }
 0x138   : > { %10877 = vmatprep.mubr.bf16.mxu0 %v11341_v40  ;;  %v2437_v40 = vsel %vm12368_vm2, 0, %v2436_v38 }
 0x139   : > { %2438 = vst [vmem:[#allocation2 + $0x48] sm:$0x1] %v2437_v40  ;;  %v2556_v40 = vld [vmem:[#allocation2 + $0xa4] sm:$0x8] }
 0x13a   : > { %v2557_v45 = vsel %vm12389_vm5, 0, %v2556_v40 }
 0x13b   : > { %2558 = vst [vmem:[#allocation2 + $0xa4] sm:$0x8] %v2557_v45  ;;  %v2448_v45 = vld [vmem:[#allocation2 + $0xa8] sm:$0x1] }
 0x13f   : > { %10878 = vmatmul.mubr.bf16.gmra.mxu0 %v11342_v41  ;;  %v11382_v41 = vld [vmem:[#allocation9 + $0x160] sm:$0xff]  }
 0x140   : > { %10881 = vmatprep.mubr.bf16.mxu0 %v11343_v43  ;;  %10931 = vmatprep.subr.bf16.mxu0 %v11382_v41 }
 0x141   : > { %10932 = vmatpush3.bf16.msra.mxu0 %v11382_v41 }
 0x142   : > { %10933 = vmatprep.subr.bf16.mxu0 %v11384_v51 }
 0x145   : > { %10934 = vmatpush3.bf16.msra.mxu0 %v11384_v51 }
 0x146   : > { %10935 = vmatprep.subr.bf16.mxu0 %v11385_v29 }
 0x147   : > { %10882 = vmatmul.mubr.bf16.gmra.mxu0 %v11344_v44 }
 0x148   : > { %10885 = vmatprep.mubr.bf16.mxu0 %v11345_v46  ;;  %v2550_v46 = vld [vmem:[#allocation2 + $0x74] sm:$0x8] }
 0x149   : > { %v2551_v48 = vsel %vm12389_vm5, 0, %v2550_v46  ;;  %10936 = vmatpush3.bf16.msra.mxu0 %v11385_v29 }
 0x14a   : > { %2552 = vst [vmem:[#allocation2 + $0x74] sm:$0x8] %v2551_v48  ;;  %v11364_v48 = vld [vmem:[%s12218_s17 + $0x108] sm:$0xff]  }
 0x14f   : > { %10886 = vmatmul.mubr.bf16.gmra.mxu0 %v11346_v47 }
 0x150   : > { %10889 = vmatprep.mubr.bf16.mxu0 %v11347_v49 }
 0x157   : > { %10890 = vmatmul.mubr.bf16.gmra.mxu0 %v11348_v50  ;;  %v11358_v50 = vld [vmem:[%s12218_s17 + $0xe8] sm:$0xff]  }
 0x158   : > { %10893 = vmatprep.mubr.bf16.mxu0 %v11349_v52 }
 0x15f   : > { %v12351_v56 = vpop.f32.mrf.mxu0  ;;  %10894 = vmatmul.mubr.bf16.gmra.mxu0 %v11350_v53  ;;  %v11360_v53 = vld [vmem:[%s12218_s17 + $0xf0] sm:$0xff]  }
 0x160   : > { %v12353_v57 = vpop.f32.mrf.mxu1  ;;  %10897 = vmatprep.mubr.bf16.mxu0 %v11351_v55 }
 0x161   : > { %v12355_v59 = vpop.f32.mrf.mxu0 }
 0x162   : > { %v12357_v60 = vpop.f32.mrf.mxu1 }
 0x163   : > { %v12359_v61 = vpop.f32.mrf.mxu0 }
 0x164   : > { %v12362_v63 = vpop.f32.mrf.mxu1 }
 0x165   : > { %v12365_v2 = vpop.f32.mrf.mxu0 }
 0x166   : > { %v12372_v4 = vpop.f32.mrf.mxu1 }
 0x167   : > { %v12376_v6 = vpop.f32.mrf.mxu0  ;;  %10898 = vmatmul.mubr.bf16.gmra.mxu0 %v11352_v62 }
 0x168   : > { %v12378_v9 = vpop.f32.mrf.mxu1  ;;  %10901 = vmatprep.mubr.bf16.mxu0 %v11353_v0  ;;  %v2548_v0 = vsel %vm12389_vm5, 0, %v2547_v58 }
 0x169   : > { %v12382_v11 = vpop.f32.mrf.mxu0  ;;  %2549 = vst [vmem:[#allocation2 + $0x5c] sm:$0x8] %v2548_v0  ;;  %v2553_v0 = vld [vmem:[#allocation2 + $0x8c] sm:$0x8] }
 0x16a   : > { %v12384_v12 = vpop.f32.mrf.mxu1  ;;  %v2554_v7 = vsel %vm12389_vm5, 0, %v2553_v0 }
 0x16b   : > { %v12386_v13 = vpop.f32.mrf.mxu0  ;;  %2555 = vst [vmem:[#allocation2 + $0x8c] sm:$0x8] %v2554_v7  ;;  %v11388_v7 = vld [vmem:[#allocation9 + $0x140] sm:$0xff]  }
 0x16c   : > { %v12393_v18 = vpop.f32.mrf.mxu1 }
 0x16d   : > { %v12398_v21 = vpop.f32.mrf.mxu0 }
 0x16e   : > { %v12400_v23 = vpop.f32.mrf.mxu1 }
 0x16f   : > { %v12404_v26 = vpop.f32.mrf.mxu0  ;;  %10902 = vmatmul.mubr.bf16.gmra.mxu0 %v11354_v14  ;;  %v2442_v14 = vld [vmem:[#allocation2 + $0x78] sm:$0x1] }
 0x170   : > { %v12406_v28 = vpop.f32.mrf.mxu1  ;;  %10905 = vmatprep.mubr.bf16.mxu0 %v11355_v19  ;;  %v2443_v22 = vsel %vm12368_vm2, 0, %v2442_v14  ;;  %v11386_v14 = vld [vmem:[#allocation9 + $0x100] sm:$0xff]  }
 0x171   : > { %v12408_v30 = vpop.f32.mrf.mxu0  ;;  %2444 = vst [vmem:[#allocation2 + $0x78] sm:$0x1] %v2443_v22  ;;  %v2451_v22 = vld [vmem:[#allocation2 + $0xc0] sm:$0x1]  ;;  %5168 = vmatpush2.bf16.msra.mxu1 %v11386_v14 }
 0x172   : > { %v12412_v32 = vpop.f32.mrf.mxu1  ;;  %v2452_v29 = vsel %vm12368_vm2, 0, %v2451_v22  ;;  %v2562_v22 = vld [vmem:[#allocation2 + $0xd4] sm:$0x8] }
 0x173   : > { %v12415_v33 = vpop.f32.mrf.mxu0  ;;  %2453 = vst [vmem:[#allocation2 + $0xc0] sm:$0x1] %v2452_v29  ;;  %v2563_v29 = vsel %vm12389_vm5, 0, %v2562_v22 }
 0x174   : > { %v12418_v35 = vpop.f32.mrf.mxu1  ;;  %2564 = vst [vmem:[#allocation2 + $0xd4] sm:$0x8] %v2563_v29 }
 0x175   : > { %v12421_v37 = vpop.f32.mrf.mxu0 }
 0x176   : > { %v12423_v39 = vpop.f32.mrf.mxu1 }
 0x177   : > { %v12427_v42 = vpop.f32.mrf.mxu0  ;;  %10906 = vmatmul.mubr.bf16.gmra.mxu0 %v11356_v34 }
 0x178   : > { %v12429_v43 = vpop.f32.mrf.mxu1  ;;  %10909 = vmatprep.mubr.bf16.mxu0 %v11357_v36 }
 0x179   : > { %v12431_v44 = vpop.f32.mrf.mxu0 }
 0x17a   : > { %v12433_v47 = vpop.f32.mrf.mxu1 }
 0x17b   : > { %v12437_v49 = vpop.f32.mrf.mxu0 }
 0x17c   : > { %v12440_v52 = vpop.f32.mrf.mxu1 }
 0x17d   : > { %v12444_v54 = vpop.f32.mrf.mxu0 }
 0x17e   : > { %v12446_v55 = vpop.f32.mrf.mxu1 }
 0x17f   : > { %v12448_v62 = vpop.f32.mrf.mxu0  ;;  %10910 = vmatmul.mubr.bf16.gmra.mxu0 %v11358_v50  ;;  %v11387_v50 = vld [vmem:[#allocation9 + $0x148] sm:$0xff]  }
 0x180   : > { %v12452_v5 = vpop.f32.mrf.mxu1  ;;  %10913 = vmatprep.mubr.bf16.mxu0 %v11360_v53  ;;  %v11366_v53 = vld [vmem:[%s12218_s17 + $0x110] sm:$0xff]   ;;  %10937 = vmatprep.subr.bf16.mxu0 %v11387_v50 }
 0x181   : > { %v12456_v8 = vpop.f32.mrf.mxu0  ;;  %10938 = vmatpush3.bf16.msra.mxu0 %v11387_v50  ;;  %v11367_v50 = vld [vmem:[%s12218_s17 + $0x118] sm:$0xff]   ;;  %s10094_s17 = sshll.u32 %s12053_s25, 12  ;;  %s11994_s25 = smov [#allocation11]  }
 0x182   : > { %v12458_v10 = vpop.f32.mrf.mxu1  ;;  %10939 = vmatprep.subr.bf16.mxu0 %v11388_v7  ;;  %s11913_s13 = sshll.u32 %s11994_s25, 4  ;;  %s11914_s13 = int_to_ptr.vmem [resolvable:$false] %s11913_s13 }
 0x183   : > { %v12460_v19 = vpop.f32.mrf.mxu0  ;;  %s11915_s18 = scalar_lea.vmem %s11914_s13, 8192  ;;  %p11916_p9 = scmp.lt.s32.totalorder %s14680_s0, %s11914_s13 }
 0x184   : > { %v12465_v24 = vpop.f32.mrf.mxu1  ;;  %p11917_p13 = scmp.lt.s32.totalorder %s11915_s18, %s11909_s12 }
 0x185   : > { %v12468_v27 = vpop.f32.mrf.mxu0  ;;  %10940 = vmatpush3.bf16.msra.mxu0 %v11388_v7  ;;  %v2559_v7 = vld [vmem:[#allocation2 + $0xbc] sm:$0x8] }
 0x186   : > { %v12471_v31 = vpop.f32.mrf.mxu1  ;;  %p11918_p1 = por %p11917_p13, %p11916_p9 }
 0x187   : > { %v12473_v34 = vpop.f32.mrf.mxu0  ;;  %10914 = vmatmul.mubr.bf16.gmra.mxu0 %v11361_v20 }
 0x188   : > { %v12475_v36 = vpop.f32.mrf.mxu1  ;;  %10917 = vmatprep.mubr.bf16.mxu0 %v11363_v25  ;;  %p11919_p4 = pnand %p11918_p1, %p11912_p2 }
 0x189   : > { %v12477_v38 = vpop.f32.mrf.mxu0 }
 0x18a   : > { %v12479_v41 = vpop.f32.mrf.mxu1 }
 0x18b   : > { %v12483_v46 = vpop.f32.mrf.mxu0 }
 0x18c   : > { %v12486_v51 = vpop.f32.mrf.mxu1 }
 0x18d   : > { %v12489_v58 = vpop.f32.mrf.mxu0 }
 0x18e   : > { %v12491_v1 = vpop.f32.mrf.mxu1 }
 0x18f   : > { %v12495_v16 = vpop.f32.mrf.mxu0  ;;  %10918 = vmatmul.mubr.bf16.gmra.mxu0 %v11364_v48  ;;  %v2449_v48 = vsel %vm12368_vm2, 0, %v2448_v45 }
 0x190   : > { %v12497_v20 = vpop.f32.mrf.mxu1  ;;  %10921 = vmatprep.mubr.bf16.mxu0 %v11366_v53  ;;  %2450 = vst [vmem:[#allocation2 + $0xa8] sm:$0x1] %v2449_v48 }
 0x191   : > { %v12499_v25 = vpop.f32.mrf.mxu0 }
 0x192   : > { %14765 = vst [vmem:[#allocation18_spill] sm:$0xff] %v12499_v25  ;;  %v12503_v40 = vpop.f32.mrf.mxu1 }
 0x193   : > { %14766 = vst [vmem:[#allocation19_spill] sm:$0xff] %v12503_v40  ;;  %v12505_v0 = vpop.f32.mrf.mxu0 }
 0x194   : > { %14767 = vst [vmem:[#allocation20_spill] sm:$0xff] %v12505_v0  ;;  %v12510_v17 = vpop.f32.mrf.mxu1  ;;  %v14772_v0 = vmov 0  }
 0x195   : > { %14768 = vst [vmem:[#allocation21_spill] sm:$0xff] %v12510_v17  ;;  %v12512_v53 = vpop.f32.mrf.mxu0  ;;  %6371 = vmatprep.subr.bf16.mxu0 %v14772_v0  ;;  %v2457_v0 = vld [vmem:[#allocation2 + $0xf0] sm:$0x1] }
 0x196   : > { %14769 = vst [vmem:[#allocation22_spill] sm:$0xff] %v12512_v53  ;;  %v12514_v14 = vpop.f32.mrf.mxu1  ;;  %v2458_v29 = vsel %vm12368_vm2, 0, %v2457_v0 }
 0x197   : > { %14770 = vst [vmem:[#allocation23_spill] sm:$0xff] %v12514_v14  ;;  %v12516_v40 = vpop.f32.mrf.mxu0  ;;  %10922 = vmatmul.mubr.bf16.gmra.mxu0 %v11367_v50  ;;  %v2560_v50 = vsel %vm12389_vm5, 0, %v2559_v7  ;;  %2459 = vst [vmem:[#allocation2 + $0xf0] sm:$0x1] %v2458_v29 }
 0x198   : > { %14771 = vst [vmem:[#allocation24_spill] sm:$0xff] %v12516_v40  ;;  %v12521_v45 = vpop.f32.mrf.mxu1  ;;  %2561 = vst [vmem:[#allocation2 + $0xbc] sm:$0x8] %v2560_v50 }
 0x199   : > { %14773 = vst [vmem:[#allocation25_spill] sm:$0xff] %v12521_v45  ;;  %v12523_v17 = vpop.f32.mrf.mxu0 }
 0x19a   : > { %14774 = vst [vmem:[#allocation26_spill] sm:$0xff] %v12523_v17  ;;  %v12525_v48 = vpop.f32.mrf.mxu1 }
 0x19b   : > { %14775 = vst [vmem:[#allocation27_spill] sm:$0xff] %v12525_v48  ;;  %v12527_v53 = vpop.f32.mrf.mxu0 }
 0x19c   : > { %14776 = vst [vmem:[#allocation28_spill] sm:$0xff] %v12527_v53  ;;  %v12529_v14 = vpop.f32.mrf.mxu1 }
 0x19d   : > { %14777 = vst [vmem:[#allocation29_spill] sm:$0xff] %v12529_v14  ;;  %v12531_v25 = vpop.f32.mrf.mxu0  ;;  %v2454_v14 = vld [vmem:[#allocation2 + $0xd8] sm:$0x1] }
 0x19e   : > { %14778 = vst [vmem:[#allocation30_spill] sm:$0xff] %v12531_v25  ;;  %v12535_v22 = vpop.f32.mrf.mxu1  ;;  %v2455_v7 = vsel %vm12368_vm2, 0, %v2454_v14 }
 0x19f   : > { %14779 = vst [vmem:[#allocation31_spill] sm:$0xff] %v12535_v22  ;;  %v12537_v45 = vpop.f32.mrf.mxu0  ;;  %2456 = vst [vmem:[#allocation2 + $0xd8] sm:$0x1] %v2455_v7  ;;  %v2568_v22 = vld [vmem:[#allocation2 + $0x104] sm:$0x8] }
 0x1a0   : > { %14780 = vst [vmem:[#allocation32_spill] sm:$0xff] %v12537_v45  ;;  %v12541_v48 = vpop.f32.mrf.mxu1  ;;  %v2569_v29 = vsel %vm12389_vm5, 0, %v2568_v22 }
 0x1a1   : > { %14781 = vst [vmem:[#allocation33_spill] sm:$0xff] %v12541_v48  ;;  %v12543_v53 = vpop.f32.mrf.mxu0  ;;  %2570 = vst [vmem:[#allocation2 + $0x104] sm:$0x8] %v2569_v29 }
 0x1a2   : > { %14782 = vst [vmem:[#allocation34_spill] sm:$0xff] %v12543_v53  ;;  %v12545_v17 = vpop.f32.mrf.mxu1 }
 0x1a3   : > { %14783 = vst [vmem:[#allocation35_spill] sm:$0xff] %v12545_v17  ;;  %v12549_v25 = vpop.f32.mrf.mxu0  ;;  %v2565_v17 = vld [vmem:[#allocation2 + $0xec] sm:$0x8] }
 0x1a4   : > { %14784 = vst [vmem:[#allocation36_spill] sm:$0xff] %v12549_v25  ;;  %v12551_v50 = vpop.f32.mrf.mxu1  ;;  %v2566_v14 = vsel %vm12389_vm5, 0, %v2565_v17 }
 0x1a5   : > { %14785 = vst [vmem:[#allocation37_spill] sm:$0xff] %v12551_v50  ;;  %v12553_v45 = vpop.f32.mrf.mxu0  ;;  %v12567_v50 = vld [vmem:[#allocation9 + $0xb8] sm:$0xff]   ;;  %2567 = vst [vmem:[#allocation2 + $0xec] sm:$0x8] %v2566_v14 }
 0x1a6   : > { %14786 = vst [vmem:[#allocation38_spill] sm:$0xff] %v12553_v45  ;;  %v12555_v0 = vpop.f32.mrf.mxu1  ;;  %14791 = vst [vmem:[#allocation43_spill] sm:$0xff] %v12567_v50  ;;  %11005 = vmatprep.subr.bf16.mxu1 %v12567_v50 }
 0x1a7   : > { %14787 = vst [vmem:[#allocation39_spill] sm:$0xff] %v12555_v0  ;;  %v12559_v53 = vpop.f32.mrf.mxu0 }
 0x1a8   : > { %14788 = vst [vmem:[#allocation40_spill] sm:$0xff] %v12559_v53  ;;  %v12561_v48 = vpop.f32.mrf.mxu1  ;;  %v2463_v53 = vld [vmem:[#allocation2 + $0x120] sm:$0x1] }
 0x1a9   : > { %14789 = vst [vmem:[#allocation41_spill] sm:$0xff] %v12561_v48  ;;  %v12565_v7 = vpop.f32.mrf.mxu0  ;;  %v2464_v17 = vsel %vm12368_vm2, 0, %v2463_v53 }
 0x1aa   : > { %14790 = vst [vmem:[#allocation42_spill] sm:$0xff] %v12565_v7  ;;  %v12569_v45 = vpop.f32.mrf.mxu1  ;;  %2465 = vst [vmem:[#allocation2 + $0x120] sm:$0x1] %v2464_v17  ;;  %v2574_v17 = vld [vmem:[#allocation2 + $0x134] sm:$0x8] }
 0x1ab   : > { %14792 = vst [vmem:[#allocation44_spill] sm:$0xff] %v12569_v45  ;;  %v12571_v0 = vpop.f32.mrf.mxu0 }
 0x1ac   : > { %14793 = vst [vmem:[#allocation45_spill] sm:$0xff] %v12571_v0  ;;  %v12574_v22 = vpop.f32.mrf.mxu1  ;;  %v2460_v0 = vld [vmem:[#allocation2 + $0x108] sm:$0x1] }
 0x1ad   : > { %14794 = vst [vmem:[#allocation46_spill] sm:$0xff] %v12574_v22  ;;  %v12576_v29 = vpop.f32.mrf.mxu0  ;;  %v2461_v50 = vsel %vm12368_vm2, 0, %v2460_v0  ;;  %v2469_v0 = vld [vmem:[#allocation2 + $0x150] sm:$0x1] }
 0x1ae   : > { %14795 = vst [vmem:[#allocation47_spill] sm:$0xff] %v12576_v29  ;;  %v12578_v48 = vpop.f32.mrf.mxu1  ;;  %2462 = vst [vmem:[#allocation2 + $0x108] sm:$0x1] %v2461_v50 }
 0x1af   : > { %14796 = vst [vmem:[#allocation48_spill] sm:$0xff] %v12578_v48  ;;  %v12582_v7 = vpop.f32.mrf.mxu0 }
 0x1b0   : > { %14797 = vst [vmem:[#allocation49_spill] sm:$0xff] %v12582_v7  ;;  %v12584_v14 = vpop.f32.mrf.mxu1 }
 0x1b1   : > { %14798 = vst [vmem:[#allocation50_spill] sm:$0xff] %v12584_v14  ;;  %v12586_v45 = vpop.f32.mrf.mxu0 }
 0x1b2   : > { %14799 = vst [vmem:[#allocation51_spill] sm:$0xff] %v12586_v45  ;;  %v12588_v25 = vpop.f32.mrf.mxu1  ;;  %v2575_v45 = vsel %vm12389_vm5, 0, %v2574_v17 }
 0x1b3   : > { %14800 = vst [vmem:[#allocation52_spill] sm:$0xff] %v12588_v25  ;;  %v12592_v29 = vpop.f32.mrf.mxu0  ;;  %2576 = vst [vmem:[#allocation2 + $0x134] sm:$0x8] %v2575_v45  ;;  %v2571_v25 = vld [vmem:[#allocation2 + $0x11c] sm:$0x8] }
 0x1b4   : > { %14801 = vst [vmem:[#allocation53_spill] sm:$0xff] %v12592_v29  ;;  %v12594_v48 = vpop.f32.mrf.mxu1  ;;  %v2572_v50 = vsel %vm12389_vm5, 0, %v2571_v25 }
 0x1b5   : > { %14802 = vst [vmem:[#allocation54_spill] sm:$0xff] %v12594_v48  ;;  %v12596_v22 = vpop.f32.mrf.mxu0  ;;  %2573 = vst [vmem:[#allocation2 + $0x11c] sm:$0x8] %v2572_v50 }
 0x1b6   : > { %14803 = vst [vmem:[#allocation55_spill] sm:$0xff] %v12596_v22  ;;  %v12598_v53 = vpop.f32.mrf.mxu1  ;;  %v2470_v22 = vsel %vm12368_vm2, 0, %v2469_v0 }
 0x1b7   : > { %14804 = vst [vmem:[#allocation56_spill] sm:$0xff] %v12598_v53  ;;  %v12600_v7 = vpop.f32.mrf.mxu0  ;;  %2471 = vst [vmem:[#allocation2 + $0x150] sm:$0x1] %v2470_v22 }
 0x1b8   : > { %14805 = vst [vmem:[#allocation57_spill] sm:$0xff] %v12600_v7  ;;  %v12604_v14 = vpop.f32.mrf.mxu1 }
 0x1b9   : > { %14806 = vst [vmem:[#allocation58_spill] sm:$0xff] %v12604_v14  ;;  %v12606_v40 = vpop.f32.mrf.mxu0  ;;  %v2466_v14 = vld [vmem:[#allocation2 + $0x138] sm:$0x1] }
 0x1ba   : > { %14807 = vst [vmem:[#allocation59_spill] sm:$0xff] %v12606_v40  ;;  %v12612_v53 = vpop.f32.mrf.mxu1  ;;  %v2467_v40 = vsel %vm12368_vm2, 0, %v2466_v14 }
 0x1bb   : > { %14808 = vst [vmem:[#allocation60_spill] sm:$0xff] %v12612_v53  ;;  %v12614_v7 = vpop.f32.mrf.mxu0  ;;  %2468 = vst [vmem:[#allocation2 + $0x138] sm:$0x1] %v2467_v40 }
 0x1bc   : > { %14809 = vst [vmem:[#allocation61_spill] sm:$0xff] %v12614_v7  ;;  %v12616_v17 = vpop.f32.mrf.mxu1  ;;  %v2580_v7 = vld [vmem:[#allocation2 + $0x164] sm:$0x8] }
 0x1bd   : > { %14810 = vst [vmem:[#allocation62_spill] sm:$0xff] %v12616_v17  ;;  %v12618_v45 = vpop.f32.mrf.mxu0  ;;  %v2581_v14 = vsel %vm12389_vm5, 0, %v2580_v7 }
 0x1be   : > { %14811 = vst [vmem:[#allocation63_spill] sm:$0xff] %v12618_v45  ;;  %v12622_v48 = vpop.f32.mrf.mxu1  ;;  %2582 = vst [vmem:[#allocation2 + $0x164] sm:$0x8] %v2581_v14  ;;  %v2472_v14 = vld [vmem:[#allocation2 + $0x168] sm:$0x1] }
 0x1bf   : > { %14812 = vst [vmem:[#allocation64_spill] sm:$0xff] %v12622_v48  ;;  %v12624_v25 = vpop.f32.mrf.mxu0 }
 0x1c0   : > { %14813 = vst [vmem:[#allocation65_spill] sm:$0xff] %v12624_v25  ;;  %v12626_v0 = vpop.f32.mrf.mxu1  ;;  %v2475_v25 = vld [vmem:[#allocation2 + $0x180] sm:$0x1] }
 0x1c1   : > { %14814 = vst [vmem:[#allocation66_spill] sm:$0xff] %v12626_v0  ;;  %v12628_v53 = vpop.f32.mrf.mxu0 }
 0x1c2   : > { %14815 = vst [vmem:[#allocation67_spill] sm:$0xff] %v12628_v53  ;;  %v12630_v22 = vpop.f32.mrf.mxu1 }
 0x1c3   : > { %14816 = vst [vmem:[#allocation68_spill] sm:$0xff] %v12630_v22  ;;  %v12632_v50 = vpop.f32.mrf.mxu0  ;;  %v2577_v22 = vld [vmem:[#allocation2 + $0x14c] sm:$0x8] }
 0x1c4   : > { %14817 = vst [vmem:[#allocation69_spill] sm:$0xff] %v12632_v50  ;;  %v12634_v17 = vpop.f32.mrf.mxu1 }
 0x1c5   : > { %14818 = vst [vmem:[#allocation70_spill] sm:$0xff] %v12634_v17  ;;  %v12636_v45 = vpop.f32.mrf.mxu0  ;;  %v2578_v17 = vsel %vm12389_vm5, 0, %v2577_v22 }
 0x1c6   : > { %14819 = vst [vmem:[#allocation71_spill] sm:$0xff] %v12636_v45  ;;  %v12640_v48 = vpop.f32.mrf.mxu1  ;;  %v2476_v45 = vsel %vm12368_vm2, 0, %v2475_v25  ;;  %2579 = vst [vmem:[#allocation2 + $0x14c] sm:$0x8] %v2578_v17  ;;  %v2586_v25 = vld [vmem:[#allocation2 + $0x194] sm:$0x8] }
 0x1c7   : > { %14820 = vst [vmem:[#allocation72_spill] sm:$0xff] %v12640_v48  ;;  %v12642_v40 = vpop.f32.mrf.mxu0  ;;  %2477 = vst [vmem:[#allocation2 + $0x180] sm:$0x1] %v2476_v45  ;;  %v2587_v17 = vsel %vm12389_vm5, 0, %v2586_v25  ;;  %v12690_v25 = vadd.f32 %v12372_v4, %v12365_v2  ;;  %v2487_v2 = vld [vmem:[#allocation2 + $0x1e0] sm:$0x1]  ;;  %v12716_v4 = vadd.f32 %v12406_v28, %v12404_v26  ;;  %v12748_v26 = vadd.f32 %v12446_v55, %v12444_v54 }
 0x1c8   : > { %14821 = vst [vmem:[#allocation73_spill] sm:$0xff] %v12642_v40  ;;  %v12644_v0 = vpop.f32.mrf.mxu1  ;;  %2588 = vst [vmem:[#allocation2 + $0x194] sm:$0x8] %v2587_v17  ;;  %v12694_v17 = vadd.f32 %v12378_v9, %v12376_v6  ;;  %v12720_v6 = vadd.f32 %v12412_v32, %v12408_v30  ;;  %v12724_v9 = vadd.f32 %v12418_v35, %v12415_v33  ;;  %v2484_v35 = vld [vmem:[#allocation2 + $0x1c8] sm:$0x1]  ;;  %v14828_v54 = vld [vmem:[#allocation18_spill] sm:$0xff] }
 0x1c9   : > { %14822 = vst [vmem:[#allocation74_spill] sm:$0xff] %v12644_v0  ;;  %v12646_v53 = vpop.f32.mrf.mxu0  ;;  %v12752_v28 = vadd.f32 %v12452_v5, %v12448_v62  ;;  %v12756_v30 = vadd.f32 %v12458_v10, %v12456_v8  ;;  %v12760_v32 = vadd.f32 %v12465_v24, %v12460_v19  ;;  %v14829_v55 = vld [vmem:[#allocation19_spill] sm:$0xff]  ;;  %v14830_v8 = vld [vmem:[#allocation20_spill] sm:$0xff]  ;;  %v14831_v10 = vld [vmem:[#allocation21_spill] sm:$0xff] }
 0x1ca   : > { %14823 = vst [vmem:[#allocation75_spill] sm:$0xff] %v12646_v53  ;;  %v12648_v50 = vpop.f32.mrf.mxu1  ;;  %v2473_v53 = vsel %vm12368_vm2, 0, %v2472_v14  ;;  %v12682_v14 = vadd.f32 %v12357_v60, %v12355_v59  ;;  %v12704_v59 = vadd.f32 %v12393_v18, %v12386_v13  ;;  %v12708_v60 = vadd.f32 %v12400_v23, %v12398_v21  ;;  %v14832_v24 = vld [vmem:[#allocation22_spill] sm:$0xff] }
 0x1cb   : > { %14824 = vst [vmem:[#allocation76_spill] sm:$0xff] %v12648_v50  ;;  %v12654_v7 = vpop.f32.mrf.mxu0  ;;  %2474 = vst [vmem:[#allocation2 + $0x168] sm:$0x1] %v2473_v53  ;;  %v12678_v53 = vadd.f32 %v12353_v57, %v12351_v56  ;;  %v2583_v56 = vld [vmem:[#allocation2 + $0x17c] sm:$0x8]  ;;  %v12700_v57 = vadd.f32 %v12384_v12, %v12382_v11  ;;  %v2488_v12 = vsel %vm12368_vm2, 0, %v2487_v2  ;;  %v12732_v13 = vadd.f32 %v12423_v39, %v12421_v37 }
 0x1cc   : > { %v12656_v40 = vpop.f32.mrf.mxu1  ;;  %v12736_v18 = vadd.f32 %v12429_v43, %v12427_v42  ;;  %v12740_v21 = vadd.f32 %v12433_v47, %v12431_v44  ;;  %v12744_v23 = vadd.f32 %v12440_v52, %v12437_v49  ;;  %2489 = vst [vmem:[#allocation2 + $0x1e0] sm:$0x1] %v2488_v12  ;;  %v12766_v37 = vadd.f32 %v12471_v31, %v12468_v27  ;;  %v14833_v27 = vld [vmem:[#allocation23_spill] sm:$0xff]  ;;  %v14843_v2 = vld [vmem:[#allocation32_spill] sm:$0xff]  ;;  %v14844_v12 = vld [vmem:[#allocation33_spill] sm:$0xff] }
 0x1cd   : > { %14825 = vst [vmem:[#allocation77_spill] sm:$0xff] %v12656_v40  ;;  %v12660_v0 = vpop.f32.mrf.mxu0  ;;  %v12770_v39 = vadd.f32 %v12475_v36, %v12473_v34  ;;  %v12774_v42 = vadd.f32 %v12479_v41, %v12477_v38  ;;  %v2485_v44 = vsel %vm12368_vm2, 0, %v2484_v35  ;;  %v12782_v47 = vadd.f32 %v12486_v51, %v12483_v46  ;;  %v14834_v34 = vld [vmem:[#allocation24_spill] sm:$0xff]  ;;  %v14835_v36 = vld [vmem:[#allocation25_spill] sm:$0xff]  ;;  %v14836_v41 = vld [vmem:[#allocation26_spill] sm:$0xff] }
 0x1ce   : > { %v12662_v50 = vpop.f32.mrf.mxu1  ;;  %v12786_v49 = vadd.f32 %v12491_v1, %v12489_v58  ;;  %v12790_v52 = vadd.f32 %v12497_v20, %v12495_v16  ;;  %v12794_v62 = vadd.f32 %v14829_v55, %v14828_v54  ;;  %2486 = vst [vmem:[#allocation2 + $0x1c8] sm:$0x1] %v2485_v44  ;;  %v12800_v19 = vadd.f32 %v14831_v10, %v14830_v8  ;;  %v14837_v46 = vld [vmem:[#allocation27_spill] sm:$0xff]  ;;  %v14838_v58 = vld [vmem:[#allocation28_spill] sm:$0xff]  ;;  %v14839_v1 = vld [vmem:[#allocation29_spill] sm:$0xff] }
 0x1cf   : > { %v12664_v48 = vpop.f32.mrf.mxu0  ;;  %v12804_v31 = vadd.f32 %v14833_v27, %v14832_v24  ;;  %v12808_v38 = vadd.f32 %v14835_v36, %v14834_v34  ;;  %v12812_v51 = vadd.f32 %v14837_v46, %v14836_v41  ;;  %v12816_v16 = vadd.f32 %v14839_v1, %v14838_v58  ;;  %v14840_v20 = vld [vmem:[#allocation30_spill] sm:$0xff]  ;;  %v14847_v54 = vld [vmem:[#allocation35_spill] sm:$0xff]  ;;  %v14850_v10 = vld [vmem:[#allocation36_spill] sm:$0xff] }
 0x1d0   : > { %v12666_v22 = vpop.f32.mrf.mxu1  ;;  %v12824_v35 = vadd.f32 %v14844_v12, %v14843_v2  ;;  %v14846_v44 = vld [vmem:[#allocation34_spill] sm:$0xff]  ;;  %v14851_v24 = vld [vmem:[#allocation37_spill] sm:$0xff]  ;;  %v14854_v36 = vld [vmem:[#allocation39_spill] sm:$0xff] }
 0x1d1   : > { %14826 = vst [vmem:[#allocation78_spill] sm:$0xff] %v12666_v22  ;;  %v12668_v29 = vpop.f32.mrf.mxu0  ;;  %v12686_v22 = vadd.f32 %v12362_v63, %v12359_v61  ;;  %v2584_v63 = vsel %vm12389_vm5, 0, %v2583_v56  ;;  %v14841_v56 = vld [vmem:[#allocation31_spill] sm:$0xff]  ;;  %v12828_v55 = vadd.f32 %v14847_v54, %v14846_v44  ;;  %v12834_v27 = vadd.f32 %v14851_v24, %v14850_v10  ;;  %v14853_v34 = vld [vmem:[#allocation38_spill] sm:$0xff]  ;;  %v14856_v46 = vld [vmem:[#allocation40_spill] sm:$0xff] }
 0x1d2   : > { %v12672_v45 = vpop.f32.mrf.mxu1  ;;  %2585 = vst [vmem:[#allocation2 + $0x17c] sm:$0x8] %v2584_v63  ;;  %v12820_v63 = vadd.f32 %v14841_v56, %v14840_v20  ;;  %14845 = vst [vmem:[#allocation19_spill] sm:$0xff] %v12824_v35  ;;  %v12838_v41 = vadd.f32 %v14854_v36, %v14853_v34  ;;  %v14857_v58 = vld [vmem:[#allocation41_spill] sm:$0xff]  ;;  %v14859_v20 = vld [vmem:[#allocation42_spill] sm:$0xff] }
 0x1d3   : > { %v12674_v40 = vpop.f32.mrf.mxu0  ;;  %14848 = vst [vmem:[#allocation20_spill] sm:$0xff] %v12828_v55  ;;  %14852 = vst [vmem:[#allocation22_spill] sm:$0xff] %v12834_v27  ;;  %v12842_v1 = vadd.f32 %v14857_v58, %v14856_v46  ;;  %v14860_v56 = vld [vmem:[#allocation44_spill] sm:$0xff]  ;;  %v14862_v54 = vld [vmem:[#allocation45_spill] sm:$0xff] }
 0x1d4   : > { %14827 = vst [vmem:[#allocation79_spill] sm:$0xff] %v12674_v40  ;;  %v12710_v61 = vpop.f32.mrf.mxu1  ;;  %14842 = vst [vmem:[#allocation18_spill] sm:$0xff] %v12820_v63  ;;  %v12846_v2 = vadd.f32 %v14860_v56, %v14859_v20  ;;  %v2598_v44 = vld [vmem:[#allocation2 + $0x1f4] sm:$0x8]  ;;  %v14865_v10 = vld [vmem:[#allocation47_spill] sm:$0xff] }
 0x1d5   : > { %v12696_v40 = vpop.f32.mrf.mxu0  ;;  %14855 = vst [vmem:[#allocation23_spill] sm:$0xff] %v12838_v41  ;;  %14858 = vst [vmem:[#allocation24_spill] sm:$0xff] %v12842_v1  ;;  %v14866_v24 = vld [vmem:[#allocation48_spill] sm:$0xff]  ;;  %v14868_v34 = vld [vmem:[#allocation49_spill] sm:$0xff]  ;;  %v2599_v20 = vsel %vm12389_vm5, 0, %v2598_v44 }
 0x1d6   : > { %v12776_v43 = vpop.f32.mrf.mxu1  ;;  %14861 = vst [vmem:[#allocation25_spill] sm:$0xff] %v12846_v2  ;;  %v12854_v27 = vadd.f32 %v14866_v24, %v14865_v10  ;;  %v14869_v36 = vld [vmem:[#allocation50_spill] sm:$0xff]  ;;  %v14871_v56 = vld [vmem:[#allocation51_spill] sm:$0xff]  ;;  %2600 = vst [vmem:[#allocation2 + $0x1f4] sm:$0x8] %v2599_v20 }
 0x1d7   : > { %v12726_v11 = vpop.f32.mrf.mxu0  ;;  %v12858_v41 = vadd.f32 %v14869_v36, %v14868_v34  ;;  %v12863_v58 = vld [vmem:[%s14727_s3] ss:$0 sm:$0xff]  ;;  %v14878_v34 = vld [vmem:[#allocation56_spill] sm:$0xff]  ;;  %v14880_v2 = vld [vmem:[#allocation57_spill] sm:$0xff] }
 0x1d8   : > { %v10843_v12 = vpop.f32.mrf.mxu1  ;;  %14867 = vst [vmem:[#allocation27_spill] sm:$0xff] %v12854_v27  ;;  %v14875_v10 = vld [vmem:[#allocation54_spill] sm:$0xff]  ;;  %v14877_v27 = vld [vmem:[#allocation55_spill] sm:$0xff] }
 0x1d9   : > { %v12762_v33 = vpop.f32.mrf.mxu0  ;;  %14870 = vst [vmem:[#allocation28_spill] sm:$0xff] %v12858_v41  ;;  %v12877_v36 = vadd.f32 %v14878_v34, %v14877_v27  ;;  %v14881_v1 = vld [vmem:[#allocation58_spill] sm:$0xff]  ;;  %v14883_v35 = vld [vmem:[#allocation59_spill] sm:$0xff]  ;;  %v14890_v27 = vld [vmem:[#allocation64_spill] sm:$0xff] }
 0x1da   : > { %v12882_v44 = vadd.f32 %v14881_v1, %v14880_v2  ;;  %v14895_v63 = vld [vmem:[#allocation67_spill] sm:$0xff]  ;;  %v14896_v1 = vld [vmem:[#allocation68_spill] sm:$0xff] }
 0x1db   : > { %v12796_v5 = vpop.f32.mrf.mxu0  ;;  %14879 = vst [vmem:[#allocation31_spill] sm:$0xff] %v12877_v36  ;;  %v14893_v36 = vld [vmem:[#allocation66_spill] sm:$0xff]  ;;  %v12902_v2 = vadd.f32 %v14896_v1, %v14895_v63  ;;  %v14905_v63 = vld [vmem:[#allocation76_spill] sm:$0xff] }
 0x1dc   : > { %14882 = vst [vmem:[#allocation32_spill] sm:$0xff] %v12882_v44  ;;  %v1550_v44 = vpop.f32.mrf.mxu1 }
 0x1dd   : > { %v12830_v8 = vpop.f32.mrf.mxu0  ;;  %14897 = vst [vmem:[#allocation37_spill] sm:$0xff] %v12902_v2 }
 0x1de   : > { %14849 = vst [vmem:[#allocation21_spill] sm:$0xff] %v12830_v8  ;;  %v14863_v8 = vld [vmem:[#allocation46_spill] sm:$0xff] }
 0x1df   : > { %v12850_v55 = vadd.f32 %v14863_v8, %v14862_v54  ;;  %v10863_v46 = vpop.f32.mrf.mxu0  ;;  %v14872_v8 = vld [vmem:[#allocation52_spill] sm:$0xff] }
 0x1e0   : > { %v12869_v54 = vadd.f32 %v14872_v8, %v14871_v56  ;;  %v2178_v41 = vadd.f32 %v10863_v46, %v12678_v53  ;;  %v14884_v56 = vld [vmem:[#allocation60_spill] sm:$0xff]  ;;  %v14892_v46 = vld [vmem:[#allocation65_spill] sm:$0xff] }
 0x1e1   : > { %14864 = vst [vmem:[#allocation26_spill] sm:$0xff] %v12850_v55  ;;  %v14874_v55 = vld [vmem:[#allocation53_spill] sm:$0xff]  ;;  %v12886_v8 = vadd.f32 %v14884_v56, %v14883_v35  ;;  %v1921_v53 = vpop.f32.mrf.mxu0  ;;  %v12898_v20 = vadd.f32 %v14893_v36, %v14892_v46  ;;  %v14903_v36 = vld [vmem:[#allocation74_spill] sm:$0xff] }
 0x1e2   : > { %14873 = vst [vmem:[#allocation29_spill] sm:$0xff] %v12869_v54  ;;  %v12873_v24 = vadd.f32 %v14875_v10, %v14874_v55  ;;  %v14886_v54 = vld [vmem:[#allocation61_spill] sm:$0xff]  ;;  %v14887_v55 = vld [vmem:[#allocation62_spill] sm:$0xff]  ;;  %v2249_v35 = vadd.f32 %v12863_v58, %v2178_v41  ;;  %v2176_v56 = vadd.f32 %v1921_v53, %v12682_v14 }
 0x1e3   : > { %14885 = vst [vmem:[#allocation33_spill] sm:$0xff] %v12886_v8  ;;  %v12890_v10 = vadd.f32 %v14887_v55, %v14886_v54  ;;  %14894 = vst [vmem:[#allocation36_spill] sm:$0xff] %v12898_v20  ;;  %v14898_v54 = vld [vmem:[#allocation69_spill] sm:$0xff]  ;;  %v14899_v55 = vld [vmem:[#allocation70_spill] sm:$0xff]  ;;  %v10864_v2 = vpop.f32.mrf.mxu0 }
 0x1e4   : > { %14876 = vst [vmem:[#allocation30_spill] sm:$0xff] %v12873_v24  ;;  %v14889_v24 = vld [vmem:[#allocation63_spill] sm:$0xff]  ;;  %v14902_v8 = vld [vmem:[#allocation73_spill] sm:$0xff]  ;;  %v2313_v53 = vmax.f32 %v2249_v35, 0.0 }
 0x1e5   : > { %14888 = vst [vmem:[#allocation34_spill] sm:$0xff] %v12890_v10  ;;  %v12894_v34 = vadd.f32 %v14890_v27, %v14889_v24  ;;  %v12908_v10 = vadd.f32 %v14899_v55, %v14898_v54  ;;  %v14900_v24 = vld [vmem:[#allocation71_spill] sm:$0xff]  ;;  %v14901_v27 = vld [vmem:[#allocation72_spill] sm:$0xff]  ;;  %v12916_v46 = vadd.f32 %v14903_v36, %v14902_v8  ;;  %v14907_v14 = vld [vmem:[#allocation77_spill] sm:$0xff]  ;;  %v2247_v54 = vadd.f32 %v12863_v58, %v2176_v56  ;;  %v10844_v56 = vpop.f32.mrf.mxu1 }
 0x1e6   : > { %v14904_v20 = vld [vmem:[#allocation75_spill] sm:$0xff]  ;;  %v12924_v41 = vadd.f32 %v14907_v14, %v12654_v7  ;;  %v2179_v55 = vadd.f32 %v10864_v2, %v12686_v22  ;;  %v12930_v8 = vadd.f32 %v12662_v50, %v12660_v0  ;;  %v12938_v36 = vadd.f32 %v12672_v45, %v12668_v29  ;;  %v1924_v7 = vpop.f32.mrf.mxu0 }
 0x1e7   : > { %14891 = vst [vmem:[#allocation35_spill] sm:$0xff] %v12894_v34  ;;  %v12912_v34 = vadd.f32 %v14901_v27, %v14900_v24  ;;  %v12920_v1 = vadd.f32 %v14905_v63, %v14904_v20  ;;  %v2595_v24 = vld [vmem:[#allocation2 + $0x1dc] sm:$0x8]  ;;  %v14910_v20 = vld [vmem:[#allocation78_spill] sm:$0xff]  ;;  %v9967_v22 = vpack.c.bf16 %v2313_v53, %v2313_v53  ;;  %v2311_v2 = vmax.f32 %v2247_v54, 0.0  ;;  %v14913_v50 = vld [vmem:[#allocation79_spill] sm:$0xff] }
 0x1e8   : > { %14908 = vst [vmem:[#allocation39_spill] sm:$0xff] %v12924_v41  ;;  %14909 = vst [vmem:[#allocation40_spill] sm:$0xff] %v12930_v8  ;;  %v12934_v27 = vadd.f32 %v14910_v20, %v12664_v48  ;;  %v2596_v35 = vsel %vm12389_vm5, 0, %v2595_v24  ;;  %v2250_v63 = vadd.f32 %v12863_v58, %v2179_v55  ;;  %v2177_v0 = vadd.f32 %v1924_v7, %v12690_v25  ;;  %v10867_v53 = vpop.f32.mrf.mxu0  ;;  %v2493_v54 = vld [vmem:[#allocation2 + $0x210] sm:$0x1] }
 0x1e9   : > { %14906 = vst [vmem:[#allocation38_spill] sm:$0xff] %v12920_v1  ;;  %14912 = vst [vmem:[#allocation42_spill] sm:$0xff] %v12938_v36  ;;  %v12946_v48 = vadd.f32 %v12710_v61, %v14913_v50  ;;  %v12950_v29 = vadd.f32 %v12776_v43, %v12696_v40  ;;  %v12953_v45 = vadd.f32 %v10843_v12, %v12726_v11  ;;  %v2825_v55 = vshrl.u32 %v9967_v22, 16 }
 0x1ea   : > { %14911 = vst [vmem:[#allocation41_spill] sm:$0xff] %v12934_v27  ;;  %2597 = vst [vmem:[#allocation2 + $0x1dc] sm:$0x8] %v2596_v35  ;;  %v12956_v14 = vadd.f32 %v1550_v44, %v12762_v33  ;;  %v2828_v24 = vshll.u32 %v9967_v22, 16  ;;  %v9965_v25 = vpack.c.bf16 %v2311_v2, %v2311_v2  ;;  %v2314_v20 = vmax.f32 %v2250_v63, 0.0  ;;  %v1937_v43 = vpop.f32.mrf.mxu0 }
 0x1eb   : > { %14914 = vst [vmem:[#allocation44_spill] sm:$0xff] %v12946_v48  ;;  %14915 = vst [vmem:[#allocation45_spill] sm:$0xff] %v12950_v29  ;;  %v12959_v61 = vadd.f32 %v10844_v56, %v12796_v5  ;;  %v2248_v7 = vadd.f32 %v12863_v58, %v2177_v0  ;;  %v2182_v40 = vadd.f32 %v10867_v53, %v12694_v17  ;;  %v2494_v11 = vsel %vm12368_vm2, 0, %v2493_v54  ;;  %v3392_v5 = vld [vmem:[#allocation2 + $0x30] sm:$0xf] }
 0x1ec   : > { %14916 = vst [vmem:[#allocation46_spill] sm:$0xff] %v12953_v45  ;;  %14917 = vst [vmem:[#allocation47_spill] sm:$0xff] %v12956_v14  ;;  %v2827_v33 = vrot.slane %v2825_v55, 7  ;;  %v3656_v12 = vrot.slane %v2825_v55, 4  ;;  %v3657_v44 = vrot.slane %v2828_v24, 5  ;;  %v2809_v35 = vshrl.u32 %v9965_v25, 16  ;;  %v10868_v0 = vpop.f32.mrf.mxu0 }
 0x1ed   : > { %3582 = vst [vmem:[#allocation2 + $0x34] sm:$0xf] %v9967_v22  ;;  %14918 = vst [vmem:[#allocation48_spill] sm:$0xff] %v12959_v61  ;;  %v2812_v56 = vshll.u32 %v9965_v25, 16  ;;  %v9968_v2 = vpack.c.bf16 %v2314_v20, %v2314_v20  ;;  %v2312_v17 = vmax.f32 %v2248_v7, 0.0  ;;  %v2253_v63 = vadd.f32 %v12863_v58, %v2182_v40 }
 0x1ee   : > { %3580 = vst [vmem:[#allocation2 + $0x1c] sm:$0xf] %v9965_v25  ;;  %2495 = vst [vmem:[#allocation2 + $0x210] sm:$0x1] %v2494_v11  ;;  %v2830_v50 = vor.u32 %v2828_v24, %v2827_v33  ;;  %v2831_v53 = vrot.slane %v2827_v33, 4  ;;  %v3658_v54 = vor.u32 %v3657_v44, %v3656_v12  ;;  %v12972_v55 = vrot.slane %v2809_v35, 7  ;;  %v1940_v48 = vpop.f32.mrf.mxu0 }
 0x1ef   : > { %v3388_v61 = vld [vmem:[#allocation2 + $0x18] sm:$0xf]  ;;  %v3647_v11 = vrot.slane %v2809_v35, 4  ;;  %v3648_v14 = vrot.slane %v2812_v56, 5  ;;  %v2833_v45 = vshrl.u32 %v9968_v2, 16  ;;  %v2836_v29 = vshll.u32 %v9968_v2, 16 }
 0x1f0   : > { %3583 = vst [vmem:[#allocation2 + $0x40] sm:$0xf] %v9968_v2  ;;  %v3393_v25 = vsel %vm12967_vm11, %v2830_v50, %v3392_v5  ;;  %v3659_v20 = vrot.slane %v3658_v54, 4  ;;  %v2814_v7 = vor.u32 %v2812_v56, %v12972_v55  ;;  %v2815_v40 = vrot.slane %v12972_v55, 4  ;;  %v12984_v2 = vpop.f32.mrf.mxu0 }
 0x1f1   : > { %3394 = vst [vmem:[#allocation2 + $0x30] sm:$0xf] %v3393_v25  ;;  %v3649_v33 = vor.u32 %v3648_v14, %v3647_v11  ;;  %v2835_v12 = vrot.slane %v2833_v45, 7  ;;  %v3660_v44 = vrot.slane %v2836_v29, 5  ;;  %v3662_v35 = vrot.slane %v2833_v45, 4 }
 0x1f2   : > { %v3389_v5 = vsel %vm12967_vm11, %v2814_v7, %v3388_v61  ;;  %v9966_v50 = vpack.c.bf16 %v2312_v17, %v2312_v17  ;;  %v2317_v54 = vmax.f32 %v2253_v63, 0.0  ;;  %v2180_v55 = vadd.f32 %v1937_v43, %v12700_v57  ;;  %v12997_v36 = vpop.f32.mrf.mxu0  ;;  %v4005_v17 = vld [vmem:[#allocation2 + $0x44] sm:$0xf] }
 0x1f3   : > { %3390 = vst [vmem:[#allocation2 + $0x18] sm:$0xf] %v3389_v5  ;;  %v3650_v14 = vrot.slane %v3649_v33, 4  ;;  %v2838_v11 = vor.u32 %v2836_v29, %v2835_v12  ;;  %v3661_v45 = vsel %vm12980_vm12, %v3659_v20, %v3660_v44  ;;  %v3663_v25 = vor.u32 %v3662_v35, %v3660_v44 }
 0x1f4   : > { %4004 = vst [vmem:[#allocation2 + $0x38] sm:$0xf] %v3661_v45  ;;  %v2817_v63 = vshrl.u32 %v9966_v50, 16  ;;  %v2820_v7 = vshll.u32 %v9966_v50, 16  ;;  %3581 = vst [vmem:[#allocation2 + $0x28] sm:$0xf] %v9966_v50  ;;  %v9971_v57 = vpack.c.bf16 %v2317_v54, %v2317_v54  ;;  %v2251_v29 = vadd.f32 %v12863_v58, %v2180_v55  ;;  %v13010_v44 = vpop.f32.mrf.mxu0 }
 0x1f5   : > { %v2839_v43 = vsel %vm12990_vm13, %v2831_v53, %v2838_v11  ;;  %v3664_v20 = vrot.slane %v3663_v25, 4  ;;  %v2183_v33 = vadd.f32 %v10868_v0, %v12704_v59  ;;  %v2181_v12 = vadd.f32 %v1940_v48, %v12708_v60  ;;  %v4001_v0 = vld [vmem:[#allocation2 + $0x2c] sm:$0xf] }
 0x1f6   : > { %3395 = vst [vmem:[#allocation2 + $0x3c] sm:$0xf] %v2839_v43  ;;  %v2819_v35 = vrot.slane %v2817_v63, 7  ;;  %v3651_v5 = vrot.slane %v2820_v7, 5  ;;  %v3653_v45 = vrot.slane %v2817_v63, 4  ;;  %v2857_v27 = vshrl.u32 %v9971_v57, 16  ;;  %v13015_v11 = vpop.f32.mrf.mxu0 }
 0x1f7   : > { %3586 = vst [vmem:[#allocation2 + $0x64] sm:$0xf] %v9971_v57  ;;  %v4006_v50 = vsel %vm13001_vm14, %v3664_v20, %v4005_v17  ;;  %v2860_v54 = vshll.u32 %v9971_v57, 16  ;;  %v2315_v55 = vmax.f32 %v2251_v29, 0.0  ;;  %v2254_v53 = vadd.f32 %v12863_v58, %v2183_v33  ;;  %v3400_v63 = vld [vmem:[#allocation2 + $0x60] sm:$0xf] }
 0x1f8   : > { %4007 = vst [vmem:[#allocation2 + $0x44] sm:$0xf] %v4006_v50  ;;  %v2822_v59 = vor.u32 %v2820_v7, %v2819_v35  ;;  %v3652_v60 = vsel %vm12980_vm12, %v3650_v14, %v3651_v5  ;;  %v3654_v48 = vor.u32 %v3653_v45, %v3651_v5  ;;  %v13019_v25 = vrot.slane %v2857_v27, 7  ;;  %v13021_v29 = vpop.f32.mrf.mxu0 }
 0x1f9   : > { %3999 = vst [vmem:[#allocation2 + $0x20] sm:$0xf] %v3652_v60  ;;  %v3674_v43 = vrot.slane %v2857_v27, 4  ;;  %v3675_v8 = vrot.slane %v2860_v54, 5  ;;  %v9969_v17 = vpack.c.bf16 %v2315_v55, %v2315_v55  ;;  %v2318_v57 = vmax.f32 %v2254_v53, 0.0 }
 0x1fa   : > { %v2823_v20 = vsel %vm12990_vm13, %v2815_v40, %v2822_v59  ;;  %v3655_v33 = vrot.slane %v3654_v48, 4  ;;  %v2862_v7 = vor.u32 %v2860_v54, %v13019_v25  ;;  %v2863_v14 = vrot.slane %v13019_v25, 4  ;;  %v13027_v27 = vpop.f32.mrf.mxu0 }
 0x1fb   : > { %3391 = vst [vmem:[#allocation2 + $0x24] sm:$0xf] %v2823_v20  ;;  %v3676_v35 = vor.u32 %v3675_v8, %v3674_v43  ;;  %v2841_v5 = vshrl.u32 %v9969_v17, 16  ;;  %v2844_v45 = vshll.u32 %v9969_v17, 16  ;;  %3584 = vst [vmem:[#allocation2 + $0x4c] sm:$0xf] %v9969_v17  ;;  %v9972_v50 = vpack.c.bf16 %v2318_v57, %v2318_v57 }
 0x1fc   : > { %v4002_v55 = vsel %vm13001_vm14, %v3655_v33, %v4001_v0  ;;  %v3401_v53 = vsel %vm12967_vm11, %v2862_v7, %v3400_v63  ;;  %v2252_v40 = vadd.f32 %v12863_v58, %v2181_v12  ;;  %v2186_v54 = vadd.f32 %v12984_v2, %v12716_v4  ;;  %v13038_v25 = vpop.f32.mrf.mxu0  ;;  %v3396_v43 = vld [vmem:[#allocation2 + $0x48] sm:$0xf] }
 0x1fd   : > { %4003 = vst [vmem:[#allocation2 + $0x2c] sm:$0xf] %v4002_v55  ;;  %3402 = vst [vmem:[#allocation2 + $0x60] sm:$0xf] %v3401_v53  ;;  %v3677_v8 = vrot.slane %v3676_v35, 4  ;;  %v13036_v59 = vrot.slane %v2841_v5, 7  ;;  %v2184_v20 = vadd.f32 %v12997_v36, %v12720_v6 }
 0x1fe   : > { %v3665_v60 = vrot.slane %v2841_v5, 4  ;;  %v3666_v48 = vrot.slane %v2844_v45, 5  ;;  %3587 = vst [vmem:[#allocation2 + $0x70] sm:$0xf] %v9972_v50  ;;  %v2865_v0 = vshrl.u32 %v9972_v50, 16  ;;  %v2868_v17 = vshll.u32 %v9972_v50, 16  ;;  %v13045_v33 = vpop.f32.mrf.mxu0 }
 0x1ff   : > { %v2316_v57 = vmax.f32 %v2252_v40, 0.0  ;;  %v2257_v63 = vadd.f32 %v12863_v58, %v2186_v54  ;;  %v2846_v12 = vor.u32 %v2844_v45, %v13036_v59  ;;  %v2847_v4 = vrot.slane %v13036_v59, 4  ;;  %v4013_v40 = vld [vmem:[#allocation2 + $0x74] sm:$0xf] }
 0x200   : > { %v3667_v2 = vor.u32 %v3666_v48, %v3665_v60  ;;  %v2867_v7 = vrot.slane %v2865_v0, 7  ;;  %v3678_v35 = vrot.slane %v2868_v17, 5  ;;  %v3680_v5 = vrot.slane %v2865_v0, 4  ;;  %v13052_v48 = vpop.f32.mrf.mxu0 }
 0x201   : > { %v9970_v55 = vpack.c.bf16 %v2316_v57, %v2316_v57  ;;  %v3397_v50 = vsel %vm12967_vm11, %v2846_v12, %v3396_v43  ;;  %v2321_v54 = vmax.f32 %v2257_v63, 0.0  ;;  %v2255_v45 = vadd.f32 %v12863_v58, %v2184_v20  ;;  %v11391_v57 = vld [vmem:[#allocation2 + $0x1c] ss:$12 sps:$4 sm:$0xff]   ;;  %v11413_v20 = vld [vmem:[#allocation9 + $0xb0] sm:$0xff]  }
 0x202   : > { %v3668_v53 = vrot.slane %v3667_v2, 4  ;;  %3398 = vst [vmem:[#allocation2 + $0x48] sm:$0xf] %v3397_v50  ;;  %v2870_v59 = vor.u32 %v2868_v17, %v2867_v7  ;;  %v3679_v60 = vsel %vm12980_vm12, %v3677_v8, %v3678_v35  ;;  %v3681_v6 = vor.u32 %v3680_v5, %v3678_v35  ;;  %v11389_v0 = vld [vmem:[#allocation2 + $0x18] ss:$12 sps:$4 sm:$0xff]   ;;  %5169 = vmatprep.mubr.bf16.mxu1 %v11391_v57 }
 0x203   : > { %v2849_v36 = vshrl.u32 %v9970_v55, 16  ;;  %3585 = vst [vmem:[#allocation2 + $0x58] sm:$0xf] %v9970_v55  ;;  %4012 = vst [vmem:[#allocation2 + $0x68] sm:$0xf] %v3679_v60  ;;  %v2852_v41 = vshll.u32 %v9970_v55, 16  ;;  %v9975_v43 = vpack.c.bf16 %v2321_v54, %v2321_v54  ;;  %v2187_v63 = vadd.f32 %v13010_v44, %v12724_v9  ;;  %5170 = vmatmul.mubr.bf16.vlgmr.msra.gmra.mxu1 %v11389_v0 }
 0x204   : > { %v2319_v12 = vmax.f32 %v2255_v45, 0.0  ;;  %v11393_v2 = vld [vmem:[#allocation2 + $0x34] ss:$12 sps:$4 sm:$0xff]   ;;  %v2871_v17 = vsel %vm12990_vm13, %v2863_v14, %v2870_v59  ;;  %v3682_v8 = vrot.slane %v3681_v6, 4  ;;  %v2185_v14 = vadd.f32 %v13015_v11, %v12732_v13  ;;  %v13063_v59 = vpop.f32.mrf.mxu0  ;;  %v11396_v60 = vld [vmem:[#allocation2 + $0x38] ss:$12 sps:$4 sm:$0xff]  }
 0x205   : > { %v2851_v7 = vrot.slane %v2849_v36, 7  ;;  %v3671_v35 = vrot.slane %v2849_v36, 4  ;;  %3403 = vst [vmem:[#allocation2 + $0x6c] sm:$0xf] %v2871_v17  ;;  %v3669_v5 = vrot.slane %v2852_v41, 5  ;;  %v2889_v50 = vshrl.u32 %v9975_v43, 16  ;;  %5177 = vmatprep.mubr.bf16.mxu1 %v11393_v2 }
 0x206   : > { %v2892_v1 = vshll.u32 %v9975_v43, 16  ;;  %3590 = vst [vmem:[#allocation2 + $0x94] sm:$0xf] %v9975_v43  ;;  %v9973_v55 = vpack.c.bf16 %v2319_v12, %v2319_v12  ;;  %v11395_v54 = vld [vmem:[#allocation2 + $0x20] ss:$12 sps:$4 sm:$0xff]   ;;  %v4014_v9 = vsel %vm13001_vm14, %v3682_v8, %v4013_v40  ;;  %v2258_v45 = vadd.f32 %v12863_v58, %v2187_v63 }
 0x207   : > { %v2854_v44 = vor.u32 %v2852_v41, %v2851_v7  ;;  %4015 = vst [vmem:[#allocation2 + $0x74] sm:$0xf] %v4014_v9  ;;  %v3670_v6 = vsel %vm12980_vm12, %v3668_v53, %v3669_v5  ;;  %v3672_v36 = vor.u32 %v3671_v35, %v3669_v5  ;;  %v4009_v0 = vld [vmem:[#allocation2 + $0x5c] sm:$0xf]  ;;  %v13067_v57 = vrot.slane %v2889_v50, 7  ;;  %10941 = vmatprep.mubr.bf16.mxu0 %v11395_v54  ;;  %v14927_v41 = vld [vmem:[#allocation43_spill] sm:$0xff] }
 0x208   : > { %v3408_v43 = vld [vmem:[#allocation2 + $0x90] sm:$0xf]  ;;  %v3692_v40 = vrot.slane %v2889_v50, 4  ;;  %3588 = vst [vmem:[#allocation2 + $0x7c] sm:$0xf] %v9973_v55  ;;  %11006 = vmatpush3.bf16.msra.mxu1 %v14927_v41  ;;  %v3693_v11 = vrot.slane %v2892_v1, 5  ;;  %10942 = vmatmul.mubr.bf16.vlgmr.msra.gmra.mxu0 %v11396_v60 }
 0x209   : > { %v2855_v13 = vsel %vm12990_vm13, %v2847_v4, %v2854_v44  ;;  %4008 = vst [vmem:[#allocation2 + $0x50] sm:$0xf] %v3670_v6  ;;  %v2873_v12 = vshrl.u32 %v9973_v55, 16  ;;  %v2876_v63 = vshll.u32 %v9973_v55, 16  ;;  %11007 = vmatprep.subr.bf16.mxu1 %v11413_v20  ;;  %v3673_v53 = vrot.slane %v3672_v36, 4  ;;  %v13076_v4 = vpop.f32.mrf.mxu0 }
 0x20a   : > { %3399 = vst [vmem:[#allocation2 + $0x54] sm:$0xf] %v2855_v13  ;;  %v2894_v2 = vor.u32 %v2892_v1, %v13067_v57  ;;  %v2895_v17 = vrot.slane %v13067_v57, 4  ;;  %v3404_v8 = vld [vmem:[#allocation2 + $0x78] sm:$0xf]  ;;  %v2322_v7 = vmax.f32 %v2258_v45, 0.0  ;;  %v3694_v35 = vor.u32 %v3693_v11, %v3692_v40 }
 0x20b   : > { %v13074_v5 = vrot.slane %v2873_v12, 7  ;;  %v3683_v50 = vrot.slane %v2873_v12, 4  ;;  %v3684_v54 = vrot.slane %v2876_v63, 5  ;;  %v4010_v55 = vsel %vm13001_vm14, %v3673_v53, %v4009_v0  ;;  %v11397_v60 = vld [vmem:[#allocation2 + $0x30] ss:$12 sps:$4 sm:$0xff]   ;;  %v13093_v12 = vpop.f32.mrf.mxu0 }
 0x20c   : > { %v3409_v9 = vsel %vm12967_vm11, %v2894_v2, %v3408_v43  ;;  %v9976_v44 = vpack.c.bf16 %v2322_v7, %v2322_v7  ;;  %v2256_v1 = vadd.f32 %v12863_v58, %v2185_v14  ;;  %11008 = vmatpush3.bf16.msra.mxu1 %v11413_v20  ;;  %4011 = vst [vmem:[#allocation2 + $0x5c] sm:$0xf] %v4010_v55  ;;  %v3695_v45 = vrot.slane %v3694_v35, 4 }
 0x20d   : > { %3410 = vst [vmem:[#allocation2 + $0x90] sm:$0xf] %v3409_v9  ;;  %v2878_v6 = vor.u32 %v2876_v63, %v13074_v5  ;;  %v2879_v36 = vrot.slane %v13074_v5, 4  ;;  %v3685_v57 = vor.u32 %v3684_v54, %v3683_v50  ;;  %v2190_v43 = vadd.f32 %v13021_v29, %v12736_v18  ;;  %5178 = vmatmul.mubr.bf16.gmra.mxu1 %v11397_v60  ;;  %v4021_v50 = vld [vmem:[#allocation2 + $0xa4] sm:$0xf]  ;;  %v13102_v60 = vpop.f32.mrf.mxu0 }
 0x20e   : > { %v2897_v40 = vshrl.u32 %v9976_v44, 16  ;;  %v2900_v41 = vshll.u32 %v9976_v44, 16  ;;  %3591 = vst [vmem:[#allocation2 + $0xa0] sm:$0xf] %v9976_v44  ;;  %v2320_v0 = vmax.f32 %v2256_v1, 0.0  ;;  %v2188_v13 = vadd.f32 %v13027_v27, %v12740_v21 }
 0x20f   : > { %v3405_v14 = vsel %vm12967_vm11, %v2878_v6, %v3404_v8  ;;  %v3686_v20 = vrot.slane %v3685_v57, 4  ;;  %v2191_v11 = vadd.f32 %v13038_v25, %v12744_v23  ;;  %v2261_v18 = vadd.f32 %v12863_v58, %v2190_v43  ;;  %v11398_v21 = vld [vmem:[#allocation2 + $0x4c] ss:$12 sps:$4 sm:$0xff]  }
 0x210   : > { %3406 = vst [vmem:[#allocation2 + $0x78] sm:$0xf] %v3405_v14  ;;  %v2899_v63 = vrot.slane %v2897_v40, 7  ;;  %v3696_v53 = vrot.slane %v2900_v41, 5  ;;  %v3698_v2 = vrot.slane %v2897_v40, 4  ;;  %v9974_v7 = vpack.c.bf16 %v2320_v0, %v2320_v0  ;;  %5185 = vmatprep.mubr.bf16.mxu1 %v11398_v21 }
 0x211   : > { %v2259_v29 = vadd.f32 %v12863_v58, %v2188_v13  ;;  %v2262_v8 = vadd.f32 %v12863_v58, %v2191_v11  ;;  %v2189_v35 = vadd.f32 %v13045_v33, %v12748_v26  ;;  %v2325_v9 = vmax.f32 %v2261_v18, 0.0  ;;  %v11402_v6 = vld [vmem:[#allocation2 + $0x48] ss:$12 sps:$4 sm:$0xff]   ;;  %v11403_v13 = vld [vmem:[#allocation2 + $0x64] ss:$12 sps:$4 sm:$0xff]  }
 0x212   : > { %v2902_v27 = vor.u32 %v2900_v41, %v2899_v63  ;;  %v3697_v23 = vsel %vm12980_vm12, %v3695_v45, %v3696_v53  ;;  %v3699_v25 = vor.u32 %v3698_v2, %v3696_v53  ;;  %v2881_v54 = vshrl.u32 %v9974_v7, 16  ;;  %3589 = vst [vmem:[#allocation2 + $0x88] sm:$0xf] %v9974_v7 }
 0x213   : > { %4020 = vst [vmem:[#allocation2 + $0x98] sm:$0xf] %v3697_v23  ;;  %v2884_v55 = vshll.u32 %v9974_v7, 16  ;;  %v2323_v44 = vmax.f32 %v2259_v29, 0.0  ;;  %v2326_v1 = vmax.f32 %v2262_v8, 0.0  ;;  %v9979_v41 = vpack.c.bf16 %v2325_v9, %v2325_v9 }
 0x214   : > { %v2903_v26 = vsel %vm12990_vm13, %v2895_v17, %v2902_v27  ;;  %v3700_v33 = vrot.slane %v3699_v25, 4  ;;  %v2883_v57 = vrot.slane %v2881_v54, 7  ;;  %v3689_v40 = vrot.slane %v2881_v54, 4  ;;  %v11400_v14 = vld [vmem:[#allocation2 + $0x50] ss:$12 sps:$4 sm:$0xff]   ;;  %v13113_v27 = vpop.f32.mrf.mxu0 }
 0x215   : > { %3411 = vst [vmem:[#allocation2 + $0x9c] sm:$0xf] %v2903_v26  ;;  %v3687_v45 = vrot.slane %v2884_v55, 5  ;;  %v9977_v0 = vpack.c.bf16 %v2323_v44, %v2323_v44  ;;  %v9980_v43 = vpack.c.bf16 %v2326_v1, %v2326_v1  ;;  %v2260_v53 = vadd.f32 %v12863_v58, %v2189_v35  ;;  %v11401_v17 = vld [vmem:[#allocation2 + $0x68] ss:$12 sps:$4 sm:$0xff]   ;;  %5186 = vmatmul.mubr.bf16.gmra.mxu1 %v11402_v6 }
 0x216   : > { %v4022_v11 = vsel %vm13001_vm14, %v3700_v33, %v4021_v50  ;;  %v2886_v63 = vor.u32 %v2884_v55, %v2883_v57  ;;  %v2194_v2 = vadd.f32 %v13052_v48, %v12752_v28  ;;  %v4017_v29 = vld [vmem:[#allocation2 + $0x8c] sm:$0xf]  ;;  %v2921_v8 = vshrl.u32 %v9979_v41, 16  ;;  %3594 = vst [vmem:[#allocation2 + $0xc4] sm:$0xf] %v9979_v41  ;;  %10945 = vmatprep.mubr.bf16.mxu0 %v11400_v14 }
 0x217   : > { %4023 = vst [vmem:[#allocation2 + $0xa4] sm:$0xf] %v4022_v11  ;;  %v3688_v7 = vsel %vm12980_vm12, %v3686_v20, %v3687_v45  ;;  %v3690_v18 = vor.u32 %v3689_v40, %v3687_v45  ;;  %v2924_v21 = vshll.u32 %v9979_v41, 16  ;;  %3592 = vst [vmem:[#allocation2 + $0xac] sm:$0xf] %v9977_v0  ;;  %5193 = vmatprep.mubr.bf16.mxu1 %v11403_v13  ;;  %v2905_v35 = vshrl.u32 %v9977_v0, 16  ;;  %v13123_v40 = vpop.f32.mrf.mxu0 }
 0x218   : > { %3595 = vst [vmem:[#allocation2 + $0xd0] sm:$0xf] %v9980_v43  ;;  %v2887_v28 = vsel %vm12990_vm13, %v2879_v36, %v2886_v63  ;;  %4016 = vst [vmem:[#allocation2 + $0x80] sm:$0xf] %v3688_v7  ;;  %v3416_v48 = vld [vmem:[#allocation2 + $0xc0] sm:$0xf]  ;;  %10946 = vmatmul.mubr.bf16.gmra.mxu0 %v11401_v17 }
 0x219   : > { %v2908_v20 = vshll.u32 %v9977_v0, 16  ;;  %v2929_v23 = vshrl.u32 %v9980_v43, 16  ;;  %3407 = vst [vmem:[#allocation2 + $0x84] sm:$0xf] %v2887_v28  ;;  %v3691_v25 = vrot.slane %v3690_v18, 4  ;;  %v2923_v50 = vrot.slane %v2921_v8, 7 }
 0x21a   : > { %v3710_v54 = vrot.slane %v2921_v8, 4  ;;  %v3711_v55 = vrot.slane %v2924_v21, 5  ;;  %v3412_v9 = vld [vmem:[#allocation2 + $0xa8] sm:$0xf]  ;;  %v13119_v44 = vrot.slane %v2905_v35, 7  ;;  %v3701_v1 = vrot.slane %v2905_v35, 4 }
 0x21b   : > { %v3702_v6 = vrot.slane %v2908_v20, 5  ;;  %v2931_v5 = vrot.slane %v2929_v23, 7  ;;  %v4018_v36 = vsel %vm13001_vm14, %v3691_v25, %v4017_v29  ;;  %v2926_v26 = vor.u32 %v2924_v21, %v2923_v50  ;;  %v11439_v45 = vld [vmem:[#allocation9 + $0x38] sm:$0xff]   ;;  %v11407_v11 = vld [vmem:[#allocation2 + $0x60] ss:$12 sps:$4 sm:$0xff]  }
 0x21c   : > { %v2927_v33 = vrot.slane %v2923_v50, 4  ;;  %v3712_v57 = vor.u32 %v3711_v55, %v3710_v54  ;;  %4019 = vst [vmem:[#allocation2 + $0x8c] sm:$0xf] %v4018_v36  ;;  %v2910_v41 = vor.u32 %v2908_v20, %v13119_v44  ;;  %v2911_v0 = vrot.slane %v13119_v44, 4  ;;  %6372 = vmatpush1.bf16.msra.mxu0 %v11439_v45  ;;  %v13131_v35 = vld [vmem:[#allocation2] sm:$0xff] }
 0x21d   : > { %v3703_v14 = vor.u32 %v3702_v6, %v3701_v1  ;;  %v2932_v13 = vshll.u32 %v9980_v43, 16  ;;  %v3417_v63 = vsel %vm12967_vm11, %v2926_v26, %v3416_v48  ;;  %v3716_v7 = vrot.slane %v2929_v23, 4  ;;  %5194 = vmatmul.mubr.bf16.gmra.mxu1 %v11407_v11  ;;  %6373 = vmatprep.subr.bf16.mxu0 %v13131_v35  ;;  %v13139_v23 = vpop.f32.mrf.mxu0  ;;  %v4029_v55 = vld [vmem:[#allocation2 + $0xd4] sm:$0xf]  ;;  %v11434_v1 = vld [vmem:[#allocation9 + $0xa8] sm:$0xff]  }
 0x21e   : > { %v3713_v17 = vrot.slane %v3712_v57, 4  ;;  %v2324_v18 = vmax.f32 %v2260_v53, 0.0  ;;  %3418 = vst [vmem:[#allocation2 + $0xc0] sm:$0xf] %v3417_v63  ;;  %v3413_v29 = vsel %vm12967_vm11, %v2910_v41, %v3412_v9  ;;  %v2265_v48 = vadd.f32 %v12863_v58, %v2194_v2  ;;  %v11408_v2 = vld [vmem:[#allocation2 + $0x7c] ss:$12 sps:$4 sm:$0xff]   ;;  %11009 = vmatprep.subr.bf16.mxu1 %v11434_v1 }
 0x21f   : > { %v3704_v8 = vrot.slane %v3703_v14, 4  ;;  %v2934_v21 = vor.u32 %v2932_v13, %v2931_v5  ;;  %v3714_v28 = vrot.slane %v2932_v13, 5  ;;  %3414 = vst [vmem:[#allocation2 + $0xa8] sm:$0xf] %v3413_v29  ;;  %v2192_v53 = vadd.f32 %v13063_v59, %v12756_v30  ;;  %v11440_v6 = vld [vmem:[#allocation9 + $0x30] sm:$0xff]   ;;  %5201 = vmatprep.mubr.bf16.mxu1 %v11408_v2  ;;  %v13154_v14 = vpop.f32.mrf.mxu0  ;;  %11010 = vmatpush3.bf16.msra.mxu1 %v11434_v1  ;;  %v11446_v2 = vld [vmem:[#allocation9 + $0x28] sm:$0xff]  }
 0x220   : > { %v9978_v43 = vpack.c.bf16 %v2324_v18, %v2324_v18  ;;  %v2195_v20 = vadd.f32 %v13076_v4, %v12760_v32  ;;  %v2193_v9 = vadd.f32 %v13093_v12, %v12766_v37  ;;  %v2329_v32 = vmax.f32 %v2265_v48, 0.0  ;;  %v11412_v37 = vld [vmem:[#allocation2 + $0x78] ss:$12 sps:$4 sm:$0xff]   ;;  %v11414_v13 = vld [vmem:[#allocation2 + $0x94] ss:$12 sps:$4 sm:$0xff]   ;;  %6374 = vmatpush1.bf16.msra.mxu0 %v11440_v6 }
 0x221   : > { %v2935_v25 = vsel %vm12990_vm13, %v2927_v33, %v2934_v21  ;;  %v3715_v50 = vsel %vm12980_vm12, %v3713_v17, %v3714_v28  ;;  %v3717_v54 = vor.u32 %v3716_v7, %v3714_v28  ;;  %v2263_v4 = vadd.f32 %v12863_v58, %v2192_v53  ;;  %6375 = vmatprep.subr.bf16.mxu0 %v13131_v35  ;;  %v11406_v21 = vld [vmem:[#allocation2 + $0x98] ss:$12 sps:$4 sm:$0xff]   ;;  %v4025_v28 = vld [vmem:[#allocation2 + $0xbc] sm:$0xf] }
 0x222   : > { %3419 = vst [vmem:[#allocation2 + $0xcc] sm:$0xf] %v2935_v25  ;;  %4028 = vst [vmem:[#allocation2 + $0xc8] sm:$0xf] %v3715_v50  ;;  %v2913_v30 = vshrl.u32 %v9978_v43, 16  ;;  %v2916_v59 = vshll.u32 %v9978_v43, 16  ;;  %v2266_v36 = vadd.f32 %v12863_v58, %v2195_v20  ;;  %v2264_v26 = vadd.f32 %v12863_v58, %v2193_v9  ;;  %v13167_v9 = vpop.f32.mrf.mxu0 }
 0x223   : > { %3593 = vst [vmem:[#allocation2 + $0xb8] sm:$0xf] %v9978_v43  ;;  %v3718_v5 = vrot.slane %v3717_v54, 4  ;;  %v13152_v33 = vadd.f32 %v13102_v60, %v12770_v39  ;;  %v9983_v41 = vpack.c.bf16 %v2329_v32, %v2329_v32  ;;  %v2327_v63 = vmax.f32 %v2263_v4, 0.0  ;;  %v11405_v7 = vld [vmem:[#allocation2 + $0x80] ss:$12 sps:$4 sm:$0xff]  }
 0x224   : > { %v2915_v12 = vrot.slane %v2913_v30, 7  ;;  %v3705_v57 = vrot.slane %v2916_v59, 5  ;;  %v3707_v45 = vrot.slane %v2913_v30, 4  ;;  %v2330_v58 = vmax.f32 %v2266_v36, 0.0  ;;  %10949 = vmatprep.mubr.bf16.mxu0 %v11405_v7  ;;  %v3424_v54 = vld [vmem:[#allocation2 + $0xf0] sm:$0xf]  ;;  %6376 = vmatpush1.bf16.msra.mxu0 %v11446_v2 }
 0x225   : > { %v4030_v11 = vsel %vm13001_vm14, %v3718_v5, %v4029_v55  ;;  %v2328_v17 = vmax.f32 %v2264_v26, 0.0  ;;  %v2953_v29 = vshrl.u32 %v9983_v41, 16  ;;  %3598 = vst [vmem:[#allocation2 + $0xf4] sm:$0xf] %v9983_v41  ;;  %v2956_v43 = vshll.u32 %v9983_v41, 16  ;;  %5202 = vmatmul.mubr.bf16.gmra.mxu1 %v11412_v37  ;;  %10950 = vmatmul.mubr.bf16.gmra.mxu0 %v11406_v21 }
 0x226   : > { %4031 = vst [vmem:[#allocation2 + $0xd4] sm:$0xf] %v4030_v11  ;;  %v2918_v39 = vor.u32 %v2916_v59, %v2915_v12  ;;  %v3706_v60 = vsel %vm12980_vm12, %v3704_v8, %v3705_v57  ;;  %v3708_v18 = vor.u32 %v3707_v45, %v3705_v57  ;;  %v9981_v48 = vpack.c.bf16 %v2327_v63, %v2327_v63  ;;  %v3420_v57 = vld [vmem:[#allocation2 + $0xd8] sm:$0xf]  ;;  %v13175_v11 = vpop.f32.mrf.mxu0 }
 0x227   : > { %4024 = vst [vmem:[#allocation2 + $0xb0] sm:$0xf] %v3706_v60  ;;  %v9984_v53 = vpack.c.bf16 %v2330_v58, %v2330_v58  ;;  %v13161_v20 = vpack.c.bf16 %v2328_v17, %v2328_v17  ;;  %v2955_v8 = vrot.slane %v2953_v29, 7  ;;  %v3728_v55 = vrot.slane %v2953_v29, 4  ;;  %5209 = vmatprep.mubr.bf16.mxu1 %v11414_v13  ;;  %6377 = vmatprep.subr.bf16.mxu0 %v13131_v35 }
 0x228   : > { %v2919_v25 = vsel %vm12990_vm13, %v2911_v0, %v2918_v39  ;;  %v3709_v50 = vrot.slane %v3708_v18, 4  ;;  %v3729_v30 = vrot.slane %v2956_v43, 5  ;;  %v2937_v59 = vshrl.u32 %v9981_v48, 16  ;;  %3596 = vst [vmem:[#allocation2 + $0xdc] sm:$0xf] %v9981_v48 }
 0x229   : > { %3415 = vst [vmem:[#allocation2 + $0xb4] sm:$0xf] %v2919_v25  ;;  %v2940_v32 = vshll.u32 %v9981_v48, 16  ;;  %v2961_v4 = vshrl.u32 %v9984_v53, 16  ;;  %3599 = vst [vmem:[#allocation2 + $0x100] sm:$0xf] %v9984_v53  ;;  %v2958_v0 = vor.u32 %v2956_v43, %v2955_v8 }
 0x22a   : > { %3597 = vst [vmem:[#allocation2 + $0xe8] sm:$0xf] %v13161_v20  ;;  %v4026_v44 = vsel %vm13001_vm14, %v3709_v50, %v4025_v28  ;;  %v2959_v1 = vrot.slane %v2955_v8, 4  ;;  %v2964_v6 = vshll.u32 %v9984_v53, 16  ;;  %v3730_v5 = vor.u32 %v3729_v30, %v3728_v55  ;;  %v11418_v39 = vld [vmem:[#allocation2 + $0x90] ss:$12 sps:$4 sm:$0xff]   ;;  %v13192_v30 = vpop.f32.mrf.mxu0 }
 0x22b   : > { %4027 = vst [vmem:[#allocation2 + $0xbc] sm:$0xf] %v4026_v44  ;;  %v2939_v36 = vrot.slane %v2937_v59, 7  ;;  %v3719_v26 = vrot.slane %v2937_v59, 4  ;;  %v3720_v37 = vrot.slane %v2940_v32, 5  ;;  %v3425_v12 = vsel %vm12967_vm11, %v2958_v0, %v3424_v54  ;;  %v11447_v8 = vld [vmem:[#allocation9 + $0x20] sm:$0xff]  }
 0x22c   : > { %v2963_v45 = vrot.slane %v2961_v4, 7  ;;  %v3732_v41 = vrot.slane %v2964_v6, 5  ;;  %v3734_v13 = vrot.slane %v2961_v4, 4  ;;  %3426 = vst [vmem:[#allocation2 + $0xf0] sm:$0xf] %v3425_v12  ;;  %v3731_v63 = vrot.slane %v3730_v5, 4  ;;  %6378 = vmatpush1.bf16.msra.mxu0 %v11447_v8 }
 0x22d   : > { %v2942_v58 = vor.u32 %v2940_v32, %v2939_v36  ;;  %v2943_v17 = vrot.slane %v2939_v36, 4  ;;  %v3721_v7 = vor.u32 %v3720_v37, %v3719_v26  ;;  %v2945_v29 = vshrl.u32 %v13161_v20, 16  ;;  %v4037_v53 = vld [vmem:[#allocation2 + $0x104] sm:$0xf]  ;;  %v13186_v25 = vld [vmem:[%s14727_s3] ss:$0 sm:$0xff]  ;;  %5210 = vmatmul.mubr.bf16.gmra.mxu1 %v11418_v39  ;;  %6379 = vmatprep.subr.bf16.mxu0 %v13131_v35 }
 0x22e   : > { %v2966_v60 = vor.u32 %v2964_v6, %v2963_v45  ;;  %v3735_v18 = vor.u32 %v3734_v13, %v3732_v41  ;;  %v2948_v21 = vshll.u32 %v13161_v20, 16  ;;  %v3733_v48 = vsel %vm12980_vm12, %v3731_v63, %v3732_v41  ;;  %v11419_v59 = vld [vmem:[#allocation2 + $0xac] ss:$12 sps:$4 sm:$0xff]   ;;  %v13214_v45 = vpop.f32.mrf.mxu0 }
 0x22f   : > { %v3421_v28 = vsel %vm12967_vm11, %v2942_v58, %v3420_v57  ;;  %v3722_v43 = vrot.slane %v3721_v7, 4  ;;  %v2269_v50 = vadd.f32 %v13186_v25, %v13152_v33  ;;  %4036 = vst [vmem:[#allocation2 + $0xf8] sm:$0xf] %v3733_v48  ;;  %v2947_v55 = vrot.slane %v2945_v29, 7  ;;  %5217 = vmatprep.mubr.bf16.mxu1 %v11419_v59  ;;  %v4033_v12 = vld [vmem:[#allocation2 + $0xec] sm:$0xf] }
 0x230   : > { %3422 = vst [vmem:[#allocation2 + $0xd8] sm:$0xf] %v3421_v28  ;;  %v2967_v20 = vsel %vm12990_vm13, %v2959_v1, %v2966_v60  ;;  %v3736_v54 = vrot.slane %v3735_v18, 4  ;;  %v3723_v2 = vrot.slane %v2948_v21, 5  ;;  %v3725_v32 = vrot.slane %v2945_v29, 4 }
 0x231   : > { %3427 = vst [vmem:[#allocation2 + $0xfc] sm:$0xf] %v2967_v20  ;;  %v2333_v4 = vmax.f32 %v2269_v50, 0.0  ;;  %v2196_v44 = vadd.f32 %v13113_v27, %v12774_v42  ;;  %v2199_v33 = vadd.f32 %v13123_v40, %v12782_v47  ;;  %v2950_v1 = vor.u32 %v2948_v21, %v2947_v55  ;;  %v11411_v40 = vld [vmem:[#allocation2 + $0xc8] ss:$12 sps:$4 sm:$0xff]   ;;  %v13225_v50 = vpop.f32.mrf.mxu0 }
 0x232   : > { %v4038_v0 = vsel %vm13001_vm14, %v3736_v54, %v4037_v53  ;;  %v3724_v6 = vsel %vm12980_vm12, %v3722_v43, %v3723_v2  ;;  %v2197_v5 = vadd.f32 %v13139_v23, %v12786_v49  ;;  %v11410_v36 = vld [vmem:[#allocation2 + $0xb0] ss:$12 sps:$4 sm:$0xff]   ;;  %v3726_v26 = vor.u32 %v3725_v32, %v3723_v2  ;;  %v3432_v21 = vld [vmem:[#allocation2 + $0x120] sm:$0xf] }
 0x233   : > { %4039 = vst [vmem:[#allocation2 + $0x104] sm:$0xf] %v4038_v0  ;;  %4032 = vst [vmem:[#allocation2 + $0xe0] sm:$0xf] %v3724_v6  ;;  %v9987_v42 = vpack.c.bf16 %v2333_v4, %v2333_v4  ;;  %v2267_v27 = vadd.f32 %v13186_v25, %v2196_v44  ;;  %v2270_v47 = vadd.f32 %v13186_v25, %v2199_v33  ;;  %10953 = vmatprep.mubr.bf16.mxu0 %v11410_v36  ;;  %v11453_v2 = vld [vmem:[#allocation9 + $0x18] sm:$0xff]  }
 0x234   : > { %v2951_v37 = vsel %vm12990_vm13, %v2943_v17, %v2950_v1  ;;  %v2268_v57 = vadd.f32 %v13186_v25, %v2197_v5  ;;  %v2202_v49 = vadd.f32 %v13154_v14, %v12790_v52  ;;  %v2200_v23 = vadd.f32 %v13167_v9, %v12794_v62  ;;  %10954 = vmatmul.mubr.bf16.gmra.mxu0 %v11411_v40  ;;  %v11423_v17 = vld [vmem:[#allocation2 + $0xa8] ss:$12 sps:$4 sm:$0xff]   ;;  %v11424_v62 = vld [vmem:[#allocation2 + $0xc4] ss:$12 sps:$4 sm:$0xff]   ;;  %v11428_v40 = vld [vmem:[#allocation2 + $0xc0] ss:$12 sps:$4 sm:$0xff]  }
 0x235   : > { %3423 = vst [vmem:[#allocation2 + $0xe4] sm:$0xf] %v2951_v37  ;;  %v3727_v41 = vrot.slane %v3726_v26, 4  ;;  %v2985_v13 = vshrl.u32 %v9987_v42, 16  ;;  %v2988_v63 = vshll.u32 %v9987_v42, 16  ;;  %v2331_v58 = vmax.f32 %v2267_v27, 0.0  ;;  %5218 = vmatmul.mubr.bf16.gmra.mxu1 %v11423_v17  ;;  %6380 = vmatpush1.bf16.msra.mxu0 %v11453_v2 }
 0x236   : > { %3602 = vst [vmem:[#allocation2 + $0x124] sm:$0xf] %v9987_v42  ;;  %v2334_v7 = vmax.f32 %v2270_v47, 0.0  ;;  %v2332_v39 = vmax.f32 %v2268_v57, 0.0  ;;  %v13217_v60 = vadd.f32 %v13186_v25, %v2202_v49  ;;  %v13220_v52 = vadd.f32 %v13186_v25, %v2200_v23  ;;  %5225 = vmatprep.mubr.bf16.mxu1 %v11424_v62  ;;  %v3428_v1 = vld [vmem:[#allocation2 + $0x108] sm:$0xf]  ;;  %v13230_v47 = vpop.f32.mrf.mxu0  ;;  %6381 = vmatprep.subr.bf16.mxu0 %v13131_v35 }
 0x237   : > { %v4034_v14 = vsel %vm13001_vm14, %v3727_v41, %v4033_v12  ;;  %v2987_v9 = vrot.slane %v2985_v13, 7  ;;  %v3746_v18 = vrot.slane %v2985_v13, 4  ;;  %v3747_v29 = vrot.slane %v2988_v63, 5  ;;  %v11454_v17 = vld [vmem:[#allocation9 + $0x10] sm:$0xff]  }
 0x238   : > { %4035 = vst [vmem:[#allocation2 + $0xec] sm:$0xf] %v4034_v14  ;;  %v9985_v28 = vpack.c.bf16 %v2331_v58, %v2331_v58  ;;  %v9988_v43 = vpack.c.bf16 %v2334_v7, %v2334_v7  ;;  %v9986_v48 = vpack.c.bf16 %v2332_v39, %v2332_v39  ;;  %v2337_v53 = vmax.f32 %v13217_v60, 0.0  ;;  %v11429_v58 = vld [vmem:[#allocation2 + $0xdc] ss:$12 sps:$4 sm:$0xff]  }
 0x239   : > { %v2990_v8 = vor.u32 %v2988_v63, %v2987_v9  ;;  %v2991_v20 = vrot.slane %v2987_v9, 4  ;;  %v3748_v54 = vor.u32 %v3747_v29, %v3746_v18  ;;  %v2335_v55 = vmax.f32 %v13220_v52, 0.0  ;;  %v4045_v29 = vld [vmem:[#allocation2 + $0x134] sm:$0xf]  ;;  %6382 = vmatpush1.bf16.msra.mxu0 %v11454_v17 }
 0x23a   : > { %v2969_v59 = vshrl.u32 %v9985_v28, 16  ;;  %v2972_v32 = vshll.u32 %v9985_v28, 16  ;;  %3600 = vst [vmem:[#allocation2 + $0x10c] sm:$0xf] %v9985_v28  ;;  %v2993_v4 = vshrl.u32 %v9988_v43, 16  ;;  %v2996_v44 = vshll.u32 %v9988_v43, 16  ;;  %v13239_v28 = vpop.f32.mrf.mxu0  ;;  %6383 = vmatprep.subr.bf16.mxu0 %v13131_v35 }
 0x23b   : > { %3603 = vst [vmem:[#allocation2 + $0x130] sm:$0xf] %v9988_v43  ;;  %3601 = vst [vmem:[#allocation2 + $0x118] sm:$0xf] %v9986_v48  ;;  %v3433_v33 = vsel %vm12967_vm11, %v2990_v8, %v3432_v21  ;;  %v3749_v0 = vrot.slane %v3748_v54, 4  ;;  %v2977_v6 = vshrl.u32 %v9986_v48, 16  ;;  %v9991_v21 = vpack.c.bf16 %v2337_v53, %v2337_v53 }
 0x23c   : > { %v2980_v5 = vshll.u32 %v9986_v48, 16  ;;  %3434 = vst [vmem:[#allocation2 + $0x120] sm:$0xf] %v3433_v33  ;;  %v2971_v36 = vrot.slane %v2969_v59, 7  ;;  %v3737_v26 = vrot.slane %v2969_v59, 4  ;;  %v3738_v42 = vrot.slane %v2972_v32, 5 }
 0x23d   : > { %v2995_v27 = vrot.slane %v2993_v4, 7  ;;  %v3750_v37 = vrot.slane %v2996_v44, 5  ;;  %v3752_v12 = vrot.slane %v2993_v4, 4  ;;  %v2979_v57 = vrot.slane %v2977_v6, 7  ;;  %5226 = vmatmul.mubr.bf16.gmra.mxu1 %v11428_v40  ;;  %v11417_v43 = vld [vmem:[#allocation2 + $0xf8] ss:$12 sps:$4 sm:$0xff]  }
 0x23e   : > { %v3741_v49 = vrot.slane %v2980_v5, 5  ;;  %v2974_v23 = vor.u32 %v2972_v32, %v2971_v36  ;;  %v2975_v41 = vrot.slane %v2971_v36, 4  ;;  %v3739_v13 = vor.u32 %v3738_v42, %v3737_v26  ;;  %5233 = vmatprep.mubr.bf16.mxu1 %v11429_v58  ;;  %3606 = vst [vmem:[#allocation2 + $0x154] sm:$0xf] %v9991_v21  ;;  %v3436_v26 = vld [vmem:[#allocation2 + $0x138] sm:$0xf] }
 0x23f   : > { %v2998_v63 = vor.u32 %v2996_v44, %v2995_v27  ;;  %v3751_v7 = vsel %vm12980_vm12, %v3749_v0, %v3750_v37  ;;  %v3753_v39 = vor.u32 %v3752_v12, %v3750_v37  ;;  %v2982_v60 = vor.u32 %v2980_v5, %v2979_v57  ;;  %v11416_v62 = vld [vmem:[#allocation2 + $0xe0] ss:$12 sps:$4 sm:$0xff]   ;;  %v10895_v27 = vpop.f32.mrf.mxu0  ;;  %v11433_v12 = vld [vmem:[#allocation2 + $0xd8] ss:$12 sps:$4 sm:$0xff]  }
 0x240   : > { %v3743_v52 = vrot.slane %v2977_v6, 4  ;;  %v3429_v14 = vsel %vm12967_vm11, %v2974_v23, %v3428_v1  ;;  %v3740_v9 = vrot.slane %v3739_v13, 4  ;;  %4044 = vst [vmem:[#allocation2 + $0x128] sm:$0xf] %v3751_v7  ;;  %v9989_v2 = vpack.c.bf16 %v2335_v55, %v2335_v55  ;;  %10957 = vmatprep.mubr.bf16.mxu0 %v11416_v62  ;;  %v3440_v55 = vld [vmem:[#allocation2 + $0x150] sm:$0xf] }
 0x241   : > { %v2999_v18 = vsel %vm12990_vm13, %v2991_v20, %v2998_v63  ;;  %3430 = vst [vmem:[#allocation2 + $0x108] sm:$0xf] %v3429_v14  ;;  %v3754_v48 = vrot.slane %v3753_v39, 4  ;;  %v2983_v8 = vsel %vm12990_vm13, %v2975_v41, %v2982_v60  ;;  %v4041_v20 = vld [vmem:[#allocation2 + $0x11c] sm:$0xf]  ;;  %v3017_v59 = vshrl.u32 %v9991_v21, 16  ;;  %10958 = vmatmul.mubr.bf16.gmra.mxu0 %v11417_v43 }
 0x242   : > { %3435 = vst [vmem:[#allocation2 + $0x12c] sm:$0xf] %v2999_v18  ;;  %v3744_v54 = vor.u32 %v3743_v52, %v3741_v49  ;;  %3431 = vst [vmem:[#allocation2 + $0x114] sm:$0xf] %v2983_v8  ;;  %v3742_v53 = vsel %vm12980_vm12, %v3740_v9, %v3741_v49  ;;  %v3020_v32 = vshll.u32 %v9991_v21, 16  ;;  %v2203_v4 = vadd.f32 %v13175_v11, %v12800_v19  ;;  %v11461_v63 = vld [vmem:[#allocation9 + $0x8] sm:$0xff]   ;;  %v13267_v9 = vpop.f32.mrf.mxu0 }
 0x243   : > { %v4046_v44 = vsel %vm13001_vm14, %v3754_v48, %v4045_v29  ;;  %4040 = vst [vmem:[#allocation2 + $0x110] sm:$0xf] %v3742_v53  ;;  %v3001_v0 = vshrl.u32 %v9989_v2, 16  ;;  %v3004_v1 = vshll.u32 %v9989_v2, 16  ;;  %3604 = vst [vmem:[#allocation2 + $0x13c] sm:$0xf] %v9989_v2  ;;  %v2201_v39 = vadd.f32 %v13192_v30, %v12804_v31  ;;  %6384 = vmatpush1.bf16.msra.mxu0 %v11461_v63 }
 0x244   : > { %v3745_v33 = vrot.slane %v3744_v54, 4  ;;  %4047 = vst [vmem:[#allocation2 + $0x134] sm:$0xf] %v4046_v44  ;;  %v13250_v6 = vrot.slane %v3017_v59, 7  ;;  %v3764_v5 = vrot.slane %v3017_v59, 4  ;;  %v3765_v36 = vrot.slane %v3020_v32, 5  ;;  %6385 = vmatprep.subr.bf16.mxu0 %v13131_v35 }
 0x245   : > { %v2274_v42 = vadd.f32 %v13186_v25, %v2203_v4  ;;  %v13255_v11 = vrot.slane %v3001_v0, 7  ;;  %v3755_v40 = vrot.slane %v3001_v0, 4  ;;  %v3756_v37 = vrot.slane %v3004_v1, 5  ;;  %v11435_v13 = vld [vmem:[#allocation2 + $0xf4] ss:$12 sps:$4 sm:$0xff]   ;;  %5234 = vmatmul.mubr.bf16.gmra.mxu1 %v11433_v12  ;;  %v14929_v53 = vld [vmem:[#allocation19_spill] sm:$0xff]  ;;  %v13286_v4 = vpop.f32.mrf.mxu0 }
 0x246   : > { %v4042_v19 = vsel %vm13001_vm14, %v3745_v33, %v4041_v20  ;;  %v3022_v57 = vor.u32 %v3020_v32, %v13250_v6  ;;  %v3023_v49 = vrot.slane %v13250_v6, 4  ;;  %v3766_v23 = vor.u32 %v3765_v36, %v3764_v5  ;;  %5241 = vmatprep.mubr.bf16.mxu1 %v11435_v13  ;;  %v14928_v54 = vld [vmem:[#allocation18_spill] sm:$0xff]  ;;  %v11441_v44 = vld [vmem:[#allocation2 + $0xf0] ss:$12 sps:$4 sm:$0xff]  }
 0x247   : > { %4043 = vst [vmem:[#allocation2 + $0x11c] sm:$0xf] %v4042_v19  ;;  %v2338_v41 = vmax.f32 %v2274_v42, 0.0  ;;  %v3006_v58 = vor.u32 %v3004_v1, %v13255_v11  ;;  %v3007_v17 = vrot.slane %v13255_v11, 4  ;;  %v3757_v7 = vor.u32 %v3756_v37, %v3755_v40  ;;  %v4053_v33 = vld [vmem:[#allocation2 + $0x164] sm:$0xf]  ;;  %v13299_v63 = vpop.f32.mrf.mxu0 }
 0x248   : > { %v3441_v60 = vsel %vm12967_vm11, %v3022_v57, %v3440_v55  ;;  %v3767_v52 = vrot.slane %v3766_v23, 4  ;;  %v2206_v14 = vadd.f32 %v13214_v45, %v12808_v38  ;;  %v2272_v31 = vadd.f32 %v13186_v25, %v2201_v39  ;;  %v11442_v42 = vld [vmem:[#allocation2 + $0x10c] ss:$12 sps:$4 sm:$0xff]  }
 0x249   : > { %v9992_v62 = vpack.c.bf16 %v2338_v41, %v2338_v41  ;;  %3442 = vst [vmem:[#allocation2 + $0x150] sm:$0xf] %v3441_v60  ;;  %v3437_v18 = vsel %vm12967_vm11, %v3006_v58, %v3436_v26  ;;  %v13271_v29 = vrot.slane %v3757_v7, 4  ;;  %v2204_v30 = vadd.f32 %v13225_v50, %v12812_v51  ;;  %v3448_v60 = vld [vmem:[#allocation2 + $0x180] sm:$0xf] }
 0x24a   : > { %3438 = vst [vmem:[#allocation2 + $0x138] sm:$0xf] %v3437_v18  ;;  %v2277_v45 = vadd.f32 %v13186_v25, %v2206_v14  ;;  %v2207_v43 = vadd.f32 %v13230_v47, %v12816_v16  ;;  %v2336_v48 = vmax.f32 %v2272_v31, 0.0  ;;  %v2205_v2 = vadd.f32 %v13239_v28, %v14928_v54 }
 0x24b   : > { %v3025_v21 = vshrl.u32 %v9992_v62, 16  ;;  %v3028_v38 = vshll.u32 %v9992_v62, 16  ;;  %3607 = vst [vmem:[#allocation2 + $0x160] sm:$0xf] %v9992_v62  ;;  %v2275_v8 = vadd.f32 %v13186_v25, %v2204_v30  ;;  %v13284_v20 = vadd.f32 %v10895_v27, %v14929_v53  ;;  %v11422_v26 = vld [vmem:[#allocation2 + $0x128] ss:$12 sps:$4 sm:$0xff]  }
 0x24c   : > { %v2341_v32 = vmax.f32 %v2277_v45, 0.0  ;;  %v9990_v55 = vpack.c.bf16 %v2336_v48, %v2336_v48  ;;  %v13289_v16 = vadd.f32 %v13186_v25, %v2207_v43  ;;  %v13292_v47 = vadd.f32 %v13186_v25, %v2205_v2  ;;  %v11462_v27 = vld [vmem:[#allocation9] sm:$0xff]   ;;  %v11469_v30 = vld [vmem:[#allocation9 + $0x78] sm:$0xff]   ;;  %v3444_v48 = vld [vmem:[#allocation2 + $0x168] sm:$0xf] }
 0x24d   : > { %v3027_v51 = vrot.slane %v3025_v21, 7  ;;  %v3768_v50 = vrot.slane %v3028_v38, 5  ;;  %v3770_v59 = vrot.slane %v3025_v21, 4  ;;  %v2339_v0 = vmax.f32 %v2275_v8, 0.0  ;;  %5242 = vmatmul.mubr.bf16.gmra.mxu1 %v11441_v44  ;;  %6386 = vmatpush1.bf16.msra.mxu0 %v11462_v27 }
 0x24e   : > { %v11421_v28 = vld [vmem:[#allocation2 + $0x110] ss:$12 sps:$4 sm:$0xff]   ;;  %v9995_v36 = vpack.c.bf16 %v2341_v32, %v2341_v32  ;;  %v3009_v19 = vshrl.u32 %v9990_v55, 16  ;;  %v3012_v40 = vshll.u32 %v9990_v55, 16  ;;  %3605 = vst [vmem:[#allocation2 + $0x148] sm:$0xf] %v9990_v55  ;;  %5249 = vmatprep.mubr.bf16.mxu1 %v11442_v42  ;;  %6387 = vmatprep.subr.bf16.mxu0 %v13131_v35 }
 0x24f   : > { %v3030_v1 = vor.u32 %v3028_v38, %v3027_v51  ;;  %v3769_v6 = vsel %vm12980_vm12, %v3767_v52, %v3768_v50  ;;  %v3771_v5 = vor.u32 %v3770_v59, %v3768_v50  ;;  %v9993_v37 = vpack.c.bf16 %v2339_v0, %v2339_v0  ;;  %10961 = vmatprep.mubr.bf16.mxu0 %v11421_v28  ;;  %v13313_v51 = vpop.f32.mrf.mxu0  ;;  %v11448_v50 = vld [vmem:[#allocation2 + $0x108] ss:$12 sps:$4 sm:$0xff]   ;;  %v11449_v28 = vld [vmem:[#allocation2 + $0x124] ss:$12 sps:$4 sm:$0xff]  }
 0x250   : > { %4052 = vst [vmem:[#allocation2 + $0x158] sm:$0xf] %v3769_v6  ;;  %v2342_v12 = vmax.f32 %v13289_v16, 0.0  ;;  %v3049_v41 = vshrl.u32 %v9995_v36, 16  ;;  %v3052_v13 = vshll.u32 %v9995_v36, 16  ;;  %10962 = vmatmul.mubr.bf16.gmra.mxu0 %v11422_v26  ;;  %v3011_v58 = vrot.slane %v3009_v19, 7 }
 0x251   : > { %v3031_v57 = vsel %vm12990_vm13, %v3023_v49, %v3030_v1  ;;  %v3772_v23 = vrot.slane %v3771_v5, 4  ;;  %3610 = vst [vmem:[#allocation2 + $0x184] sm:$0xf] %v9995_v36  ;;  %v3759_v7 = vrot.slane %v3012_v40, 5  ;;  %v3761_v39 = vrot.slane %v3009_v19, 4  ;;  %6388 = vmatpush2.bf16.msra.mxu0 %v11469_v30  ;;  %v11470_v5 = vld [vmem:[#allocation9 + $0x70] sm:$0xff]  }
 0x252   : > { %3443 = vst [vmem:[#allocation2 + $0x15c] sm:$0xf] %v3031_v57  ;;  %v3033_v52 = vshrl.u32 %v9993_v37, 16  ;;  %3608 = vst [vmem:[#allocation2 + $0x16c] sm:$0xf] %v9993_v37  ;;  %v13303_v14 = vrot.slane %v3049_v41, 7  ;;  %v3014_v21 = vor.u32 %v3012_v40, %v3011_v58  ;;  %6389 = vmatprep.subr.bf16.mxu0 %v13131_v35  ;;  %v2281_v6 = vadd.f32 %v13186_v25, %v13284_v20 }
 0x253   : > { %v4054_v62 = vsel %vm13001_vm14, %v3772_v23, %v4053_v33  ;;  %v4049_v49 = vld [vmem:[#allocation2 + $0x14c] sm:$0xf]  ;;  %v3782_v18 = vrot.slane %v3049_v41, 4  ;;  %v3783_v31 = vrot.slane %v3052_v13, 5  ;;  %v3760_v38 = vsel %vm12980_vm12, %v13271_v29, %v3759_v7  ;;  %v14930_v42 = vld [vmem:[#allocation20_spill] sm:$0xff]  ;;  %v14931_v19 = vld [vmem:[#allocation22_spill] sm:$0xff] }
 0x254   : > { %4055 = vst [vmem:[#allocation2 + $0x164] sm:$0xf] %v4054_v62  ;;  %v3762_v45 = vor.u32 %v3761_v39, %v3759_v7  ;;  %v13309_v43 = vrot.slane %v3033_v52, 7  ;;  %4048 = vst [vmem:[#allocation2 + $0x140] sm:$0xf] %v3760_v38  ;;  %v3054_v8 = vor.u32 %v3052_v13, %v13303_v14  ;;  %v3055_v54 = vrot.slane %v13303_v14, 4 }
 0x255   : > { %v3784_v2 = vor.u32 %v3783_v31, %v3782_v18  ;;  %v3036_v53 = vshll.u32 %v9993_v37, 16  ;;  %v3015_v59 = vsel %vm12990_vm13, %v3007_v17, %v3014_v21  ;;  %v3773_v44 = vrot.slane %v3033_v52, 4  ;;  %5250 = vmatmul.mubr.bf16.gmra.mxu1 %v11448_v50  ;;  %v13335_v37 = vpop.f32.mrf.mxu0  ;;  %6390 = vmatpush2.bf16.msra.mxu0 %v11470_v5  ;;  %v4061_v62 = vld [vmem:[#allocation2 + $0x194] sm:$0xf] }
 0x256   : > { %v3763_v29 = vrot.slane %v3762_v45, 4  ;;  %v3039_v32 = vrot.slane %v13309_v43, 4  ;;  %3439 = vst [vmem:[#allocation2 + $0x144] sm:$0xf] %v3015_v59  ;;  %v3449_v33 = vsel %vm12967_vm11, %v3054_v8, %v3448_v60  ;;  %v9996_v17 = vpack.c.bf16 %v2342_v12, %v2342_v12  ;;  %5257 = vmatprep.mubr.bf16.mxu1 %v11449_v28  ;;  %6391 = vmatprep.subr.bf16.mxu0 %v13131_v35  ;;  %v11455_v8 = vld [vmem:[#allocation2 + $0x120] ss:$12 sps:$4 sm:$0xff]  }
 0x257   : > { %v3785_v55 = vrot.slane %v3784_v2, 4  ;;  %v3038_v0 = vor.u32 %v3036_v53, %v13309_v43  ;;  %v3774_v16 = vrot.slane %v3036_v53, 5  ;;  %3450 = vst [vmem:[#allocation2 + $0x180] sm:$0xf] %v3449_v33  ;;  %v2340_v1 = vmax.f32 %v13292_v47, 0.0  ;;  %v13347_v21 = vpop.f32.mrf.mxu0 }
 0x258   : > { %v4050_v11 = vsel %vm13001_vm14, %v3763_v29, %v4049_v49  ;;  %v2208_v27 = vadd.f32 %v13267_v9, %v14930_v42  ;;  %v2211_v40 = vadd.f32 %v13286_v4, %v14931_v19  ;;  %v3057_v47 = vshrl.u32 %v9996_v17, 16  ;;  %3611 = vst [vmem:[#allocation2 + $0x190] sm:$0xf] %v9996_v17  ;;  %v14932_v9 = vld [vmem:[#allocation23_spill] sm:$0xff]  ;;  %v11463_v19 = vld [vmem:[#allocation9 + $0xa0] sm:$0xff]  }
 0x259   : > { %4051 = vst [vmem:[#allocation2 + $0x14c] sm:$0xf] %v4050_v11  ;;  %v3445_v36 = vsel %vm12967_vm11, %v3038_v0, %v3444_v48  ;;  %v3775_v26 = vor.u32 %v3774_v16, %v3773_v44  ;;  %v3060_v12 = vshll.u32 %v9996_v17, 16  ;;  %v9994_v20 = vpack.c.bf16 %v2340_v1, %v2340_v1  ;;  %v11476_v4 = vld [vmem:[#allocation9 + $0x68] sm:$0xff]   ;;  %v11477_v44 = vld [vmem:[#allocation9 + $0x60] sm:$0xff]   ;;  %v13360_v5 = vpop.f32.mrf.mxu0  ;;  %11011 = vmatprep.subr.bf16.mxu1 %v11463_v19 }
 0x25a   : > { %3446 = vst [vmem:[#allocation2 + $0x168] sm:$0xf] %v3445_v36  ;;  %v2345_v57 = vmax.f32 %v2281_v6, 0.0  ;;  %v2279_v41 = vadd.f32 %v13186_v25, %v2208_v27  ;;  %v13339_v13 = vadd.f32 %v13186_v25, %v2211_v40  ;;  %v13343_v58 = vadd.f32 %v13299_v63, %v14932_v9  ;;  %v11458_v2 = vld [vmem:[#allocation2 + $0x13c] ss:$12 sps:$4 sm:$0xff]   ;;  %6392 = vmatpush2.bf16.msra.mxu0 %v11476_v4 }
 0x25b   : > { %v3776_v23 = vrot.slane %v3775_v26, 4  ;;  %v3059_v7 = vrot.slane %v3057_v47, 7  ;;  %v3786_v39 = vrot.slane %v3060_v12, 5  ;;  %v3788_v60 = vrot.slane %v3057_v47, 4  ;;  %3609 = vst [vmem:[#allocation2 + $0x178] sm:$0xf] %v9994_v20  ;;  %6393 = vmatprep.subr.bf16.mxu0 %v13131_v35  ;;  %11012 = vmatpush3.bf16.msra.mxu1 %v11463_v19 }
 0x25c   : > { %v3041_v52 = vshrl.u32 %v9994_v20, 16  ;;  %v3044_v49 = vshll.u32 %v9994_v20, 16  ;;  %v9999_v18 = vpack.c.bf16 %v2345_v57, %v2345_v57  ;;  %v2343_v31 = vmax.f32 %v2279_v41, 0.0  ;;  %v4057_v16 = vld [vmem:[#allocation2 + $0x17c] sm:$0xf] }
 0x25d   : > { %v2346_v30 = vmax.f32 %v13339_v13, 0.0  ;;  %v3062_v38 = vor.u32 %v3060_v12, %v3059_v7  ;;  %v3787_v63 = vsel %vm12980_vm12, %v3785_v55, %v3786_v39  ;;  %v3789_v45 = vor.u32 %v3788_v60, %v3786_v39  ;;  %5258 = vmatmul.mubr.bf16.gmra.mxu1 %v11455_v8  ;;  %v11427_v14 = vld [vmem:[#allocation2 + $0x158] ss:$12 sps:$4 sm:$0xff]   ;;  %v3456_v26 = vld [vmem:[#allocation2 + $0x1e0] sm:$0xf]  ;;  %v14933_v8 = vld [vmem:[#allocation24_spill] sm:$0xff] }
 0x25e   : > { %v3043_v48 = vrot.slane %v3041_v52, 7  ;;  %4060 = vst [vmem:[#allocation2 + $0x188] sm:$0xf] %v3787_v63  ;;  %v3777_v53 = vrot.slane %v3044_v49, 5  ;;  %v3779_v50 = vrot.slane %v3041_v52, 4  ;;  %v3081_v59 = vshrl.u32 %v9999_v18, 16  ;;  %5265 = vmatprep.mubr.bf16.mxu1 %v11458_v2  ;;  %6394 = vmatpush2.bf16.msra.mxu0 %v11477_v44 }
 0x25f   : > { %v3084_v29 = vshll.u32 %v9999_v18, 16  ;;  %3614 = vst [vmem:[#allocation2 + $0x1e4] sm:$0xf] %v9999_v18  ;;  %v3063_v33 = vsel %vm12990_vm13, %v3055_v54, %v3062_v38  ;;  %v3790_v55 = vrot.slane %v3789_v45, 4  ;;  %v9997_v28 = vpack.c.bf16 %v2343_v31, %v2343_v31  ;;  %v11483_v40 = vld [vmem:[#allocation9 + $0x58] sm:$0xff]   ;;  %v11484_v38 = vld [vmem:[#allocation9 + $0x50] sm:$0xff]  }
 0x260   : > { %v3046_v0 = vor.u32 %v3044_v49, %v3043_v48  ;;  %v11426_v11 = vld [vmem:[#allocation2 + $0x140] ss:$12 sps:$4 sm:$0xff]   ;;  %3451 = vst [vmem:[#allocation2 + $0x18c] sm:$0xf] %v3063_v33  ;;  %v3778_v17 = vsel %vm12980_vm12, %v3776_v23, %v3777_v53  ;;  %v3780_v1 = vor.u32 %v3779_v50, %v3777_v53  ;;  %v13358_v6 = vrot.slane %v3081_v59, 7  ;;  %v14934_v44 = vld [vmem:[#allocation25_spill] sm:$0xff] }
 0x261   : > { %v3800_v35 = vrot.slane %v3081_v59, 4  ;;  %v4062_v54 = vsel %vm13001_vm14, %v3790_v55, %v4061_v62  ;;  %4056 = vst [vmem:[#allocation2 + $0x170] sm:$0xf] %v3778_v17  ;;  %v3801_v42 = vrot.slane %v3084_v29, 5  ;;  %v3065_v27 = vshrl.u32 %v9997_v28, 16  ;;  %10965 = vmatprep.mubr.bf16.mxu0 %v11426_v11  ;;  %v13381_v62 = vpop.f32.mrf.mxu0 }
 0x262   : > { %v3047_v36 = vsel %vm12990_vm13, %v3039_v32, %v3046_v0  ;;  %3612 = vst [vmem:[#allocation2 + $0x1cc] sm:$0xf] %v9997_v28  ;;  %4063 = vst [vmem:[#allocation2 + $0x194] sm:$0xf] %v4062_v54  ;;  %v3781_v47 = vrot.slane %v3780_v1, 4  ;;  %v3086_v12 = vor.u32 %v3084_v29, %v13358_v6  ;;  %v3087_v20 = vrot.slane %v13358_v6, 4  ;;  %10966 = vmatmul.mubr.bf16.gmra.mxu0 %v11427_v14 }
 0x263   : > { %3447 = vst [vmem:[#allocation2 + $0x174] sm:$0xf] %v3047_v36  ;;  %v3068_v43 = vshll.u32 %v9997_v28, 16  ;;  %v3452_v57 = vld [vmem:[#allocation2 + $0x1c8] sm:$0xf]  ;;  %v13370_v32 = vld [vmem:[#allocation2] sm:$0xff]  ;;  %v3802_v23 = vor.u32 %v3801_v42, %v3800_v35  ;;  %v10000_v9 = vpack.c.bf16 %v2346_v30, %v2346_v30  ;;  %v2280_v52 = vadd.f32 %v13186_v25, %v13343_v58 }
 0x264   : > { %6395 = vmatprep.subr.bf16.mxu0 %v13370_v32  ;;  %v13373_v41 = vrot.slane %v3065_v27, 7  ;;  %v3791_v13 = vrot.slane %v3065_v27, 4  ;;  %v11456_v4 = vld [vmem:[#allocation2 + $0x138] ss:$12 sps:$4 sm:$0xff]   ;;  %v4058_v7 = vsel %vm13001_vm14, %v3781_v47, %v4057_v16  ;;  %v3457_v39 = vsel %vm12967_vm11, %v3086_v12, %v3456_v26  ;;  %v11466_v53 = vld [vmem:[#allocation2 + $0x154] ss:$12 sps:$4 sm:$0xff]  }
 0x265   : > { %v3792_v60 = vrot.slane %v3068_v43, 5  ;;  %4059 = vst [vmem:[#allocation2 + $0x17c] sm:$0xf] %v4058_v7  ;;  %3458 = vst [vmem:[#allocation2 + $0x1e0] sm:$0xf] %v3457_v39  ;;  %v3803_v49 = vrot.slane %v3802_v23, 4  ;;  %6396 = vmatpush2.bf16.msra.mxu0 %v11483_v40  ;;  %v2214_v58 = vadd.f32 %v13313_v51, %v14933_v8  ;;  %v2212_v33 = vadd.f32 %v13335_v37, %v14934_v44  ;;  %v13393_v51 = vpop.f32.mrf.mxu0 }
 0x266   : > { %v3070_v18 = vor.u32 %v3068_v43, %v13373_v41  ;;  %v3071_v31 = vrot.slane %v13373_v41, 4  ;;  %v3089_v30 = vshrl.u32 %v10000_v9, 16  ;;  %3615 = vst [vmem:[#allocation2 + $0x1f0] sm:$0xf] %v10000_v9  ;;  %v3092_v45 = vshll.u32 %v10000_v9, 16  ;;  %6397 = vmatprep.subr.bf16.mxu0 %v13370_v32  ;;  %5266 = vmatmul.mubr.bf16.gmra.mxu1 %v11456_v4  ;;  %v14935_v6 = vld [vmem:[#allocation26_spill] sm:$0xff] }
 0x267   : > { %v3793_v63 = vor.u32 %v3792_v60, %v3791_v13  ;;  %v2344_v48 = vmax.f32 %v2280_v52, 0.0  ;;  %v2490_v2 = vld [vmem:[#allocation2 + $0x1f8] sm:$0x1]  ;;  %v2285_v28 = vadd.f32 %v13186_v25, %v2214_v58  ;;  %5273 = vmatprep.mubr.bf16.mxu1 %v11466_v53  ;;  %v2283_v17 = vadd.f32 %v13186_v25, %v2212_v33  ;;  %v4069_v54 = vld [vmem:[#allocation2 + $0x1f4] sm:$0xf]  ;;  %v11490_v12 = vld [vmem:[#allocation9 + $0x48] sm:$0xff]   ;;  %v13406_v7 = vpop.f32.mrf.mxu0 }
 0x268   : > { %v3453_v50 = vsel %vm12967_vm11, %v3070_v18, %v3452_v57  ;;  %v3091_v59 = vrot.slane %v3089_v30, 7  ;;  %v3806_v29 = vrot.slane %v3089_v30, 4  ;;  %v3804_v0 = vrot.slane %v3092_v45, 5  ;;  %v2604_v42 = vld [vmem:[#allocation2 + $0x224] sm:$0x8]  ;;  %v11492_v57 = vld [vmem:[#allocation9 + $0x98] sm:$0xff]  }
 0x269   : > { %3454 = vst [vmem:[#allocation2 + $0x1c8] sm:$0xf] %v3453_v50  ;;  %v3794_v55 = vrot.slane %v3793_v63, 4  ;;  %v9998_v16 = vpack.c.bf16 %v2344_v48, %v2344_v48  ;;  %v2491_v1 = vsel %vm12368_vm2, 0, %v2490_v2  ;;  %v2215_v35 = vadd.f32 %v13347_v21, %v14935_v6  ;;  %6398 = vmatpush2.bf16.msra.mxu0 %v11484_v38  ;;  %v11464_v47 = vld [vmem:[#allocation2 + $0x150] ss:$12 sps:$4 sm:$0xff]   ;;  %11013 = vmatprep.subr.bf16.mxu1 %v11492_v57 }
 0x26a   : > { %v3094_v11 = vor.u32 %v3092_v45, %v3091_v59  ;;  %v3805_v37 = vsel %vm12980_vm12, %v3803_v49, %v3804_v0  ;;  %v3807_v14 = vor.u32 %v3806_v29, %v3804_v0  ;;  %2492 = vst [vmem:[#allocation2 + $0x1f8] sm:$0x1] %v2491_v1  ;;  %6399 = vmatprep.subr.bf16.mxu0 %v13370_v32  ;;  %v2349_v19 = vmax.f32 %v2285_v28, 0.0  ;;  %v11491_v43 = vld [vmem:[#allocation9 + $0x40] sm:$0xff]   ;;  %v11432_v39 = vld [vmem:[#allocation2 + $0x188] ss:$12 sps:$4 sm:$0xff]  }
 0x26b   : > { %v3073_v36 = vshrl.u32 %v9998_v16, 16  ;;  %v3076_v26 = vshll.u32 %v9998_v16, 16  ;;  %3613 = vst [vmem:[#allocation2 + $0x1d8] sm:$0xf] %v9998_v16  ;;  %4068 = vst [vmem:[#allocation2 + $0x1e8] sm:$0xf] %v3805_v37  ;;  %v2286_v21 = vadd.f32 %v13186_v25, %v2215_v35  ;;  %11014 = vmatpush3.bf16.msra.mxu1 %v11492_v57 }
 0x26c   : > { %v3095_v27 = vsel %vm12990_vm13, %v3087_v20, %v3094_v11  ;;  %v2347_v40 = vmax.f32 %v2283_v17, 0.0  ;;  %v3808_v23 = vrot.slane %v3807_v14, 4  ;;  %v4065_v60 = vld [vmem:[#allocation2 + $0x1dc] sm:$0xf]  ;;  %v10003_v52 = vpack.c.bf16 %v2349_v19, %v2349_v19  ;;  %v11473_v48 = vld [vmem:[#allocation2 + $0x16c] ss:$12 sps:$4 sm:$0xff]  }
 0x26d   : > { %3459 = vst [vmem:[#allocation2 + $0x1ec] sm:$0xf] %v3095_v27  ;;  %v3075_v13 = vrot.slane %v3073_v36, 7  ;;  %v3795_v9 = vrot.slane %v3076_v26, 5  ;;  %v3797_v4 = vrot.slane %v3073_v36, 4  ;;  %v2350_v49 = vmax.f32 %v2286_v21, 0.0  ;;  %6400 = vmatpush2.bf16.msra.mxu0 %v11490_v12 }
 0x26e   : > { %v10001_v20 = vpack.c.bf16 %v2347_v40, %v2347_v40  ;;  %v2605_v18 = vsel %vm12389_vm5, 0, %v2604_v42  ;;  %v11431_v25 = vld [vmem:[#allocation2 + $0x170] ss:$12 sps:$4 sm:$0xff]   ;;  %v4070_v30 = vsel %vm13001_vm14, %v3808_v23, %v4069_v54  ;;  %6401 = vmatprep.subr.bf16.mxu0 %v13370_v32  ;;  %v3113_v8 = vshrl.u32 %v10003_v52, 16  ;;  %3618 = vst [vmem:[#allocation2 + $0x214] sm:$0xf] %v10003_v52  ;;  %5274 = vmatmul.mubr.bf16.gmra.mxu1 %v11464_v47 }
 0x26f   : > { %v3078_v38 = vor.u32 %v3076_v26, %v3075_v13  ;;  %v3796_v63 = vsel %vm12980_vm12, %v3794_v55, %v3795_v9  ;;  %v3798_v45 = vor.u32 %v3797_v4, %v3795_v9  ;;  %2606 = vst [vmem:[#allocation2 + $0x224] sm:$0x8] %v2605_v18  ;;  %4071 = vst [vmem:[#allocation2 + $0x1f4] sm:$0xf] %v4070_v30  ;;  %v3116_v58 = vshll.u32 %v10003_v52, 16  ;;  %v14936_v33 = vld [vmem:[#allocation27_spill] sm:$0xff]  ;;  %v13421_v55 = vpop.f32.mrf.mxu0 }
 0x270   : > { %4064 = vst [vmem:[#allocation2 + $0x1d0] sm:$0xf] %v3796_v63  ;;  %v3097_v2 = vshrl.u32 %v10001_v20, 16  ;;  %v3100_v53 = vshll.u32 %v10001_v20, 16  ;;  %3616 = vst [vmem:[#allocation2 + $0x1fc] sm:$0xf] %v10001_v20  ;;  %10969 = vmatprep.mubr.bf16.mxu0 %v11431_v25  ;;  %v10004_v44 = vpack.c.bf16 %v2350_v49, %v2350_v49  ;;  %v2213_v32 = vadd.f32 %v13360_v5, %v14936_v33 }
 0x271   : > { %v3079_v50 = vsel %vm12990_vm13, %v3071_v31, %v3078_v38  ;;  %v3799_v59 = vrot.slane %v3798_v45, 4  ;;  %v3464_v29 = vld [vmem:[#allocation2 + $0x210] sm:$0xf]  ;;  %10970 = vmatmul.mubr.bf16.gmra.mxu0 %v11432_v39  ;;  %5281 = vmatprep.mubr.bf16.mxu1 %v11473_v48  ;;  %v3115_v0 = vrot.slane %v3113_v8, 7  ;;  %v3818_v16 = vrot.slane %v3113_v8, 4  ;;  %v10907_v21 = vpop.f32.mrf.mxu0  ;;  %v14938_v30 = vld [vmem:[#allocation29_spill] sm:$0xff] }
 0x272   : > { %3455 = vst [vmem:[#allocation2 + $0x1d4] sm:$0xf] %v3079_v50  ;;  %v3819_v28 = vrot.slane %v3116_v58, 5  ;;  %v13423_v11 = vrot.slane %v3097_v2, 7  ;;  %v3460_v41 = vld [vmem:[#allocation2 + $0x1f8] sm:$0xf]  ;;  %6402 = vmatpush2.bf16.msra.mxu0 %v11491_v43  ;;  %v2216_v38 = vadd.f32 %v13393_v51, %v14938_v30 }
 0x273   : > { %v4066_v31 = vsel %vm13001_vm14, %v3799_v59, %v4065_v60  ;;  %v3809_v17 = vrot.slane %v3097_v2, 4  ;;  %v3810_v1 = vrot.slane %v3100_v53, 5  ;;  %v3121_v6 = vshrl.u32 %v10004_v44, 16  ;;  %3619 = vst [vmem:[#allocation2 + $0x220] sm:$0xf] %v10004_v44  ;;  %v14937_v49 = vld [vmem:[#allocation28_spill] sm:$0xff] }
 0x274   : > { %4067 = vst [vmem:[#allocation2 + $0x1dc] sm:$0xf] %v4066_v31  ;;  %v3118_v5 = vor.u32 %v3116_v58, %v3115_v0  ;;  %v3119_v35 = vrot.slane %v3115_v0, 4  ;;  %v3820_v37 = vor.u32 %v3819_v28, %v3818_v16  ;;  %v3102_v14 = vor.u32 %v3100_v53, %v13423_v11  ;;  %v2601_v54 = vld [vmem:[#allocation2 + $0x20c] sm:$0x8]  ;;  %v13453_v53 = vpop.f32.mrf.mxu0 }
 0x275   : > { %v2499_v36 = vld [vmem:[#allocation2 + $0x240] sm:$0x1]  ;;  %v3103_v26 = vrot.slane %v13423_v11, 4  ;;  %v3811_v42 = vor.u32 %v3810_v1, %v3809_v17  ;;  %v3123_v27 = vrot.slane %v3121_v6, 7  ;;  %v3124_v19 = vshll.u32 %v10004_v44, 16  ;;  %v14940_v28 = vld [vmem:[#allocation31_spill] sm:$0xff] }
 0x276   : > { %v2496_v40 = vld [vmem:[#allocation2 + $0x228] sm:$0x1]  ;;  %v11480_v47 = vld [vmem:[#allocation2 + $0x184] ss:$12 sps:$4 sm:$0xff]   ;;  %v3465_v12 = vsel %vm12967_vm11, %v3118_v5, %v3464_v29  ;;  %v3821_v43 = vrot.slane %v3820_v37, 4  ;;  %v3461_v57 = vsel %vm12967_vm11, %v3102_v14, %v3460_v41  ;;  %v3824_v23 = vrot.slane %v3121_v6, 4 }
 0x277   : > { %v11471_v13 = vld [vmem:[#allocation2 + $0x168] ss:$12 sps:$4 sm:$0xff]   ;;  %3466 = vst [vmem:[#allocation2 + $0x210] sm:$0xf] %v3465_v12  ;;  %3462 = vst [vmem:[#allocation2 + $0x1f8] sm:$0xf] %v3461_v57  ;;  %v3126_v4 = vor.u32 %v3124_v19, %v3123_v27  ;;  %v2218_v18 = vadd.f32 %v13381_v62, %v14937_v49  ;;  %v2217_v41 = vadd.f32 %v13421_v55, %v14940_v28  ;;  %v13473_v55 = vpop.f32.mrf.mxu0 }
 0x278   : > { %v13433_v9 = vrot.slane %v3811_v42, 4  ;;  %v3822_v39 = vrot.slane %v3124_v19, 5  ;;  %v13438_v60 = vld [vmem:[%s14727_s3] ss:$0 sm:$0xff]  ;;  %v2602_v20 = vsel %vm12389_vm5, 0, %v2601_v54  ;;  %v2500_v25 = vsel %vm12368_vm2, 0, %v2499_v36  ;;  %5282 = vmatmul.mubr.bf16.gmra.mxu1 %v11471_v13 }
 0x279   : > { %v2284_v52 = vadd.f32 %v13438_v60, %v2213_v32  ;;  %v2610_v63 = vld [vmem:[#allocation2 + $0x254] sm:$0x8]  ;;  %v3127_v45 = vsel %vm12990_vm13, %v3119_v35, %v3126_v4  ;;  %v4077_v58 = vld [vmem:[#allocation2 + $0x224] sm:$0xf]  ;;  %2603 = vst [vmem:[#allocation2 + $0x20c] sm:$0x8] %v2602_v20  ;;  %5289 = vmatprep.mubr.bf16.mxu1 %v11480_v47  ;;  %v2289_v51 = vadd.f32 %v13438_v60, %v2218_v18 }
 0x27a   : > { %v3823_v48 = vsel %vm12980_vm12, %v3821_v43, %v3822_v39  ;;  %v3825_v8 = vor.u32 %v3824_v23, %v3822_v39  ;;  %2501 = vst [vmem:[#allocation2 + $0x240] sm:$0x1] %v2500_v25  ;;  %v2607_v62 = vld [vmem:[#allocation2 + $0x23c] sm:$0x8]  ;;  %3467 = vst [vmem:[#allocation2 + $0x21c] sm:$0xf] %v3127_v45  ;;  %v2287_v50 = vadd.f32 %v13438_v60, %v2216_v38  ;;  %v13481_v25 = vpop.f32.mrf.mxu0 }
 0x27b   : > { %v2348_v2 = vmax.f32 %v2284_v52, 0.0  ;;  %4076 = vst [vmem:[#allocation2 + $0x218] sm:$0xf] %v3823_v48  ;;  %v2497_v59 = vsel %vm12368_vm2, 0, %v2496_v40  ;;  %v14939_v29 = vld [vmem:[#allocation30_spill] sm:$0xff]  ;;  %v2611_v16 = vsel %vm12389_vm5, 0, %v2610_v63  ;;  %v13471_v14 = vadd.f32 %v13438_v60, %v2217_v41 }
 0x27c   : > { %v2219_v44 = vadd.f32 %v13406_v7, %v14939_v29  ;;  %v11438_v33 = vld [vmem:[#allocation2 + $0x1e8] ss:$12 sps:$4 sm:$0xff]   ;;  %v3826_v32 = vrot.slane %v3825_v8, 4  ;;  %2498 = vst [vmem:[#allocation2 + $0x228] sm:$0x1] %v2497_v59  ;;  %v2353_v17 = vmax.f32 %v2289_v51, 0.0  ;;  %v13493_v28 = vpop.f32.mrf.mxu0 }
 0x27d   : > { %v10002_v0 = vpack.c.bf16 %v2348_v2, %v2348_v2  ;;  %v11437_v31 = vld [vmem:[#allocation2 + $0x1d0] ss:$12 sps:$4 sm:$0xff]   ;;  %v2351_v1 = vmax.f32 %v2287_v50, 0.0  ;;  %2612 = vst [vmem:[#allocation2 + $0x254] sm:$0x8] %v2611_v16  ;;  %v2608_v5 = vsel %vm12389_vm5, 0, %v2607_v62 }
 0x27e   : > { %v2290_v6 = vadd.f32 %v13438_v60, %v2219_v44  ;;  %v4078_v7 = vsel %vm13001_vm14, %v3826_v32, %v4077_v58  ;;  %2609 = vst [vmem:[#allocation2 + $0x23c] sm:$0x8] %v2608_v5  ;;  %10973 = vmatprep.mubr.bf16.mxu0 %v11437_v31  ;;  %v11478_v54 = vld [vmem:[#allocation2 + $0x180] ss:$12 sps:$4 sm:$0xff]   ;;  %v10007_v36 = vpack.c.bf16 %v2353_v17, %v2353_v17  ;;  %v14941_v19 = vld [vmem:[#allocation32_spill] sm:$0xff]  ;;  %v2352_v57 = vmax.f32 %v13471_v14, 0.0 }
 0x27f   : > { %v3105_v35 = vshrl.u32 %v10002_v0, 16  ;;  %v3108_v37 = vshll.u32 %v10002_v0, 16  ;;  %3617 = vst [vmem:[#allocation2 + $0x208] sm:$0xf] %v10002_v0  ;;  %4079 = vst [vmem:[#allocation2 + $0x224] sm:$0xf] %v4078_v7  ;;  %v10005_v42 = vpack.c.bf16 %v2351_v1, %v2351_v1  ;;  %v2222_v40 = vadd.f32 %v10907_v21, %v14941_v19  ;;  %10974 = vmatmul.mubr.bf16.gmra.mxu0 %v11438_v33 }
 0x280   : > { %v2354_v27 = vmax.f32 %v2290_v6, 0.0  ;;  %v11487_v23 = vld [vmem:[#allocation2 + $0x1cc] ss:$12 sps:$4 sm:$0xff]   ;;  %v3145_v13 = vshrl.u32 %v10007_v36, 16  ;;  %v3148_v4 = vshll.u32 %v10007_v36, 16  ;;  %5290 = vmatmul.mubr.bf16.gmra.mxu1 %v11478_v54 }
 0x281   : > { %v3107_v47 = vrot.slane %v3105_v35, 7  ;;  %v3813_v12 = vrot.slane %v3108_v37, 5  ;;  %v3815_v43 = vrot.slane %v3105_v35, 4  ;;  %3622 = vst [vmem:[#allocation2 + $0x244] sm:$0xf] %v10007_v36  ;;  %v2293_v52 = vadd.f32 %v13438_v60, %v2222_v40  ;;  %5297 = vmatprep.mubr.bf16.mxu1 %v11487_v23  ;;  %v13503_v23 = vpop.f32.mrf.mxu0 }
 0x282   : > { %3620 = vst [vmem:[#allocation2 + $0x22c] sm:$0xf] %v10005_v42  ;;  %v10008_v39 = vpack.c.bf16 %v2354_v27, %v2354_v27  ;;  %v3129_v18 = vshrl.u32 %v10005_v42, 16  ;;  %v4073_v30 = vld [vmem:[#allocation2 + $0x20c] sm:$0xf]  ;;  %v3147_v38 = vrot.slane %v3145_v13, 7 }
 0x283   : > { %v3110_v20 = vor.u32 %v3108_v37, %v3107_v47  ;;  %v3814_v21 = vsel %vm12980_vm12, %v13433_v9, %v3813_v12  ;;  %v3816_v49 = vor.u32 %v3815_v43, %v3813_v12  ;;  %v3836_v63 = vrot.slane %v3145_v13, 4  ;;  %v3472_v2 = vld [vmem:[#allocation2 + $0x240] sm:$0xf]  ;;  %v3468_v29 = vld [vmem:[#allocation2 + $0x228] sm:$0xf]  ;;  %v14942_v12 = vld [vmem:[#allocation33_spill] sm:$0xff] }
 0x284   : > { %4072 = vst [vmem:[#allocation2 + $0x200] sm:$0xf] %v3814_v21  ;;  %v3837_v45 = vrot.slane %v3148_v4, 5  ;;  %v3132_v48 = vshll.u32 %v10005_v42, 16  ;;  %3623 = vst [vmem:[#allocation2 + $0x250] sm:$0xf] %v10008_v39  ;;  %v3150_v51 = vor.u32 %v3148_v4, %v3147_v38  ;;  %v10006_v37 = vpack.c.bf16 %v2352_v57, %v2352_v57 }
 0x285   : > { %v3111_v8 = vsel %vm12990_vm13, %v3103_v26, %v3110_v20  ;;  %v3817_v58 = vrot.slane %v3816_v49, 4  ;;  %v13487_v9 = vrot.slane %v3129_v18, 7  ;;  %v3827_v62 = vrot.slane %v3129_v18, 4  ;;  %v2505_v33 = vld [vmem:[#allocation2 + $0x270] sm:$0x1] }
 0x286   : > { %3463 = vst [vmem:[#allocation2 + $0x204] sm:$0xf] %v3111_v8  ;;  %v3151_v50 = vrot.slane %v3147_v38, 4  ;;  %v3838_v59 = vor.u32 %v3837_v45, %v3836_v63  ;;  %v3828_v44 = vrot.slane %v3132_v48, 5  ;;  %v3153_v26 = vshrl.u32 %v10008_v39, 16 }
 0x287   : > { %v4074_v32 = vsel %vm13001_vm14, %v3817_v58, %v4073_v30  ;;  %v3134_v11 = vor.u32 %v3132_v48, %v13487_v9  ;;  %v3135_v0 = vrot.slane %v13487_v9, 4  ;;  %v2502_v16 = vld [vmem:[#allocation2 + $0x258] sm:$0x1]  ;;  %v11485_v41 = vld [vmem:[#allocation2 + $0x1c8] ss:$12 sps:$4 sm:$0xff]   ;;  %v3473_v31 = vsel %vm12967_vm11, %v3150_v51, %v3472_v2 }
 0x288   : > { %4075 = vst [vmem:[#allocation2 + $0x20c] sm:$0xf] %v4074_v32  ;;  %v3839_v17 = vrot.slane %v3838_v59, 4  ;;  %v3829_v1 = vor.u32 %v3828_v44, %v3827_v62  ;;  %v3156_v6 = vshll.u32 %v10008_v39, 16  ;;  %3474 = vst [vmem:[#allocation2 + $0x240] sm:$0xf] %v3473_v31  ;;  %5298 = vmatmul.mubr.bf16.gmra.mxu1 %v11485_v41  ;;  %v2220_v43 = vadd.f32 %v13453_v53, %v14942_v12  ;;  %v13516_v44 = vpop.f32.mrf.mxu0 }
 0x289   : > { %v3469_v5 = vsel %vm12967_vm11, %v3134_v11, %v3468_v29  ;;  %v3155_v7 = vrot.slane %v3153_v26, 7  ;;  %v3842_v35 = vrot.slane %v3153_v26, 4  ;;  %v11495_v14 = vld [vmem:[#allocation2 + $0x1e4] ss:$12 sps:$4 sm:$0xff]   ;;  %v2357_v42 = vmax.f32 %v2293_v52, 0.0 }
 0x28a   : > { %3470 = vst [vmem:[#allocation2 + $0x228] sm:$0xf] %v3469_v5  ;;  %v3830_v54 = vrot.slane %v3829_v1, 4  ;;  %v3840_v36 = vrot.slane %v3156_v6, 5  ;;  %v2506_v27 = vsel %vm12368_vm2, 0, %v2505_v33  ;;  %v3137_v40 = vshrl.u32 %v10006_v37, 16  ;;  %5305 = vmatprep.mubr.bf16.mxu1 %v11495_v14 }
 0x28b   : > { %v3158_v19 = vor.u32 %v3156_v6, %v3155_v7  ;;  %v3140_v47 = vshll.u32 %v10006_v37, 16  ;;  %3621 = vst [vmem:[#allocation2 + $0x238] sm:$0xf] %v10006_v37  ;;  %2507 = vst [vmem:[#allocation2 + $0x270] sm:$0x1] %v2506_v27  ;;  %v10011_v4 = vpack.c.bf16 %v2357_v42, %v2357_v42  ;;  %v2503_v39 = vsel %vm12368_vm2, 0, %v2502_v16 }
 0x28c   : > { %v3841_v57 = vsel %vm12980_vm12, %v3839_v17, %v3840_v36  ;;  %v3843_v13 = vor.u32 %v3842_v35, %v3840_v36  ;;  %v4085_v20 = vld [vmem:[#allocation2 + $0x254] sm:$0xf]  ;;  %v3139_v21 = vrot.slane %v3137_v40, 7  ;;  %v3833_v18 = vrot.slane %v3137_v40, 4  ;;  %2504 = vst [vmem:[#allocation2 + $0x258] sm:$0x1] %v2503_v39  ;;  %v13535_v40 = vpop.f32.mrf.mxu0 }
 0x28d   : > { %v3159_v52 = vsel %vm12990_vm13, %v3151_v50, %v3158_v19  ;;  %4084 = vst [vmem:[#allocation2 + $0x248] sm:$0xf] %v3841_v57  ;;  %v3831_v49 = vrot.slane %v3140_v47, 5  ;;  %v2616_v53 = vld [vmem:[#allocation2 + $0x284] sm:$0x8]  ;;  %v3177_v63 = vshrl.u32 %v10011_v4, 16  ;;  %v2291_v48 = vadd.f32 %v13438_v60, %v2220_v43 }
 0x28e   : > { %3475 = vst [vmem:[#allocation2 + $0x24c] sm:$0xf] %v3159_v52  ;;  %v3844_v30 = vrot.slane %v3843_v13, 4  ;;  %v4081_v38 = vld [vmem:[#allocation2 + $0x23c] sm:$0xf]  ;;  %v3180_v45 = vshll.u32 %v10011_v4, 16  ;;  %v3142_v2 = vor.u32 %v3140_v47, %v3139_v21 }
 0x28f   : > { %3626 = vst [vmem:[#allocation2 + $0x274] sm:$0xf] %v10011_v4  ;;  %v11445_v8 = vld [vmem:[#allocation2 + $0x218] ss:$12 sps:$4 sm:$0xff]   ;;  %v11493_v58 = vld [vmem:[#allocation2 + $0x1e0] ss:$12 sps:$4 sm:$0xff]   ;;  %v3832_v62 = vsel %vm12980_vm12, %v3830_v54, %v3831_v49  ;;  %v3834_v51 = vor.u32 %v3833_v18, %v3831_v49 }
 0x290   : > { %v14943_v50 = vld [vmem:[#allocation34_spill] sm:$0xff]  ;;  %v2613_v29 = vld [vmem:[#allocation2 + $0x26c] sm:$0x8]  ;;  %v11517_v32 = vld [vmem:[#allocation9 + $0x90] sm:$0xff]   ;;  %v4086_v11 = vsel %vm13001_vm14, %v3844_v30, %v4085_v20  ;;  %4080 = vst [vmem:[#allocation2 + $0x230] sm:$0xf] %v3832_v62  ;;  %v3143_v31 = vsel %vm12990_vm13, %v3135_v0, %v3142_v2  ;;  %5306 = vmatmul.mubr.bf16.gmra.mxu1 %v11493_v58 }
 0x291   : > { %v2223_v59 = vadd.f32 %v13473_v55, %v14943_v50  ;;  %v11444_v33 = vld [vmem:[#allocation2 + $0x200] ss:$12 sps:$4 sm:$0xff]   ;;  %v13520_v26 = vrot.slane %v3177_v63, 7  ;;  %v3854_v16 = vrot.slane %v3177_v63, 4  ;;  %v3855_v41 = vrot.slane %v3180_v45, 5  ;;  %11015 = vmatprep.subr.bf16.mxu1 %v11517_v32  ;;  %v14945_v57 = vld [vmem:[#allocation36_spill] sm:$0xff] }
 0x292   : > { %4087 = vst [vmem:[#allocation2 + $0x254] sm:$0xf] %v4086_v11  ;;  %v3835_v55 = vrot.slane %v3834_v51, 4  ;;  %v2355_v17 = vmax.f32 %v2291_v48, 0.0  ;;  %10977 = vmatprep.mubr.bf16.mxu0 %v11444_v33  ;;  %v11501_v6 = vld [vmem:[#allocation2 + $0x1fc] ss:$12 sps:$4 sm:$0xff]   ;;  %11016 = vmatpush3.bf16.msra.mxu1 %v11517_v32  ;;  %v2226_v13 = vadd.f32 %v13493_v28, %v14945_v57 }
 0x293   : > { %v2294_v1 = vadd.f32 %v13438_v60, %v2223_v59  ;;  %3471 = vst [vmem:[#allocation2 + $0x234] sm:$0xf] %v3143_v31  ;;  %v3182_v5 = vor.u32 %v3180_v45, %v13520_v26  ;;  %v3183_v7 = vrot.slane %v13520_v26, 4  ;;  %v3480_v35 = vld [vmem:[#allocation2 + $0x270] sm:$0xf]  ;;  %v3856_v37 = vor.u32 %v3855_v41, %v3854_v16  ;;  %10978 = vmatmul.mubr.bf16.gmra.mxu0 %v11445_v8  ;;  %v14944_v42 = vld [vmem:[#allocation35_spill] sm:$0xff]  ;;  %v13553_v8 = vpop.f32.mrf.mxu0 }
 0x294   : > { %v2617_v9 = vsel %vm12389_vm5, 0, %v2616_v53  ;;  %v2511_v14 = vld [vmem:[#allocation2 + $0x2a0] sm:$0x1]  ;;  %v4082_v0 = vsel %vm13001_vm14, %v3835_v55, %v4081_v38  ;;  %v10009_v54 = vpack.c.bf16 %v2355_v17, %v2355_v17  ;;  %v2221_v27 = vadd.f32 %v13481_v25, %v14944_v42  ;;  %v2508_v19 = vld [vmem:[#allocation2 + $0x288] sm:$0x1]  ;;  %5313 = vmatprep.mubr.bf16.mxu1 %v11501_v6  ;;  %v14946_v18 = vld [vmem:[#allocation37_spill] sm:$0xff] }
 0x295   : > { %v2358_v36 = vmax.f32 %v2294_v1, 0.0  ;;  %2618 = vst [vmem:[#allocation2 + $0x284] sm:$0x8] %v2617_v9  ;;  %4083 = vst [vmem:[#allocation2 + $0x23c] sm:$0xf] %v4082_v0  ;;  %v3481_v47 = vsel %vm12967_vm11, %v3182_v5, %v3480_v35  ;;  %v3857_v12 = vrot.slane %v3856_v37, 4  ;;  %v2297_v21 = vadd.f32 %v13438_v60, %v2226_v13  ;;  %v13560_v6 = vpop.f32.mrf.mxu0 }
 0x296   : > { %v2614_v43 = vsel %vm12389_vm5, 0, %v2613_v29  ;;  %3482 = vst [vmem:[#allocation2 + $0x270] sm:$0xf] %v3481_v47  ;;  %v3161_v4 = vshrl.u32 %v10009_v54, 16  ;;  %v3164_v39 = vshll.u32 %v10009_v54, 16  ;;  %v2292_v52 = vadd.f32 %v13438_v60, %v2221_v27 }
 0x297   : > { %3624 = vst [vmem:[#allocation2 + $0x25c] sm:$0xf] %v10009_v54  ;;  %v10012_v25 = vpack.c.bf16 %v2358_v36, %v2358_v36  ;;  %2615 = vst [vmem:[#allocation2 + $0x26c] sm:$0x8] %v2614_v43  ;;  %v3476_v20 = vld [vmem:[#allocation2 + $0x258] sm:$0xf]  ;;  %v2224_v53 = vadd.f32 %v13503_v23, %v14946_v18 }
 0x298   : > { %v2512_v49 = vsel %vm12368_vm2, 0, %v2511_v14  ;;  %v2509_v28 = vsel %vm12368_vm2, 0, %v2508_v19  ;;  %v11499_v30 = vld [vmem:[#allocation2 + $0x1f8] ss:$12 sps:$4 sm:$0xff]   ;;  %v13551_v38 = vrot.slane %v3161_v4, 7  ;;  %v3845_v63 = vrot.slane %v3161_v4, 4 }
 0x299   : > { %v3846_v45 = vrot.slane %v3164_v39, 5  ;;  %v3185_v48 = vshrl.u32 %v10012_v25, 16  ;;  %3627 = vst [vmem:[#allocation2 + $0x280] sm:$0xf] %v10012_v25  ;;  %2513 = vst [vmem:[#allocation2 + $0x2a0] sm:$0x1] %v2512_v49  ;;  %v2295_v51 = vadd.f32 %v13438_v60, %v2224_v53  ;;  %5314 = vmatmul.mubr.bf16.gmra.mxu1 %v11499_v30 }
 0x29a   : > { %2510 = vst [vmem:[#allocation2 + $0x288] sm:$0x1] %v2509_v28  ;;  %v3188_v58 = vshll.u32 %v10012_v25, 16  ;;  %v2356_v2 = vmax.f32 %v2292_v52, 0.0  ;;  %v2361_v62 = vmax.f32 %v2297_v21, 0.0  ;;  %v3166_v23 = vor.u32 %v3164_v39, %v13551_v38  ;;  %v10916_v52 = vpop.f32.mrf.mxu0 }
 0x29b   : > { %v3167_v50 = vrot.slane %v13551_v38, 4  ;;  %v3847_v59 = vor.u32 %v3846_v45, %v3845_v63  ;;  %v3187_v29 = vrot.slane %v3185_v48, 7  ;;  %v11507_v33 = vld [vmem:[#allocation2 + $0x214] ss:$12 sps:$4 sm:$0xff]   ;;  %v3860_v11 = vrot.slane %v3185_v48, 4 }
 0x29c   : > { %v3858_v32 = vrot.slane %v3188_v58, 5  ;;  %v10010_v16 = vpack.c.bf16 %v2356_v2, %v2356_v2  ;;  %v10015_v41 = vpack.c.bf16 %v2361_v62, %v2361_v62  ;;  %v3477_v31 = vsel %vm12967_vm11, %v3166_v23, %v3476_v20  ;;  %v11451_v5 = vld [vmem:[#allocation2 + $0x230] ss:$12 sps:$4 sm:$0xff]   ;;  %5321 = vmatprep.mubr.bf16.mxu1 %v11507_v33  ;;  %v4093_v9 = vld [vmem:[#allocation2 + $0x284] sm:$0xf] }
 0x29d   : > { %v3848_v55 = vrot.slane %v3847_v59, 4  ;;  %v3190_v17 = vor.u32 %v3188_v58, %v3187_v29  ;;  %v2359_v1 = vmax.f32 %v2295_v51, 0.0  ;;  %3478 = vst [vmem:[#allocation2 + $0x258] sm:$0xf] %v3477_v31  ;;  %v11452_v54 = vld [vmem:[#allocation2 + $0x248] ss:$12 sps:$4 sm:$0xff]   ;;  %10981 = vmatprep.mubr.bf16.mxu0 %v11451_v5  ;;  %v2132_v31 = vpop.f32.mrf.mxu0 }
 0x29e   : > { %v3859_v35 = vsel %vm12980_vm12, %v3857_v12, %v3858_v32  ;;  %v3861_v37 = vor.u32 %v3860_v11, %v3858_v32  ;;  %v3169_v14 = vshrl.u32 %v10010_v16, 16  ;;  %v3172_v0 = vshll.u32 %v10010_v16, 16  ;;  %3625 = vst [vmem:[#allocation2 + $0x268] sm:$0xf] %v10010_v16  ;;  %3630 = vst [vmem:[#allocation2 + $0x2a4] sm:$0xf] %v10015_v41  ;;  %10982 = vmatmul.mubr.bf16.gmra.mxu0 %v11452_v54 }
 0x29f   : > { %v3191_v36 = vsel %vm12990_vm13, %v3183_v7, %v3190_v17  ;;  %4092 = vst [vmem:[#allocation2 + $0x278] sm:$0xf] %v3859_v35  ;;  %v3209_v42 = vshrl.u32 %v10015_v41, 16  ;;  %v3212_v27 = vshll.u32 %v10015_v41, 16  ;;  %v10013_v19 = vpack.c.bf16 %v2359_v1, %v2359_v1  ;;  %v2622_v26 = vld [vmem:[#allocation2 + $0x2b4] sm:$0x8] }
 0x2a0   : > { %3483 = vst [vmem:[#allocation2 + $0x27c] sm:$0xf] %v3191_v36  ;;  %v3862_v47 = vrot.slane %v3861_v37, 4  ;;  %v3171_v12 = vrot.slane %v3169_v14, 7  ;;  %v3849_v43 = vrot.slane %v3172_v0, 5  ;;  %v3851_v57 = vrot.slane %v3169_v14, 4 }
 0x2a1   : > { %v13568_v13 = vrot.slane %v3209_v42, 7  ;;  %v3872_v4 = vrot.slane %v3209_v42, 4  ;;  %v3873_v39 = vrot.slane %v3212_v27, 5  ;;  %v3193_v25 = vshrl.u32 %v10013_v19, 16  ;;  %3628 = vst [vmem:[#allocation2 + $0x28c] sm:$0xf] %v10013_v19 }
 0x2a2   : > { %v11505_v7 = vld [vmem:[#allocation2 + $0x210] ss:$12 sps:$4 sm:$0xff]   ;;  %v4094_v20 = vsel %vm13001_vm14, %v3862_v47, %v4093_v9  ;;  %v3174_v21 = vor.u32 %v3172_v0, %v3171_v12  ;;  %v3850_v49 = vsel %vm12980_vm12, %v3848_v55, %v3849_v43  ;;  %v3852_v18 = vor.u32 %v3851_v57, %v3849_v43  ;;  %v3488_v53 = vld [vmem:[#allocation2 + $0x2a0] sm:$0xf]  ;;  %v4089_v30 = vld [vmem:[#allocation2 + $0x26c] sm:$0xf] }
 0x2a3   : > { %v2619_v28 = vld [vmem:[#allocation2 + $0x29c] sm:$0x8]  ;;  %4095 = vst [vmem:[#allocation2 + $0x284] sm:$0xf] %v4094_v20  ;;  %4088 = vst [vmem:[#allocation2 + $0x260] sm:$0xf] %v3850_v49  ;;  %v3214_v38 = vor.u32 %v3212_v27, %v13568_v13  ;;  %v3874_v45 = vor.u32 %v3873_v39, %v3872_v4  ;;  %5322 = vmatmul.mubr.bf16.gmra.mxu1 %v11505_v7  ;;  %v2227_v41 = vadd.f32 %v13516_v44, %v12908_v10 }
 0x2a4   : > { %v3215_v63 = vrot.slane %v13568_v13, 4  ;;  %v13576_v48 = vrot.slane %v3193_v25, 7  ;;  %v2517_v58 = vld [vmem:[#allocation2 + $0x2d0] sm:$0x1]  ;;  %v11513_v2 = vld [vmem:[#allocation2 + $0x22c] ss:$12 sps:$4 sm:$0xff]   ;;  %v3175_v62 = vsel %vm12990_vm13, %v3167_v50, %v3174_v21  ;;  %v2225_v35 = vadd.f32 %v13535_v40, %v12912_v34 }
 0x2a5   : > { %v3853_v51 = vrot.slane %v3852_v18, 4  ;;  %v3196_v23 = vshll.u32 %v10013_v19, 16  ;;  %v3484_v59 = vld [vmem:[#allocation2 + $0x288] sm:$0xf]  ;;  %v3863_v29 = vrot.slane %v3193_v25, 4  ;;  %v3489_v32 = vsel %vm12967_vm11, %v3214_v38, %v3488_v53  ;;  %5329 = vmatprep.mubr.bf16.mxu1 %v11513_v2  ;;  %v14947_v36 = vld [vmem:[#allocation38_spill] sm:$0xff]  ;;  %v10919_v19 = vpop.f32.mrf.mxu0 }
 0x2a6   : > { %v2514_v33 = vld [vmem:[#allocation2 + $0x2b8] sm:$0x1]  ;;  %3479 = vst [vmem:[#allocation2 + $0x264] sm:$0xf] %v3175_v62  ;;  %v13582_v11 = vrot.slane %v3874_v45, 4  ;;  %v3199_v16 = vrot.slane %v13576_v48, 4  ;;  %v2298_v5 = vadd.f32 %v13438_v60, %v2227_v41  ;;  %v2230_v44 = vadd.f32 %v13553_v8, %v12916_v46 }
 0x2a7   : > { %v4090_v50 = vsel %vm13001_vm14, %v3853_v51, %v4089_v30  ;;  %3490 = vst [vmem:[#allocation2 + $0x2a0] sm:$0xf] %v3489_v32  ;;  %v3198_v55 = vor.u32 %v3196_v23, %v13576_v48  ;;  %v3864_v17 = vrot.slane %v3196_v23, 5  ;;  %v2623_v1 = vsel %vm12389_vm5, 0, %v2622_v26  ;;  %v2628_v37 = vld [vmem:[#allocation2 + $0x2e4] sm:$0x8]  ;;  %v13631_v32 = vpop.f32.mrf.mxu0 }
 0x2a8   : > { %4091 = vst [vmem:[#allocation2 + $0x26c] sm:$0xf] %v4090_v50  ;;  %2624 = vst [vmem:[#allocation2 + $0x2b4] sm:$0x8] %v2623_v1  ;;  %v2620_v10 = vsel %vm12389_vm5, 0, %v2619_v28  ;;  %v2518_v54 = vsel %vm12368_vm2, 0, %v2517_v58  ;;  %v2228_v42 = vadd.f32 %v13560_v6, %v14947_v36  ;;  %v2296_v27 = vadd.f32 %v13438_v60, %v2225_v35 }
 0x2a9   : > { %v2625_v9 = vld [vmem:[#allocation2 + $0x2cc] sm:$0x8]  ;;  %v3485_v14 = vsel %vm12967_vm11, %v3198_v55, %v3484_v59  ;;  %v3865_v0 = vor.u32 %v3864_v17, %v3863_v29  ;;  %2621 = vst [vmem:[#allocation2 + $0x29c] sm:$0x8] %v2620_v10  ;;  %v11511_v34 = vld [vmem:[#allocation2 + $0x228] ss:$12 sps:$4 sm:$0xff]   ;;  %v2301_v46 = vadd.f32 %v13438_v60, %v2230_v44 }
 0x2aa   : > { %3486 = vst [vmem:[#allocation2 + $0x288] sm:$0xf] %v3485_v14  ;;  %v2362_v40 = vmax.f32 %v2298_v5, 0.0  ;;  %2519 = vst [vmem:[#allocation2 + $0x2d0] sm:$0x1] %v2518_v54  ;;  %v2515_v8 = vsel %vm12368_vm2, 0, %v2514_v33  ;;  %v2299_v12 = vadd.f32 %v13438_v60, %v2228_v42 }
 0x2ab   : > { %v13609_v47 = vrot.slane %v3865_v0, 4  ;;  %2516 = vst [vmem:[#allocation2 + $0x2b8] sm:$0x1] %v2515_v8  ;;  %v14948_v43 = vld [vmem:[#allocation39_spill] sm:$0xff]  ;;  %v2629_v6 = vsel %vm12389_vm5, 0, %v2628_v37  ;;  %v2360_v39 = vmax.f32 %v2296_v27, 0.0  ;;  %5330 = vmatmul.mubr.bf16.gmra.mxu1 %v11511_v34 }
 0x2ac   : > { %v2231_v57 = vadd.f32 %v10916_v52, %v14948_v43  ;;  %v10016_v4 = vpack.c.bf16 %v2362_v40, %v2362_v40  ;;  %v2365_v25 = vmax.f32 %v2301_v46, 0.0  ;;  %2630 = vst [vmem:[#allocation2 + $0x2e4] sm:$0x8] %v2629_v6  ;;  %v14949_v26 = vld [vmem:[#allocation40_spill] sm:$0xff]  ;;  %v2363_v21 = vmax.f32 %v2299_v12, 0.0  ;;  %v14950_v53 = vld [vmem:[#allocation41_spill] sm:$0xff]  ;;  %v13644_v46 = vpop.f32.mrf.mxu0 }
 0x2ad   : > { %v2229_v7 = vadd.f32 %v2132_v31, %v14949_v26  ;;  %v11520_v20 = vld [vmem:[#allocation2 + $0x244] ss:$12 sps:$4 sm:$0xff]   ;;  %v2626_v18 = vsel %vm12389_vm5, 0, %v2625_v9  ;;  %v2234_v28 = vadd.f32 %v10919_v19, %v14950_v53  ;;  %v10014_v38 = vpack.c.bf16 %v2360_v39, %v2360_v39  ;;  %v11518_v1 = vld [vmem:[#allocation2 + $0x240] ss:$12 sps:$4 sm:$0xff]  }
 0x2ae   : > { %v13617_v49 = vadd.f32 %v13438_v60, %v2231_v57  ;;  %v3217_v52 = vshrl.u32 %v10016_v4, 16  ;;  %v3220_v30 = vshll.u32 %v10016_v4, 16  ;;  %3631 = vst [vmem:[#allocation2 + $0x2b0] sm:$0xf] %v10016_v4  ;;  %v10019_v45 = vpack.c.bf16 %v2365_v25, %v2365_v25  ;;  %2627 = vst [vmem:[#allocation2 + $0x2cc] sm:$0x8] %v2626_v18  ;;  %5337 = vmatprep.mubr.bf16.mxu1 %v11520_v20 }
 0x2af   : > { %v13622_v58 = vpack.c.bf16 %v2363_v21, %v2363_v21  ;;  %v13626_v62 = vadd.f32 %v13438_v60, %v2229_v7  ;;  %v13629_v51 = vadd.f32 %v13438_v60, %v2234_v28  ;;  %v3201_v33 = vshrl.u32 %v10014_v38, 16  ;;  %3629 = vst [vmem:[#allocation2 + $0x298] sm:$0xf] %v10014_v38  ;;  %v11460_v17 = vld [vmem:[#allocation2 + $0x278] ss:$12 sps:$4 sm:$0xff]   ;;  %v11542_v8 = vld [vmem:[#allocation9 + $0x88] sm:$0xff]   ;;  %v13667_v28 = vpop.f32.mrf.mxu0 }
 0x2b0   : > { %v2366_v2 = vmax.f32 %v13617_v49, 0.0  ;;  %v3219_v23 = vrot.slane %v3217_v52, 7  ;;  %v3876_v59 = vrot.slane %v3220_v30, 5  ;;  %v3878_v29 = vrot.slane %v3217_v52, 4  ;;  %3634 = vst [vmem:[#allocation2 + $0x2d4] sm:$0xf] %v10019_v45  ;;  %11017 = vmatprep.subr.bf16.mxu1 %v11542_v8 }
 0x2b1   : > { %v3204_v41 = vshll.u32 %v10014_v38, 16  ;;  %v3241_v31 = vshrl.u32 %v10019_v45, 16  ;;  %v3244_v50 = vshll.u32 %v10019_v45, 16  ;;  %v3225_v55 = vshrl.u32 %v13622_v58, 16  ;;  %3632 = vst [vmem:[#allocation2 + $0x2bc] sm:$0xf] %v13622_v58  ;;  %11018 = vmatpush3.bf16.msra.mxu1 %v11542_v8 }
 0x2b2   : > { %v3222_v5 = vor.u32 %v3220_v30, %v3219_v23  ;;  %v3877_v60 = vsel %vm12980_vm12, %v13582_v11, %v3876_v59  ;;  %v3879_v35 = vor.u32 %v3878_v29, %v3876_v59  ;;  %v4101_v10 = vld [vmem:[#allocation2 + $0x2b4] sm:$0xf]  ;;  %v3203_v44 = vrot.slane %v3201_v33, 7  ;;  %v11459_v37 = vld [vmem:[#allocation2 + $0x260] ss:$12 sps:$4 sm:$0xff]  }
 0x2b3   : > { %v11526_v9 = vld [vmem:[#allocation2 + $0x25c] ss:$12 sps:$4 sm:$0xff]   ;;  %4100 = vst [vmem:[#allocation2 + $0x2a8] sm:$0xf] %v3877_v60  ;;  %v3867_v14 = vrot.slane %v3204_v41, 5  ;;  %v3869_v0 = vrot.slane %v3201_v33, 4  ;;  %10985 = vmatprep.mubr.bf16.mxu0 %v11459_v37  ;;  %5338 = vmatmul.mubr.bf16.gmra.mxu1 %v11518_v1  ;;  %v10020_v18 = vpack.c.bf16 %v2366_v2, %v2366_v2 }
 0x2b4   : > { %v13638_v54 = vrot.slane %v3241_v31, 7  ;;  %v3496_v36 = vld [vmem:[#allocation2 + $0x2d0] sm:$0xf]  ;;  %v3890_v42 = vrot.slane %v3241_v31, 4  ;;  %v3223_v34 = vsel %vm12990_vm13, %v3215_v63, %v3222_v5  ;;  %v3880_v40 = vrot.slane %v3879_v35, 4  ;;  %10986 = vmatmul.mubr.bf16.gmra.mxu0 %v11460_v17  ;;  %5345 = vmatprep.mubr.bf16.mxu1 %v11526_v9  ;;  %v13679_v5 = vpop.f32.mrf.mxu0 }
 0x2b5   : > { %v3206_v27 = vor.u32 %v3204_v41, %v3203_v44  ;;  %v3891_v11 = vrot.slane %v3244_v50, 5  ;;  %3491 = vst [vmem:[#allocation2 + $0x2ac] sm:$0xf] %v3223_v34  ;;  %v3868_v19 = vsel %vm12980_vm12, %v13609_v47, %v3867_v14  ;;  %v3870_v12 = vor.u32 %v3869_v0, %v3867_v14  ;;  %v4097_v6 = vld [vmem:[#allocation2 + $0x29c] sm:$0xf]  ;;  %v14951_v41 = vld [vmem:[#allocation42_spill] sm:$0xff] }
 0x2b6   : > { %v3246_v43 = vor.u32 %v3244_v50, %v13638_v54  ;;  %v3247_v13 = vrot.slane %v13638_v54, 4  ;;  %v4102_v63 = vsel %vm13001_vm14, %v3880_v40, %v4101_v10  ;;  %4096 = vst [vmem:[#allocation2 + $0x290] sm:$0xf] %v3868_v19  ;;  %v13657_v39 = vrot.slane %v3225_v55, 7  ;;  %v2523_v48 = vld [vmem:[#allocation2 + $0x300] sm:$0x1] }
 0x2b7   : > { %v3207_v57 = vsel %vm12990_vm13, %v3199_v16, %v3206_v27  ;;  %v3892_v4 = vor.u32 %v3891_v11, %v3890_v42  ;;  %4103 = vst [vmem:[#allocation2 + $0x2b4] sm:$0xf] %v4102_v63  ;;  %v3871_v47 = vrot.slane %v3870_v12, 4  ;;  %v3228_v26 = vshll.u32 %v13622_v58, 16  ;;  %v3492_v21 = vld [vmem:[#allocation2 + $0x2b8] sm:$0xf] }
 0x2b8   : > { %3487 = vst [vmem:[#allocation2 + $0x294] sm:$0xf] %v3207_v57  ;;  %v3497_v25 = vsel %vm12967_vm11, %v3246_v43, %v3496_v36  ;;  %v3881_v7 = vrot.slane %v3225_v55, 4  ;;  %v3231_v20 = vrot.slane %v13657_v39, 4  ;;  %v2364_v53 = vmax.f32 %v13626_v62, 0.0 }
 0x2b9   : > { %3498 = vst [vmem:[#allocation2 + $0x2d0] sm:$0xf] %v3497_v25  ;;  %v3893_v16 = vrot.slane %v3892_v4, 4  ;;  %v4098_v52 = vsel %vm13001_vm14, %v3871_v47, %v4097_v6  ;;  %v3230_v30 = vor.u32 %v3228_v26, %v13657_v39  ;;  %v3882_v38 = vrot.slane %v3228_v26, 5  ;;  %3635 = vst [vmem:[#allocation2 + $0x2e0] sm:$0xf] %v10020_v18  ;;  %v2161_v6 = vpop.f32.mrf.mxu0 }
 0x2ba   : > { %v2369_v45 = vmax.f32 %v13629_v51, 0.0  ;;  %4099 = vst [vmem:[#allocation2 + $0x29c] sm:$0xf] %v4098_v52  ;;  %v3249_v58 = vshrl.u32 %v10020_v18, 16  ;;  %v3252_v23 = vshll.u32 %v10020_v18, 16  ;;  %v10018_v59 = vpack.c.bf16 %v2364_v53, %v2364_v53 }
 0x2bb   : > { %v2524_v49 = vsel %vm12368_vm2, 0, %v2523_v48  ;;  %v11532_v2 = vld [vmem:[#allocation2 + $0x274] ss:$12 sps:$4 sm:$0xff]   ;;  %v3493_v62 = vsel %vm12967_vm11, %v3230_v30, %v3492_v21  ;;  %v3883_v29 = vor.u32 %v3882_v38, %v3881_v7  ;;  %v2232_v31 = vadd.f32 %v13631_v32, %v14951_v41  ;;  %v11524_v50 = vld [vmem:[#allocation2 + $0x258] ss:$12 sps:$4 sm:$0xff]  }
 0x2bc   : > { %2525 = vst [vmem:[#allocation2 + $0x300] sm:$0x1] %v2524_v49  ;;  %v10023_v33 = vpack.c.bf16 %v2369_v45, %v2369_v45  ;;  %3494 = vst [vmem:[#allocation2 + $0x2b8] sm:$0xf] %v3493_v62  ;;  %v3251_v51 = vrot.slane %v3249_v58, 7  ;;  %v3894_v55 = vrot.slane %v3252_v23, 5  ;;  %5346 = vmatmul.mubr.bf16.gmra.mxu1 %v11524_v50 }
 0x2bd   : > { %v3896_v17 = vrot.slane %v3249_v58, 4  ;;  %v3233_v1 = vshrl.u32 %v10018_v59, 16  ;;  %3633 = vst [vmem:[#allocation2 + $0x2c8] sm:$0xf] %v10018_v59  ;;  %v3884_v60 = vrot.slane %v3883_v29, 4  ;;  %v3236_v35 = vshll.u32 %v10018_v59, 16  ;;  %5353 = vmatprep.mubr.bf16.mxu1 %v11532_v2 }
 0x2be   : > { %v3273_v10 = vshrl.u32 %v10023_v33, 16  ;;  %v3276_v44 = vshll.u32 %v10023_v33, 16  ;;  %3638 = vst [vmem:[#allocation2 + $0x304] sm:$0xf] %v10023_v33  ;;  %v3254_v37 = vor.u32 %v3252_v23, %v3251_v51  ;;  %v3895_v9 = vsel %vm12980_vm12, %v3893_v16, %v3894_v55  ;;  %v2520_v0 = vld [vmem:[#allocation2 + $0x2e8] sm:$0x1]  ;;  %v10924_v33 = vpop.f32.mrf.mxu0 }
 0x2bf   : > { %v3897_v32 = vor.u32 %v3896_v17, %v3894_v55  ;;  %v3235_v14 = vrot.slane %v3233_v1, 7  ;;  %4108 = vst [vmem:[#allocation2 + $0x2d8] sm:$0xf] %v3895_v9  ;;  %v4109_v36 = vld [vmem:[#allocation2 + $0x2e4] sm:$0xf]  ;;  %v3885_v42 = vrot.slane %v3236_v35, 5 }
 0x2c0   : > { %v3887_v34 = vrot.slane %v3233_v1, 4  ;;  %v13683_v40 = vrot.slane %v3273_v10, 7  ;;  %v3908_v27 = vrot.slane %v3273_v10, 4  ;;  %v2634_v11 = vld [vmem:[#allocation2 + $0x314] sm:$0x8]  ;;  %v3255_v8 = vsel %vm12990_vm13, %v3247_v13, %v3254_v37  ;;  %v14953_v62 = vld [vmem:[#allocation45_spill] sm:$0xff] }
 0x2c1   : > { %v3898_v19 = vrot.slane %v3897_v32, 4  ;;  %v3238_v12 = vor.u32 %v3236_v35, %v3235_v14  ;;  %v4105_v43 = vld [vmem:[#allocation2 + $0x2cc] sm:$0xf]  ;;  %v3909_v63 = vrot.slane %v3276_v44, 5  ;;  %v2631_v57 = vld [vmem:[#allocation2 + $0x2fc] sm:$0x8]  ;;  %v3886_v4 = vsel %vm12980_vm12, %v3884_v60, %v3885_v42 }
 0x2c2   : > { %3499 = vst [vmem:[#allocation2 + $0x2dc] sm:$0xf] %v3255_v8  ;;  %v3888_v47 = vor.u32 %v3887_v34, %v3885_v42  ;;  %v3278_v25 = vor.u32 %v3276_v44, %v13683_v40  ;;  %v3279_v26 = vrot.slane %v13683_v40, 4  ;;  %v2529_v7 = vld [vmem:[#allocation2 + $0x330] sm:$0x1]  ;;  %v2635_v2 = vsel %vm12389_vm5, 0, %v2634_v11 }
 0x2c3   : > { %v11467_v54 = vld [vmem:[#allocation2 + $0x290] ss:$12 sps:$4 sm:$0xff]   ;;  %v4110_v13 = vsel %vm13001_vm14, %v3898_v19, %v4109_v36  ;;  %v3239_v16 = vsel %vm12990_vm13, %v3231_v20, %v3238_v12  ;;  %4104 = vst [vmem:[#allocation2 + $0x2c0] sm:$0xf] %v3886_v4  ;;  %v3504_v21 = vld [vmem:[#allocation2 + $0x300] sm:$0xf]  ;;  %v3910_v18 = vor.u32 %v3909_v63, %v3908_v27  ;;  %v2233_v29 = vadd.f32 %v13667_v28, %v14953_v62 }
 0x2c4   : > { %v11530_v48 = vld [vmem:[#allocation2 + $0x270] ss:$12 sps:$4 sm:$0xff]   ;;  %v13702_v53 = vld [vmem:[%s14727_s3] ss:$0 sm:$0xff]  ;;  %v2526_v30 = vld [vmem:[#allocation2 + $0x318] sm:$0x1]  ;;  %v3505_v39 = vsel %vm12967_vm11, %v3278_v25, %v3504_v21  ;;  %10989 = vmatprep.mubr.bf16.mxu0 %v11467_v54 }
 0x2c5   : > { %v2303_v52 = vadd.f32 %v13702_v53, %v2232_v31  ;;  %v11468_v38 = vld [vmem:[#allocation2 + $0x2a8] ss:$12 sps:$4 sm:$0xff]   ;;  %4111 = vst [vmem:[#allocation2 + $0x2e4] sm:$0xf] %v4110_v13  ;;  %3495 = vst [vmem:[#allocation2 + $0x2c4] sm:$0xf] %v3239_v16  ;;  %5354 = vmatmul.mubr.bf16.gmra.mxu1 %v11530_v48  ;;  %v2304_v28 = vadd.f32 %v13702_v53, %v2233_v29 }
 0x2c6   : > { %v3889_v45 = vrot.slane %v3888_v47, 4  ;;  %v2521_v20 = vsel %vm12368_vm2, 0, %v2520_v0  ;;  %v14952_v58 = vld [vmem:[#allocation44_spill] sm:$0xff]  ;;  %3506 = vst [vmem:[#allocation2 + $0x300] sm:$0xf] %v3505_v39  ;;  %v13711_v59 = vrot.slane %v3910_v18, 4  ;;  %10990 = vmatmul.mubr.bf16.gmra.mxu0 %v11468_v38 }
 0x2c7   : > { %v2235_v23 = vadd.f32 %v13644_v46, %v14952_v58  ;;  %v2367_v49 = vmax.f32 %v2303_v52, 0.0  ;;  %2522 = vst [vmem:[#allocation2 + $0x2e8] sm:$0x1] %v2521_v20  ;;  %v11538_v41 = vld [vmem:[#allocation2 + $0x28c] ss:$12 sps:$4 sm:$0xff]   ;;  %v2632_v50 = vsel %vm12389_vm5, 0, %v2631_v57 }
 0x2c8   : > { %v4106_v31 = vsel %vm13001_vm14, %v3889_v45, %v4105_v43  ;;  %2636 = vst [vmem:[#allocation2 + $0x314] sm:$0x8] %v2635_v2  ;;  %v14954_v51 = vld [vmem:[#allocation46_spill] sm:$0xff]  ;;  %2633 = vst [vmem:[#allocation2 + $0x2fc] sm:$0x8] %v2632_v50  ;;  %v2530_v60 = vsel %vm12368_vm2, 0, %v2529_v7  ;;  %5361 = vmatprep.mubr.bf16.mxu1 %v11538_v41  ;;  %v2164_v2 = vpop.f32.mrf.mxu0 }
 0x2c9   : > { %v2306_v46 = vadd.f32 %v13702_v53, %v2235_v23  ;;  %v2238_v55 = vadd.f32 %v13679_v5, %v14954_v51  ;;  %v2640_v17 = vld [vmem:[#allocation2 + $0x344] sm:$0x8]  ;;  %4107 = vst [vmem:[#allocation2 + $0x2cc] sm:$0xf] %v4106_v31  ;;  %v10021_v1 = vpack.c.bf16 %v2367_v49, %v2367_v49  ;;  %v14955_v35 = vld [vmem:[#allocation47_spill] sm:$0xff]  ;;  %v2527_v5 = vsel %vm12368_vm2, 0, %v2526_v30 }
 0x2ca   : > { %v2236_v10 = vadd.f32 %v2161_v6, %v14955_v35  ;;  %2531 = vst [vmem:[#allocation2 + $0x330] sm:$0x1] %v2530_v60  ;;  %v14956_v9 = vld [vmem:[#allocation48_spill] sm:$0xff]  ;;  %v2368_v36 = vmax.f32 %v2304_v28, 0.0  ;;  %2528 = vst [vmem:[#allocation2 + $0x318] sm:$0x1] %v2527_v5  ;;  %v13738_v6 = vpop.f32.mrf.mxu1  ;;  %v13752_v60 = vpop.f32.mrf.mxu0 }
 0x2cb   : > { %v2370_v44 = vmax.f32 %v2306_v46, 0.0  ;;  %v2309_v37 = vadd.f32 %v13702_v53, %v2238_v55  ;;  %v2239_v32 = vadd.f32 %v10924_v33, %v14956_v9  ;;  %v3257_v14 = vshrl.u32 %v10021_v1, 16  ;;  %3636 = vst [vmem:[#allocation2 + $0x2ec] sm:$0xf] %v10021_v1  ;;  %v11536_v19 = vld [vmem:[#allocation2 + $0x288] ss:$12 sps:$4 sm:$0xff]  }
 0x2cc   : > { %v3260_v0 = vshll.u32 %v10021_v1, 16  ;;  %v2307_v42 = vadd.f32 %v13702_v53, %v2236_v10  ;;  %v2641_v8 = vsel %vm12389_vm5, 0, %v2640_v17  ;;  %v10022_v57 = vpack.c.bf16 %v2368_v36, %v2368_v36  ;;  %v11545_v18 = vld [vmem:[#allocation2 + $0x2a4] ss:$12 sps:$4 sm:$0xff]   ;;  %v13743_v39 = vpop.f32.mrf.mxu1  ;;  %v11543_v9 = vld [vmem:[#allocation2 + $0x2a0] ss:$12 sps:$4 sm:$0xff]  }
 0x2cd   : > { %v10024_v34 = vpack.c.bf16 %v2370_v44, %v2370_v44  ;;  %v2373_v27 = vmax.f32 %v2309_v37, 0.0  ;;  %v13734_v11 = vadd.f32 %v13702_v53, %v2239_v32  ;;  %v3259_v12 = vrot.slane %v3257_v14, 7  ;;  %2642 = vst [vmem:[#allocation2 + $0x344] sm:$0x8] %v2641_v8  ;;  %5362 = vmatmul.mubr.bf16.gmra.mxu1 %v11536_v19  ;;  %v11475_v28 = vld [vmem:[#allocation2 + $0x2d8] ss:$12 sps:$4 sm:$0xff]  }
 0x2ce   : > { %v3899_v43 = vrot.slane %v3257_v14, 4  ;;  %v3900_v63 = vrot.slane %v3260_v0, 5  ;;  %v3500_v4 = vld [vmem:[#allocation2 + $0x2e8] sm:$0xf]  ;;  %v2371_v54 = vmax.f32 %v2307_v42, 0.0  ;;  %v3265_v21 = vshrl.u32 %v10022_v57, 16  ;;  %5369 = vmatprep.mubr.bf16.mxu1 %v11545_v18  ;;  %v5173_v46 = vpop.f32.mrf.mxu1 }
 0x2cf   : > { %v3281_v47 = vshrl.u32 %v10024_v34, 16  ;;  %v3284_v25 = vshll.u32 %v10024_v34, 16  ;;  %3639 = vst [vmem:[#allocation2 + $0x310] sm:$0xf] %v10024_v34  ;;  %v13740_v7 = vpack.c.bf16 %v2373_v27, %v2373_v27  ;;  %v3262_v48 = vor.u32 %v3260_v0, %v3259_v12  ;;  %3637 = vst [vmem:[#allocation2 + $0x2f8] sm:$0xf] %v10022_v57 }
 0x2d0   : > { %v3263_v13 = vrot.slane %v3259_v12, 4  ;;  %v3901_v16 = vor.u32 %v3900_v63, %v3899_v43  ;;  %v3268_v45 = vshll.u32 %v10022_v57, 16  ;;  %v3267_v23 = vrot.slane %v3265_v21, 7  ;;  %v4117_v41 = vld [vmem:[#allocation2 + $0x314] sm:$0xf]  ;;  %v13760_v32 = vpop.f32.mrf.mxu1  ;;  %v11564_v42 = vld [vmem:[#allocation9 + $0x80] sm:$0xff]   ;;  %v5460_v12 = vpop.f32.mrf.mxu0 }
 0x2d1   : > { %v3283_v52 = vrot.slane %v3281_v47, 7  ;;  %v3912_v30 = vrot.slane %v3284_v25, 5  ;;  %v3914_v38 = vrot.slane %v3281_v47, 4  ;;  %3642 = vst [vmem:[#allocation2 + $0x334] sm:$0xf] %v13740_v7  ;;  %v3501_v20 = vsel %vm12967_vm11, %v3262_v48, %v3500_v4  ;;  %v14957_v63 = vld [vmem:[#allocation21_spill] sm:$0xff]  ;;  %11019 = vmatprep.subr.bf16.mxu1 %v11564_v42 }
 0x2d2   : > { %v3902_v58 = vrot.slane %v3901_v16, 4  ;;  %v3905_v49 = vrot.slane %v3265_v21, 4  ;;  %3502 = vst [vmem:[#allocation2 + $0x2e8] sm:$0xf] %v3501_v20  ;;  %v3903_v31 = vrot.slane %v3268_v45, 5  ;;  %v3270_v50 = vor.u32 %v3268_v45, %v3267_v23  ;;  %v5176_v43 = vpop.f32.mrf.mxu1  ;;  %11020 = vmatpush3.bf16.msra.mxu1 %v11564_v42  ;;  %v10944_v23 = vpop.f32.mrf.mxu0 }
 0x2d3   : > { %v3286_v62 = vor.u32 %v3284_v25, %v3283_v52  ;;  %v3913_v29 = vsel %vm12980_vm12, %v13711_v59, %v3912_v30  ;;  %v3915_v33 = vor.u32 %v3914_v38, %v3912_v30  ;;  %v3305_v51 = vshrl.u32 %v13740_v7, 16  ;;  %v11474_v1 = vld [vmem:[#allocation2 + $0x2c0] ss:$12 sps:$4 sm:$0xff]   ;;  %v4113_v37 = vld [vmem:[#allocation2 + $0x2fc] sm:$0xf] }
 0x2d4   : > { %4116 = vst [vmem:[#allocation2 + $0x308] sm:$0xf] %v3913_v29  ;;  %v3308_v55 = vshll.u32 %v13740_v7, 16  ;;  %v10025_v17 = vpack.c.bf16 %v2371_v54, %v2371_v54  ;;  %v3904_v10 = vsel %vm12980_vm12, %v3902_v58, %v3903_v31  ;;  %v3906_v44 = vor.u32 %v3905_v49, %v3903_v31  ;;  %v3512_v5 = vld [vmem:[#allocation2 + $0x330] sm:$0xf]  ;;  %10993 = vmatprep.mubr.bf16.mxu0 %v11474_v1  ;;  %v5179_v18 = vpop.f32.mrf.mxu1 }
 0x2d5   : > { %v3287_v59 = vsel %vm12990_vm13, %v3279_v26, %v3286_v62  ;;  %v3916_v35 = vrot.slane %v3915_v33, 4  ;;  %v3271_v14 = vsel %vm12990_vm13, %v3263_v13, %v3270_v50  ;;  %4112 = vst [vmem:[#allocation2 + $0x2f0] sm:$0xf] %v3904_v10  ;;  %v13764_v0 = vrot.slane %v3305_v51, 7  ;;  %v2637_v26 = vld [vmem:[#allocation2 + $0x32c] sm:$0x8]  ;;  %10994 = vmatmul.mubr.bf16.gmra.mxu0 %v11475_v28  ;;  %5370 = vmatmul.mubr.bf16.gmra.mxu1 %v11543_v9 }
 0x2d6   : > { %3507 = vst [vmem:[#allocation2 + $0x30c] sm:$0xf] %v3287_v59  ;;  %v3926_v40 = vrot.slane %v3305_v51, 4  ;;  %v3927_v36 = vrot.slane %v3308_v55, 5  ;;  %3640 = vst [vmem:[#allocation2 + $0x31c] sm:$0xf] %v10025_v17  ;;  %v1554_v57 = vadd.f32 %v13738_v6, %v14957_v63  ;;  %v5181_v49 = vpop.f32.mrf.mxu1  ;;  %v13790_v46 = vadd.f32 %v5460_v12, %v13743_v39 }
 0x2d7   : > { %v4118_v34 = vsel %vm13001_vm14, %v3916_v35, %v4117_v41  ;;  %3503 = vst [vmem:[#allocation2 + $0x2f4] sm:$0xf] %v3271_v14  ;;  %v3907_v27 = vrot.slane %v3906_v44, 4  ;;  %v3289_v8 = vshrl.u32 %v10025_v17, 16  ;;  %v3292_v19 = vshll.u32 %v10025_v17, 16  ;;  %v13781_v62 = vld [vmem:[#allocation2] sm:$0xff]  ;;  %v13796_v35 = vpop.f32.mrf.mxu0 }
 0x2d8   : > { %4119 = vst [vmem:[#allocation2 + $0x314] sm:$0xf] %v4118_v34  ;;  %v3310_v4 = vor.u32 %v3308_v55, %v13764_v0  ;;  %v3928_v47 = vor.u32 %v3927_v36, %v3926_v40  ;;  %v2374_v25 = vmax.f32 %v13734_v11, 0.0  ;;  %v11551_v7 = vld [vmem:[#allocation2 + $0x2bc] ss:$12 sps:$4 sm:$0xff]   ;;  %v2237_v38 = vadd.f32 %v2164_v2, %v1554_v57  ;;  %7783 = vmatprep.subr.bf16.mxu1 %v13781_v62  ;;  %v5182_v51 = vpop.f32.mrf.mxu1 }
 0x2d9   : > { %v4114_v54 = vsel %vm13001_vm14, %v3907_v27, %v4113_v37  ;;  %v13774_v48 = vrot.slane %v3289_v8, 7  ;;  %v3917_v13 = vrot.slane %v3289_v8, 4  ;;  %v3918_v16 = vrot.slane %v3292_v19, 5  ;;  %v2427_v21 = vld [vmem:[#allocation2] sm:$0x1]  ;;  %5377 = vmatprep.mubr.bf16.mxu1 %v11551_v7  ;;  %v10947_v8 = vpop.f32.mrf.mxu0 }
 0x2da   : > { %4115 = vst [vmem:[#allocation2 + $0x2fc] sm:$0xf] %v4114_v54  ;;  %v3513_v6 = vsel %vm12967_vm11, %v3310_v4, %v3512_v5  ;;  %v3508_v52 = vld [vmem:[#allocation2 + $0x318] sm:$0xf]  ;;  %v10028_v30 = vpack.c.bf16 %v2374_v25, %v2374_v25  ;;  %v3929_v11 = vrot.slane %v3928_v47, 4  ;;  %v2638_v58 = vsel %vm12389_vm5, 0, %v2637_v26  ;;  %v5184_v44 = vpop.f32.mrf.mxu1 }
 0x2db   : > { %3514 = vst [vmem:[#allocation2 + $0x330] sm:$0xf] %v3513_v6  ;;  %v3294_v45 = vor.u32 %v3292_v19, %v13774_v48  ;;  %v3919_v20 = vor.u32 %v3918_v16, %v3917_v13  ;;  %v2308_v2 = vadd.f32 %v13702_v53, %v2237_v38  ;;  %2639 = vst [vmem:[#allocation2 + $0x32c] sm:$0x8] %v2638_v58  ;;  %v2428_v41 = vsel %vm12368_vm2, 0, %v2427_v21  ;;  %v5476_v47 = vpop.f32.mrf.mxu0 }
 0x2dc   : > { %v3313_v29 = vshrl.u32 %v10028_v30, 16  ;;  %v3316_v33 = vshll.u32 %v10028_v30, 16  ;;  %3643 = vst [vmem:[#allocation2 + $0x340] sm:$0xf] %v10028_v30  ;;  %2429 = vst [vmem:[#allocation2] sm:$0x1] %v2428_v41  ;;  %v13793_v50 = vadd.f32 %v13752_v60, %v5179_v18  ;;  %v13798_v10 = vadd.f32 %v10944_v23, %v5182_v51  ;;  %v5187_v26 = vpop.f32.mrf.mxu1 }
 0x2dd   : > { %v3509_v31 = vsel %vm12967_vm11, %v3294_v45, %v3508_v52  ;;  %v2372_v53 = vmax.f32 %v2308_v2, 0.0  ;;  %v3311_v28 = vrot.slane %v13764_v0, 4  ;;  %v3920_v59 = vrot.slane %v3919_v20, 4  ;;  %v11549_v22 = vld [vmem:[#allocation2 + $0x2b8] ss:$12 sps:$4 sm:$0xff]   ;;  %v10948_v24 = vpop.f32.mrf.mxu0 }
 0x2de   : > { %3510 = vst [vmem:[#allocation2 + $0x318] sm:$0xf] %v3509_v31  ;;  %v3315_v55 = vrot.slane %v3313_v29, 7  ;;  %v3930_v17 = vrot.slane %v3316_v33, 5  ;;  %v3932_v1 = vrot.slane %v3313_v29, 4  ;;  %5378 = vmatmul.mubr.bf16.gmra.mxu1 %v11549_v22  ;;  %v5189_v19 = vpop.f32.mrf.mxu1  ;;  %v3295_v4 = vrot.slane %v13774_v48, 4 }
 0x2df   : > { %v4125_v5 = vld [vmem:[#allocation2 + $0x344] sm:$0xf]  ;;  %v10026_v9 = vpack.c.bf16 %v2372_v53, %v2372_v53  ;;  %v11557_v14 = vld [vmem:[#allocation2 + $0x2d4] ss:$12 sps:$4 sm:$0xff]   ;;  %v13811_v16 = vadd.f32 %v5476_v47, %v5187_v26  ;;  %v11555_v21 = vld [vmem:[#allocation2 + $0x2d0] ss:$12 sps:$4 sm:$0xff]   ;;  %v13819_v23 = vpop.f32.mrf.mxu0 }
 0x2e0   : > { %v3318_v39 = vor.u32 %v3316_v33, %v3315_v55  ;;  %v3931_v60 = vsel %vm12980_vm12, %v3929_v11, %v3930_v17  ;;  %v3933_v37 = vor.u32 %v3932_v1, %v3930_v17  ;;  %v11482_v36 = vld [vmem:[#allocation2 + $0x308] ss:$12 sps:$4 sm:$0xff]   ;;  %5385 = vmatprep.mubr.bf16.mxu1 %v11557_v14  ;;  %v13807_v25 = vpop.f32.mrf.mxu1  ;;  %v11563_v48 = vld [vmem:[#allocation2 + $0x2ec] ss:$12 sps:$4 sm:$0xff]   ;;  %v11567_v41 = vld [vmem:[#allocation2 + $0x304] ss:$12 sps:$4 sm:$0xff]  }
 0x2e1   : > { %4124 = vst [vmem:[#allocation2 + $0x338] sm:$0xf] %v3931_v60  ;;  %v11481_v40 = vld [vmem:[#allocation2 + $0x2f0] ss:$12 sps:$4 sm:$0xff]   ;;  %v3297_v34 = vshrl.u32 %v10026_v9, 16  ;;  %v3300_v27 = vshll.u32 %v10026_v9, 16 }
 0x2e2   : > { %v3319_v0 = vsel %vm12990_vm13, %v3311_v28, %v3318_v39  ;;  %v3934_v42 = vrot.slane %v3933_v37, 4  ;;  %3641 = vst [vmem:[#allocation2 + $0x328] sm:$0xf] %v10026_v9  ;;  %10997 = vmatprep.mubr.bf16.mxu0 %v11481_v40  ;;  %v4121_v18 = vld [vmem:[#allocation2 + $0x32c] sm:$0xf]  ;;  %v5192_v6 = vpop.f32.mrf.mxu1  ;;  %v11574_v60 = vld [vmem:[#allocation9 + $0x238] sm:$0xff]  }
 0x2e3   : > { %3515 = vst [vmem:[#allocation2 + $0x33c] sm:$0xf] %v3319_v0  ;;  %v3299_v43 = vrot.slane %v3297_v34, 7  ;;  %v3921_v63 = vrot.slane %v3300_v27, 5  ;;  %v3923_v57 = vrot.slane %v3297_v34, 4  ;;  %10998 = vmatmul.mubr.bf16.gmra.mxu0 %v11482_v36  ;;  %v4128_v56 = vld [vmem:[#allocation2] sm:$0xff]  ;;  %11085 = vmatprep.subr.bf16.mxu0 %v11574_v60 }
 0x2e4   : > { %v4126_v12 = vsel %vm13001_vm14, %v3934_v42, %v4125_v5  ;;  %v5195_v38 = vpop.f32.mrf.mxu1  ;;  %v11561_v29 = vld [vmem:[#allocation2 + $0x2e8] ss:$12 sps:$4 sm:$0xff]   ;;  %v2481_v51 = vld [vmem:[#allocation2 + $0x1b0] sm:$0x1]  ;;  %v9653_v17 = vcombine.high %v4128_v56, %v13781_v62  ;;  %v11565_v5 = vld [vmem:[#allocation2 + $0x300] ss:$12 sps:$4 sm:$0xff]   ;;  %v9652_v40 = vcombine.low %v4128_v56, %v13781_v62 }
 0x2e5   : > { %4127 = vst [vmem:[#allocation2 + $0x344] sm:$0xf] %v4126_v12  ;;  %v3302_v7 = vor.u32 %v3300_v27, %v3299_v43  ;;  %v3922_v54 = vsel %vm12980_vm12, %v3920_v59, %v3921_v63  ;;  %v3924_v13 = vor.u32 %v3923_v57, %v3921_v63  ;;  %v13817_v45 = vadd.f32 %v10947_v8, %v5195_v38  ;;  %v2538_v2 = vld [vmem:[#allocation2 + $0x14] sm:$0x8]  ;;  %v10951_v1 = vpop.f32.mrf.mxu0  ;;  %v11498_v34 = vld [vmem:[#allocation2 + $0x1c] ss:$12 sps:$4 sm:$0xff]  }
 0x2e6   : > { %4120 = vst [vmem:[#allocation2 + $0x320] sm:$0xf] %v3922_v54  ;;  %5386 = vmatmul.mubr.bf16.gmra.mxu1 %v11555_v21  ;;  %v5197_v20 = vpop.f32.mrf.mxu1  ;;  %v2539_v61 = vsel %vm12389_vm5, 0, %v2538_v2  ;;  %v2482_v53 = vsel %vm12368_vm2, 0, %v2481_v51  ;;  %v11573_v63 = vld [vmem:[#allocation2 + $0x334] ss:$12 sps:$4 sm:$0xff]  }
 0x2e7   : > { %v3303_v52 = vsel %vm12990_vm13, %v3295_v4, %v3302_v7  ;;  %v3925_v30 = vrot.slane %v3924_v13, 4  ;;  %5393 = vmatprep.mubr.bf16.mxu1 %v11563_v48  ;;  %2540 = vst [vmem:[#allocation2 + $0x14] sm:$0x8] %v2539_v61  ;;  %2483 = vst [vmem:[#allocation2 + $0x1b0] sm:$0x1] %v2482_v53  ;;  %v5492_v22 = vpop.f32.mrf.mxu0  ;;  %v11578_v2 = vld [vmem:[#allocation9 + $0x1b8] sm:$0xff]  }
 0x2e8   : > { %3511 = vst [vmem:[#allocation2 + $0x324] sm:$0xf] %v3303_v52  ;;  %v5198_v58 = vpop.f32.mrf.mxu1  ;;  %v11496_v7 = vld [vmem:[#allocation2 + $0x18] ss:$12 sps:$4 sm:$0xff]   ;;  %v11504_v13 = vld [vmem:[#allocation2 + $0x34] ss:$12 sps:$4 sm:$0xff]  }
 0x2e9   : > { %v4122_v11 = vsel %vm13001_vm14, %v3925_v30, %v4121_v18  ;;  %v13821_v49 = vadd.f32 %v10948_v24, %v5198_v58  ;;  %v10952_v37 = vpop.f32.mrf.mxu0  ;;  %v11570_v14 = vld [vmem:[#allocation2 + $0x31c] ss:$12 sps:$4 sm:$0xff]   ;;  %v11510_v58 = vld [vmem:[#allocation2 + $0x4c] ss:$12 sps:$4 sm:$0xff]  }
 0x2ea   : > { %4123 = vst [vmem:[#allocation2 + $0x32c] sm:$0xf] %v4122_v11  ;;  %v5200_v33 = vpop.f32.mrf.mxu1  ;;  %v11571_v52 = vld [vmem:[#allocation2 + $0x330] ss:$12 sps:$4 sm:$0xff]   ;;  %v11576_v61 = vld [vmem:[#allocation2 + $0x20] ss:$12 sps:$4 sm:$0xff]  }
 0x2eb   : > { %v13835_v0 = vpop.f32.mrf.mxu0  ;;  %v11502_v24 = vld [vmem:[#allocation2 + $0x30] ss:$12 sps:$4 sm:$0xff]   ;;  %v11577_v51 = vld [vmem:[#allocation2 + $0x38] ss:$12 sps:$4 sm:$0xff]   ;;  %v11508_v53 = vld [vmem:[#allocation2 + $0x48] ss:$12 sps:$4 sm:$0xff]  }
 0x2ec   : > { %v5203_v31 = vpop.f32.mrf.mxu1  ;;  %v11489_v28 = vld [vmem:[#allocation2 + $0x338] ss:$12 sps:$4 sm:$0xff]  }
 0x2ed   : > { %v13828_v44 = vadd.f32 %v5492_v22, %v5203_v31 }
 0x2ee   : > { %5394 = vmatmul.mubr.bf16.gmra.mxu1 %v11561_v29  ;;  %v5205_v59 = vpop.f32.mrf.mxu1  ;;  %v11575_v6 = vld [vmem:[#allocation2 + $0x8] ss:$12 sps:$4 sm:$0xff]  }
 0x2ef   : > { %5401 = vmatprep.mubr.bf16.mxu1 %v11567_v41  ;;  %v11568_v12 = vld [vmem:[#allocation2 + $0x318] ss:$12 sps:$4 sm:$0xff]  }
 0x2f0   : > { %v13830_v39 = vpop.f32.mrf.mxu1  ;;  %v11516_v59 = vld [vmem:[#allocation2 + $0x64] ss:$12 sps:$4 sm:$0xff]  }
 0x2f1   : > { %v11488_v55 = vld [vmem:[#allocation2 + $0x320] ss:$12 sps:$4 sm:$0xff]  }
 0x2f2   : > { %11001 = vmatprep.mubr.bf16.mxu0 %v11488_v55  ;;  %v5208_v9 = vpop.f32.mrf.mxu1 }
 0x2f3   : > { %11002 = vmatmul.mubr.bf16.gmra.mxu0 %v11489_v28 }
 0x2f4   : > { %6403 = vmatprep.mubr.bf16.mxu0 %v9653_v17  ;;  %v5211_v36 = vpop.f32.mrf.mxu1  ;;  %v10955_v19 = vpop.f32.mrf.mxu0 }
 0x2f5   : > { %v13833_v26 = vadd.f32 %v10951_v1, %v5211_v36  ;;  %v11581_v1 = vld [vmem:[#allocation9 + $0x1b0] sm:$0xff]  }
 0x2f6   : > { %5402 = vmatmul.mubr.bf16.gmra.mxu1 %v11565_v5  ;;  %v5213_v42 = vpop.f32.mrf.mxu1  ;;  %v5508_v57 = vpop.f32.mrf.mxu0  ;;  %v11588_v5 = vld [vmem:[#allocation9 + $0x230] sm:$0xff]  }
 0x2f7   : > { %5409 = vmatprep.mubr.bf16.mxu1 %v11570_v14  ;;  %v11579_v14 = vld [vmem:[#allocation2 + $0x50] ss:$12 sps:$4 sm:$0xff]   ;;  %v11580_v36 = vld [vmem:[#allocation2 + $0x68] ss:$12 sps:$4 sm:$0xff]  }
 0x2f8   : > { %v5214_v27 = vpop.f32.mrf.mxu1  ;;  %v10956_v21 = vpop.f32.mrf.mxu0 }
 0x2f9   : > { %v13837_v8 = vadd.f32 %v10952_v37, %v5214_v27  ;;  %v11584_v37 = vld [vmem:[#allocation9 + $0x1a8] sm:$0xff]   ;;  %v11587_v27 = vld [vmem:[#allocation9 + $0x1a0] sm:$0xff]  }
 0x2fa   : > { %v5216_v43 = vpop.f32.mrf.mxu1  ;;  %v13843_v48 = vpop.f32.mrf.mxu0 }
 0x2fb   : > { %6404 = vmatmul.mubr.bf16.vlgmr.msra.gmra.mxu0 %v9652_v40  ;;  %v11523_v43 = vld [vmem:[#allocation2 + $0x7c] ss:$12 sps:$4 sm:$0xff]  }
 0x2fc   : > { %6411 = vmatprep.mubr.bf16.mxu0 %v11498_v34  ;;  %11086 = vmatpush3.bf16.msra.mxu0 %v11574_v60  ;;  %v5219_v4 = vpop.f32.mrf.mxu1 }
 0x2fd   : > { %v13839_v47 = vadd.f32 %v5508_v57, %v5219_v4  ;;  %11087 = vmatprep.subr.bf16.mxu0 %v11588_v5 }
 0x2fe   : > { %5410 = vmatmul.mubr.bf16.gmra.mxu1 %v11568_v12  ;;  %v5221_v54 = vpop.f32.mrf.mxu1 }
 0x2ff   : > { %5417 = vmatprep.mubr.bf16.mxu1 %v11573_v63 }
 0x300   : > { %v13841_v18 = vpop.f32.mrf.mxu1  ;;  %11088 = vmatpush3.bf16.msra.mxu0 %v11588_v5 }
 0x301   : > { %v10959_v56 = vpop.f32.mrf.mxu0 }
 0x302   : > { %v5224_v30 = vpop.f32.mrf.mxu1 }
 0x303   : > { %6412 = vmatmul.mubr.bf16.gmra.mxu0 %v11496_v7  ;;  %v5524_v31 = vpop.f32.mrf.mxu0  ;;  %v11591_v7 = vld [vmem:[#allocation9 + $0x198] sm:$0xff]  }
 0x304   : > { %6419 = vmatprep.mubr.bf16.mxu0 %v11504_v13  ;;  %v5227_v38 = vpop.f32.mrf.mxu1  ;;  %v11582_v13 = vld [vmem:[#allocation2 + $0x80] ss:$12 sps:$4 sm:$0xff]  }
 0x305   : > { %v13845_v11 = vadd.f32 %v10955_v19, %v5227_v38  ;;  %v10960_v22 = vpop.f32.mrf.mxu0  ;;  %v11514_v19 = vld [vmem:[#allocation2 + $0x60] ss:$12 sps:$4 sm:$0xff]   ;;  %v11594_v38 = vld [vmem:[#allocation9 + $0x190] sm:$0xff]  }
 0x306   : > { %5418 = vmatmul.mubr.bf16.gmra.mxu1 %v11571_v52  ;;  %v5229_v20 = vpop.f32.mrf.mxu1 }
 0x307   : > { %11021 = vmatprep.mubr.bf16.mxu1 %v11575_v6  ;;  %v13855_v40 = vpop.f32.mrf.mxu0  ;;  %v11583_v6 = vld [vmem:[#allocation2 + $0x98] ss:$12 sps:$4 sm:$0xff]  }
 0x308   : > { %v5230_v29 = vpop.f32.mrf.mxu1 }
 0x309   : > { %v13847_v33 = vadd.f32 %v10956_v21, %v5230_v29 }
 0x30a   : > { %v5232_v41 = vpop.f32.mrf.mxu1 }
 0x30b   : > { %6420 = vmatmul.mubr.bf16.gmra.mxu0 %v11502_v24  ;;  %v11521_v24 = vld [vmem:[#allocation2 + $0x78] ss:$12 sps:$4 sm:$0xff]  }
 0x30c   : > { %6427 = vmatprep.mubr.bf16.mxu0 %v11510_v58  ;;  %v5235_v55 = vpop.f32.mrf.mxu1  ;;  %v11529_v58 = vld [vmem:[#allocation2 + $0x94] ss:$12 sps:$4 sm:$0xff]  }
 0x30d   : > { %v13849_v17 = vadd.f32 %v5524_v31, %v5235_v55 }
 0x30e   : > { %11022 = vmatmul.mubr.bf16.vlgmr.msra.gmra.mxu1 %v11576_v61  ;;  %v5237_v28 = vpop.f32.mrf.mxu1  ;;  %v11585_v61 = vld [vmem:[#allocation2 + $0xb0] ss:$12 sps:$4 sm:$0xff]  }
 0x30f   : > { %11025 = vmatprep.mubr.bf16.mxu1 %v11577_v51  ;;  %7784 = vmatpush1.bf16.msra.mxu1 %v11578_v2  ;;  %v11597_v2 = vld [vmem:[#allocation9 + $0x188] sm:$0xff]  }
 0x310   : > { %7785 = vmatprep.subr.bf16.mxu1 %v13781_v62  ;;  %v13852_v60 = vpop.f32.mrf.mxu1  ;;  %v10963_v63 = vpop.f32.mrf.mxu0  ;;  %v11586_v51 = vld [vmem:[#allocation2 + $0xc8] ss:$12 sps:$4 sm:$0xff]  }
 0x312   : > { %v5240_v9 = vpop.f32.mrf.mxu1  ;;  %v5540_v21 = vpop.f32.mrf.mxu0 }
 0x313   : > { %6428 = vmatmul.mubr.bf16.gmra.mxu0 %v11508_v53  ;;  %7786 = vmatpush1.bf16.msra.mxu1 %v11581_v1  ;;  %v11527_v53 = vld [vmem:[#allocation2 + $0x90] ss:$12 sps:$4 sm:$0xff]  }
 0x314   : > { %6435 = vmatprep.mubr.bf16.mxu0 %v11516_v59  ;;  %7787 = vmatprep.subr.bf16.mxu1 %v13781_v62  ;;  %v5243_v42 = vpop.f32.mrf.mxu1  ;;  %v11535_v59 = vld [vmem:[#allocation2 + $0xac] ss:$12 sps:$4 sm:$0xff]  }
 0x315   : > { %v13857_v34 = vadd.f32 %v10959_v56, %v5243_v42  ;;  %v10964_v56 = vpop.f32.mrf.mxu0  ;;  %v11589_v42 = vld [vmem:[#allocation2 + $0xe0] ss:$12 sps:$4 sm:$0xff]  }
 0x316   : > { %11026 = vmatmul.mubr.bf16.gmra.mxu1 %v11579_v14  ;;  %v5245_v12 = vpop.f32.mrf.mxu1  ;;  %v11599_v14 = vld [vmem:[#allocation9 + $0x180] sm:$0xff]  }
 0x317   : > { %11029 = vmatprep.mubr.bf16.mxu1 %v11580_v36  ;;  %7788 = vmatpush1.bf16.msra.mxu1 %v11584_v37  ;;  %v13869_v31 = vpop.f32.mrf.mxu0 }
 0x318   : > { %7789 = vmatprep.subr.bf16.mxu1 %v13781_v62  ;;  %v5246_v57 = vpop.f32.mrf.mxu1 }
 0x319   : > { %v13860_v4 = vadd.f32 %v10960_v22, %v5246_v57 }
 0x31a   : > { %v5248_v54 = vpop.f32.mrf.mxu1 }
 0x31b   : > { %6436 = vmatmul.mubr.bf16.gmra.mxu0 %v11514_v19  ;;  %7790 = vmatpush1.bf16.msra.mxu1 %v11587_v27  ;;  %v2592_v27 = vld [vmem:[#allocation2 + $0x1c4] sm:$0x8] }
 0x31c   : > { %6443 = vmatprep.mubr.bf16.mxu0 %v11523_v43  ;;  %7791 = vmatprep.subr.bf16.mxu1 %v13781_v62  ;;  %v5251_v52 = vpop.f32.mrf.mxu1  ;;  %v11590_v19 = vld [vmem:[#allocation2 + $0xf8] ss:$12 sps:$4 sm:$0xff]   ;;  %v2593_v12 = vsel %vm12389_vm5, 0, %v2592_v27 }
 0x31d   : > { %v13863_v30 = vadd.f32 %v5540_v21, %v5251_v52  ;;  %2594 = vst [vmem:[#allocation2 + $0x1c4] sm:$0x8] %v2593_v12  ;;  %v11546_v27 = vld [vmem:[#allocation2 + $0xd8] ss:$12 sps:$4 sm:$0xff]   ;;  %v11607_v12 = vld [vmem:[#allocation9 + $0x1f0] sm:$0xff]  }
 0x31e   : > { %11030 = vmatmul.mubr.bf16.gmra.mxu1 %v11582_v13  ;;  %v5253_v20 = vpop.f32.mrf.mxu1  ;;  %v11541_v13 = vld [vmem:[#allocation2 + $0xc4] ss:$12 sps:$4 sm:$0xff]  }
 0x31f   : > { %11033 = vmatprep.mubr.bf16.mxu1 %v11583_v6  ;;  %7792 = vmatpush1.bf16.msra.mxu1 %v11591_v7  ;;  %v11533_v7 = vld [vmem:[#allocation2 + $0xa8] ss:$12 sps:$4 sm:$0xff]  }
 0x320   : > { %7793 = vmatprep.subr.bf16.mxu1 %v13781_v62  ;;  %v13866_v29 = vpop.f32.mrf.mxu1 }
 0x322   : > { %v5256_v41 = vpop.f32.mrf.mxu1  ;;  %v10967_v22 = vpop.f32.mrf.mxu0 }
 0x323   : > { %6444 = vmatmul.mubr.bf16.gmra.mxu0 %v11521_v24  ;;  %7794 = vmatpush1.bf16.msra.mxu1 %v11594_v38  ;;  %v11592_v38 = vld [vmem:[#allocation2 + $0x110] ss:$12 sps:$4 sm:$0xff]   ;;  %v11593_v24 = vld [vmem:[#allocation2 + $0x128] ss:$12 sps:$4 sm:$0xff]   ;;  %v11539_v41 = vld [vmem:[#allocation2 + $0xc0] ss:$12 sps:$4 sm:$0xff]  }
 0x324   : > { %6451 = vmatprep.mubr.bf16.mxu0 %v11529_v58  ;;  %7795 = vmatprep.subr.bf16.mxu1 %v13781_v62  ;;  %v5259_v55 = vpop.f32.mrf.mxu1  ;;  %v5556_v5 = vpop.f32.mrf.mxu0  ;;  %v11600_v58 = vld [vmem:[#allocation9 + $0x228] sm:$0xff]  }
 0x325   : > { %v13871_v1 = vadd.f32 %v10963_v63, %v5259_v55  ;;  %11089 = vmatprep.subr.bf16.mxu0 %v11600_v58  ;;  %v11548_v55 = vld [vmem:[#allocation2 + $0xdc] ss:$12 sps:$4 sm:$0xff]  }
 0x326   : > { %11034 = vmatmul.mubr.bf16.gmra.mxu1 %v11585_v61  ;;  %v5261_v28 = vpop.f32.mrf.mxu1  ;;  %v10968_v63 = vpop.f32.mrf.mxu0  ;;  %11090 = vmatpush3.bf16.msra.mxu0 %v11600_v58  ;;  %v11552_v58 = vld [vmem:[#allocation2 + $0xf0] ss:$12 sps:$4 sm:$0xff]  }
 0x327   : > { %11037 = vmatprep.mubr.bf16.mxu1 %v11586_v51  ;;  %7796 = vmatpush1.bf16.msra.mxu1 %v11597_v2  ;;  %v11604_v51 = vld [vmem:[#allocation9 + $0x1f8] sm:$0xff]  }
 0x328   : > { %7797 = vmatprep.subr.bf16.mxu1 %v13781_v62  ;;  %v5262_v37 = vpop.f32.mrf.mxu1  ;;  %v13883_v6 = vpop.f32.mrf.mxu0 }
 0x329   : > { %v13874_v9 = vadd.f32 %v10964_v56, %v5262_v37 }
 0x32a   : > { %v5264_v36 = vpop.f32.mrf.mxu1 }
 0x32b   : > { %6452 = vmatmul.mubr.bf16.gmra.mxu0 %v11527_v53  ;;  %7798 = vmatpush1.bf16.msra.mxu1 %v11599_v14 }
 0x32c   : > { %6459 = vmatprep.mubr.bf16.mxu0 %v11535_v59  ;;  %v5267_v43 = vpop.f32.mrf.mxu1  ;;  %7799 = vmatprep.subr.bf16.mxu1 %v13781_v62 }
 0x32d   : > { %v13879_v57 = vadd.f32 %v5556_v5, %v5267_v43  ;;  %v11595_v5 = vld [vmem:[#allocation2 + $0x140] ss:$12 sps:$4 sm:$0xff]  }
 0x32e   : > { %11038 = vmatmul.mubr.bf16.gmra.mxu1 %v11589_v42  ;;  %v5269_v54 = vpop.f32.mrf.mxu1  ;;  %v11554_v43 = vld [vmem:[#allocation2 + $0xf4] ss:$12 sps:$4 sm:$0xff]  }
 0x32f   : > { %11041 = vmatprep.mubr.bf16.mxu1 %v11590_v19  ;;  %7800 = vmatpush2.bf16.msra.mxu1 %v11604_v51  ;;  %v11601_v54 = vld [vmem:[#allocation2 + $0x1b8] ss:$12 sps:$4 sm:$0xff]  }
 0x330   : > { %v13881_v21 = vpop.f32.mrf.mxu1  ;;  %7801 = vmatprep.subr.bf16.mxu1 %v13781_v62  ;;  %v11560_v51 = vld [vmem:[#allocation2 + $0x10c] ss:$12 sps:$4 sm:$0xff]  }
 0x331   : > { %v10971_v56 = vpop.f32.mrf.mxu0 }
 0x332   : > { %v5272_v52 = vpop.f32.mrf.mxu1 }
 0x333   : > { %6460 = vmatmul.mubr.bf16.gmra.mxu0 %v11533_v7  ;;  %v5572_v53 = vpop.f32.mrf.mxu0  ;;  %7802 = vmatpush2.bf16.msra.mxu1 %v11607_v12  ;;  %v11598_v52 = vld [vmem:[#allocation2 + $0x170] ss:$12 sps:$4 sm:$0xff]  }
 0x334   : > { %6467 = vmatprep.mubr.bf16.mxu0 %v11541_v13  ;;  %v5275_v20 = vpop.f32.mrf.mxu1  ;;  %7803 = vmatprep.subr.bf16.mxu1 %v13781_v62 }
 0x335   : > { %v13885_v2 = vadd.f32 %v10967_v22, %v5275_v20  ;;  %v11596_v22 = vld [vmem:[#allocation2 + $0x158] ss:$12 sps:$4 sm:$0xff]   ;;  %v10972_v14 = vpop.f32.mrf.mxu0 }
 0x336   : > { %11042 = vmatmul.mubr.bf16.gmra.mxu1 %v11592_v38  ;;  %v5277_v61 = vpop.f32.mrf.mxu1 }
 0x337   : > { %11045 = vmatprep.mubr.bf16.mxu1 %v11593_v24  ;;  %v13892_v7 = vpop.f32.mrf.mxu0  ;;  %v11610_v61 = vld [vmem:[#allocation9 + $0x1e8] sm:$0xff]  }
 0x338   : > { %v5278_v28 = vpop.f32.mrf.mxu1  ;;  %7804 = vmatpush2.bf16.msra.mxu1 %v11610_v61 }
 0x339   : > { %v13887_v59 = vadd.f32 %v10968_v63, %v5278_v28  ;;  %7805 = vmatprep.subr.bf16.mxu1 %v13781_v62 }
 0x33a   : > { %v5280_v37 = vpop.f32.mrf.mxu1 }
 0x33b   : > { %6468 = vmatmul.mubr.bf16.gmra.mxu0 %v11539_v41 }
 0x33c   : > { %6475 = vmatprep.mubr.bf16.mxu0 %v11548_v55  ;;  %v5283_v36 = vpop.f32.mrf.mxu1 }
 0x33d   : > { %v13890_v42 = vadd.f32 %v5572_v53, %v5283_v36 }
 0x33e   : > { %11046 = vmatmul.mubr.bf16.gmra.mxu1 %v11595_v5  ;;  %v5285_v19 = vpop.f32.mrf.mxu1  ;;  %v11602_v5 = vld [vmem:[#allocation2 + $0x1d0] ss:$12 sps:$4 sm:$0xff]  }
 0x33f   : > { %11049 = vmatprep.mubr.bf16.mxu1 %v11596_v22  ;;  %v10975_v38 = vpop.f32.mrf.mxu0  ;;  %v11603_v22 = vld [vmem:[#allocation2 + $0x1e8] ss:$12 sps:$4 sm:$0xff]  }
 0x340   : > { %v13894_v63 = vpop.f32.mrf.mxu1  ;;  %v11558_v19 = vld [vmem:[#allocation2 + $0x108] ss:$12 sps:$4 sm:$0xff]  }
 0x341   : > { %v5588_v55 = vpop.f32.mrf.mxu0 }
 0x342   : > { %v5288_v13 = vpop.f32.mrf.mxu1 }
 0x343   : > { %6476 = vmatmul.mubr.bf16.gmra.mxu0 %v11546_v27  ;;  %v10976_v36 = vpop.f32.mrf.mxu0 }
 0x344   : > { %6483 = vmatprep.mubr.bf16.mxu0 %v11554_v43  ;;  %v5291_v24 = vpop.f32.mrf.mxu1  ;;  %v11613_v43 = vld [vmem:[#allocation9 + $0x1e0] sm:$0xff]  }
 0x345   : > { %v13897_v20 = vadd.f32 %v10971_v56, %v5291_v24  ;;  %7806 = vmatpush2.bf16.msra.mxu1 %v11613_v43  ;;  %v11605_v24 = vld [vmem:[#allocation2 + $0x200] ss:$12 sps:$4 sm:$0xff]  }
 0x346   : > { %11050 = vmatmul.mubr.bf16.gmra.mxu1 %v11598_v52  ;;  %v5293_v41 = vpop.f32.mrf.mxu1  ;;  %7807 = vmatprep.subr.bf16.mxu1 %v13781_v62 }
 0x347   : > { %11053 = vmatprep.mubr.bf16.mxu1 %v11601_v54  ;;  %v13904_v54 = vpop.f32.mrf.mxu0 }
 0x348   : > { %v5294_v53 = vpop.f32.mrf.mxu1  ;;  %14958 = vst [vmem:[#allocation49_spill] sm:$0xff] %v13904_v54  ;;  %v11622_v54 = vld [vmem:[#allocation2 + $0x2d8] ss:$12 sps:$4 sm:$0xff]  }
 0x349   : > { %v13899_v28 = vadd.f32 %v10972_v14, %v5294_v53  ;;  %v11767_v14 = vld [vmem:[#allocation2 + $0x124] ss:$12 sps:$4 sm:$0xff]  }
 0x34a   : > { %v5296_v37 = vpop.f32.mrf.mxu1 }
 0x34b   : > { %6484 = vmatmul.mubr.bf16.gmra.mxu0 %v11552_v58  ;;  %v11606_v58 = vld [vmem:[#allocation2 + $0x218] ss:$12 sps:$4 sm:$0xff]  }
 0x34c   : > { %6491 = vmatprep.mubr.bf16.mxu0 %v11560_v51  ;;  %v5299_v56 = vpop.f32.mrf.mxu1  ;;  %v11617_v37 = vld [vmem:[#allocation9 + $0x1d8] sm:$0xff]  }
 0x34d   : > { %v13902_v27 = vadd.f32 %v5588_v55, %v5299_v56  ;;  %v11614_v55 = vld [vmem:[#allocation9 + $0x220] sm:$0xff]   ;;  %7808 = vmatpush2.bf16.msra.mxu1 %v11617_v37 }
 0x34e   : > { %11054 = vmatmul.mubr.bf16.gmra.mxu1 %v11602_v5  ;;  %v5301_v12 = vpop.f32.mrf.mxu1  ;;  %11091 = vmatprep.subr.bf16.mxu0 %v11614_v55  ;;  %v11768_v5 = vld [vmem:[#allocation2 + $0x120] ss:$12 sps:$4 sm:$0xff]  }
 0x34f   : > { %11057 = vmatprep.mubr.bf16.mxu1 %v11603_v22  ;;  %11092 = vmatpush3.bf16.msra.mxu0 %v11614_v55 }
 0x350   : > { %v13906_v13 = vpop.f32.mrf.mxu1  ;;  %7809 = vmatprep.subr.bf16.mxu1 %v13781_v62 }
 0x352   : > { %v5304_v52 = vpop.f32.mrf.mxu1 }
 0x353   : > { %6492 = vmatmul.mubr.bf16.gmra.mxu0 %v11558_v19  ;;  %v10979_v41 = vpop.f32.mrf.mxu0  ;;  %v11769_v19 = vld [vmem:[#allocation2 + $0x13c] ss:$12 sps:$4 sm:$0xff]  }
 0x354   : > { %6499 = vmatprep.mubr.bf16.mxu0 %v11767_v14  ;;  %v5307_v61 = vpop.f32.mrf.mxu1  ;;  %v11608_v14 = vld [vmem:[#allocation2 + $0x230] ss:$12 sps:$4 sm:$0xff]  }
 0x355   : > { %v13909_v51 = vadd.f32 %v10975_v38, %v5307_v61  ;;  %v5604_v22 = vpop.f32.mrf.mxu0  ;;  %v11609_v38 = vld [vmem:[#allocation2 + $0x248] ss:$12 sps:$4 sm:$0xff]  }
 0x356   : > { %11058 = vmatmul.mubr.bf16.gmra.mxu1 %v11605_v24  ;;  %v5309_v53 = vpop.f32.mrf.mxu1 }
 0x357   : > { %14959 = vst [vmem:[#allocation50_spill] sm:$0xff] %v13909_v51  ;;  %11061 = vmatprep.mubr.bf16.mxu1 %v11606_v58  ;;  %v10980_v52 = vpop.f32.mrf.mxu0  ;;  %v11623_v53 = vld [vmem:[#allocation9 + $0x1d0] sm:$0xff]  }
 0x358   : > { %v5310_v56 = vpop.f32.mrf.mxu1  ;;  %7810 = vmatpush2.bf16.msra.mxu1 %v11623_v53  ;;  %v11615_v51 = vld [vmem:[#allocation2 + $0x290] ss:$12 sps:$4 sm:$0xff]  }
 0x359   : > { %v13911_v12 = vadd.f32 %v10976_v36, %v5310_v56  ;;  %v5607_v37 = vpop.f32.mrf.mxu0  ;;  %v11771_v36 = vld [vmem:[#allocation2 + $0x154] ss:$12 sps:$4 sm:$0xff]   ;;  %7811 = vmatprep.subr.bf16.mxu1 %v13781_v62 }
 0x35a   : > { %v5312_v43 = vpop.f32.mrf.mxu1 }
 0x35b   : > { %6500 = vmatmul.mubr.bf16.gmra.mxu0 %v11768_v5  ;;  %14960 = vst [vmem:[#allocation51_spill] sm:$0xff] %v13911_v12  ;;  %v11770_v5 = vld [vmem:[#allocation2 + $0x138] ss:$12 sps:$4 sm:$0xff]   ;;  %v11611_v43 = vld [vmem:[#allocation2 + $0x260] ss:$12 sps:$4 sm:$0xff]  }
 0x35c   : > { %6507 = vmatprep.mubr.bf16.mxu0 %v11769_v19  ;;  %v5315_v24 = vpop.f32.mrf.mxu1  ;;  %v11612_v12 = vld [vmem:[#allocation2 + $0x278] ss:$12 sps:$4 sm:$0xff]  }
 0x35d   : > { %v13914_v58 = vadd.f32 %v5604_v22, %v5315_v24 }
 0x35e   : > { %11062 = vmatmul.mubr.bf16.gmra.mxu1 %v11608_v14  ;;  %v5317_v61 = vpop.f32.mrf.mxu1  ;;  %v10983_v14 = vpop.f32.mrf.mxu0 }
 0x35f   : > { %14961 = vst [vmem:[#allocation52_spill] sm:$0xff] %v13914_v58  ;;  %11065 = vmatprep.mubr.bf16.mxu1 %v11609_v38  ;;  %v11629_v61 = vld [vmem:[#allocation9 + $0x1c8] sm:$0xff]   ;;  %v11772_v58 = vld [vmem:[#allocation2 + $0x150] ss:$12 sps:$4 sm:$0xff]  }
 0x360   : > { %v5318_v19 = vpop.f32.mrf.mxu1  ;;  %v5620_v53 = vpop.f32.mrf.mxu0  ;;  %7812 = vmatpush2.bf16.msra.mxu1 %v11629_v61 }
 0x361   : > { %v13916_v55 = vadd.f32 %v5607_v37, %v5318_v19  ;;  %v11773_v37 = vld [vmem:[#allocation2 + $0x16c] ss:$12 sps:$4 sm:$0xff]   ;;  %7813 = vmatprep.subr.bf16.mxu1 %v13781_v62 }
 0x362   : > { %v5320_v56 = vpop.f32.mrf.mxu1 }
 0x363   : > { %6508 = vmatmul.mubr.bf16.gmra.mxu0 %v11770_v5  ;;  %14962 = vst [vmem:[#allocation53_spill] sm:$0xff] %v13916_v55  ;;  %v11630_v5 = vld [vmem:[#allocation9 + $0x218] sm:$0xff]   ;;  %v4192_v56 = vld [vmem:[#allocation2 + $0x1b0] sm:$0xff] }
 0x364   : > { %6515 = vmatprep.mubr.bf16.mxu0 %v11771_v36  ;;  %v5323_v22 = vpop.f32.mrf.mxu1  ;;  %11093 = vmatprep.subr.bf16.mxu0 %v11630_v5 }
 0x365   : > { %v13919_v38 = vadd.f32 %v10979_v41, %v5323_v22  ;;  %11094 = vmatpush3.bf16.msra.mxu0 %v11630_v5  ;;  %v11616_v41 = vld [vmem:[#allocation2 + $0x2a8] ss:$12 sps:$4 sm:$0xff]  }
 0x366   : > { %11066 = vmatmul.mubr.bf16.gmra.mxu1 %v11611_v43  ;;  %v5325_v24 = vpop.f32.mrf.mxu1 }
 0x367   : > { %14963 = vst [vmem:[#allocation54_spill] sm:$0xff] %v13919_v38  ;;  %11069 = vmatprep.mubr.bf16.mxu1 %v11612_v12  ;;  %v10984_v12 = vpop.f32.mrf.mxu0  ;;  %v11634_v24 = vld [vmem:[#allocation9 + $0x210] sm:$0xff]   ;;  %v11621_v38 = vld [vmem:[#allocation2 + $0x2c0] ss:$12 sps:$4 sm:$0xff]  }
 0x368   : > { %v5326_v36 = vpop.f32.mrf.mxu1  ;;  %11095 = vmatprep.subr.bf16.mxu0 %v11634_v24 }
 0x369   : > { %v13921_v19 = vadd.f32 %v10980_v52, %v5326_v36  ;;  %v11636_v52 = vld [vmem:[#allocation9 + $0x1c0] sm:$0xff]   ;;  %v11774_v36 = vld [vmem:[#allocation2 + $0x168] ss:$12 sps:$4 sm:$0xff]   ;;  %11096 = vmatpush3.bf16.msra.mxu0 %v11634_v24 }
 0x36a   : > { %v5328_v55 = vpop.f32.mrf.mxu1  ;;  %7814 = vmatpush2.bf16.msra.mxu1 %v11636_v52 }
 0x36b   : > { %6516 = vmatmul.mubr.bf16.gmra.mxu0 %v11772_v58  ;;  %14964 = vst [vmem:[#allocation55_spill] sm:$0xff] %v13921_v19  ;;  %v9701_v58 = vcombine.high %v4192_v56, %v13781_v62  ;;  %v5623_v55 = vpop.f32.mrf.mxu0  ;;  %v11640_v19 = vld [vmem:[#allocation9 + $0x208] sm:$0xff]  }
 0x36c   : > { %6523 = vmatprep.mubr.bf16.mxu0 %v11773_v37  ;;  %v5331_v43 = vpop.f32.mrf.mxu1  ;;  %11097 = vmatprep.subr.bf16.mxu0 %v11640_v19 }
 0x36d   : > { %v13925_v22 = vadd.f32 %v5620_v53, %v5331_v43  ;;  %v9700_v53 = vcombine.low %v4192_v56, %v13781_v62  ;;  %11098 = vmatpush3.bf16.msra.mxu0 %v11640_v19  ;;  %v11627_v62 = vld [vmem:[#allocation2 + $0x2f0] ss:$12 sps:$4 sm:$0xff]  }
 0x36e   : > { %11070 = vmatmul.mubr.bf16.gmra.mxu1 %v11615_v51  ;;  %v5333_v61 = vpop.f32.mrf.mxu1 }
 0x36f   : > { %14965 = vst [vmem:[#allocation56_spill] sm:$0xff] %v13925_v22  ;;  %11073 = vmatprep.mubr.bf16.mxu1 %v11616_v41 }
 0x370   : > { %v5334_v37 = vpop.f32.mrf.mxu1 }
 0x371   : > { %v13927_v5 = vadd.f32 %v5623_v55, %v5334_v37  ;;  %v11775_v55 = vld [vmem:[#allocation2 + $0x1cc] ss:$12 sps:$4 sm:$0xff]  }
 0x372   : > { %v5336_v51 = vpop.f32.mrf.mxu1 }
 0x373   : > { %6524 = vmatmul.mubr.bf16.gmra.mxu0 %v11774_v36  ;;  %14966 = vst [vmem:[#allocation57_spill] sm:$0xff] %v13927_v5  ;;  %v11642_v36 = vld [vmem:[#allocation9 + $0x200] sm:$0xff]   ;;  %v11628_v5 = vld [vmem:[#allocation2 + $0x308] ss:$12 sps:$4 sm:$0xff]  }
 0x374   : > { %6531 = vmatprep.mubr.bf16.mxu0 %v9701_v58  ;;  %v10987_v41 = vpop.f32.mrf.mxu0  ;;  %v5339_v43 = vpop.f32.mrf.mxu1  ;;  %11099 = vmatprep.subr.bf16.mxu0 %v11642_v36 }
 0x375   : > { %v13930_v61 = vadd.f32 %v10983_v14, %v5339_v43  ;;  %11100 = vmatpush3.bf16.msra.mxu0 %v11642_v36  ;;  %v11776_v43 = vld [vmem:[#allocation2 + $0x1c8] ss:$12 sps:$4 sm:$0xff]   ;;  %v11635_v36 = vld [vmem:[#allocation2 + $0x320] ss:$12 sps:$4 sm:$0xff]  }
 0x376   : > { %11074 = vmatmul.mubr.bf16.gmra.mxu1 %v11621_v38  ;;  %v5341_v52 = vpop.f32.mrf.mxu1  ;;  %v5636_v58 = vpop.f32.mrf.mxu0 }
 0x377   : > { %14967 = vst [vmem:[#allocation58_spill] sm:$0xff] %v13930_v61  ;;  %11077 = vmatprep.mubr.bf16.mxu1 %v11622_v54  ;;  %v11777_v52 = vld [vmem:[#allocation2 + $0x1e4] ss:$12 sps:$4 sm:$0xff]  }
 0x378   : > { %v5342_v24 = vpop.f32.mrf.mxu1  ;;  %v10988_v56 = vpop.f32.mrf.mxu0 }
 0x379   : > { %v13932_v37 = vadd.f32 %v10984_v12, %v5342_v24 }
 0x37a   : > { %v5344_v51 = vpop.f32.mrf.mxu1  ;;  %v5639_v19 = vpop.f32.mrf.mxu0 }
 0x37b   : > { %6532 = vmatmul.mubr.bf16.gmra.mxu0 %v9700_v53  ;;  %14968 = vst [vmem:[#allocation59_spill] sm:$0xff] %v13932_v37  ;;  %v11639_v51 = vld [vmem:[#allocation2 + $0x34] ss:$12 sps:$4 sm:$0xff]  }
 0x37c   : > { %6539 = vmatprep.mubr.bf16.mxu0 %v11775_v55  ;;  %v5347_v38 = vpop.f32.mrf.mxu1 }
 0x37d   : > { %v13934_v14 = vadd.f32 %v5636_v58, %v5347_v38 }
 0x37e   : > { %11078 = vmatmul.mubr.bf16.gmra.mxu1 %v11627_v62  ;;  %v5349_v54 = vpop.f32.mrf.mxu1  ;;  %v11778_v62 = vld [vmem:[#allocation2 + $0x1e0] ss:$12 sps:$4 sm:$0xff]  }
 0x37f   : > { %14969 = vst [vmem:[#allocation60_spill] sm:$0xff] %v13934_v14  ;;  %11081 = vmatprep.mubr.bf16.mxu1 %v11628_v5  ;;  %v11779_v54 = vld [vmem:[#allocation2 + $0x1fc] ss:$12 sps:$4 sm:$0xff]  }
 0x380   : > { %v5350_v53 = vpop.f32.mrf.mxu1 }
 0x381   : > { %v13936_v55 = vadd.f32 %v5639_v19, %v5350_v53  ;;  %v11637_v53 = vld [vmem:[#allocation2 + $0x30] ss:$12 sps:$4 sm:$0xff]  }
 0x382   : > { %v5352_v12 = vpop.f32.mrf.mxu1 }
 0x383   : > { %6540 = vmatmul.mubr.bf16.gmra.mxu0 %v11776_v43  ;;  %14970 = vst [vmem:[#allocation61_spill] sm:$0xff] %v13936_v55  ;;  %v11645_v12 = vld [vmem:[#allocation2 + $0x4c] ss:$12 sps:$4 sm:$0xff]  }
 0x384   : > { %6547 = vmatprep.mubr.bf16.mxu0 %v11777_v52 }
 0x385   : > { %v5355_v37 = vpop.f32.mrf.mxu1 }
 0x386   : > { %v10991_v24 = vpop.f32.mrf.mxu0  ;;  %11082 = vmatmul.mubr.bf16.gmra.mxu1 %v11635_v36  ;;  %v13938_v61 = vadd.f32 %v10987_v41, %v5355_v37  ;;  %v11780_v36 = vld [vmem:[#allocation2 + $0x1f8] ss:$12 sps:$4 sm:$0xff]  }
 0x387   : > { %7815 = vmatprep.mubr.bf16.mxu1 %v11639_v51  ;;  %v5357_v5 = vpop.f32.mrf.mxu1 }
 0x388   : > { %14971 = vst [vmem:[#allocation62_spill] sm:$0xff] %v13938_v61  ;;  %v5652_v58 = vpop.f32.mrf.mxu0  ;;  %v11781_v5 = vld [vmem:[#allocation2 + $0x214] ss:$12 sps:$4 sm:$0xff]  }
 0x389   : > { %v5358_v38 = vpop.f32.mrf.mxu1 }
 0x38a   : > { %v13940_v43 = vadd.f32 %v10988_v56, %v5358_v38  ;;  %v10992_v19 = vpop.f32.mrf.mxu0  ;;  %v11643_v38 = vld [vmem:[#allocation2 + $0x48] ss:$12 sps:$4 sm:$0xff]  }
 0x38b   : > { %6548 = vmatmul.mubr.bf16.gmra.mxu0 %v11778_v62  ;;  %v5360_v52 = vpop.f32.mrf.mxu1 }
 0x38c   : > { %6555 = vmatprep.mubr.bf16.mxu0 %v11779_v54  ;;  %14972 = vst [vmem:[#allocation63_spill] sm:$0xff] %v13940_v43  ;;  %v5655_v41 = vpop.f32.mrf.mxu0  ;;  %v11650_v43 = vld [vmem:[#allocation2 + $0x64] ss:$12 sps:$4 sm:$0xff]  }
 0x38d   : > { %v5363_v55 = vpop.f32.mrf.mxu1 }
 0x38e   : > { %7816 = vmatmul.mubr.bf16.vlgmr.msra.gmra.mxu1 %v11637_v53  ;;  %v13942_v14 = vadd.f32 %v5652_v58, %v5363_v55  ;;  %v11782_v58 = vld [vmem:[#allocation2 + $0x210] ss:$12 sps:$4 sm:$0xff]  }
 0x38f   : > { %7823 = vmatprep.mubr.bf16.mxu1 %v11645_v12  ;;  %v5365_v37 = vpop.f32.mrf.mxu1 }
 0x390   : > { %14973 = vst [vmem:[#allocation64_spill] sm:$0xff] %v13942_v14 }
 0x391   : > { %v5366_v51 = vpop.f32.mrf.mxu1 }
 0x392   : > { %v13944_v62 = vadd.f32 %v5655_v41, %v5366_v51  ;;  %v11648_v41 = vld [vmem:[#allocation2 + $0x60] ss:$12 sps:$4 sm:$0xff]  }
 0x393   : > { %6556 = vmatmul.mubr.bf16.gmra.mxu0 %v11780_v36  ;;  %v5368_v54 = vpop.f32.mrf.mxu1  ;;  %v11783_v36 = vld [vmem:[#allocation2 + $0x22c] ss:$12 sps:$4 sm:$0xff]  }
 0x394   : > { %6563 = vmatprep.mubr.bf16.mxu0 %v11781_v5  ;;  %14974 = vst [vmem:[#allocation65_spill] sm:$0xff] %v13944_v62  ;;  %v11655_v62 = vld [vmem:[#allocation2 + $0x7c] ss:$12 sps:$4 sm:$0xff]  }
 0x395   : > { %v10995_v56 = vpop.f32.mrf.mxu0  ;;  %v5371_v61 = vpop.f32.mrf.mxu1  ;;  %v15049_v3 = vld [vmem:[#allocation63_spill] sm:$0xff] }
 0x396   : > { %7824 = vmatmul.mubr.bf16.gmra.mxu1 %v11643_v38  ;;  %v13946_v53 = vadd.f32 %v10991_v24, %v5371_v61  ;;  %v11784_v24 = vld [vmem:[#allocation2 + $0x228] ss:$12 sps:$4 sm:$0xff]  }
 0x397   : > { %v5668_v52 = vpop.f32.mrf.mxu0  ;;  %7831 = vmatprep.mubr.bf16.mxu1 %v11650_v43  ;;  %v5373_v55 = vpop.f32.mrf.mxu1 }
 0x398   : > { %14975 = vst [vmem:[#allocation66_spill] sm:$0xff] %v13946_v53  ;;  %v11785_v55 = vld [vmem:[#allocation2 + $0x244] ss:$12 sps:$4 sm:$0xff]  }
 0x399   : > { %v10996_v12 = vpop.f32.mrf.mxu0  ;;  %v5374_v37 = vpop.f32.mrf.mxu1 }
 0x39a   : > { %v13948_v5 = vadd.f32 %v10992_v19, %v5374_v37  ;;  %v11653_v19 = vld [vmem:[#allocation2 + $0x78] ss:$12 sps:$4 sm:$0xff]  }
 0x39b   : > { %6564 = vmatmul.mubr.bf16.gmra.mxu0 %v11782_v58  ;;  %v5376_v51 = vpop.f32.mrf.mxu1  ;;  %v5671_v54 = vpop.f32.mrf.mxu0 }
 0x39c   : > { %6571 = vmatprep.mubr.bf16.mxu0 %v11783_v36  ;;  %14976 = vst [vmem:[#allocation67_spill] sm:$0xff] %v13948_v5  ;;  %v11660_v36 = vld [vmem:[#allocation2 + $0x94] ss:$12 sps:$4 sm:$0xff]  }
 0x39e   : > { %v5379_v14 = vpop.f32.mrf.mxu1  ;;  %7832 = vmatmul.mubr.bf16.gmra.mxu1 %v11648_v41 }
 0x39f   : > { %v13950_v22 = vadd.f32 %v5668_v52, %v5379_v14  ;;  %7839 = vmatprep.mubr.bf16.mxu1 %v11655_v62  ;;  %v11786_v62 = vld [vmem:[#allocation2 + $0x240] ss:$12 sps:$4 sm:$0xff]  }
 0x3a0   : > { %v5381_v61 = vpop.f32.mrf.mxu1 }
 0x3a1   : > { %14977 = vst [vmem:[#allocation68_spill] sm:$0xff] %v13950_v22  ;;  %v11787_v61 = vld [vmem:[#allocation2 + $0x25c] ss:$12 sps:$4 sm:$0xff]  }
 0x3a2   : > { %v5382_v38 = vpop.f32.mrf.mxu1 }
 0x3a3   : > { %6572 = vmatmul.mubr.bf16.gmra.mxu0 %v11784_v24  ;;  %v10999_v43 = vpop.f32.mrf.mxu0  ;;  %v13952_v58 = vadd.f32 %v5671_v54, %v5382_v38  ;;  %v11658_v54 = vld [vmem:[#allocation2 + $0x90] ss:$12 sps:$4 sm:$0xff]  }
 0x3a4   : > { %6579 = vmatprep.mubr.bf16.mxu0 %v11785_v55  ;;  %v5384_v37 = vpop.f32.mrf.mxu1  ;;  %v11665_v55 = vld [vmem:[#allocation2 + $0xac] ss:$12 sps:$4 sm:$0xff]  }
 0x3a5   : > { %14978 = vst [vmem:[#allocation69_spill] sm:$0xff] %v13952_v58  ;;  %v5684_v51 = vpop.f32.mrf.mxu0 }
 0x3a6   : > { %v5387_v5 = vpop.f32.mrf.mxu1  ;;  %7840 = vmatmul.mubr.bf16.gmra.mxu1 %v11653_v19  ;;  %v11788_v19 = vld [vmem:[#allocation2 + $0x258] ss:$12 sps:$4 sm:$0xff]  }
 0x3a7   : > { %v13954_v53 = vadd.f32 %v10995_v56, %v5387_v5  ;;  %7847 = vmatprep.mubr.bf16.mxu1 %v11660_v36  ;;  %v11000_v52 = vpop.f32.mrf.mxu0 }
 0x3a8   : > { %v5389_v14 = vpop.f32.mrf.mxu1 }
 0x3a9   : > { %14979 = vst [vmem:[#allocation70_spill] sm:$0xff] %v13954_v53  ;;  %v5687_v37 = vpop.f32.mrf.mxu0  ;;  %v11789_v14 = vld [vmem:[#allocation2 + $0x274] ss:$12 sps:$4 sm:$0xff]  }
 0x3aa   : > { %v5390_v41 = vpop.f32.mrf.mxu1 }
 0x3ab   : > { %6580 = vmatmul.mubr.bf16.gmra.mxu0 %v11786_v62  ;;  %v13956_v24 = vadd.f32 %v10996_v12, %v5390_v41  ;;  %v2589_v12 = vld [vmem:[#allocation2 + $0x1ac] sm:$0x8] }
 0x3ac   : > { %6587 = vmatprep.mubr.bf16.mxu0 %v11787_v61  ;;  %v5392_v38 = vpop.f32.mrf.mxu1  ;;  %v11663_v61 = vld [vmem:[#allocation2 + $0xa8] ss:$12 sps:$4 sm:$0xff]  }
 0x3ad   : > { %14980 = vst [vmem:[#allocation71_spill] sm:$0xff] %v13956_v24  ;;  %v2590_v24 = vsel %vm12389_vm5, 0, %v2589_v12 }
 0x3ae   : > { %v5395_v58 = vpop.f32.mrf.mxu1  ;;  %7848 = vmatmul.mubr.bf16.gmra.mxu1 %v11658_v54  ;;  %v11670_v54 = vld [vmem:[#allocation2 + $0xc4] ss:$12 sps:$4 sm:$0xff]   ;;  %2591 = vst [vmem:[#allocation2 + $0x1ac] sm:$0x8] %v2590_v24  ;;  %v11668_v24 = vld [vmem:[#allocation2 + $0xc0] ss:$12 sps:$4 sm:$0xff]  }
 0x3af   : > { %v13958_v22 = vadd.f32 %v5684_v51, %v5395_v58  ;;  %7855 = vmatprep.mubr.bf16.mxu1 %v11665_v55 }
 0x3b0   : > { %v5397_v56 = vpop.f32.mrf.mxu1 }
 0x3b1   : > { %14981 = vst [vmem:[#allocation72_spill] sm:$0xff] %v13958_v22 }
 0x3b2   : > { %v5398_v36 = vpop.f32.mrf.mxu1 }
 0x3b3   : > { %v11003_v5 = vpop.f32.mrf.mxu0  ;;  %6588 = vmatmul.mubr.bf16.gmra.mxu0 %v11788_v19  ;;  %v13960_v62 = vadd.f32 %v5687_v37, %v5398_v36  ;;  %v11790_v37 = vld [vmem:[#allocation2 + $0x270] ss:$12 sps:$4 sm:$0xff]  }
 0x3b4   : > { %6595 = vmatprep.mubr.bf16.mxu0 %v11789_v14  ;;  %v5400_v38 = vpop.f32.mrf.mxu1 }
 0x3b5   : > { %14982 = vst [vmem:[#allocation73_spill] sm:$0xff] %v13960_v62  ;;  %v5700_v41 = vpop.f32.mrf.mxu0  ;;  %v11791_v38 = vld [vmem:[#allocation2 + $0x28c] ss:$12 sps:$4 sm:$0xff]  }
 0x3b6   : > { %v5403_v51 = vpop.f32.mrf.mxu1  ;;  %7856 = vmatmul.mubr.bf16.gmra.mxu1 %v11663_v61  ;;  %v11675_v61 = vld [vmem:[#allocation2 + $0xdc] ss:$12 sps:$4 sm:$0xff]  }
 0x3b7   : > { %v11004_v58 = vpop.f32.mrf.mxu0  ;;  %v13964_v55 = vadd.f32 %v10999_v43, %v5403_v51  ;;  %7863 = vmatprep.mubr.bf16.mxu1 %v11670_v54  ;;  %v5464_v43 = vadd.f32 %v13796_v35, %v13760_v32  ;;  %v11673_v35 = vld [vmem:[#allocation2 + $0xd8] ss:$12 sps:$4 sm:$0xff]  }
 0x3b8   : > { %v5405_v19 = vpop.f32.mrf.mxu1 }
 0x3b9   : > { %14983 = vst [vmem:[#allocation74_spill] sm:$0xff] %v13964_v55  ;;  %v5703_v56 = vpop.f32.mrf.mxu0 }
 0x3ba   : > { %v5406_v36 = vpop.f32.mrf.mxu1 }
 0x3bb   : > { %v6405_v14 = vpop.f32.mrf.mxu0  ;;  %6596 = vmatmul.mubr.bf16.gmra.mxu0 %v11790_v37  ;;  %v13967_v22 = vadd.f32 %v11000_v52, %v5406_v36 }
 0x3bc   : > { %v6406_v62 = vadd.f32 %v6405_v14, %v13790_v46  ;;  %6603 = vmatprep.mubr.bf16.mxu0 %v11791_v38  ;;  %v5408_v53 = vpop.f32.mrf.mxu1  ;;  %v11792_v38 = vld [vmem:[#allocation2 + $0x288] ss:$12 sps:$4 sm:$0xff]  }
 0x3bd   : > { %14984 = vst [vmem:[#allocation75_spill] sm:$0xff] %v13967_v22  ;;  %v6407_v12 = vpop.f32.mrf.mxu0  ;;  %v11793_v53 = vld [vmem:[#allocation2 + $0x2a4] ss:$12 sps:$4 sm:$0xff]  }
 0x3be   : > { %v5411_v51 = vpop.f32.mrf.mxu1  ;;  %7864 = vmatmul.mubr.bf16.gmra.mxu1 %v11668_v24  ;;  %v11680_v24 = vld [vmem:[#allocation2 + $0xf4] ss:$12 sps:$4 sm:$0xff]  }
 0x3bf   : > { %v6408_v54 = vpop.f32.mrf.mxu0  ;;  %v13971_v55 = vadd.f32 %v5700_v41, %v5411_v51  ;;  %7871 = vmatprep.mubr.bf16.mxu1 %v11675_v61 }
 0x3c0   : > { %v6409_v19 = vadd.f32 %v6408_v54, %v5464_v43  ;;  %v5413_v46 = vpop.f32.mrf.mxu1 }
 0x3c1   : > { %v6410_v37 = vpop.f32.mrf.mxu0 }
 0x3c2   : > { %v5414_v52 = vpop.f32.mrf.mxu1 }
 0x3c3   : > { %v6413_v14 = vpop.f32.mrf.mxu0  ;;  %6604 = vmatmul.mubr.bf16.gmra.mxu0 %v11792_v38  ;;  %v13974_v12 = vadd.f32 %v5703_v56, %v5414_v52  ;;  %v11795_v38 = vld [vmem:[#allocation2 + $0x2bc] ss:$12 sps:$4 sm:$0xff]  }
 0x3c4   : > { %v6414_v36 = vadd.f32 %v6413_v14, %v13793_v50  ;;  %6611 = vmatprep.mubr.bf16.mxu0 %v11793_v53  ;;  %v5416_v22 = vpop.f32.mrf.mxu1  ;;  %v11794_v50 = vld [vmem:[#allocation2 + $0x2a0] ss:$12 sps:$4 sm:$0xff]   ;;  %v11678_v53 = vld [vmem:[#allocation2 + $0xf0] ss:$12 sps:$4 sm:$0xff]  }
 0x3c5   : > { %v6415_v32 = vpop.f32.mrf.mxu0 }
 0x3c6   : > { %v5419_v41 = vpop.f32.mrf.mxu1  ;;  %7872 = vmatmul.mubr.bf16.gmra.mxu1 %v11673_v35 }
 0x3c7   : > { %v6416_v43 = vpop.f32.mrf.mxu0  ;;  %v13977_v54 = vadd.f32 %v11003_v5, %v5419_v41  ;;  %7879 = vmatprep.mubr.bf16.mxu1 %v11680_v24  ;;  %v11685_v5 = vld [vmem:[#allocation2 + $0x10c] ss:$12 sps:$4 sm:$0xff]  }
 0x3c8   : > { %v6417_v61 = vadd.f32 %v6416_v43, %v13798_v10  ;;  %v5421_v37 = vpop.f32.mrf.mxu1  ;;  %v5480_v10 = vadd.f32 %v13819_v23, %v13807_v25 }
 0x3c9   : > { %v6418_v51 = vpop.f32.mrf.mxu0 }
 0x3ca   : > { %v5422_v14 = vpop.f32.mrf.mxu1 }
 0x3cb   : > { %v6421_v46 = vpop.f32.mrf.mxu0  ;;  %6612 = vmatmul.mubr.bf16.gmra.mxu0 %v11794_v50  ;;  %v13980_v22 = vadd.f32 %v11004_v58, %v5422_v14 }
 0x3cc   : > { %v6422_v56 = vadd.f32 %v6421_v46, %v13811_v16  ;;  %6619 = vmatprep.mubr.bf16.mxu0 %v11795_v38  ;;  %v5424_v32 = vpop.f32.mrf.mxu1  ;;  %v11796_v46 = vld [vmem:[#allocation2 + $0x2b8] ss:$12 sps:$4 sm:$0xff]   ;;  %v11797_v38 = vld [vmem:[#allocation2 + $0x2d4] ss:$12 sps:$4 sm:$0xff]  }
 0x3cd   : > { %v6423_v52 = vpop.f32.mrf.mxu0  ;;  %v11690_v32 = vld [vmem:[#allocation2 + $0x124] ss:$12 sps:$4 sm:$0xff]  }
 0x3ce   : > { %v11023_v24 = vpop.f32.mrf.mxu1  ;;  %7880 = vmatmul.mubr.bf16.gmra.mxu1 %v11678_v53  ;;  %v11683_v52 = vld [vmem:[#allocation2 + $0x108] ss:$12 sps:$4 sm:$0xff]  }
 0x3cf   : > { %v6424_v35 = vpop.f32.mrf.mxu0  ;;  %v13984_v41 = vadd.f32 %v11023_v24, %v6414_v36  ;;  %7887 = vmatprep.mubr.bf16.mxu1 %v11685_v5 }
 0x3d0   : > { %v6425_v43 = vadd.f32 %v6424_v35, %v5480_v10  ;;  %v6694_v16 = vpop.f32.mrf.mxu1 }
 0x3d1   : > { %v6426_v51 = vpop.f32.mrf.mxu0  ;;  %v13986_v37 = vadd.f32 %v6694_v16, %v6406_v62 }
 0x3d2   : > { %v11024_v50 = vpop.f32.mrf.mxu1  ;;  %v11620_v51 = vld [vmem:[#allocation2 + $0x2ec] ss:$12 sps:$4 sm:$0xff]  }
 0x3d3   : > { %v6429_v58 = vpop.f32.mrf.mxu0  ;;  %6620 = vmatmul.mubr.bf16.gmra.mxu0 %v11796_v46  ;;  %v13989_v25 = vadd.f32 %v11024_v50, %v6417_v61 }
 0x3d4   : > { %v6430_v14 = vadd.f32 %v6429_v58, %v13817_v45  ;;  %6627 = vmatprep.mubr.bf16.mxu0 %v11797_v38  ;;  %v6697_v53 = vpop.f32.mrf.mxu1  ;;  %v11798_v58 = vld [vmem:[#allocation2 + $0x2d0] ss:$12 sps:$4 sm:$0xff]  }
 0x3d5   : > { %v6431_v23 = vpop.f32.mrf.mxu0  ;;  %v13991_v36 = vadd.f32 %v6697_v53, %v6409_v19  ;;  %v11695_v53 = vld [vmem:[#allocation2 + $0x13c] ss:$12 sps:$4 sm:$0xff]  }
 0x3d6   : > { %v11027_v5 = vpop.f32.mrf.mxu1  ;;  %7888 = vmatmul.mubr.bf16.gmra.mxu1 %v11683_v52  ;;  %v11688_v23 = vld [vmem:[#allocation2 + $0x120] ss:$12 sps:$4 sm:$0xff]  }
 0x3d7   : > { %v6432_v10 = vpop.f32.mrf.mxu0  ;;  %v13994_v35 = vadd.f32 %v11027_v5, %v6430_v14  ;;  %7895 = vmatprep.mubr.bf16.mxu1 %v11690_v32  ;;  %v5496_v14 = vadd.f32 %v13835_v0, %v13830_v39  ;;  %v11618_v5 = vld [vmem:[#allocation2 + $0x2e8] ss:$12 sps:$4 sm:$0xff]   ;;  %v11693_v0 = vld [vmem:[#allocation2 + $0x138] ss:$12 sps:$4 sm:$0xff]  }
 0x3d8   : > { %v6433_v62 = vadd.f32 %v6432_v10, %v13821_v49  ;;  %v6710_v45 = vpop.f32.mrf.mxu1 }
 0x3d9   : > { %v6434_v24 = vpop.f32.mrf.mxu0  ;;  %v13996_v16 = vadd.f32 %v6710_v45, %v6422_v56  ;;  %v11626_v45 = vld [vmem:[#allocation2 + $0x304] ss:$12 sps:$4 sm:$0xff]  }
 0x3da   : > { %v11028_v46 = vpop.f32.mrf.mxu1 }
 0x3db   : > { %v6437_v61 = vpop.f32.mrf.mxu0  ;;  %6628 = vmatmul.mubr.bf16.gmra.mxu0 %v11798_v58  ;;  %v13999_v50 = vadd.f32 %v11028_v46, %v6433_v62 }
 0x3dc   : > { %v6438_v19 = vadd.f32 %v6437_v61, %v13828_v44  ;;  %6635 = vmatprep.mubr.bf16.mxu0 %v11620_v51  ;;  %v6713_v49 = vpop.f32.mrf.mxu1 }
 0x3dd   : > { %v6439_v38 = vpop.f32.mrf.mxu0  ;;  %v14003_v52 = vadd.f32 %v6713_v49, %v6425_v43 }
 0x3de   : > { %v11031_v32 = vpop.f32.mrf.mxu1  ;;  %7896 = vmatmul.mubr.bf16.gmra.mxu1 %v11688_v23  ;;  %v11700_v23 = vld [vmem:[#allocation2 + $0x154] ss:$12 sps:$4 sm:$0xff]  }
 0x3df   : > { %v6440_v56 = vpop.f32.mrf.mxu0  ;;  %7903 = vmatprep.mubr.bf16.mxu1 %v11695_v53  ;;  %v11624_v53 = vld [vmem:[#allocation2 + $0x300] ss:$12 sps:$4 sm:$0xff]  }
 0x3e0   : > { %v6441_v10 = vadd.f32 %v6440_v56, %v5496_v14  ;;  %v6726_v44 = vpop.f32.mrf.mxu1 }
 0x3e1   : > { %v6442_v24 = vpop.f32.mrf.mxu0  ;;  %v14005_v62 = vadd.f32 %v6726_v44, %v6438_v19 }
 0x3e2   : > { %v11032_v61 = vpop.f32.mrf.mxu1  ;;  %v11633_v24 = vld [vmem:[#allocation2 + $0x31c] ss:$12 sps:$4 sm:$0xff]  }
 0x3e3   : > { %v6445_v51 = vpop.f32.mrf.mxu0  ;;  %6636 = vmatmul.mubr.bf16.gmra.mxu0 %v11618_v5 }
 0x3e4   : > { %v6446_v58 = vadd.f32 %v6445_v51, %v13833_v26  ;;  %6643 = vmatprep.mubr.bf16.mxu0 %v11626_v45  ;;  %v6729_v43 = vpop.f32.mrf.mxu1  ;;  %v11698_v51 = vld [vmem:[#allocation2 + $0x150] ss:$12 sps:$4 sm:$0xff]  }
 0x3e5   : > { %v6447_v39 = vpop.f32.mrf.mxu0  ;;  %v14010_v38 = vadd.f32 %v6729_v43, %v6441_v10 }
 0x3e6   : > { %v14008_v46 = vadd.f32 %v11031_v32, %v6446_v58  ;;  %v11035_v14 = vpop.f32.mrf.mxu1  ;;  %7904 = vmatmul.mubr.bf16.gmra.mxu1 %v11693_v0  ;;  %v5512_v39 = vadd.f32 %v13843_v48, %v13841_v18  ;;  %v11705_v0 = vld [vmem:[#allocation2 + $0x16c] ss:$12 sps:$4 sm:$0xff]  }
 0x3e7   : > { %v6448_v49 = vpop.f32.mrf.mxu0  ;;  %7911 = vmatprep.mubr.bf16.mxu1 %v11700_v23 }
 0x3e8   : > { %v6449_v19 = vadd.f32 %v6448_v49, %v13837_v8  ;;  %v6742_v5 = vpop.f32.mrf.mxu1  ;;  %v2478_v49 = vld [vmem:[#allocation2 + $0x198] sm:$0x1] }
 0x3e9   : > { %v6450_v56 = vpop.f32.mrf.mxu0 }
 0x3ea   : > { %v14013_v26 = vadd.f32 %v11032_v61, %v6449_v19  ;;  %v11036_v45 = vpop.f32.mrf.mxu1  ;;  %v11631_v19 = vld [vmem:[#allocation2 + $0x318] ss:$12 sps:$4 sm:$0xff]   ;;  %v2479_v56 = vsel %vm12368_vm2, 0, %v2478_v49  ;;  %v11646_v49 = vld [vmem:[#allocation2 + $0x50] ss:$12 sps:$4 sm:$0xff]  }
 0x3eb   : > { %v6453_v44 = vpop.f32.mrf.mxu0  ;;  %6644 = vmatmul.mubr.bf16.gmra.mxu0 %v11624_v53  ;;  %2480 = vst [vmem:[#allocation2 + $0x198] sm:$0x1] %v2479_v56 }
 0x3ec   : > { %v6454_v32 = vadd.f32 %v6453_v44, %v13839_v47  ;;  %6651 = vmatprep.mubr.bf16.mxu0 %v11633_v24  ;;  %v6745_v58 = vpop.f32.mrf.mxu1  ;;  %v11641_v24 = vld [vmem:[#allocation2 + $0x38] ss:$12 sps:$4 sm:$0xff]  }
 0x3ed   : > { %v6455_v10 = vpop.f32.mrf.mxu0 }
 0x3ee   : > { %v14018_v8 = vadd.f32 %v6742_v5, %v6454_v32  ;;  %v14020_v23 = vpop.f32.mrf.mxu1  ;;  %7912 = vmatmul.mubr.bf16.gmra.mxu1 %v11698_v51  ;;  %v11703_v10 = vld [vmem:[#allocation2 + $0x168] ss:$12 sps:$4 sm:$0xff]  }
 0x3ef   : > { %v6456_v43 = vpop.f32.mrf.mxu0  ;;  %7919 = vmatprep.mubr.bf16.mxu1 %v11705_v0  ;;  %v11710_v0 = vld [vmem:[#allocation2 + $0x184] ss:$12 sps:$4 sm:$0xff]  }
 0x3f0   : > { %14985 = vst [vmem:[#allocation76_spill] sm:$0xff] %v14018_v8  ;;  %v6457_v61 = vadd.f32 %v6456_v43, %v5512_v39  ;;  %v6758_v47 = vpop.f32.mrf.mxu1 }
 0x3f1   : > { %v6458_v53 = vpop.f32.mrf.mxu0 }
 0x3f2   : > { %v14024_v44 = vadd.f32 %v6745_v58, %v6457_v61  ;;  %v11040_v48 = vpop.f32.mrf.mxu1  ;;  %v7010_v56 = vld [vmem:[#allocation2 + $0x198] sm:$0xff] }
 0x3f3   : > { %v6461_v18 = vpop.f32.mrf.mxu0  ;;  %6652 = vmatmul.mubr.bf16.gmra.mxu0 %v11631_v19 }
 0x3f4   : > { %14986 = vst [vmem:[#allocation77_spill] sm:$0xff] %v14024_v44  ;;  %v6462_v5 = vadd.f32 %v6461_v18, %v13845_v11  ;;  %11101 = vmatprep.mubr.bf16.mxu0 %v11641_v24  ;;  %v6761_v51 = vpop.f32.mrf.mxu1  ;;  %v11647_v44 = vld [vmem:[#allocation2 + $0x68] ss:$12 sps:$4 sm:$0xff]  }
 0x3f5   : > { %v6463_v32 = vpop.f32.mrf.mxu0 }
 0x3f6   : > { %v14027_v39 = vadd.f32 %v11035_v14, %v6462_v5  ;;  %v14029_v53 = vpop.f32.mrf.mxu1  ;;  %7920 = vmatmul.mubr.bf16.gmra.mxu1 %v11703_v10  ;;  %v14037_v5 = vld [vmem:[#allocation2 + $0xc] sm:$0xff] }
 0x3f7   : > { %v6464_v43 = vpop.f32.mrf.mxu0  ;;  %7927 = vmatprep.mubr.bf16.mxu1 %v11710_v0  ;;  %v9818_v32 = vcombine.high %v7010_v56, %v14037_v5  ;;  %v11708_v10 = vld [vmem:[#allocation2 + $0x180] ss:$12 sps:$4 sm:$0xff]  }
 0x3f8   : > { %14987 = vst [vmem:[#allocation78_spill] sm:$0xff] %v14027_v39  ;;  %v6465_v58 = vadd.f32 %v6464_v43, %v13847_v33  ;;  %v6774_v19 = vpop.f32.mrf.mxu1  ;;  %v5528_v43 = vadd.f32 %v13855_v40, %v13852_v60  ;;  %v9817_v60 = vcombine.low %v7010_v56, %v14037_v5 }
 0x3f9   : > { %v6466_v61 = vpop.f32.mrf.mxu0 }
 0x3fa   : > { %v14032_v11 = vadd.f32 %v11036_v45, %v6465_v58  ;;  %v14034_v18 = vpop.f32.mrf.mxu1 }
 0x3fb   : > { %v6469_v24 = vpop.f32.mrf.mxu0  ;;  %11102 = vmatmul.mubr.bf16.vlgmr.msra.gmra.mxu0 %v11646_v49 }
 0x3fc   : > { %14988 = vst [vmem:[#allocation79_spill] sm:$0xff] %v14032_v11  ;;  %v6470_v14 = vadd.f32 %v6469_v24, %v13849_v17  ;;  %11105 = vmatprep.mubr.bf16.mxu0 %v11647_v44  ;;  %v6777_v0 = vpop.f32.mrf.mxu1  ;;  %v11651_v44 = vld [vmem:[#allocation2 + $0x80] ss:$12 sps:$4 sm:$0xff]   ;;  %v11652_v11 = vld [vmem:[#allocation2 + $0x98] ss:$12 sps:$4 sm:$0xff]  }
 0x3fd   : > { %v6471_v33 = vpop.f32.mrf.mxu0 }
 0x3fe   : > { %v14042_v61 = vadd.f32 %v6758_v47, %v6470_v14  ;;  %v14044_v58 = vpop.f32.mrf.mxu1  ;;  %7928 = vmatmul.mubr.bf16.gmra.mxu1 %v11708_v10  ;;  %v11717_v10 = vld [vmem:[#allocation2 + $0x1e4] ss:$12 sps:$4 sm:$0xff]  }
 0x3ff   : > { %v6472_v45 = vpop.f32.mrf.mxu0  ;;  %7935 = vmatprep.mubr.bf16.mxu1 %v9818_v32 }
 0x400   : > { %v6473_v49 = vadd.f32 %v6472_v45, %v5528_v43  ;;  %v14046_v24 = vpop.f32.mrf.mxu1 }
 0x401   : > { %v6474_v17 = vpop.f32.mrf.mxu0 }
 0x402   : > { %v14048_v8 = vadd.f32 %v6761_v51, %v6473_v49  ;;  %v14050_v39 = vpop.f32.mrf.mxu1  ;;  %v11656_v17 = vld [vmem:[#allocation2 + $0xb0] ss:$12 sps:$4 sm:$0xff]  }
 0x403   : > { %v6477_v33 = vpop.f32.mrf.mxu0  ;;  %11106 = vmatmul.mubr.bf16.gmra.mxu0 %v11651_v44 }
 0x404   : > { %14989 = vst [vmem:[#allocation43_spill] sm:$0xff] %v14048_v8  ;;  %v6478_v40 = vadd.f32 %v6477_v33, %v13857_v34  ;;  %11109 = vmatprep.mubr.bf16.mxu0 %v11652_v11  ;;  %v14054_v14 = vpop.f32.mrf.mxu1  ;;  %v11657_v34 = vld [vmem:[#allocation2 + $0xc8] ss:$12 sps:$4 sm:$0xff]   ;;  %v11661_v8 = vld [vmem:[#allocation2 + $0xe0] ss:$12 sps:$4 sm:$0xff]  }
 0x405   : > { %v6479_v47 = vpop.f32.mrf.mxu0 }
 0x406   : > { %v14057_v32 = vadd.f32 %v14020_v23, %v6478_v40  ;;  %v14059_v45 = vpop.f32.mrf.mxu1  ;;  %7936 = vmatmul.mubr.bf16.gmra.mxu1 %v9817_v60  ;;  %v11715_v47 = vld [vmem:[#allocation2 + $0x1e0] ss:$12 sps:$4 sm:$0xff]  }
 0x407   : > { %v6480_v43 = vpop.f32.mrf.mxu0  ;;  %7943 = vmatprep.mubr.bf16.mxu1 %v11717_v10 }
 0x408   : > { %v6481_v51 = vadd.f32 %v6480_v43, %v13860_v4  ;;  %v14062_v56 = vpop.f32.mrf.mxu1  ;;  %v5544_v4 = vadd.f32 %v13869_v31, %v13866_v29  ;;  %v11720_v43 = vld [vmem:[#allocation2 + $0x1fc] ss:$12 sps:$4 sm:$0xff]  }
 0x409   : > { %v6482_v49 = vpop.f32.mrf.mxu0 }
 0x40a   : > { %v14064_v11 = vadd.f32 %v11040_v48, %v6481_v51  ;;  %v14066_v33 = vpop.f32.mrf.mxu1 }
 0x40b   : > { %v6485_v44 = vpop.f32.mrf.mxu0  ;;  %11110 = vmatmul.mubr.bf16.gmra.mxu0 %v11656_v17 }
 0x40c   : > { %14990 = vst [vmem:[#allocation18_spill] sm:$0xff] %v14064_v11  ;;  %v6486_v23 = vadd.f32 %v6485_v44, %v13863_v30  ;;  %11113 = vmatprep.mubr.bf16.mxu0 %v11657_v34  ;;  %v14069_v60 = vpop.f32.mrf.mxu1  ;;  %v11662_v34 = vld [vmem:[#allocation2 + $0xf8] ss:$12 sps:$4 sm:$0xff]  }
 0x40d   : > { %v6487_v40 = vpop.f32.mrf.mxu0 }
 0x40e   : > { %v14073_v10 = vadd.f32 %v6774_v19, %v6486_v23  ;;  %v14075_v48 = vpop.f32.mrf.mxu1  ;;  %7944 = vmatmul.mubr.bf16.gmra.mxu1 %v11715_v47  ;;  %v11718_v19 = vld [vmem:[#allocation2 + $0x1f8] ss:$12 sps:$4 sm:$0xff]  }
 0x40f   : > { %v6488_v49 = vpop.f32.mrf.mxu0  ;;  %7951 = vmatprep.mubr.bf16.mxu1 %v11720_v43 }
 0x410   : > { %v6489_v51 = vadd.f32 %v6488_v49, %v5544_v4  ;;  %v14077_v30 = vpop.f32.mrf.mxu1  ;;  %v11723_v4 = vld [vmem:[#allocation2 + $0x214] ss:$12 sps:$4 sm:$0xff]  }
 0x411   : > { %v6490_v17 = vpop.f32.mrf.mxu0 }
 0x412   : > { %v14079_v44 = vadd.f32 %v6777_v0, %v6489_v51  ;;  %v14081_v11 = vpop.f32.mrf.mxu1  ;;  %v11666_v51 = vld [vmem:[#allocation2 + $0x110] ss:$12 sps:$4 sm:$0xff]  }
 0x413   : > { %v6493_v40 = vpop.f32.mrf.mxu0  ;;  %11114 = vmatmul.mubr.bf16.gmra.mxu0 %v11661_v8 }
 0x414   : > { %14991 = vst [vmem:[#allocation19_spill] sm:$0xff] %v14079_v44  ;;  %v6494_v29 = vadd.f32 %v6493_v40, %v13871_v1  ;;  %11117 = vmatprep.mubr.bf16.mxu0 %v11662_v34  ;;  %v14084_v23 = vpop.f32.mrf.mxu1  ;;  %v11667_v1 = vld [vmem:[#allocation2 + $0x128] ss:$12 sps:$4 sm:$0xff]  }
 0x415   : > { %v6495_v31 = vpop.f32.mrf.mxu0 }
 0x416   : > { %v14087_v47 = vadd.f32 %v14029_v53, %v6494_v29  ;;  %v14089_v49 = vpop.f32.mrf.mxu1  ;;  %7952 = vmatmul.mubr.bf16.gmra.mxu1 %v11718_v19  ;;  %v11721_v19 = vld [vmem:[#allocation2 + $0x210] ss:$12 sps:$4 sm:$0xff]  }
 0x417   : > { %v6496_v43 = vpop.f32.mrf.mxu0  ;;  %7959 = vmatprep.mubr.bf16.mxu1 %v11723_v4 }
 0x418   : > { %v6497_v0 = vadd.f32 %v6496_v43, %v13874_v9  ;;  %v14092_v17 = vpop.f32.mrf.mxu1  ;;  %v5560_v9 = vadd.f32 %v13883_v6, %v13881_v21  ;;  %v11726_v43 = vld [vmem:[#allocation2 + $0x22c] ss:$12 sps:$4 sm:$0xff]  }
 0x419   : > { %v6498_v8 = vpop.f32.mrf.mxu0 }
 0x41a   : > { %v14095_v34 = vadd.f32 %v14034_v18, %v6497_v0  ;;  %v14097_v53 = vpop.f32.mrf.mxu1 }
 0x41b   : > { %v6501_v40 = vpop.f32.mrf.mxu0  ;;  %11118 = vmatmul.mubr.bf16.gmra.mxu0 %v11666_v51 }
 0x41c   : > { %14992 = vst [vmem:[#allocation20_spill] sm:$0xff] %v14095_v34  ;;  %v6502_v29 = vadd.f32 %v6501_v40, %v13879_v57  ;;  %11121 = vmatprep.mubr.bf16.mxu0 %v11667_v1  ;;  %v14100_v44 = vpop.f32.mrf.mxu1  ;;  %v11671_v57 = vld [vmem:[#allocation2 + $0x140] ss:$12 sps:$4 sm:$0xff]   ;;  %v11672_v40 = vld [vmem:[#allocation2 + $0x158] ss:$12 sps:$4 sm:$0xff]  }
 0x41d   : > { %v6503_v31 = vpop.f32.mrf.mxu0 }
 0x41e   : > { %v14105_v4 = vadd.f32 %v14046_v24, %v6502_v29  ;;  %v14107_v0 = vpop.f32.mrf.mxu1  ;;  %7960 = vmatmul.mubr.bf16.gmra.mxu1 %v11721_v19  ;;  %v11724_v29 = vld [vmem:[#allocation2 + $0x228] ss:$12 sps:$4 sm:$0xff]  }
 0x41f   : > { %v6504_v18 = vpop.f32.mrf.mxu0  ;;  %14993 = vst [vmem:[#allocation22_spill] sm:$0xff] %v14107_v0  ;;  %7967 = vmatprep.mubr.bf16.mxu1 %v11726_v43  ;;  %v11729_v43 = vld [vmem:[#allocation2 + $0x244] ss:$12 sps:$4 sm:$0xff]  }
 0x420   : > { %v6505_v8 = vadd.f32 %v6504_v18, %v5560_v9  ;;  %v14109_v1 = vpop.f32.mrf.mxu1 }
 0x421   : > { %v6506_v51 = vpop.f32.mrf.mxu0 }
 0x422   : > { %v14112_v31 = vadd.f32 %v14054_v14, %v6505_v8  ;;  %v14114_v21 = vpop.f32.mrf.mxu1 }
 0x423   : > { %v6509_v34 = vpop.f32.mrf.mxu0  ;;  %11122 = vmatmul.mubr.bf16.gmra.mxu0 %v11671_v57  ;;  %14995 = vst [vmem:[#allocation24_spill] sm:$0xff] %v14114_v21  ;;  %v11676_v57 = vld [vmem:[#allocation2 + $0x170] ss:$12 sps:$4 sm:$0xff]  }
 0x424   : > { %14994 = vst [vmem:[#allocation23_spill] sm:$0xff] %v14112_v31  ;;  %v6510_v6 = vadd.f32 %v6509_v34, %v13885_v2  ;;  %11125 = vmatprep.mubr.bf16.mxu0 %v11672_v40  ;;  %v14117_v19 = vpop.f32.mrf.mxu1  ;;  %v11677_v2 = vld [vmem:[#allocation2 + $0x188] ss:$12 sps:$4 sm:$0xff]  }
 0x425   : > { %v6511_v24 = vpop.f32.mrf.mxu0 }
 0x426   : > { %v14120_v9 = vadd.f32 %v14044_v58, %v6510_v6  ;;  %v14122_v51 = vpop.f32.mrf.mxu1  ;;  %7968 = vmatmul.mubr.bf16.gmra.mxu1 %v11724_v29  ;;  %v11727_v29 = vld [vmem:[#allocation2 + $0x240] ss:$12 sps:$4 sm:$0xff]  }
 0x427   : > { %v6512_v18 = vpop.f32.mrf.mxu0  ;;  %14996 = vst [vmem:[#allocation25_spill] sm:$0xff] %v14122_v51  ;;  %7975 = vmatprep.mubr.bf16.mxu1 %v11729_v43 }
 0x428   : > { %v6513_v14 = vadd.f32 %v6512_v18, %v13887_v59  ;;  %v14125_v21 = vpop.f32.mrf.mxu1  ;;  %v5576_v59 = vadd.f32 %v13892_v7, %v13894_v63  ;;  %v11732_v18 = vld [vmem:[#allocation2 + $0x25c] ss:$12 sps:$4 sm:$0xff]  }
 0x429   : > { %v6514_v8 = vpop.f32.mrf.mxu0  ;;  %14997 = vst [vmem:[#allocation26_spill] sm:$0xff] %v14125_v21  ;;  %v15043_v21 = vld [vmem:[#allocation60_spill] sm:$0xff] }
 0x42a   : > { %v14128_v34 = vadd.f32 %v14050_v39, %v6513_v14  ;;  %v14130_v58 = vpop.f32.mrf.mxu1  ;;  %v11681_v14 = vld [vmem:[#allocation2 + $0x1a0] ss:$12 sps:$4 sm:$0xff]  }
 0x42b   : > { %v6517_v40 = vpop.f32.mrf.mxu0  ;;  %11126 = vmatmul.mubr.bf16.gmra.mxu0 %v11676_v57  ;;  %14998 = vst [vmem:[#allocation27_spill] sm:$0xff] %v14130_v58  ;;  %v11712_v58 = vld [vmem:[#allocation2 + $0x308] ss:$12 sps:$4 sm:$0xff]  }
 0x42c   : > { %v6518_v6 = vadd.f32 %v6517_v40, %v13890_v42  ;;  %11129 = vmatprep.mubr.bf16.mxu0 %v11677_v2  ;;  %v14133_v51 = vpop.f32.mrf.mxu1  ;;  %v11682_v40 = vld [vmem:[#allocation2 + $0x1e8] ss:$12 sps:$4 sm:$0xff]  }
 0x42d   : > { %v6519_v24 = vpop.f32.mrf.mxu0  ;;  %14999 = vst [vmem:[#allocation28_spill] sm:$0xff] %v14133_v51 }
 0x42e   : > { %v14138_v43 = vadd.f32 %v14062_v56, %v6518_v6  ;;  %v14140_v8 = vpop.f32.mrf.mxu1  ;;  %7976 = vmatmul.mubr.bf16.gmra.mxu1 %v11727_v29  ;;  %v11730_v6 = vld [vmem:[#allocation2 + $0x258] ss:$12 sps:$4 sm:$0xff]  }
 0x42f   : > { %v6520_v39 = vpop.f32.mrf.mxu0  ;;  %15001 = vst [vmem:[#allocation30_spill] sm:$0xff] %v14140_v8  ;;  %7983 = vmatprep.mubr.bf16.mxu1 %v11732_v18 }
 0x430   : > { %15000 = vst [vmem:[#allocation29_spill] sm:$0xff] %v14138_v43  ;;  %v6521_v57 = vadd.f32 %v6520_v39, %v5576_v59  ;;  %v14142_v2 = vpop.f32.mrf.mxu1  ;;  %v11735_v59 = vld [vmem:[#allocation2 + $0x274] ss:$12 sps:$4 sm:$0xff]  }
 0x431   : > { %v6522_v42 = vpop.f32.mrf.mxu0  ;;  %15002 = vst [vmem:[#allocation31_spill] sm:$0xff] %v14142_v2 }
 0x432   : > { %v14145_v24 = vadd.f32 %v14069_v60, %v6521_v57  ;;  %v14147_v7 = vpop.f32.mrf.mxu1  ;;  %v11686_v57 = vld [vmem:[#allocation2 + $0x200] ss:$12 sps:$4 sm:$0xff]  }
 0x433   : > { %v6525_v51 = vpop.f32.mrf.mxu0  ;;  %11130 = vmatmul.mubr.bf16.gmra.mxu0 %v11681_v14  ;;  %15004 = vst [vmem:[#allocation33_spill] sm:$0xff] %v14147_v7  ;;  %v11707_v7 = vld [vmem:[#allocation2 + $0x2d8] ss:$12 sps:$4 sm:$0xff]  }
 0x434   : > { %15003 = vst [vmem:[#allocation32_spill] sm:$0xff] %v14145_v24  ;;  %v6526_v63 = vadd.f32 %v6525_v51, %v13897_v20  ;;  %11133 = vmatprep.mubr.bf16.mxu0 %v11682_v40  ;;  %v14150_v8 = vpop.f32.mrf.mxu1  ;;  %v11687_v20 = vld [vmem:[#allocation2 + $0x218] ss:$12 sps:$4 sm:$0xff]  }
 0x435   : > { %v6527_v56 = vpop.f32.mrf.mxu0  ;;  %15005 = vst [vmem:[#allocation34_spill] sm:$0xff] %v14150_v8 }
 0x436   : > { %v14153_v29 = vadd.f32 %v14059_v45, %v6526_v63  ;;  %v14155_v39 = vpop.f32.mrf.mxu1  ;;  %7984 = vmatmul.mubr.bf16.gmra.mxu1 %v11730_v6  ;;  %v11733_v6 = vld [vmem:[#allocation2 + $0x270] ss:$12 sps:$4 sm:$0xff]  }
 0x437   : > { %v6528_v18 = vpop.f32.mrf.mxu0  ;;  %15007 = vst [vmem:[#allocation36_spill] sm:$0xff] %v14155_v39  ;;  %7991 = vmatprep.mubr.bf16.mxu1 %v11735_v59 }
 0x438   : > { %15006 = vst [vmem:[#allocation35_spill] sm:$0xff] %v14153_v29  ;;  %v6529_v60 = vadd.f32 %v6528_v18, %v13899_v28  ;;  %v14158_v42 = vpop.f32.mrf.mxu1  ;;  %v15012_v28 = vld [vmem:[#allocation49_spill] sm:$0xff] }
 0x439   : > { %v6530_v14 = vpop.f32.mrf.mxu0  ;;  %15008 = vst [vmem:[#allocation37_spill] sm:$0xff] %v14158_v42  ;;  %v5592_v59 = vadd.f32 %v15012_v28, %v13906_v13  ;;  %v11742_v42 = vld [vmem:[#allocation2 + $0x2b8] ss:$12 sps:$4 sm:$0xff]  }
 0x43a   : > { %v14161_v51 = vadd.f32 %v14066_v33, %v6529_v60  ;;  %v14163_v45 = vpop.f32.mrf.mxu1  ;;  %v11738_v14 = vld [vmem:[#allocation2 + $0x28c] ss:$12 sps:$4 sm:$0xff]  }
 0x43b   : > { %v6533_v40 = vpop.f32.mrf.mxu0  ;;  %11134 = vmatmul.mubr.bf16.gmra.mxu0 %v11686_v57  ;;  %15010 = vst [vmem:[#allocation39_spill] sm:$0xff] %v14163_v45 }
 0x43c   : > { %15009 = vst [vmem:[#allocation38_spill] sm:$0xff] %v14161_v51  ;;  %v6534_v63 = vadd.f32 %v6533_v40, %v13902_v27  ;;  %11137 = vmatprep.mubr.bf16.mxu0 %v11687_v20  ;;  %v14166_v39 = vpop.f32.mrf.mxu1  ;;  %v11691_v27 = vld [vmem:[#allocation2 + $0x230] ss:$12 sps:$4 sm:$0xff]   ;;  %v11692_v40 = vld [vmem:[#allocation2 + $0x248] ss:$12 sps:$4 sm:$0xff]  }
 0x43d   : > { %v6535_v56 = vpop.f32.mrf.mxu0  ;;  %15011 = vst [vmem:[#allocation40_spill] sm:$0xff] %v14166_v39 }
 0x43e   : > { %v14171_v18 = vadd.f32 %v14077_v30, %v6534_v63  ;;  %v14173_v60 = vpop.f32.mrf.mxu1  ;;  %7992 = vmatmul.mubr.bf16.gmra.mxu1 %v11733_v6  ;;  %v15018_v30 = vld [vmem:[#allocation50_spill] sm:$0xff] }
 0x43f   : > { %v6536_v33 = vpop.f32.mrf.mxu0  ;;  %15014 = vst [vmem:[#allocation42_spill] sm:$0xff] %v14173_v60  ;;  %7999 = vmatprep.mubr.bf16.mxu1 %v11738_v14  ;;  %v11736_v60 = vld [vmem:[#allocation2 + $0x288] ss:$12 sps:$4 sm:$0xff]  }
 0x440   : > { %15013 = vst [vmem:[#allocation41_spill] sm:$0xff] %v14171_v18  ;;  %v6537_v57 = vadd.f32 %v6536_v33, %v5592_v59  ;;  %v14175_v20 = vpop.f32.mrf.mxu1  ;;  %v11741_v59 = vld [vmem:[#allocation2 + $0x2a4] ss:$12 sps:$4 sm:$0xff]  }
 0x441   : > { %v6538_v45 = vpop.f32.mrf.mxu0  ;;  %15015 = vst [vmem:[#allocation44_spill] sm:$0xff] %v14175_v20 }
 0x442   : > { %v14178_v56 = vadd.f32 %v14084_v23, %v6537_v57  ;;  %v14180_v13 = vpop.f32.mrf.mxu1  ;;  %v15022_v23 = vld [vmem:[#allocation51_spill] sm:$0xff] }
 0x443   : > { %v6541_v39 = vpop.f32.mrf.mxu0  ;;  %11138 = vmatmul.mubr.bf16.gmra.mxu0 %v11691_v27  ;;  %15017 = vst [vmem:[#allocation46_spill] sm:$0xff] %v14180_v13  ;;  %v11696_v13 = vld [vmem:[#allocation2 + $0x260] ss:$12 sps:$4 sm:$0xff]  }
 0x444   : > { %15016 = vst [vmem:[#allocation45_spill] sm:$0xff] %v14178_v56  ;;  %v6542_v63 = vadd.f32 %v6541_v39, %v15018_v30  ;;  %11141 = vmatprep.mubr.bf16.mxu0 %v11692_v40  ;;  %v14183_v6 = vpop.f32.mrf.mxu1  ;;  %v11697_v39 = vld [vmem:[#allocation2 + $0x278] ss:$12 sps:$4 sm:$0xff]  }
 0x445   : > { %v6543_v28 = vpop.f32.mrf.mxu0  ;;  %15019 = vst [vmem:[#allocation47_spill] sm:$0xff] %v14183_v6 }
 0x446   : > { %v14186_v45 = vadd.f32 %v14075_v48, %v6542_v63  ;;  %v14188_v33 = vpop.f32.mrf.mxu1  ;;  %8000 = vmatmul.mubr.bf16.gmra.mxu1 %v11736_v60  ;;  %v15026_v63 = vld [vmem:[#allocation52_spill] sm:$0xff]  ;;  %v11739_v60 = vld [vmem:[#allocation2 + $0x2a0] ss:$12 sps:$4 sm:$0xff]  }
 0x447   : > { %v6544_v14 = vpop.f32.mrf.mxu0  ;;  %15021 = vst [vmem:[#allocation21_spill] sm:$0xff] %v14188_v33  ;;  %8007 = vmatprep.mubr.bf16.mxu1 %v11741_v59 }
 0x448   : > { %15020 = vst [vmem:[#allocation48_spill] sm:$0xff] %v14186_v45  ;;  %v6545_v57 = vadd.f32 %v6544_v14, %v15022_v23  ;;  %v14191_v20 = vpop.f32.mrf.mxu1  ;;  %v11744_v14 = vld [vmem:[#allocation2 + $0x2bc] ss:$12 sps:$4 sm:$0xff]  }
 0x449   : > { %v6546_v27 = vpop.f32.mrf.mxu0  ;;  %15023 = vst [vmem:[#allocation49_spill] sm:$0xff] %v14191_v20 }
 0x44a   : > { %v14194_v40 = vadd.f32 %v14081_v11, %v6545_v57  ;;  %v14196_v48 = vpop.f32.mrf.mxu1  ;;  %v15029_v11 = vld [vmem:[#allocation53_spill] sm:$0xff] }
 0x44b   : > { %v6549_v30 = vpop.f32.mrf.mxu0  ;;  %11142 = vmatmul.mubr.bf16.gmra.mxu0 %v11696_v13  ;;  %15025 = vst [vmem:[#allocation51_spill] sm:$0xff] %v14196_v48  ;;  %v11701_v48 = vld [vmem:[#allocation2 + $0x290] ss:$12 sps:$4 sm:$0xff]  }
 0x44c   : > { %15024 = vst [vmem:[#allocation50_spill] sm:$0xff] %v14194_v40  ;;  %v6550_v28 = vadd.f32 %v6549_v30, %v15026_v63  ;;  %11145 = vmatprep.mubr.bf16.mxu0 %v11697_v39  ;;  %v14199_v6 = vpop.f32.mrf.mxu1  ;;  %v11702_v30 = vld [vmem:[#allocation2 + $0x2a8] ss:$12 sps:$4 sm:$0xff]  }
 0x44d   : > { %v6551_v33 = vpop.f32.mrf.mxu0  ;;  %15027 = vst [vmem:[#allocation52_spill] sm:$0xff] %v14199_v6 }
 0x44e   : > { %v14202_v59 = vadd.f32 %v14092_v17, %v6550_v28  ;;  %v14204_v27 = vpop.f32.mrf.mxu1  ;;  %8008 = vmatmul.mubr.bf16.gmra.mxu1 %v11739_v60  ;;  %v15031_v17 = vld [vmem:[#allocation54_spill] sm:$0xff] }
 0x44f   : > { %v6552_v23 = vpop.f32.mrf.mxu0  ;;  %8015 = vmatprep.mubr.bf16.mxu1 %v11744_v14  ;;  %v11747_v14 = vld [vmem:[#allocation2 + $0x2d4] ss:$12 sps:$4 sm:$0xff]  }
 0x450   : > { %15028 = vst [vmem:[#allocation80_spill] sm:$0xff] %v14202_v59  ;;  %v6553_v57 = vadd.f32 %v6552_v23, %v15029_v11  ;;  %v7819_v20 = vpop.f32.mrf.mxu1 }
 0x451   : > { %v6554_v13 = vpop.f32.mrf.mxu0 }
 0x452   : > { %v14208_v33 = vadd.f32 %v14100_v44, %v6553_v57  ;;  %v14210_v63 = vpop.f32.mrf.mxu1  ;;  %v15033_v44 = vld [vmem:[#allocation55_spill] sm:$0xff] }
 0x453   : > { %v6557_v39 = vpop.f32.mrf.mxu0  ;;  %11146 = vmatmul.mubr.bf16.gmra.mxu0 %v11701_v48  ;;  %v11706_v13 = vld [vmem:[#allocation2 + $0x2c0] ss:$12 sps:$4 sm:$0xff]  }
 0x454   : > { %15030 = vst [vmem:[#allocation53_spill] sm:$0xff] %v14208_v33  ;;  %v6558_v28 = vadd.f32 %v6557_v39, %v15031_v17  ;;  %11149 = vmatprep.mubr.bf16.mxu0 %v11702_v30  ;;  %v7822_v60 = vpop.f32.mrf.mxu1 }
 0x455   : > { %v6559_v6 = vpop.f32.mrf.mxu0  ;;  %v11745_v60 = vld [vmem:[#allocation2 + $0x2d0] ss:$12 sps:$4 sm:$0xff]  }
 0x456   : > { %v14214_v23 = vadd.f32 %v14089_v49, %v6558_v28  ;;  %v14216_v20 = vpop.f32.mrf.mxu1  ;;  %8016 = vmatmul.mubr.bf16.gmra.mxu1 %v11742_v42  ;;  %v15035_v49 = vld [vmem:[#allocation56_spill] sm:$0xff] }
 0x457   : > { %v6560_v11 = vpop.f32.mrf.mxu0  ;;  %8023 = vmatprep.mubr.bf16.mxu1 %v11747_v14  ;;  %v11750_v14 = vld [vmem:[#allocation2 + $0x2ec] ss:$12 sps:$4 sm:$0xff]  }
 0x458   : > { %15032 = vst [vmem:[#allocation54_spill] sm:$0xff] %v14214_v23  ;;  %v6561_v57 = vadd.f32 %v6560_v11, %v15033_v44  ;;  %v7827_v8 = vpop.f32.mrf.mxu1 }
 0x459   : > { %v6562_v48 = vpop.f32.mrf.mxu0 }
 0x45a   : > { %v14220_v30 = vadd.f32 %v14097_v53, %v6561_v57  ;;  %v14222_v39 = vpop.f32.mrf.mxu1  ;;  %v15037_v53 = vld [vmem:[#allocation57_spill] sm:$0xff] }
 0x45b   : > { %v6565_v6 = vpop.f32.mrf.mxu0  ;;  %11150 = vmatmul.mubr.bf16.gmra.mxu0 %v11706_v13  ;;  %v11711_v13 = vld [vmem:[#allocation2 + $0x2f0] ss:$12 sps:$4 sm:$0xff]  }
 0x45c   : > { %15034 = vst [vmem:[#allocation55_spill] sm:$0xff] %v14220_v30  ;;  %v6566_v17 = vadd.f32 %v6565_v6, %v15035_v49  ;;  %11153 = vmatprep.mubr.bf16.mxu0 %v11707_v7  ;;  %v7830_v42 = vpop.f32.mrf.mxu1 }
 0x45d   : > { %v6567_v28 = vpop.f32.mrf.mxu0 }
 0x45e   : > { %v14226_v11 = vadd.f32 %v14109_v1, %v6566_v17  ;;  %v14228_v8 = vpop.f32.mrf.mxu1  ;;  %8024 = vmatmul.mubr.bf16.gmra.mxu1 %v11745_v60  ;;  %v15039_v1 = vld [vmem:[#allocation58_spill] sm:$0xff]  ;;  %v11748_v60 = vld [vmem:[#allocation2 + $0x2e8] ss:$12 sps:$4 sm:$0xff]  }
 0x45f   : > { %v6568_v44 = vpop.f32.mrf.mxu0  ;;  %8031 = vmatprep.mubr.bf16.mxu1 %v11750_v14 }
 0x460   : > { %15036 = vst [vmem:[#allocation56_spill] sm:$0xff] %v14226_v11  ;;  %v6569_v57 = vadd.f32 %v6568_v44, %v15037_v53  ;;  %v7835_v2 = vpop.f32.mrf.mxu1  ;;  %v11753_v44 = vld [vmem:[#allocation2 + $0x304] ss:$12 sps:$4 sm:$0xff]  }
 0x461   : > { %v6570_v48 = vpop.f32.mrf.mxu0  ;;  %v2643_v2 = vld [vmem:[#allocation2 + $0x35c] sm:$0x8] }
 0x462   : > { %v14232_v7 = vadd.f32 %v14117_v19, %v6569_v57  ;;  %v14234_v49 = vpop.f32.mrf.mxu1  ;;  %v15041_v48 = vld [vmem:[#allocation59_spill] sm:$0xff]  ;;  %v2644_v57 = vsel %vm12389_vm5, 0, %v2643_v2 }
 0x463   : > { %v6573_v6 = vpop.f32.mrf.mxu0  ;;  %11154 = vmatmul.mubr.bf16.gmra.mxu0 %v11711_v13  ;;  %2645 = vst [vmem:[#allocation2 + $0x35c] sm:$0x8] %v2644_v57  ;;  %v2532_v2 = vld [vmem:[#allocation2 + $0x348] sm:$0x1] }
 0x464   : > { %15038 = vst [vmem:[#allocation57_spill] sm:$0xff] %v14232_v7  ;;  %v14237_v17 = vadd.f32 %v6573_v6, %v15039_v1  ;;  %11157 = vmatprep.mubr.bf16.mxu0 %v11712_v58  ;;  %v7838_v42 = vpop.f32.mrf.mxu1  ;;  %v11713_v6 = vld [vmem:[#allocation2 + $0x320] ss:$12 sps:$4 sm:$0xff]   ;;  %v11714_v58 = vld [vmem:[#allocation2 + $0x338] ss:$12 sps:$4 sm:$0xff]  }
 0x465   : > { %v6575_v28 = vpop.f32.mrf.mxu0 }
 0x466   : > { %15040 = vst [vmem:[#allocation58_spill] sm:$0xff] %v14237_v17  ;;  %v14239_v53 = vpop.f32.mrf.mxu1  ;;  %8032 = vmatmul.mubr.bf16.gmra.mxu1 %v11748_v60 }
 0x467   : > { %v6576_v14 = vpop.f32.mrf.mxu0  ;;  %8039 = vmatprep.mubr.bf16.mxu1 %v11753_v44  ;;  %v11756_v44 = vld [vmem:[#allocation2 + $0x31c] ss:$12 sps:$4 sm:$0xff]  }
 0x468   : > { %v14242_v19 = vadd.f32 %v6576_v14, %v15041_v48  ;;  %v7843_v1 = vpop.f32.mrf.mxu1  ;;  %v11751_v14 = vld [vmem:[#allocation2 + $0x300] ss:$12 sps:$4 sm:$0xff]  }
 0x469   : > { %v6578_v13 = vpop.f32.mrf.mxu0  ;;  %v2533_v1 = vsel %vm12368_vm2, 0, %v2532_v2 }
 0x46a   : > { %15042 = vst [vmem:[#allocation59_spill] sm:$0xff] %v14242_v19  ;;  %v14246_v42 = vpop.f32.mrf.mxu1  ;;  %v15045_v13 = vld [vmem:[#allocation61_spill] sm:$0xff]  ;;  %2534 = vst [vmem:[#allocation2 + $0x348] sm:$0x1] %v2533_v1 }
 0x46b   : > { %v6581_v28 = vpop.f32.mrf.mxu0  ;;  %11158 = vmatmul.mubr.bf16.gmra.mxu0 %v11713_v6  ;;  %v11760_v6 = vld [vmem:[#allocation2 + $0x350] ss:$12 sps:$4 sm:$0xff]   ;;  %v11754_v19 = vld [vmem:[#allocation2 + $0x318] ss:$12 sps:$4 sm:$0xff]  }
 0x46c   : > { %v14249_v7 = vadd.f32 %v6581_v28, %v15043_v21  ;;  %11161 = vmatprep.mubr.bf16.mxu0 %v11714_v58  ;;  %v7846_v48 = vpop.f32.mrf.mxu1 }
 0x46d   : > { %v6583_v60 = vpop.f32.mrf.mxu0  ;;  %v15047_v48 = vld [vmem:[#allocation62_spill] sm:$0xff] }
 0x46e   : > { %15044 = vst [vmem:[#allocation60_spill] sm:$0xff] %v14249_v7  ;;  %v14251_v15 = vpop.f32.mrf.mxu1  ;;  %8040 = vmatmul.mubr.bf16.gmra.mxu1 %v11751_v14 }
 0x46f   : > { %v6584_v11 = vpop.f32.mrf.mxu0  ;;  %8047 = vmatprep.mubr.bf16.mxu1 %v11756_v44 }
 0x470   : > { %v14254_v57 = vadd.f32 %v6584_v11, %v15045_v13  ;;  %v7851_v28 = vpop.f32.mrf.mxu1  ;;  %v11759_v11 = vld [vmem:[#allocation2 + $0x334] ss:$12 sps:$4 sm:$0xff]  }
 0x471   : > { %v6586_v21 = vpop.f32.mrf.mxu0  ;;  %v7074_v28 = vld [vmem:[#allocation2 + $0x348] sm:$0xff] }
 0x472   : > { %15046 = vst [vmem:[#allocation61_spill] sm:$0xff] %v14254_v57  ;;  %v14258_v60 = vpop.f32.mrf.mxu1 }
 0x473   : > { %v6589_v58 = vpop.f32.mrf.mxu0  ;;  %11162 = vmatmul.mubr.bf16.gmra.mxu0 %v11760_v6 }
 0x474   : > { %v14261_v7 = vadd.f32 %v6589_v58, %v15047_v48  ;;  %v7854_v0 = vpop.f32.mrf.mxu1  ;;  %v15051_v58 = vld [vmem:[#allocation64_spill] sm:$0xff] }
 0x475   : > { %v6591_v14 = vpop.f32.mrf.mxu0  ;;  %v9866_v0 = vcombine.high %v7074_v28, %v14037_v5 }
 0x476   : > { %15048 = vst [vmem:[#allocation62_spill] sm:$0xff] %v14261_v7  ;;  %v14263_v44 = vpop.f32.mrf.mxu1  ;;  %8048 = vmatmul.mubr.bf16.gmra.mxu1 %v11754_v19  ;;  %v11757_v7 = vld [vmem:[#allocation2 + $0x330] ss:$12 sps:$4 sm:$0xff]  }
 0x477   : > { %v6592_v13 = vpop.f32.mrf.mxu0  ;;  %8055 = vmatprep.mubr.bf16.mxu1 %v11759_v11 }
 0x478   : > { %v14266_v2 = vadd.f32 %v6592_v13, %v15049_v3  ;;  %v7859_v21 = vpop.f32.mrf.mxu1  ;;  %v15053_v13 = vld [vmem:[#allocation65_spill] sm:$0xff] }
 0x479   : > { %v6594_v1 = vpop.f32.mrf.mxu0 }
 0x47a   : > { %15050 = vst [vmem:[#allocation63_spill] sm:$0xff] %v14266_v2  ;;  %v14268_v6 = vpop.f32.mrf.mxu1 }
 0x47b   : > { %v6597_v57 = vpop.f32.mrf.mxu0 }
 0x47c   : > { %v14271_v48 = vadd.f32 %v6597_v57, %v15051_v58  ;;  %v7862_v17 = vpop.f32.mrf.mxu1  ;;  %v9865_v57 = vcombine.low %v7074_v28, %v14037_v5  ;;  %v15055_v58 = vld [vmem:[#allocation66_spill] sm:$0xff] }
 0x47d   : > { %v6599_v14 = vpop.f32.mrf.mxu0 }
 0x47e   : > { %15052 = vst [vmem:[#allocation64_spill] sm:$0xff] %v14271_v48  ;;  %v14274_v19 = vpop.f32.mrf.mxu1  ;;  %8056 = vmatmul.mubr.bf16.gmra.mxu1 %v11757_v7  ;;  %v15057_v7 = vld [vmem:[#allocation67_spill] sm:$0xff] }
 0x47f   : > { %v6600_v33 = vpop.f32.mrf.mxu0  ;;  %8063 = vmatprep.mubr.bf16.mxu1 %v9866_v0 }
 0x480   : > { %v14277_v11 = vadd.f32 %v6600_v33, %v15053_v13  ;;  %v7867_v1 = vpop.f32.mrf.mxu1 }
 0x481   : > { %v6602_v3 = vpop.f32.mrf.mxu0 }
 0x482   : > { %15054 = vst [vmem:[#allocation65_spill] sm:$0xff] %v14277_v11  ;;  %v14279_v2 = vpop.f32.mrf.mxu1  ;;  %v15059_v11 = vld [vmem:[#allocation68_spill] sm:$0xff] }
 0x483   : > { %v6605_v21 = vpop.f32.mrf.mxu0 }
 0x484   : > { %v14283_v48 = vadd.f32 %v6605_v21, %v15055_v58  ;;  %v7870_v17 = vpop.f32.mrf.mxu1 }
 0x485   : > { %v6607_v14 = vpop.f32.mrf.mxu0 }
 0x486   : > { %15056 = vst [vmem:[#allocation66_spill] sm:$0xff] %v14283_v48  ;;  %v14285_v59 = vpop.f32.mrf.mxu1  ;;  %8064 = vmatmul.mubr.bf16.gmra.mxu1 %v9865_v57  ;;  %v15061_v14 = vld [vmem:[#allocation69_spill] sm:$0xff] }
 0x487   : > { %v6608_v30 = vpop.f32.mrf.mxu0 }
 0x488   : > { %v14288_v33 = vadd.f32 %v6608_v30, %v15057_v7  ;;  %v7875_v13 = vpop.f32.mrf.mxu1 }
 0x489   : > { %v6610_v0 = vpop.f32.mrf.mxu0 }
 0x48a   : > { %15058 = vst [vmem:[#allocation67_spill] sm:$0xff] %v14288_v33  ;;  %v14290_v1 = vpop.f32.mrf.mxu1  ;;  %v15063_v0 = vld [vmem:[#allocation70_spill] sm:$0xff] }
 0x48b   : > { %v6613_v3 = vpop.f32.mrf.mxu0 }
 0x48c   : > { %v14293_v23 = vadd.f32 %v6613_v3, %v15059_v11  ;;  %v7878_v28 = vpop.f32.mrf.mxu1 }
 0x48d   : > { %v6615_v5 = vpop.f32.mrf.mxu0 }
 0x48e   : > { %15060 = vst [vmem:[#allocation68_spill] sm:$0xff] %v14293_v23  ;;  %v14295_v58 = vpop.f32.mrf.mxu1  ;;  %v15065_v5 = vld [vmem:[#allocation71_spill] sm:$0xff] }
 0x48f   : > { %v6616_v21 = vpop.f32.mrf.mxu0 }
 0x490   : > { %v14298_v17 = vadd.f32 %v6616_v21, %v15061_v14  ;;  %v7883_v48 = vpop.f32.mrf.mxu1 }
 0x491   : > { %v6618_v57 = vpop.f32.mrf.mxu0  ;;  %v15067_v48 = vld [vmem:[#allocation72_spill] sm:$0xff] }
 0x492   : > { %15062 = vst [vmem:[#allocation69_spill] sm:$0xff] %v14298_v17  ;;  %v14300_v7 = vpop.f32.mrf.mxu1 }
 0x493   : > { %v6621_v30 = vpop.f32.mrf.mxu0 }
 0x494   : > { %v14303_v13 = vadd.f32 %v6621_v30, %v15063_v0  ;;  %v7886_v56 = vpop.f32.mrf.mxu1 }
 0x495   : > { %v6623_v33 = vpop.f32.mrf.mxu0  ;;  %v15069_v56 = vld [vmem:[#allocation73_spill] sm:$0xff] }
 0x496   : > { %15064 = vst [vmem:[#allocation70_spill] sm:$0xff] %v14303_v13  ;;  %v14305_v3 = vpop.f32.mrf.mxu1 }
 0x497   : > { %v6624_v11 = vpop.f32.mrf.mxu0 }
 0x498   : > { %v14308_v28 = vadd.f32 %v6624_v11, %v15065_v5  ;;  %v7891_v40 = vpop.f32.mrf.mxu1 }
 0x499   : > { %v6626_v23 = vpop.f32.mrf.mxu0  ;;  %v15071_v40 = vld [vmem:[#allocation74_spill] sm:$0xff] }
 0x49a   : > { %15066 = vst [vmem:[#allocation71_spill] sm:$0xff] %v14308_v28  ;;  %v14310_v14 = vpop.f32.mrf.mxu1 }
 0x49b   : > { %v6629_v21 = vpop.f32.mrf.mxu0 }
 0x49c   : > { %v14313_v57 = vadd.f32 %v6629_v21, %v15067_v48  ;;  %v7894_v18 = vpop.f32.mrf.mxu1 }
 0x49d   : > { %v6631_v17 = vpop.f32.mrf.mxu0  ;;  %v15073_v18 = vld [vmem:[#allocation75_spill] sm:$0xff] }
 0x49e   : > { %15068 = vst [vmem:[#allocation72_spill] sm:$0xff] %v14313_v57  ;;  %v14315_v0 = vpop.f32.mrf.mxu1 }
 0x49f   : > { %v6632_v30 = vpop.f32.mrf.mxu0 }
 0x4a0   : > { %v14318_v33 = vadd.f32 %v6632_v30, %v15069_v56  ;;  %v7899_v45 = vpop.f32.mrf.mxu1 }
 0x4a1   : > { %v6634_v13 = vpop.f32.mrf.mxu0 }
 0x4a2   : > { %15070 = vst [vmem:[#allocation73_spill] sm:$0xff] %v14318_v33  ;;  %v14320_v5 = vpop.f32.mrf.mxu1 }
 0x4a3   : > { %v6637_v11 = vpop.f32.mrf.mxu0 }
 0x4a4   : > { %v14323_v23 = vadd.f32 %v6637_v11, %v15071_v40  ;;  %v7902_v24 = vpop.f32.mrf.mxu1 }
 0x4a5   : > { %v6639_v28 = vpop.f32.mrf.mxu0 }
 0x4a6   : > { %15072 = vst [vmem:[#allocation74_spill] sm:$0xff] %v14323_v23  ;;  %v14325_v48 = vpop.f32.mrf.mxu1 }
 0x4a7   : > { %v6640_v21 = vpop.f32.mrf.mxu0 }
 0x4a8   : > { %v14328_v17 = vadd.f32 %v6640_v21, %v15073_v18  ;;  %v7907_v51 = vpop.f32.mrf.mxu1 }
 0x4a9   : > { %v6642_v57 = vpop.f32.mrf.mxu0 }
 0x4aa   : > { %15074 = vst [vmem:[#allocation75_spill] sm:$0xff] %v14328_v17  ;;  %v14330_v56 = vpop.f32.mrf.mxu1  ;;  %v10383_v17 = vld [vmem:[%s12228_s11 + $0x8] sm:$0xff]  }
 0x4ab   : > { %v6645_v30 = vpop.f32.mrf.mxu0 }
 0x4ac   : > { %v14333_v45 = vadd.f32 %v6645_v30, %v13971_v55  ;;  %v7910_v33 = vpop.f32.mrf.mxu1 }
 0x4ad   : > { %v6647_v13 = vpop.f32.mrf.mxu0 }
 0x4ae   : > { %15075 = vst [vmem:[#allocation81_spill] sm:$0xff] %v14333_v45  ;;  %v14335_v40 = vpop.f32.mrf.mxu1 }
 0x4af   : > { %v6648_v11 = vpop.f32.mrf.mxu0 }
 0x4b0   : > { %v14338_v24 = vadd.f32 %v6648_v11, %v13974_v12  ;;  %v7915_v21 = vpop.f32.mrf.mxu1 }
 0x4b1   : > { %v6650_v28 = vpop.f32.mrf.mxu0 }
 0x4b2   : > { %15076 = vst [vmem:[#allocation82_spill] sm:$0xff] %v14338_v24  ;;  %v14340_v57 = vpop.f32.mrf.mxu1 }
 0x4b3   : > { %v6653_v18 = vpop.f32.mrf.mxu0 }
 0x4b4   : > { %v14343_v51 = vadd.f32 %v6653_v18, %v13977_v54  ;;  %v7918_v30 = vpop.f32.mrf.mxu1  ;;  %v10096_v18 = vld [vmem:[%s12228_s11] sm:$0xff]  }
 0x4b5   : > { %v6655_v55 = vpop.f32.mrf.mxu0 }
 0x4b6   : > { %15077 = vst [vmem:[#allocation83_spill] sm:$0xff] %v14343_v51  ;;  %v14345_v33 = vpop.f32.mrf.mxu1  ;;  %v10102_v51 = vunpack.c.h.bf16 %v10383_v17 }
 0x4b7   : > { %v6656_v13 = vpop.f32.mrf.mxu0 }
 0x4b8   : > { %v14348_v45 = vadd.f32 %v6656_v13, %v13980_v22  ;;  %v7923_v11 = vpop.f32.mrf.mxu1  ;;  %v14360_v22 = vld [vmem:[%s14729_s5] ss:$0 sm:$0xff]  ;;  %v10101_v13 = vunpack.c.l.bf16 %v10383_v17  ;;  %v10384_v17 = vld [vmem:[%s12228_s11 + $0x10] sm:$0xff]  }
 0x4b9   : > { %v6658_v12 = vpop.f32.mrf.mxu0 }
 0x4ba   : > { %15078 = vst [vmem:[#allocation84_spill] sm:$0xff] %v14348_v45  ;;  %v14350_v28 = vpop.f32.mrf.mxu1 }
 0x4bb   : > { %v11103_v24 = vpop.f32.mrf.mxu0 }
 0x4bc   : > { %v8115_v21 = vadd.f32 %v11103_v24, %v14216_v20  ;;  %v7926_v43 = vpop.f32.mrf.mxu1  ;;  %v10097_v24 = vunpack.c.l.bf16 %v10096_v18 }
 0x4bd   : > { %v8106_v23 = vpop.f32.mrf.mxu0 }
 0x4be   : > { %v8107_v54 = vadd.f32 %v8106_v23, %v14204_v27  ;;  %v8363_v55 = vadd.f32 %v8115_v21, %v13984_v41  ;;  %v14362_v12 = vpop.f32.mrf.mxu1 }
 0x4bf   : > { %v11104_v30 = vpop.f32.mrf.mxu0  ;;  %15079 = vst [vmem:[#allocation85_spill] sm:$0xff] %v14362_v12 }
 0x4c0   : > { %v8361_v11 = vadd.f32 %v8107_v54, %v13986_v37  ;;  %v8562_v20 = vadd.f32 %v14360_v22, %v8363_v55  ;;  %v8118_v43 = vadd.f32 %v11104_v30, %v14222_v39  ;;  %v7931_v23 = vpop.f32.mrf.mxu1  ;;  %v10098_v54 = vunpack.c.h.bf16 %v10096_v18 }
 0x4c1   : > { %v8109_v27 = vpop.f32.mrf.mxu0 }
 0x4c2   : > { %v8560_v41 = vadd.f32 %v14360_v22, %v8361_v11  ;;  %v8110_v21 = vadd.f32 %v8109_v27, %v14210_v63  ;;  %v8364_v45 = vadd.f32 %v8118_v43, %v13989_v25  ;;  %v8626_v29 = vadd.f32 %v10101_v13, %v8562_v20  ;;  %v14370_v31 = vpop.f32.mrf.mxu1  ;;  %v10385_v13 = vld [vmem:[%s12228_s11 + $0x18] sm:$0xff]  }
 0x4c3   : > { %v11107_v12 = vpop.f32.mrf.mxu0  ;;  %15080 = vst [vmem:[#allocation86_spill] sm:$0xff] %v14370_v31 }
 0x4c4   : > { %v8362_v37 = vadd.f32 %v8110_v21, %v13991_v36  ;;  %v8563_v39 = vadd.f32 %v14360_v22, %v8364_v45  ;;  %v8624_v55 = vadd.f32 %v10097_v24, %v8560_v41  ;;  %v8131_v11 = vadd.f32 %v11107_v12, %v14239_v53  ;;  %v7934_v23 = vpop.f32.mrf.mxu1 }
 0x4c5   : > { %v8122_v30 = vpop.f32.mrf.mxu0  ;;  %v8690_v20 = vmax.f32 %v8626_v29, 0.0  ;;  %v10105_v41 = vunpack.c.l.bf16 %v10384_v17  ;;  %v10109_v21 = vunpack.c.l.bf16 %v10385_v13  ;;  %v10106_v23 = vunpack.c.h.bf16 %v10384_v17 }
 0x4c6   : > { %v8561_v63 = vadd.f32 %v14360_v22, %v8362_v37  ;;  %v8627_v27 = vadd.f32 %v10102_v51, %v8563_v39  ;;  %v8123_v25 = vadd.f32 %v8122_v30, %v14228_v8  ;;  %v8367_v31 = vadd.f32 %v8131_v11, %v13994_v35  ;;  %v14380_v36 = vpop.f32.mrf.mxu1 }
 0x4c7   : > { %v11108_v43 = vpop.f32.mrf.mxu0  ;;  %v8688_v12 = vmax.f32 %v8624_v55, 0.0  ;;  %v10110_v11 = vunpack.c.h.bf16 %v10385_v13 }
 0x4c8   : > { %v8625_v18 = vadd.f32 %v10098_v54, %v8561_v63  ;;  %v8691_v45 = vmax.f32 %v8627_v27, 0.0  ;;  %v8365_v24 = vadd.f32 %v8123_v25, %v13996_v16  ;;  %v8134_v53 = vadd.f32 %v11108_v43, %v14246_v42  ;;  %v7939_v37 = vpop.f32.mrf.mxu1  ;;  %v10386_v25 = vld [vmem:[%s12228_s11 + $0x20] sm:$0xff]  }
 0x4c9   : > { %v8125_v51 = vpop.f32.mrf.mxu0  ;;  %v8566_v8 = vadd.f32 %v14360_v22, %v8367_v31 }
 0x4ca   : > { %v8689_v29 = vmax.f32 %v8625_v18, 0.0  ;;  %v10231_v39 = vpack.c.bf16 %v8691_v45, %v8690_v20  ;;  %v8564_v35 = vadd.f32 %v14360_v22, %v8365_v24  ;;  %v8126_v54 = vadd.f32 %v8125_v51, %v14234_v49  ;;  %v14388_v42 = vpop.f32.mrf.mxu1  ;;  %v10387_v24 = vld [vmem:[%s12228_s11 + $0x28] sm:$0xff]  }
 0x4cb   : > { %v11111_v30 = vpop.f32.mrf.mxu0  ;;  %v8368_v16 = vadd.f32 %v8134_v53, %v13999_v50  ;;  %v8630_v27 = vadd.f32 %v10109_v21, %v8566_v8  ;;  %v10113_v51 = vunpack.c.l.bf16 %v10386_v25 }
 0x4cc   : > { %v10226_v55 = vpack.c.bf16 %v8689_v29, %v8688_v12  ;;  %10414 = vst [vmem:[%s14392_s14 + $0x8] sm:$0xff] %v10231_v39   ;;  %v8366_v31 = vadd.f32 %v8126_v54, %v14003_v52  ;;  %v8147_v63 = vadd.f32 %v11111_v30, %v14263_v44  ;;  %v7942_v13 = vpop.f32.mrf.mxu1  ;;  %v8628_v20 = vadd.f32 %v10105_v41, %v8564_v35 }
 0x4cd   : > { %v8138_v49 = vpop.f32.mrf.mxu0  ;;  %v8567_v50 = vadd.f32 %v14360_v22, %v8368_v16  ;;  %v8694_v8 = vmax.f32 %v8630_v27, 0.0  ;;  %v10117_v29 = vunpack.c.l.bf16 %v10387_v24  ;;  %v10389_v27 = vld [vmem:[%s12228_s11 + $0x38] sm:$0xff]  }
 0x4ce   : > { %10227 = vst [vmem:[%s14392_s14] sm:$0xff] %v10226_v55   ;;  %v8565_v43 = vadd.f32 %v14360_v22, %v8366_v31  ;;  %v8139_v18 = vadd.f32 %v8138_v49, %v14251_v15  ;;  %v8371_v45 = vadd.f32 %v8147_v63, %v14008_v46  ;;  %v14404_v17 = vpop.f32.mrf.mxu1  ;;  %v8692_v39 = vmax.f32 %v8628_v20, 0.0  ;;  %v10388_v49 = vld [vmem:[%s12228_s11 + $0x30] sm:$0xff]  }
 0x4cf   : > { %v11112_v53 = vpop.f32.mrf.mxu0  ;;  %v8631_v52 = vadd.f32 %v10110_v11, %v8567_v50  ;;  %v10118_v11 = vunpack.c.h.bf16 %v10387_v24  ;;  %v10114_v63 = vunpack.c.h.bf16 %v10386_v25  ;;  %v15081_v25 = vld [vmem:[#allocation78_spill] sm:$0xff] }
 0x4d0   : > { %v8629_v44 = vadd.f32 %v10106_v23, %v8565_v43  ;;  %v8369_v12 = vadd.f32 %v8139_v18, %v14005_v62  ;;  %v8150_v21 = vadd.f32 %v11112_v53, %v14268_v6  ;;  %v8570_v15 = vadd.f32 %v14360_v22, %v8371_v45  ;;  %v7947_v46 = vpop.f32.mrf.mxu1 }
 0x4d1   : > { %v8141_v37 = vpop.f32.mrf.mxu0  ;;  %v8695_v41 = vmax.f32 %v8631_v52, 0.0 }
 0x4d2   : > { %v8693_v35 = vmax.f32 %v8629_v44, 0.0  ;;  %v8568_v54 = vadd.f32 %v14360_v22, %v8369_v12  ;;  %v8142_v30 = vadd.f32 %v8141_v37, %v14258_v60  ;;  %v8372_v6 = vadd.f32 %v8150_v21, %v14013_v26  ;;  %v14412_v55 = vpop.f32.mrf.mxu1  ;;  %v15082_v21 = vld [vmem:[#allocation76_spill] sm:$0xff] }
 0x4d3   : > { %v11115_v62 = vpop.f32.mrf.mxu0  ;;  %v10241_v16 = vpack.c.bf16 %v8695_v41, %v8694_v8  ;;  %v8634_v20 = vadd.f32 %v10117_v29, %v8570_v15  ;;  %v10125_v44 = vunpack.c.l.bf16 %v10389_v27 }
 0x4d4   : > { %v10236_v31 = vpack.c.bf16 %v8693_v35, %v8692_v39  ;;  %v8370_v23 = vadd.f32 %v8142_v30, %v14010_v38  ;;  %v8632_v13 = vadd.f32 %v10113_v51, %v8568_v54  ;;  %v8571_v60 = vadd.f32 %v14360_v22, %v8372_v6  ;;  %v7950_v18 = vpop.f32.mrf.mxu1 }
 0x4d5   : > { %10416 = vst [vmem:[%s14392_s14 + $0x18] sm:$0xff] %v10241_v16   ;;  %v8154_v50 = vpop.f32.mrf.mxu0  ;;  %v8163_v43 = vadd.f32 %v11115_v62, %v14285_v59  ;;  %v10121_v38 = vunpack.c.l.bf16 %v10388_v49  ;;  %v10126_v59 = vunpack.c.h.bf16 %v10389_v27  ;;  %v8698_v15 = vmax.f32 %v8634_v20, 0.0  ;;  %v15083_v62 = vld [vmem:[#allocation79_spill] sm:$0xff] }
 0x4d6   : > { %10415 = vst [vmem:[%s14392_s14 + $0x10] sm:$0xff] %v10236_v31   ;;  %v8569_v26 = vadd.f32 %v14360_v22, %v8370_v23  ;;  %v8155_v45 = vadd.f32 %v8154_v50, %v14274_v19  ;;  %v8635_v53 = vadd.f32 %v10118_v11, %v8571_v60  ;;  %v14424_v12 = vpop.f32.mrf.mxu1  ;;  %v8696_v41 = vmax.f32 %v8632_v13, 0.0 }
 0x4d7   : > { %v11116_v24 = vpop.f32.mrf.mxu0  ;;  %v8375_v52 = vadd.f32 %v8163_v43, %v15081_v25  ;;  %v10122_v50 = vunpack.c.h.bf16 %v10388_v49 }
 0x4d8   : > { %v8633_v51 = vadd.f32 %v10114_v63, %v8569_v26  ;;  %v8373_v8 = vadd.f32 %v8155_v45, %v15082_v21  ;;  %v8166_v37 = vadd.f32 %v11116_v24, %v14290_v1  ;;  %v8699_v46 = vmax.f32 %v8635_v53, 0.0  ;;  %v7955_v39 = vpop.f32.mrf.mxu1  ;;  %v15084_v63 = vld [vmem:[#allocation77_spill] sm:$0xff]  ;;  %v10390_v24 = vld [vmem:[%s12228_s11 + $0x40] sm:$0xff]   ;;  %v10391_v53 = vld [vmem:[%s12228_s11 + $0x48] sm:$0xff]  }
 0x4d9   : > { %v8157_v29 = vpop.f32.mrf.mxu0  ;;  %v8574_v19 = vadd.f32 %v14360_v22, %v8375_v52 }
 0x4da   : > { %v8697_v35 = vmax.f32 %v8633_v51, 0.0  ;;  %v8572_v54 = vadd.f32 %v14360_v22, %v8373_v8  ;;  %v8158_v30 = vadd.f32 %v8157_v29, %v14279_v2  ;;  %v8376_v16 = vadd.f32 %v8166_v37, %v15083_v62  ;;  %v14432_v31 = vpop.f32.mrf.mxu1  ;;  %v15086_v62 = vld [vmem:[#allocation43_spill] sm:$0xff] }
 0x4db   : > { %v11119_v6 = vpop.f32.mrf.mxu0  ;;  %v10251_v11 = vpack.c.bf16 %v8699_v46, %v8698_v15  ;;  %v8638_v1 = vadd.f32 %v10125_v44, %v8574_v19 }
 0x4dc   : > { %v10246_v23 = vpack.c.bf16 %v8697_v35, %v8696_v41  ;;  %v8374_v27 = vadd.f32 %v8158_v30, %v15084_v63  ;;  %v8575_v13 = vadd.f32 %v14360_v22, %v8376_v16  ;;  %v8636_v60 = vadd.f32 %v10121_v38, %v8572_v54  ;;  %v7958_v43 = vpop.f32.mrf.mxu1 }
 0x4dd   : > { %v8170_v20 = vpop.f32.mrf.mxu0  ;;  %10418 = vst [vmem:[%s14392_s14 + $0x28] sm:$0xff] %v10251_v11   ;;  %v8179_v2 = vadd.f32 %v11119_v6, %v14305_v3  ;;  %v8702_v52 = vmax.f32 %v8638_v1, 0.0  ;;  %v10133_v41 = vunpack.c.l.bf16 %v10391_v53  ;;  %v10130_v6 = vunpack.c.h.bf16 %v10390_v24 }
 0x4de   : > { %10417 = vst [vmem:[%s14392_s14 + $0x20] sm:$0xff] %v10246_v23   ;;  %v8573_v18 = vadd.f32 %v14360_v22, %v8374_v27  ;;  %v8639_v26 = vadd.f32 %v10126_v59, %v8575_v13  ;;  %v8171_v45 = vadd.f32 %v8170_v20, %v14295_v58  ;;  %v14444_v44 = vpop.f32.mrf.mxu1  ;;  %v8700_v37 = vmax.f32 %v8636_v60, 0.0  ;;  %v10392_v27 = vld [vmem:[%s12228_s11 + $0x50] sm:$0xff]  }
 0x4df   : > { %v11120_v25 = vpop.f32.mrf.mxu0  ;;  %v8379_v49 = vadd.f32 %v8179_v2, %v14057_v32  ;;  %v10129_v59 = vunpack.c.l.bf16 %v10390_v24  ;;  %v10393_v2 = vld [vmem:[%s12228_s11 + $0x58] sm:$0xff]   ;;  %v10137_v24 = vunpack.c.l.bf16 %v10392_v27 }
 0x4e0   : > { %v8637_v51 = vadd.f32 %v10122_v50, %v8573_v18  ;;  %v8703_v21 = vmax.f32 %v8639_v26, 0.0  ;;  %v8377_v38 = vadd.f32 %v8171_v45, %v14042_v61  ;;  %v8182_v3 = vadd.f32 %v11120_v25, %v14310_v14  ;;  %v7963_v29 = vpop.f32.mrf.mxu1  ;;  %v15085_v61 = vld [vmem:[#allocation18_spill] sm:$0xff] }
 0x4e1   : > { %v8173_v8 = vpop.f32.mrf.mxu0  ;;  %v8578_v58 = vadd.f32 %v14360_v22, %v8379_v49  ;;  %v10134_v14 = vunpack.c.h.bf16 %v10391_v53 }
 0x4e2   : > { %v8701_v15 = vmax.f32 %v8637_v51, 0.0  ;;  %v10261_v46 = vpack.c.bf16 %v8703_v21, %v8702_v52  ;;  %v8576_v32 = vadd.f32 %v14360_v22, %v8377_v38  ;;  %v8174_v19 = vadd.f32 %v8173_v8, %v14300_v7  ;;  %v14452_v54 = vpop.f32.mrf.mxu1 }
 0x4e3   : > { %v11123_v39 = vpop.f32.mrf.mxu0  ;;  %v8380_v35 = vadd.f32 %v8182_v3, %v15085_v61  ;;  %v8642_v23 = vadd.f32 %v10133_v41, %v8578_v58  ;;  %v10141_v51 = vunpack.c.l.bf16 %v10393_v2  ;;  %v10142_v41 = vunpack.c.h.bf16 %v10393_v2 }
 0x4e4   : > { %v10256_v30 = vpack.c.bf16 %v8701_v15, %v8700_v37  ;;  %10420 = vst [vmem:[%s14392_s14 + $0x38] sm:$0xff] %v10261_v46   ;;  %v8378_v16 = vadd.f32 %v8174_v19, %v15086_v62  ;;  %v8195_v11 = vadd.f32 %v11123_v39, %v14325_v48  ;;  %v7966_v7 = vpop.f32.mrf.mxu1  ;;  %v8640_v50 = vadd.f32 %v10129_v59, %v8576_v32  ;;  %v15087_v59 = vld [vmem:[#allocation20_spill] sm:$0xff]  ;;  %v15088_v15 = vld [vmem:[#allocation19_spill] sm:$0xff]  ;;  %v10394_v19 = vld [vmem:[%s12228_s11 + $0x60] sm:$0xff]  }
 0x4e5   : > { %v8186_v1 = vpop.f32.mrf.mxu0  ;;  %v8579_v63 = vadd.f32 %v14360_v22, %v8380_v35  ;;  %v8706_v52 = vmax.f32 %v8642_v23, 0.0  ;;  %v10138_v32 = vunpack.c.h.bf16 %v10392_v27  ;;  %v10395_v39 = vld [vmem:[%s12228_s11 + $0x68] sm:$0xff]   ;;  %v10145_v23 = vunpack.c.l.bf16 %v10394_v19 }
 0x4e6   : > { %10419 = vst [vmem:[%s14392_s14 + $0x30] sm:$0xff] %v10256_v30   ;;  %v8577_v13 = vadd.f32 %v14360_v22, %v8378_v16  ;;  %v8187_v20 = vadd.f32 %v8186_v1, %v14315_v0  ;;  %v8383_v60 = vadd.f32 %v8195_v11, %v14087_v47  ;;  %v14464_v26 = vpop.f32.mrf.mxu1  ;;  %v8704_v21 = vmax.f32 %v8640_v50, 0.0 }
 0x4e7   : > { %v11124_v43 = vpop.f32.mrf.mxu0  ;;  %v8643_v18 = vadd.f32 %v10134_v14, %v8579_v63  ;;  %v10149_v27 = vunpack.c.l.bf16 %v10395_v39 }
 0x4e8   : > { %v8641_v48 = vadd.f32 %v10130_v6, %v8577_v13  ;;  %v8381_v45 = vadd.f32 %v8187_v20, %v14073_v10  ;;  %v8198_v53 = vadd.f32 %v11124_v43, %v14330_v56  ;;  %v8582_v0 = vadd.f32 %v14360_v22, %v8383_v60  ;;  %v7971_v47 = vpop.f32.mrf.mxu1 }
 0x4e9   : > { %v8189_v25 = vpop.f32.mrf.mxu0  ;;  %v8707_v49 = vmax.f32 %v8643_v18, 0.0  ;;  %v10146_v47 = vunpack.c.h.bf16 %v10394_v19 }
 0x4ea   : > { %v8705_v38 = vmax.f32 %v8641_v48, 0.0  ;;  %v8580_v3 = vadd.f32 %v14360_v22, %v8381_v45  ;;  %v8190_v8 = vadd.f32 %v8189_v25, %v14320_v5  ;;  %v8384_v56 = vadd.f32 %v8198_v53, %v15087_v59  ;;  %v14472_v58 = vpop.f32.mrf.mxu1 }
 0x4eb   : > { %v11127_v10 = vpop.f32.mrf.mxu0  ;;  %v10271_v37 = vpack.c.bf16 %v8707_v49, %v8706_v52  ;;  %v8646_v14 = vadd.f32 %v10141_v51, %v8582_v0  ;;  %v15089_v51 = vld [vmem:[#allocation23_spill] sm:$0xff] }
 0x4ec   : > { %v10266_v29 = vpack.c.bf16 %v8705_v38, %v8704_v21  ;;  %v8382_v46 = vadd.f32 %v8190_v8, %v15088_v15  ;;  %v8644_v35 = vadd.f32 %v10137_v24, %v8580_v3  ;;  %v8583_v5 = vadd.f32 %v14360_v22, %v8384_v56  ;;  %v7974_v62 = vpop.f32.mrf.mxu1  ;;  %v10396_v56 = vld [vmem:[%s12228_s11 + $0x70] sm:$0xff]  }
 0x4ed   : > { %v8202_v61 = vpop.f32.mrf.mxu0  ;;  %10422 = vst [vmem:[%s14392_s14 + $0x48] sm:$0xff] %v10271_v37   ;;  %v8211_v30 = vadd.f32 %v11127_v10, %v14345_v33  ;;  %v10150_v33 = vunpack.c.h.bf16 %v10395_v39  ;;  %v8710_v43 = vmax.f32 %v8646_v14, 0.0  ;;  %v15090_v37 = vld [vmem:[#allocation85_spill] sm:$0xff]  ;;  %v10153_v62 = vunpack.c.l.bf16 %v10396_v56 }
 0x4ee   : > { %10421 = vst [vmem:[%s14392_s14 + $0x40] sm:$0xff] %v10266_v29   ;;  %v8581_v16 = vadd.f32 %v14360_v22, %v8382_v46  ;;  %v8203_v6 = vadd.f32 %v8202_v61, %v14335_v40  ;;  %v8647_v1 = vadd.f32 %v10142_v41, %v8583_v5  ;;  %v14484_v7 = vpop.f32.mrf.mxu1  ;;  %v8708_v2 = vmax.f32 %v8644_v35, 0.0  ;;  %v10397_v41 = vld [vmem:[%s12228_s11 + $0x78] sm:$0xff]   ;;  %v15091_v46 = vld [vmem:[#allocation35_spill] sm:$0xff] }
 0x4ef   : > { %v11128_v11 = vpop.f32.mrf.mxu0  ;;  %v8387_v63 = vadd.f32 %v8211_v30, %v14120_v9  ;;  %v15092_v35 = vld [vmem:[#allocation29_spill] sm:$0xff] }
 0x4f0   : > { %v8645_v50 = vadd.f32 %v10138_v32, %v8581_v16  ;;  %v8385_v13 = vadd.f32 %v8203_v6, %v14105_v4  ;;  %v8214_v20 = vadd.f32 %v11128_v11, %v14350_v28  ;;  %v8711_v18 = vmax.f32 %v8647_v1, 0.0  ;;  %v7979_v48 = vpop.f32.mrf.mxu1 }
 0x4f1   : > { %v8205_v60 = vpop.f32.mrf.mxu0  ;;  %v8586_v40 = vadd.f32 %v14360_v22, %v8387_v63  ;;  %v10157_v16 = vunpack.c.l.bf16 %v10397_v41 }
 0x4f2   : > { %v8709_v45 = vmax.f32 %v8645_v50, 0.0  ;;  %v8584_v9 = vadd.f32 %v14360_v22, %v8385_v13  ;;  %v8206_v24 = vadd.f32 %v8205_v60, %v14340_v57  ;;  %v8388_v53 = vadd.f32 %v8214_v20, %v14128_v34  ;;  %v14492_v52 = vpop.f32.mrf.mxu1  ;;  %v15094_v20 = vld [vmem:[#allocation38_spill] sm:$0xff] }
 0x4f3   : > { %v11131_v4 = vpop.f32.mrf.mxu0  ;;  %v10281_v25 = vpack.c.bf16 %v8711_v18, %v8710_v43  ;;  %v8650_v28 = vadd.f32 %v10149_v27, %v8586_v40  ;;  %v15093_v27 = vld [vmem:[#allocation86_spill] sm:$0xff]  ;;  %v15095_v43 = vld [vmem:[#allocation32_spill] sm:$0xff]  ;;  %v10154_v40 = vunpack.c.h.bf16 %v10396_v56 }
 0x4f4   : > { %v10276_v49 = vpack.c.bf16 %v8709_v45, %v8708_v2  ;;  %v8386_v0 = vadd.f32 %v8206_v24, %v15089_v51  ;;  %v8587_v21 = vadd.f32 %v14360_v22, %v8388_v53  ;;  %v8648_v3 = vadd.f32 %v10145_v23, %v8584_v9  ;;  %v7982_v8 = vpop.f32.mrf.mxu1  ;;  %v10398_v53 = vld [vmem:[%s12228_s11 + $0x80] sm:$0xff]   ;;  %v15096_v51 = vld [vmem:[#allocation48_spill] sm:$0xff] }
 0x4f5   : > { %v8218_v38 = vpop.f32.mrf.mxu0  ;;  %10424 = vst [vmem:[%s14392_s14 + $0x58] sm:$0xff] %v10281_v25   ;;  %v8227_v57 = vadd.f32 %v11131_v4, %v14380_v36  ;;  %v8714_v15 = vmax.f32 %v8650_v28, 0.0 }
 0x4f6   : > { %10423 = vst [vmem:[%s14392_s14 + $0x50] sm:$0xff] %v10276_v49   ;;  %v8585_v34 = vadd.f32 %v14360_v22, %v8386_v0  ;;  %v8651_v10 = vadd.f32 %v10150_v33, %v8587_v21  ;;  %v8219_v59 = vadd.f32 %v8218_v38, %v15090_v37  ;;  %v14504_v19 = vpop.f32.mrf.mxu1  ;;  %v8712_v30 = vmax.f32 %v8648_v3, 0.0 }
 0x4f7   : > { %v11132_v29 = vpop.f32.mrf.mxu0  ;;  %v8391_v32 = vadd.f32 %v8227_v57, %v15091_v46  ;;  %v15097_v57 = vld [vmem:[#allocation41_spill] sm:$0xff] }
 0x4f8   : > { %v8649_v39 = vadd.f32 %v10146_v47, %v8585_v34  ;;  %v8715_v61 = vmax.f32 %v8651_v10, 0.0  ;;  %v8389_v14 = vadd.f32 %v8219_v59, %v15092_v35  ;;  %v8230_v36 = vadd.f32 %v11132_v29, %v14388_v42  ;;  %v7987_v11 = vpop.f32.mrf.mxu1  ;;  %v10399_v47 = vld [vmem:[%s12228_s11 + $0x88] sm:$0xff]  }
 0x4f9   : > { %v8221_v5 = vpop.f32.mrf.mxu0  ;;  %v8590_v6 = vadd.f32 %v14360_v22, %v8391_v32  ;;  %v10158_v42 = vunpack.c.h.bf16 %v10397_v41  ;;  %v10161_v34 = vunpack.c.l.bf16 %v10398_v53  ;;  %v10165_v41 = vunpack.c.l.bf16 %v10399_v47  ;;  %v10400_v11 = vld [vmem:[%s12228_s11 + $0x90] sm:$0xff]  }
 0x4fa   : > { %v8713_v1 = vmax.f32 %v8649_v39, 0.0  ;;  %v10291_v23 = vpack.c.bf16 %v8715_v61, %v8714_v15  ;;  %v8588_v63 = vadd.f32 %v14360_v22, %v8389_v14  ;;  %v8222_v50 = vadd.f32 %v8221_v5, %v15093_v27  ;;  %v14512_v60 = vpop.f32.mrf.mxu1  ;;  %v15098_v14 = vld [vmem:[#allocation50_spill] sm:$0xff] }
 0x4fb   : > { %v11135_v13 = vpop.f32.mrf.mxu0  ;;  %v8392_v33 = vadd.f32 %v8230_v36, %v15094_v20  ;;  %v8654_v9 = vadd.f32 %v10157_v16, %v8590_v6  ;;  %v10166_v36 = vunpack.c.h.bf16 %v10399_v47  ;;  %v10162_v6 = vunpack.c.h.bf16 %v10398_v53 }
 0x4fc   : > { %v10286_v2 = vpack.c.bf16 %v8713_v1, %v8712_v30  ;;  %10426 = vst [vmem:[%s14392_s14 + $0x68] sm:$0xff] %v10291_v23   ;;  %v8390_v18 = vadd.f32 %v8222_v50, %v15095_v43  ;;  %v8243_v48 = vadd.f32 %v11135_v13, %v14424_v12  ;;  %v7990_v4 = vpop.f32.mrf.mxu1  ;;  %v8652_v25 = vadd.f32 %v10153_v62, %v8588_v63  ;;  %v15099_v62 = vld [vmem:[#allocation45_spill] sm:$0xff] }
 0x4fd   : > { %v8234_v45 = vpop.f32.mrf.mxu0  ;;  %v8591_v24 = vadd.f32 %v14360_v22, %v8392_v33  ;;  %v8718_v59 = vmax.f32 %v8654_v9, 0.0  ;;  %v10401_v1 = vld [vmem:[%s12228_s11 + $0x98] sm:$0xff]   ;;  %v10169_v43 = vunpack.c.l.bf16 %v10400_v11 }
 0x4fe   : > { %10425 = vst [vmem:[%s14392_s14 + $0x60] sm:$0xff] %v10286_v2   ;;  %v8589_v28 = vadd.f32 %v14360_v22, %v8390_v18  ;;  %v8235_v49 = vadd.f32 %v8234_v45, %v14404_v17  ;;  %v8395_v0 = vadd.f32 %v8243_v48, %v15096_v51  ;;  %v14524_v3 = vpop.f32.mrf.mxu1  ;;  %v8716_v15 = vmax.f32 %v8652_v25, 0.0  ;;  %v15100_v18 = vld [vmem:[#allocation54_spill] sm:$0xff] }
 0x4ff   : > { %v11136_v21 = vpop.f32.mrf.mxu0  ;;  %v8655_v38 = vadd.f32 %v10158_v42, %v8591_v24  ;;  %v10173_v48 = vunpack.c.l.bf16 %v10401_v1  ;;  %v15101_v24 = vld [vmem:[#allocation80_spill] sm:$0xff] }
 0x500   : > { %v8653_v12 = vadd.f32 %v10154_v40, %v8589_v28  ;;  %v8393_v8 = vadd.f32 %v8235_v49, %v15097_v57  ;;  %v8246_v10 = vadd.f32 %v11136_v21, %v14432_v31  ;;  %v8594_v17 = vadd.f32 %v14360_v22, %v8395_v0  ;;  %v7995_v29 = vpop.f32.mrf.mxu1 }
 0x501   : > { %v8237_v37 = vpop.f32.mrf.mxu0  ;;  %v8719_v56 = vmax.f32 %v8655_v38, 0.0  ;;  %v15104_v29 = vld [vmem:[#allocation58_spill] sm:$0xff] }
 0x502   : > { %v8717_v46 = vmax.f32 %v8653_v12, 0.0  ;;  %v8592_v32 = vadd.f32 %v14360_v22, %v8393_v8  ;;  %v8238_v39 = vadd.f32 %v8237_v37, %v14412_v55  ;;  %v8396_v31 = vadd.f32 %v8246_v10, %v15098_v14  ;;  %v14532_v5 = vpop.f32.mrf.mxu1  ;;  %v15102_v12 = vld [vmem:[#allocation55_spill] sm:$0xff] }
 0x503   : > { %v11139_v61 = vpop.f32.mrf.mxu0  ;;  %v10301_v35 = vpack.c.bf16 %v8719_v56, %v8718_v59  ;;  %v8658_v27 = vadd.f32 %v10165_v41, %v8594_v17  ;;  %v15103_v59 = vld [vmem:[#allocation53_spill] sm:$0xff]  ;;  %v10170_v41 = vunpack.c.h.bf16 %v10400_v11 }
 0x504   : > { %v10296_v30 = vpack.c.bf16 %v8717_v46, %v8716_v15  ;;  %v8394_v16 = vadd.f32 %v8238_v39, %v15099_v62  ;;  %v8656_v63 = vadd.f32 %v10161_v34, %v8592_v32  ;;  %v8595_v55 = vadd.f32 %v14360_v22, %v8396_v31  ;;  %v7998_v13 = vpop.f32.mrf.mxu1  ;;  %v15105_v15 = vld [vmem:[#allocation22_spill] sm:$0xff]  ;;  %v15106_v62 = vld [vmem:[#allocation59_spill] sm:$0xff] }
 0x505   : > { %v8250_v23 = vpop.f32.mrf.mxu0  ;;  %10428 = vst [vmem:[%s14392_s14 + $0x78] sm:$0xff] %v10301_v35   ;;  %v8259_v50 = vadd.f32 %v11139_v61, %v14464_v26  ;;  %v10174_v26 = vunpack.c.h.bf16 %v10401_v1  ;;  %v8722_v49 = vmax.f32 %v8658_v27, 0.0  ;;  %v6863_v46 = vadd.f32 %v15105_v15, %v15104_v29  ;;  %v15114_v29 = vld [vmem:[#allocation63_spill] sm:$0xff] }
 0x506   : > { %10427 = vst [vmem:[%s14392_s14 + $0x70] sm:$0xff] %v10296_v30   ;;  %v8593_v20 = vadd.f32 %v14360_v22, %v8394_v16  ;;  %v8251_v33 = vadd.f32 %v8250_v23, %v14444_v44  ;;  %v8659_v2 = vadd.f32 %v10166_v36, %v8595_v55  ;;  %v14544_v45 = vpop.f32.mrf.mxu1  ;;  %v8720_v28 = vmax.f32 %v8656_v63, 0.0  ;;  %v10402_v36 = vld [vmem:[%s12228_s11 + $0xa0] sm:$0xff]   ;;  %v10403_v30 = vld [vmem:[%s12228_s11 + $0xa8] sm:$0xff]   ;;  %v15107_v16 = vld [vmem:[#allocation24_spill] sm:$0xff] }
 0x507   : > { %v11140_v42 = vpop.f32.mrf.mxu0  ;;  %v8399_v40 = vadd.f32 %v8259_v50, %v15100_v18  ;;  %v15115_v15 = vld [vmem:[#allocation27_spill] sm:$0xff] }
 0x508   : > { %v8657_v9 = vadd.f32 %v10162_v6, %v8593_v20  ;;  %v8397_v53 = vadd.f32 %v8251_v33, %v15101_v24  ;;  %v8262_v4 = vadd.f32 %v11140_v42, %v14472_v58  ;;  %v8723_v51 = vmax.f32 %v8659_v2, 0.0  ;;  %v8003_v0 = vpop.f32.mrf.mxu1  ;;  %v15109_v24 = vld [vmem:[#allocation62_spill] sm:$0xff] }
 0x509   : > { %v8253_v25 = vpop.f32.mrf.mxu0  ;;  %v8598_v44 = vadd.f32 %v14360_v22, %v8399_v40  ;;  %v6866_v6 = vadd.f32 %v15107_v16, %v15106_v62  ;;  %v10181_v42 = vunpack.c.l.bf16 %v10403_v30  ;;  %v10178_v0 = vunpack.c.h.bf16 %v10402_v36 }
 0x50a   : > { %v8721_v47 = vmax.f32 %v8657_v9, 0.0  ;;  %v8596_v21 = vadd.f32 %v14360_v22, %v8397_v53  ;;  %v8254_v38 = vadd.f32 %v8253_v25, %v14452_v54  ;;  %v8400_v57 = vadd.f32 %v8262_v4, %v15102_v12  ;;  %v14552_v10 = vpop.f32.mrf.mxu1  ;;  %v15110_v53 = vld [vmem:[#allocation25_spill] sm:$0xff] }
 0x50b   : > { %v11143_v8 = vpop.f32.mrf.mxu0  ;;  %v10311_v34 = vpack.c.bf16 %v8723_v51, %v8722_v49  ;;  %v8662_v58 = vadd.f32 %v10173_v48, %v8598_v44  ;;  %v6879_v4 = vadd.f32 %v15110_v53, %v15109_v24  ;;  %v10182_v25 = vunpack.c.h.bf16 %v10403_v30  ;;  %v15111_v51 = vld [vmem:[#allocation57_spill] sm:$0xff]  ;;  %v10406_v53 = vld [vmem:[%s12228_s11 + $0xc0] sm:$0xff]  }
 0x50c   : > { %v10306_v37 = vpack.c.bf16 %v8721_v47, %v8720_v28  ;;  %v8398_v56 = vadd.f32 %v8254_v38, %v15103_v59  ;;  %v8599_v17 = vadd.f32 %v14360_v22, %v8400_v57  ;;  %v8660_v32 = vadd.f32 %v10169_v43, %v8596_v21  ;;  %v8006_v61 = vpop.f32.mrf.mxu1  ;;  %v15112_v21 = vld [vmem:[#allocation60_spill] sm:$0xff]  ;;  %v15113_v38 = vld [vmem:[#allocation26_spill] sm:$0xff] }
 0x50d   : > { %v8266_v54 = vpop.f32.mrf.mxu0  ;;  %10430 = vst [vmem:[%s14392_s14 + $0x88] sm:$0xff] %v10311_v34   ;;  %v8275_v39 = vadd.f32 %v11143_v8, %v14504_v19  ;;  %v8726_v1 = vmax.f32 %v8662_v58, 0.0  ;;  %v15108_v19 = vld [vmem:[#allocation56_spill] sm:$0xff] }
 0x50e   : > { %10429 = vst [vmem:[%s14392_s14 + $0x80] sm:$0xff] %v10306_v37   ;;  %v8597_v35 = vadd.f32 %v14360_v22, %v8398_v56  ;;  %v8663_v14 = vadd.f32 %v10174_v26, %v8599_v17  ;;  %v8267_v31 = vadd.f32 %v8266_v54, %v14484_v7  ;;  %v14567_v63 = vpop.f32.mrf.mxu1  ;;  %v8724_v33 = vmax.f32 %v8660_v32, 0.0  ;;  %v10404_v34 = vld [vmem:[%s12228_s11 + $0xb0] sm:$0xff]   ;;  %v10405_v17 = vld [vmem:[%s12228_s11 + $0xb8] sm:$0xff]  }
 0x50f   : > { %v11144_v11 = vpop.f32.mrf.mxu0  ;;  %v8403_v23 = vadd.f32 %v8275_v39, %v6863_v46  ;;  %v10177_v7 = vunpack.c.l.bf16 %v10402_v36  ;;  %v15116_v46 = vld [vmem:[#allocation61_spill] sm:$0xff]  ;;  %v15117_v54 = vld [vmem:[#allocation28_spill] sm:$0xff]  ;;  %v10185_v36 = vunpack.c.l.bf16 %v10404_v34  ;;  %v10186_v24 = vunpack.c.h.bf16 %v10404_v34 }
 0x510   : > { %v8661_v27 = vadd.f32 %v10170_v41, %v8597_v35  ;;  %v8727_v55 = vmax.f32 %v8663_v14, 0.0  ;;  %v8401_v50 = vadd.f32 %v8267_v31, %v15108_v19  ;;  %v8278_v13 = vadd.f32 %v11144_v11, %v14512_v60  ;;  %v8011_v43 = vpop.f32.mrf.mxu1 }
 0x511   : > { %v8269_v20 = vpop.f32.mrf.mxu0  ;;  %v8602_v2 = vadd.f32 %v14360_v22, %v8403_v23  ;;  %v6874_v32 = vadd.f32 %v15117_v54, %v15116_v46  ;;  %v15120_v43 = vld [vmem:[#allocation66_spill] sm:$0xff] }
 0x512   : > { %v8725_v18 = vmax.f32 %v8661_v27, 0.0  ;;  %v10321_v40 = vpack.c.bf16 %v8727_v55, %v8726_v1  ;;  %v8600_v48 = vadd.f32 %v14360_v22, %v8401_v50  ;;  %v8270_v9 = vadd.f32 %v8269_v20, %v14492_v52  ;;  %v14576_v28 = vpop.f32.mrf.mxu1  ;;  %v15118_v50 = vld [vmem:[#allocation64_spill] sm:$0xff] }
 0x513   : > { %v11147_v60 = vpop.f32.mrf.mxu0  ;;  %v8404_v26 = vadd.f32 %v8278_v13, %v6866_v6  ;;  %v6871_v52 = vadd.f32 %v15113_v38, %v15112_v21  ;;  %v8666_v57 = vadd.f32 %v10181_v42, %v8602_v2  ;;  %v15119_v13 = vld [vmem:[#allocation31_spill] sm:$0xff]  ;;  %v10190_v42 = vunpack.c.h.bf16 %v10405_v17  ;;  %v15124_v21 = vld [vmem:[#allocation65_spill] sm:$0xff]  ;;  %v15125_v38 = vld [vmem:[#allocation34_spill] sm:$0xff] }
 0x514   : > { %v10316_v49 = vpack.c.bf16 %v8725_v18, %v8724_v33  ;;  %10432 = vst [vmem:[%s14392_s14 + $0x98] sm:$0xff] %v10321_v40   ;;  %v8402_v44 = vadd.f32 %v8270_v9, %v15111_v51  ;;  %v8291_v47 = vadd.f32 %v11147_v60, %v14544_v45  ;;  %v8014_v58 = vpop.f32.mrf.mxu1  ;;  %v8664_v37 = vadd.f32 %v10177_v7, %v8600_v48  ;;  %v15121_v18 = vld [vmem:[#allocation30_spill] sm:$0xff] }
 0x515   : > { %v8282_v12 = vpop.f32.mrf.mxu0  ;;  %v8603_v8 = vadd.f32 %v14360_v22, %v8404_v26  ;;  %v6882_v45 = vadd.f32 %v15115_v15, %v15114_v29  ;;  %v8730_v16 = vmax.f32 %v8666_v57, 0.0  ;;  %v6887_v20 = vadd.f32 %v15119_v13, %v15118_v50  ;;  %v15127_v50 = vld [vmem:[#allocation37_spill] sm:$0xff] }
 0x516   : > { %10431 = vst [vmem:[%s14392_s14 + $0x90] sm:$0xff] %v10316_v49   ;;  %v8601_v59 = vadd.f32 %v14360_v22, %v8402_v44  ;;  %v8283_v56 = vadd.f32 %v8282_v12, %v14524_v3  ;;  %v8407_v41 = vadd.f32 %v8291_v47, %v6879_v4  ;;  %v8017_v35 = vpop.f32.mrf.mxu1  ;;  %v10189_v3 = vunpack.c.l.bf16 %v10405_v17  ;;  %v10407_v4 = vld [vmem:[%s12228_s11 + $0xc8] sm:$0xff]  }
 0x517   : > { %v11148_v39 = vpop.f32.mrf.mxu0  ;;  %v8667_v61 = vadd.f32 %v10182_v25, %v8603_v8  ;;  %v8728_v23 = vmax.f32 %v8664_v37, 0.0  ;;  %v6895_v40 = vadd.f32 %v15121_v18, %v15120_v43  ;;  %v15122_v44 = vld [vmem:[#allocation67_spill] sm:$0xff]  ;;  %v10193_v58 = vunpack.c.l.bf16 %v10406_v53 }
 0x518   : > { %v8665_v14 = vadd.f32 %v10178_v0, %v8601_v59  ;;  %v8405_v31 = vadd.f32 %v8283_v56, %v6871_v52  ;;  %v8294_v30 = vadd.f32 %v11148_v39, %v14552_v10  ;;  %v8606_v11 = vadd.f32 %v14360_v22, %v8407_v41  ;;  %v8019_v1 = vpop.f32.mrf.mxu1  ;;  %v15123_v0 = vld [vmem:[#allocation33_spill] sm:$0xff] }
 0x519   : > { %v8285_v62 = vpop.f32.mrf.mxu0  ;;  %v8731_v6 = vmax.f32 %v8667_v61, 0.0  ;;  %v6898_v47 = vadd.f32 %v15123_v0, %v15122_v44  ;;  %v6890_v52 = vadd.f32 %v15125_v38, %v15124_v21  ;;  %v10197_v59 = vunpack.c.l.bf16 %v10407_v4 }
 0x51a   : > { %v8729_v27 = vmax.f32 %v8665_v14, 0.0  ;;  %v8604_v55 = vadd.f32 %v14360_v22, %v8405_v31  ;;  %v8286_v19 = vadd.f32 %v8285_v62, %v14532_v5  ;;  %v8408_v7 = vadd.f32 %v8294_v30, %v6882_v45  ;;  %v8020_v2 = vpop.f32.mrf.mxu1 }
 0x51b   : > { %v11151_v10 = vpop.f32.mrf.mxu0  ;;  %v10331_v33 = vpack.c.bf16 %v8731_v6, %v8730_v16  ;;  %v8670_v26 = vadd.f32 %v10189_v3, %v8606_v11  ;;  %v10198_v15 = vunpack.c.h.bf16 %v10407_v4  ;;  %v10194_v11 = vunpack.c.h.bf16 %v10406_v53  ;;  %v15129_v53 = vld [vmem:[#allocation36_spill] sm:$0xff] }
 0x51c   : > { %v10326_v48 = vpack.c.bf16 %v8729_v27, %v8728_v23  ;;  %v8406_v9 = vadd.f32 %v8286_v19, %v6874_v32  ;;  %v8668_v5 = vadd.f32 %v10185_v36, %v8604_v55  ;;  %v8607_v25 = vadd.f32 %v14360_v22, %v8408_v7  ;;  %v8022_v51 = vpop.f32.mrf.mxu1  ;;  %v15126_v19 = vld [vmem:[#allocation68_spill] sm:$0xff] }
 0x51d   : > { %v8298_v60 = vpop.f32.mrf.mxu0  ;;  %10434 = vst [vmem:[%s14392_s14 + $0xa8] sm:$0xff] %v10331_v33   ;;  %v8307_v49 = vadd.f32 %v11151_v10, %v8017_v35  ;;  %v8734_v54 = vmax.f32 %v8670_v26, 0.0  ;;  %v6903_v13 = vadd.f32 %v15127_v50, %v15126_v19  ;;  %v10408_v33 = vld [vmem:[%s12228_s11 + $0xd0] sm:$0xff]   ;;  %v15137_v19 = vld [vmem:[#allocation47_spill] sm:$0xff] }
 0x51e   : > { %10433 = vst [vmem:[%s14392_s14 + $0xa0] sm:$0xff] %v10326_v48   ;;  %v8605_v12 = vadd.f32 %v14360_v22, %v8406_v9  ;;  %v8299_v57 = vadd.f32 %v8298_v60, %v14567_v63  ;;  %v8671_v34 = vadd.f32 %v10190_v42, %v8607_v25  ;;  %v8025_v56 = vpop.f32.mrf.mxu1  ;;  %v8732_v46 = vmax.f32 %v8668_v5, 0.0  ;;  %v10409_v9 = vld [vmem:[%s12228_s11 + $0xd8] sm:$0xff]   ;;  %v15131_v5 = vld [vmem:[#allocation40_spill] sm:$0xff] }
 0x51f   : > { %v11152_v8 = vpop.f32.mrf.mxu0  ;;  %v8411_v37 = vadd.f32 %v8307_v49, %v6895_v40  ;;  %v15130_v60 = vld [vmem:[#allocation69_spill] sm:$0xff]  ;;  %v10201_v51 = vunpack.c.l.bf16 %v10408_v33 }
 0x520   : > { %v8669_v41 = vadd.f32 %v10186_v24, %v8605_v12  ;;  %v8409_v17 = vadd.f32 %v8299_v57, %v6887_v20  ;;  %v8310_v29 = vadd.f32 %v11152_v8, %v8020_v2  ;;  %v8735_v32 = vmax.f32 %v8671_v34, 0.0  ;;  %v8027_v61 = vpop.f32.mrf.mxu1  ;;  %v15128_v24 = vld [vmem:[#allocation70_spill] sm:$0xff]  ;;  %v15133_v12 = vld [vmem:[#allocation39_spill] sm:$0xff] }
 0x521   : > { %v8301_v45 = vpop.f32.mrf.mxu0  ;;  %v8610_v39 = vadd.f32 %v14360_v22, %v8411_v37  ;;  %v6911_v4 = vadd.f32 %v15129_v53, %v15128_v24  ;;  %v6906_v26 = vadd.f32 %v15131_v5, %v15130_v60  ;;  %v15138_v53 = vld [vmem:[#allocation74_spill] sm:$0xff] }
 0x522   : > { %v8733_v35 = vmax.f32 %v8669_v41, 0.0  ;;  %v8608_v63 = vadd.f32 %v14360_v22, %v8409_v17  ;;  %v8302_v14 = vadd.f32 %v8301_v45, %v14576_v28  ;;  %v8412_v31 = vadd.f32 %v8310_v29, %v6898_v47  ;;  %v8028_v16 = vpop.f32.mrf.mxu1 }
 0x523   : > { %v11155_v36 = vpop.f32.mrf.mxu0  ;;  %v10341_v30 = vpack.c.bf16 %v8735_v32, %v8734_v54  ;;  %v8674_v62 = vadd.f32 %v10197_v59, %v8610_v39  ;;  %v10202_v41 = vunpack.c.h.bf16 %v10408_v33  ;;  %v10206_v39 = vunpack.c.h.bf16 %v10409_v9 }
 0x524   : > { %v10336_v6 = vpack.c.bf16 %v8733_v35, %v8732_v46  ;;  %v8410_v3 = vadd.f32 %v8302_v14, %v6890_v52  ;;  %v8611_v1 = vadd.f32 %v14360_v22, %v8412_v31  ;;  %v8672_v27 = vadd.f32 %v10193_v58, %v8608_v63  ;;  %v8030_v55 = vpop.f32.mrf.mxu1  ;;  %v15132_v52 = vld [vmem:[#allocation71_spill] sm:$0xff]  ;;  %v15134_v14 = vld [vmem:[#allocation72_spill] sm:$0xff] }
 0x525   : > { %v8314_v23 = vpop.f32.mrf.mxu0  ;;  %10436 = vst [vmem:[%s14392_s14 + $0xb8] sm:$0xff] %v10341_v30   ;;  %v8738_v42 = vmax.f32 %v8674_v62, 0.0  ;;  %v6914_v57 = vadd.f32 %v15133_v12, %v15132_v52  ;;  %v10205_v58 = vunpack.c.l.bf16 %v10409_v9  ;;  %v15135_v31 = vld [vmem:[#allocation44_spill] sm:$0xff]  ;;  %v15136_v55 = vld [vmem:[#allocation73_spill] sm:$0xff] }
 0x526   : > { %10435 = vst [vmem:[%s14392_s14 + $0xb0] sm:$0xff] %v10336_v6   ;;  %v8609_v28 = vadd.f32 %v14360_v22, %v8410_v3  ;;  %v8675_v20 = vadd.f32 %v10198_v15, %v8611_v1  ;;  %v8315_v10 = vadd.f32 %v8314_v23, %v8025_v56  ;;  %v8033_v2 = vpop.f32.mrf.mxu1  ;;  %v8736_v49 = vmax.f32 %v8672_v27, 0.0  ;;  %v10410_v6 = vld [vmem:[%s12228_s11 + $0xe0] sm:$0xff]  }
 0x527   : > { %v11156_v7 = vpop.f32.mrf.mxu0  ;;  %v8323_v48 = vadd.f32 %v11155_v36, %v8033_v2  ;;  %v6919_v36 = vadd.f32 %v15135_v31, %v15134_v14  ;;  %v6922_v50 = vadd.f32 %v15137_v19, %v15136_v55  ;;  %v10210_v9 = vunpack.c.h.bf16 %v10410_v6 }
 0x528   : > { %v8673_v43 = vadd.f32 %v10194_v11, %v8609_v28  ;;  %v8739_v18 = vmax.f32 %v8675_v20, 0.0  ;;  %v8413_v40 = vadd.f32 %v8315_v10, %v6903_v13  ;;  %v8035_v44 = vpop.f32.mrf.mxu1  ;;  %v10209_v20 = vunpack.c.l.bf16 %v10410_v6 }
 0x529   : > { %v8317_v25 = vpop.f32.mrf.mxu0  ;;  %v8415_v34 = vadd.f32 %v8323_v48, %v6911_v4  ;;  %v15139_v4 = vld [vmem:[#allocation42_spill] sm:$0xff] }
 0x52a   : > { %v8737_v0 = vmax.f32 %v8673_v43, 0.0  ;;  %v10351_v47 = vpack.c.bf16 %v8739_v18, %v8738_v42  ;;  %v8612_v21 = vadd.f32 %v14360_v22, %v8413_v40  ;;  %v8318_v38 = vadd.f32 %v8317_v25, %v8028_v16  ;;  %v8036_v37 = vpop.f32.mrf.mxu1  ;;  %v14634_v22 = vld [vmem:[%s14729_s5] ss:$0 sm:$0xff] }
 0x52b   : > { %v11159_v8 = vpop.f32.mrf.mxu0  ;;  %v8326_v17 = vadd.f32 %v11156_v7, %v8036_v37  ;;  %v8614_v15 = vadd.f32 %v14634_v22, %v8415_v34  ;;  %v6927_v60 = vadd.f32 %v15139_v4, %v15138_v53  ;;  %v15149_v53 = vld [vmem:[#allocation51_spill] sm:$0xff] }
 0x52c   : > { %v10346_v59 = vpack.c.bf16 %v8737_v0, %v8736_v49  ;;  %10438 = vst [vmem:[%s14392_s14 + $0xc8] sm:$0xff] %v10351_v47   ;;  %v8414_v56 = vadd.f32 %v8318_v38, %v6906_v26  ;;  %v8038_v45 = vpop.f32.mrf.mxu1  ;;  %v8676_v46 = vadd.f32 %v10201_v51, %v8612_v21  ;;  %v10411_v49 = vld [vmem:[%s12228_s11 + $0xe8] sm:$0xff]   ;;  %v15141_v38 = vld [vmem:[#allocation46_spill] sm:$0xff] }
 0x52d   : > { %v8330_v29 = vpop.f32.mrf.mxu0  ;;  %v8416_v32 = vadd.f32 %v8326_v17, %v6914_v57  ;;  %v8678_v35 = vadd.f32 %v10205_v58, %v8614_v15  ;;  %v15140_v21 = vld [vmem:[#allocation75_spill] sm:$0xff]  ;;  %v10213_v12 = vunpack.c.l.bf16 %v10411_v49  ;;  %v15142_v45 = vld [vmem:[#allocation81_spill] sm:$0xff] }
 0x52e   : > { %10437 = vst [vmem:[%s14392_s14 + $0xc0] sm:$0xff] %v10346_v59   ;;  %v8613_v54 = vadd.f32 %v14634_v22, %v8414_v56  ;;  %v8041_v63 = vpop.f32.mrf.mxu1  ;;  %v8740_v11 = vmax.f32 %v8676_v46, 0.0  ;;  %v6930_v52 = vadd.f32 %v15141_v38, %v15140_v21  ;;  %v15143_v46 = vld [vmem:[#allocation49_spill] sm:$0xff] }
 0x52f   : > { %v11160_v61 = vpop.f32.mrf.mxu0  ;;  %v8615_v62 = vadd.f32 %v14634_v22, %v8416_v32  ;;  %v8331_v16 = vadd.f32 %v8330_v29, %v8041_v63  ;;  %v8742_v28 = vmax.f32 %v8678_v35, 0.0  ;;  %v10214_v29 = vunpack.c.h.bf16 %v10411_v49  ;;  %v10412_v63 = vld [vmem:[%s12228_s11 + $0xf0] sm:$0xff]  }
 0x530   : > { %v8677_v30 = vadd.f32 %v10202_v41, %v8613_v54  ;;  %v8043_v3 = vpop.f32.mrf.mxu1  ;;  %v6935_v54 = vadd.f32 %v15143_v46, %v15142_v45  ;;  %v10217_v6 = vunpack.c.l.bf16 %v10412_v63 }
 0x531   : > { %v8679_v23 = vadd.f32 %v10206_v39, %v8615_v62  ;;  %v8417_v27 = vadd.f32 %v8331_v16, %v6919_v36  ;;  %v8333_v13 = vpop.f32.mrf.mxu0  ;;  %v15145_v62 = vld [vmem:[#allocation52_spill] sm:$0xff] }
 0x532   : > { %v8741_v1 = vmax.f32 %v8677_v30, 0.0  ;;  %v8044_v10 = vpop.f32.mrf.mxu1  ;;  %v15144_v30 = vld [vmem:[#allocation82_spill] sm:$0xff] }
 0x533   : > { %v8743_v7 = vmax.f32 %v8679_v23, 0.0  ;;  %v8616_v42 = vadd.f32 %v14634_v22, %v8417_v27  ;;  %v8334_v2 = vadd.f32 %v8333_v13, %v8044_v10  ;;  %v11163_v18 = vpop.f32.mrf.mxu0  ;;  %v6938_v16 = vadd.f32 %v15145_v62, %v15144_v30  ;;  %v15147_v10 = vld [vmem:[#allocation21_spill] sm:$0xff] }
 0x534   : > { %v10356_v33 = vpack.c.bf16 %v8741_v1, %v8740_v11  ;;  %v8046_v43 = vpop.f32.mrf.mxu1  ;;  %v10218_v13 = vunpack.c.h.bf16 %v10412_v63 }
 0x535   : > { %v10361_v40 = vpack.c.bf16 %v8743_v7, %v8742_v28  ;;  %v8418_v48 = vadd.f32 %v8334_v2, %v6922_v50  ;;  %v8680_v5 = vadd.f32 %v10209_v20, %v8616_v42  ;;  %v8346_v44 = vpop.f32.mrf.mxu0  ;;  %v15146_v20 = vld [vmem:[#allocation83_spill] sm:$0xff]  ;;  %v10413_v43 = vld [vmem:[%s12228_s11 + $0xf8] sm:$0xff]   ;;  %s14678_s11 = scalar_lea.hbm %s14730_s6, %s10094_s17 }
 0x536   : > { %10439 = vst [vmem:[%s14392_s14 + $0xd0] sm:$0xff] %v10356_v33   ;;  %v8049_v24 = vpop.f32.mrf.mxu1  ;;  %v6943_v33 = vadd.f32 %v15147_v10, %v15146_v20 }
 0x537   : > { %10440 = vst [vmem:[%s14392_s14 + $0xd8] sm:$0xff] %v10361_v40   ;;  %v8617_v26 = vadd.f32 %v14634_v22, %v8418_v48  ;;  %v8339_v25 = vadd.f32 %v11159_v8, %v8049_v24  ;;  %v8744_v34 = vmax.f32 %v8680_v5, 0.0  ;;  %v11164_v41 = vpop.f32.mrf.mxu0  ;;  %v15148_v24 = vld [vmem:[#allocation84_spill] sm:$0xff] }
 0x538   : > { %v8051_v51 = vpop.f32.mrf.mxu1  ;;  %v6946_v4 = vadd.f32 %v15149_v53, %v15148_v24 }
 0x539   : > { %v8681_v0 = vadd.f32 %v10210_v9, %v8617_v26  ;;  %v8419_v47 = vadd.f32 %v8339_v25, %v6927_v60  ;;  %v8349_v31 = vpop.f32.mrf.mxu0  ;;  %v10221_v60 = vunpack.c.l.bf16 %v10413_v43 }
 0x53a   : > { %v8052_v57 = vpop.f32.mrf.mxu1 }
 0x53b   : > { %v8745_v58 = vmax.f32 %v8681_v0, 0.0  ;;  %v8618_v37 = vadd.f32 %v14634_v22, %v8419_v47  ;;  %v8342_v59 = vadd.f32 %v11160_v61, %v8052_v57  ;;  %v10222_v47 = vunpack.c.h.bf16 %v10413_v43 }
 0x53c   : > { %v8054_v56 = vpop.f32.mrf.mxu1 }
 0x53d   : > { %v10366_v8 = vpack.c.bf16 %v8745_v58, %v8744_v34  ;;  %v8420_v17 = vadd.f32 %v8342_v59, %v6930_v52  ;;  %v8682_v32 = vadd.f32 %v10213_v12, %v8618_v37 }
 0x53e   : > { %v8057_v15 = vpop.f32.mrf.mxu1 }
 0x53f   : > { %10441 = vst [vmem:[%s14392_s14 + $0xe0] sm:$0xff] %v10366_v8   ;;  %v8619_v39 = vadd.f32 %v14634_v22, %v8420_v17  ;;  %v8347_v35 = vadd.f32 %v8346_v44, %v8057_v15  ;;  %v8746_v11 = vmax.f32 %v8682_v32, 0.0 }
 0x540   : > { %v8059_v14 = vpop.f32.mrf.mxu1 }
 0x541   : > { %v8683_v36 = vadd.f32 %v10214_v29, %v8619_v39  ;;  %v8421_v61 = vadd.f32 %v8347_v35, %v6935_v54 }
 0x542   : > { %v8060_v3 = vpop.f32.mrf.mxu1 }
 0x543   : > { %v8747_v1 = vmax.f32 %v8683_v36, 0.0  ;;  %v8620_v23 = vadd.f32 %v14634_v22, %v8421_v61  ;;  %v8350_v27 = vadd.f32 %v8349_v31, %v8060_v3 }
 0x544   : > { %v8062_v55 = vpop.f32.mrf.mxu1 }
 0x545   : > { %v10371_v19 = vpack.c.bf16 %v8747_v1, %v8746_v11  ;;  %v8422_v50 = vadd.f32 %v8350_v27, %v6938_v16  ;;  %v8684_v7 = vadd.f32 %v10217_v6, %v8620_v23 }
 0x546   : > { %v8065_v28 = vpop.f32.mrf.mxu1 }
 0x547   : > { %10442 = vst [vmem:[%s14392_s14 + $0xe8] sm:$0xff] %v10371_v19   ;;  %v8621_v42 = vadd.f32 %v14634_v22, %v8422_v50  ;;  %v8355_v2 = vadd.f32 %v11163_v18, %v8065_v28  ;;  %v8748_v26 = vmax.f32 %v8684_v7, 0.0 }
 0x548   : > { %v8067_v40 = vpop.f32.mrf.mxu1 }
 0x549   : > { %v8685_v48 = vadd.f32 %v10218_v13, %v8621_v42  ;;  %v8423_v9 = vadd.f32 %v8355_v2, %v6943_v33 }
 0x54a   : > { %v8068_v5 = vpop.f32.mrf.mxu1 }
 0x54b   : > { %v8749_v25 = vmax.f32 %v8685_v48, 0.0  ;;  %v8622_v49 = vadd.f32 %v14634_v22, %v8423_v9  ;;  %v8358_v51 = vadd.f32 %v11164_v41, %v8068_v5 }
 0x54c   : > { %v8070_v44 = vpop.f32.mrf.mxu1 }
 0x54d   : > { %v10376_v18 = vpack.c.bf16 %v8749_v25, %v8748_v26  ;;  %v8424_v0 = vadd.f32 %v8358_v51, %v6946_v4  ;;  %v8686_v21 = vadd.f32 %v10221_v60, %v8622_v49 }
 0x54f   : > { %10443 = vst [vmem:[%s14392_s14 + $0xf0] sm:$0xff] %v10376_v18   ;;  %v8623_v38 = vadd.f32 %v14634_v22, %v8424_v0  ;;  %v8750_v12 = vmax.f32 %v8686_v21, 0.0 }
 0x551   : > { %v8687_v52 = vadd.f32 %v10222_v47, %v8623_v38 }
 0x553   : > { %v8751_v57 = vmax.f32 %v8687_v52, 0.0 }
 0x555   : > { %v10381_v34 = vpack.c.bf16 %v8751_v57, %v8750_v12 }
 0x557   : > { %10444 = vst [vmem:[%s14392_s14 + $0xf8] sm:$0xff] %v10381_v34  }
 0x558   : > { %11922 = shalt.err (!%p11919_p4)
}
 0x559   : > { %s11923_s20 = scalar_lea.hbm %s14678_s11, 4096  ;;  %s11927_s2 = scalar_lea.hbm %s14730_s6, 8192 }
 0x55a   : > { %p11924_p5 = scmp.ne.s32.totalorder %s14678_s11, %s11923_s20  ;;  %p11928_p11 = scmp.lt.s32.totalorder %s14678_s11, %s14730_s6 }
 0x55b   : > { %p11929_p6 = scmp.lt.s32.totalorder %s11927_s2, %s11923_s20 }
 0x55c   : > { %p11925_p7 = pnand %p11924_p5, %p15150_p10 }
 0x55d   : > { %p11930_p12 = por %p11929_p6, %p11928_p11 }
 0x55e   : > { %p11926_p8 = pneg %p11925_p7 }
 0x560   : > { %p11931_p0 = pnand %p11930_p12, %p11926_p8 }
 0x562   : > { %11934 = shalt.err (!%p11931_p0)
}
 0x563   : > { %s11995_s14 = smov 64   ;;  %s11996_s15 = smov 4  }
 0x564   : > { %11180 = dma.vmem_to_hbm [thread:$0]  (%p15150_p10), %s14680_s0, 4096, %s14678_s11, %s9073_s27, %s11995_s14, %s11995_s14, %s11996_s15  }
 0x565 PF: > { %s9102_s8 = sand.u32 1, %s11973_s21   ;;  %p15151_p3 = scmp.ne.s32.totalorder %s14744_s28, 0 }
 0x566   : > { %p15152_p2 = scmp.ge.s32.totalorder %s11985_s24, 2  ;;  %s9103_s17 = scalar_lea.sflag [#allocation5], %s9102_s8 }
 0x568   : > { %p11197_p9 = pnand %p15152_p2, %p15151_p3 }
 0x56a   : > { %p11198_p13 = pneg %p11197_p9 }
 0x56c   : > { %11968 = dma.done.wait (%p11198_p13), %s9103_s17, 4096  }
 0x56d   : > { %11970 = vsyncadd (%p11198_p13), %s9103_s17, 4294963200  ;;  %s15153_s4 = sld [smem:[#allocation17_spill]]  ;;  %p23_p1 = scmp.ge.s32.totalorder %s12110_s19, 4  }
 0x56e   : > { %s15154_s21 = smov %s11977_s22  ;;  %s15155_s22 = smov %s11981_s23 }
 0x56f   : > { %s15157_s24 = smov %s12110_s19  ;;  %25 = sbr.rel (!%p23_p1) target bundleno = 12 (0xc), region = 119 }
 0x573   : > { %s15156_s23 = smov %s15153_s4 }
 0x574   :  { %9108 = vsyncpa [#allocation4], 1 }
 0x575   :  { %9110 = vsyncpa [#allocation4 + $0x1], 1 }
 0x576   :  { %9111 = vsyncpa [#allocation7], 1 }
 0x577   :  { %9113 = vsyncpa [#allocation7 + $0x1], 1 }
 0x578   :  { %9114 = vsyncpa [#allocation10], 1 }
 0x579   :  { %9115 = vsyncpa [#allocation5], 1 }
 0x57a   :  { %9117 = vsyncpa [#allocation5 + $0x1], 1 }

</bundles_post_ra>
